<compile_context>
chip_gen: v5e
topology: v5e:2x2
jax: 0.10.0
libtpu: 0.0.40
codegen_flags: <defaults>
</compile_context>

<pallas_src>
import functools
import math

import jax
import jax.numpy as jnp
from jax.experimental import pallas as pl

# ----------------------------- hyper-parameters -----------------------------
ALPHA = 0.2                       # LeakyReLU slope in the GAT heads
DIM_DA = 8                        # atom feature dim
DIM_DB = 3                        # number of bond relations
DIM_MOL_PROPS = 6
NUM_LANDMARKS = 16
DIM_HID_GCN = 16
IMG_SIZE_SWIN = 16
PATCH_SIZE_SWIN = 4
DIM_INCHANNEL_SWIN = 1
DIM_OUTCHANNEL_SWIN = 16
DIM_OUT_SWIN = 16
DIM_HID_RGCN = 16
NUM_BASES_RGCN = 2
NUM_LAYER_RGCN = 2
DIM_OUT_RGCN = 16
DIM_HID_GAT = 16
DIM_OUT_GAT = 8
NUM_HEAD_GAT = 2
MULTI_GRAPHS = ("tanimoto", "pathway")
NUM_CELL_LINES = 3
NUM_LAYERS_TRANS = 1
NUM_HEADS_TRANS = 2
DIM_HEAD_TRANS = 8
DOSING_TIME_LIB = (6, 24)         # -> 3 time-series stages, 2 expression stages
NUM_DOSES = 2
NUM_COMPOUNDS = 4
NUM_ATOMS = 8
BATCH = 2
E = DIM_OUT_GAT * NUM_HEAD_GAT    # 16 (shared embedding width)
NEG_INF = -1e9


# ------------------------------ Pallas kernels ------------------------------
def _compound_kernel(atoms_ref, adjcat_ref, poolr_ref, patches_ref, pooli_ref,
                     adjs_ref, *refs, num_layers, num_rel, num_graphs, num_heads,
                     alpha):
    """Fused compound encoder: RGCN (all compounds) + image branch + uni + GAT."""
    o_ref = refs[-1]
    w = [r[...] for r in refs[:-1]]

    # --- RGCN over all compounds at once (atoms row-stacked, block-diag adj) ---
    h = atoms_ref[...]                                       # (Nc*A, Din)
    adj_cat = adjcat_ref[...]                                # (Nc*A, R*Nc*A)
    for l in range(num_layers):
        ws = w[2 * l]                                        # (Fin, Fout)
        wrv = w[2 * l + 1]                                   # (R*Fin, Fout)
        fin = ws.shape[0]
        hr = [jnp.dot(h, wrv[r * fin:(r + 1) * fin],
                      preferred_element_type=jnp.float32) for r in range(num_rel)]
        hr_stack = jnp.concatenate(hr, axis=0)               # (R*Nc*A, Fout)
        out = (jnp.dot(h, ws, preferred_element_type=jnp.float32)
               + jnp.dot(adj_cat, hr_stack, preferred_element_type=jnp.float32))
        h = out if l == num_layers - 1 else jnp.maximum(out, 0.0)
    rgcn_out = jnp.dot(poolr_ref[...], h, preferred_element_type=jnp.float32)  # (Nc, Fout)

    cur = 2 * num_layers
    pw, pb, hw, hb, uni_s, uni_r, asrc, adst, wout = w[cur:cur + 9]

    # --- image branch: patch embed (ReLU) + mean pool (matmul) + head ---
    ph = jnp.maximum(jnp.dot(patches_ref[...], pw, preferred_element_type=jnp.float32) + pb, 0.0)
    pooled = jnp.dot(pooli_ref[...], ph, preferred_element_type=jnp.float32)
    swin_out = jnp.dot(pooled, hw, preferred_element_type=jnp.float32) + hb    # (Nc, 16)

    # --- uni_heads: cat([swin, rgcn]) @ uni  ==  swin@uni_s + rgcn@uni_r ---
    uh = (jnp.dot(swin_out, uni_s, preferred_element_type=jnp.float32)
          + jnp.dot(rgcn_out, uni_r, preferred_element_type=jnp.float32))      # (Nc, H*F)

    # --- GAT: batched attention-score mat-vecs for all (graph, head) pairs ---
    f = uni_s.shape[1] // num_heads
    es_all = jnp.dot(uh, asrc, preferred_element_type=jnp.float32)             # (Nc, G*H)
    ed_all = jax.lax.dot_general(adst, uh, (((0,), (1,)), ((), ())),
                                 preferred_element_type=jnp.float32)           # (G*H, Nc)
    outs = []
    for g in range(num_graphs):
        adj = adjs_ref[g]                                    # (Nc, Nc)
        for k in range(num_heads):
            idx = g * num_heads + k
            hk = uh[:, k * f:(k + 1) * f]                    # (Nc, F)
            e = es_all[:, idx:idx + 1] + ed_all[idx:idx + 1, :]
            e = jnp.where(e > 0, e, alpha * e)               # LeakyReLU
            e = jnp.where(adj > 0, e, NEG_INF)
            e = e - jnp.max(e, axis=-1, keepdims=True)
            p = jnp.exp(e)
            p = p / jnp.sum(p, axis=-1, keepdims=True)
            y = jnp.dot(jnp.dot(p, hk, preferred_element_type=jnp.float32), wout[idx],
                        preferred_element_type=jnp.float32)
            y = jnp.where(y > 0, y, jnp.exp(jnp.minimum(y, 0.0)) - 1.0)  # safe ELU
            outs.append(y)
    o_ref[...] = jnp.concatenate(outs, axis=-1)              # one lane-dense write


def _ln2d(x, g, b, eps=1e-5):
    m = jnp.mean(x, axis=-1, keepdims=True)
    v = jnp.mean((x - m) ** 2, axis=-1, keepdims=True)
    return (x - m) * jax.lax.rsqrt(v + eps) * g + b


def _mha(x, ctx, mask, wqkv, bqkv, wo, bo, ln_g, ln_b):
    """Batched (row-stacked) MHA + out-proj + residual + LayerNorm with block mask."""
    hd = NUM_HEADS_TRANS * DIM_HEAD_TRANS
    dh = DIM_HEAD_TRANS
    q_all = jnp.dot(x, wqkv[:, :hd], preferred_element_type=jnp.float32) + bqkv[:, :hd]
    kv = jnp.dot(ctx, wqkv[:, hd:], preferred_element_type=jnp.float32) + bqkv[:, hd:]
    k_all = kv[:, :hd]
    v_all = kv[:, hd:]
    scale = 1.0 / math.sqrt(dh)
    out = None
    for h in range(NUM_HEADS_TRANS):
        q = q_all[:, h * dh:(h + 1) * dh]
        k = k_all[:, h * dh:(h + 1) * dh]
        v = v_all[:, h * dh:(h + 1) * dh]
        s = jax.lax.dot_general(q, k, (((1,), (1,)), ((), ())),
                                preferred_element_type=jnp.float32) * scale + mask
        s = s - jnp.max(s, axis=-1, keepdims=True)
        p = jnp.exp(s)
        p = p / jnp.sum(p, axis=-1, keepdims=True)
        attn = jnp.dot(p, v, preferred_element_type=jnp.float32)
        # concat(heads) @ wo  ==  sum_h head_h @ wo[h*dh:(h+1)*dh, :]
        contrib = jnp.dot(attn, wo[h * dh:(h + 1) * dh, :], preferred_element_type=jnp.float32)
        out = contrib if out is None else out + contrib
    y = x + out + bo
    return _ln2d(y, ln_g, ln_b)


def _ffn(x, w1, b1, w2, b2, ln_g, ln_b):
    h = jnp.maximum(jnp.dot(x, w1, preferred_element_type=jnp.float32) + b1, 0.0)
    o = jnp.dot(h, w2, preferred_element_type=jnp.float32) + b2
    return _ln2d(x + o, ln_g, ln_b)


def _ts_express_kernel(x0_ref, base_ref, gmask_ref, ctx_ref, smask_ref, cmask_ref,
                       ahat_ref, *refs, num_layers, num_stages):
    """All time_serise stages + both expression stages in one kernel.

    Batch rows are stacked along the sublane axis; cross-batch attention is
    disabled by additive block masks, and the gene GCN uses a block-diagonal
    normalized adjacency, so every matmul is batched over the whole batch.
    """
    o_ref = refs[-1]
    vals = [r[...] for r in refs[:-1]]
    n_stage_w = num_layers * 18 + 4

    X = x0_ref[...]                                          # (B*(1+G), E)
    base = base_ref[...]
    gmask = gmask_ref[...]
    ctx = ctx_ref[...]                                       # (B*num_graphs, E)
    smask = smask_ref[...]
    cmask = cmask_ref[...]
    ahat = ahat_ref[...]                                     # (B*(1+G), B*(1+G))

    feats = []
    for stage in range(num_stages):
        if stage > 0:
            # rebuild x0: cls row <- cls_token+dose, gene rows <- prev genes + dose
            X = base + gmask * X
        cur = 0
        for _ in range(num_layers):
            X = _mha(X, ctx, cmask, *vals[cur:cur + 6]); cur += 6   # cross-attn
            X = _mha(X, X, smask, *vals[cur:cur + 6]); cur += 6     # self-attn
            X = _ffn(X, *vals[cur:cur + 6]); cur += 6               # feed-forward
        gw1, gb1, gw2, gb2 = vals[cur:cur + 4]
        # gene GCN (cls rows/cols are zero in ahat so gene rows match the reference)
        h1 = jnp.maximum(
            jnp.dot(jnp.dot(ahat, X, preferred_element_type=jnp.float32), gw1,
                    preferred_element_type=jnp.float32) + gb1, 0.0)
        h2 = jnp.dot(jnp.dot(ahat, h1, preferred_element_type=jnp.float32), gw2,
                     preferred_element_type=jnp.float32) + gb2
        X = X + h2
        feats.append(X)

    # --- expression head: concat([prev, cur, cur-prev]) @ w1 via split matmul ---
    ew1, eb1, ew2, eb2 = vals[n_stage_w:n_stage_w + 4]
    edim = X.shape[-1]
    rows = []
    for s in range(1, num_stages):
        prev = feats[s - 1]
        cur_f = feats[s]
        pre = (jnp.dot(prev, ew1[:edim], preferred_element_type=jnp.float32)
               + jnp.dot(cur_f, ew1[edim:2 * edim], preferred_element_type=jnp.float32)
               + jnp.dot(cur_f - prev, ew1[2 * edim:], preferred_element_type=jnp.float32)
               + eb1)
        hmid = jnp.maximum(pre, 0.0)
        # (2E,1)^T @ hmid^T done as dot_general -> (1, B*(1+G)) lane-dense row
        yrow = jax.lax.dot_general(ew2, hmid, (((0,), (1,)), ((), ())),
                                   preferred_element_type=jnp.float32) + eb2
        rows.append(yrow)
    o_ref[...] = jnp.concatenate(rows, axis=0)               # one lane-dense write


# ------------------------------ FireBird forward -----------------------------
@functools.partial(jax.jit, static_argnames=("multi_graphs_list",))
def firebird_forward(params, bond_feats, atom_feats, mol_props, ConMap,
                     multi_graphs_list, adj_dict, express_gene_adj,
                     weight_gene_relations, data_indices, dose_indices):
    del mol_props  # unused in the reference forward as well
    compound_indices = data_indices[:, 0]
    time_indices = data_indices[:, 1]
    cell_line_indices = data_indices[:, 2]

    nc = bond_feats.shape[0]
    na = bond_feats.shape[1]
    num_graphs = len(multi_graphs_list)

    # ---------------- kernel 1: fused compound encoder ----------------
    atoms_all = atom_feats.astype(jnp.float32).reshape(nc * na, -1)            # (Nc*A, Din)
    adj_rel = jnp.transpose(bond_feats, (0, 3, 1, 2)).astype(jnp.float32)      # (Nc, R, A, A)
    eye_c = jnp.eye(nc, dtype=jnp.float32)
    adj_blk = jnp.einsum("cd,crij->rcidj", eye_c, adj_rel).reshape(DIM_DB, nc * na, nc * na)
    adj_cat = jnp.transpose(adj_blk, (1, 0, 2)).reshape(nc * na, DIM_DB * nc * na)
    pool_rgcn = jnp.repeat(eye_c, na, axis=1)                                   # (Nc, Nc*A) sum

    n, c, hh, ww = ConMap.shape
    pp = PATCH_SIZE_SWIN
    xim = jnp.transpose(ConMap, (0, 2, 3, 1)).reshape(n, hh // pp, pp, ww // pp, pp, c)
    xim = jnp.transpose(xim, (0, 1, 3, 2, 4, 5)).reshape(n, (hh // pp) * (ww // pp), pp * pp * c)
    num_patches = xim.shape[1]
    patches = xim.reshape(n * num_patches, pp * pp * c).astype(jnp.float32)
    pool_img = jnp.repeat(jnp.eye(n, dtype=jnp.float32), num_patches, axis=1) / num_patches

    adjs = jnp.stack([adj_dict[g] for g in multi_graphs_list]).astype(jnp.float32)

    rgcn_w = []
    for layer in params["rgcn"]:
        rgcn_w += [layer["w_self"], layer["w_rel_v"]]
    sw = params["swin"]
    gat = params["gat"]
    uni_swin = params["uni_cat"][:DIM_OUT_SWIN]
    uni_rgcn = params["uni_cat"][DIM_OUT_SWIN:]

    words = pl.pallas_call(
        functools.partial(_compound_kernel, num_layers=len(params["rgcn"]),
                          num_rel=DIM_DB, num_graphs=num_graphs,
                          num_heads=NUM_HEAD_GAT, alpha=ALPHA),
        out_shape=jax.ShapeDtypeStruct((nc, num_graphs * E), jnp.float32),
    )(atoms_all, adj_cat, pool_rgcn, patches, pool_img, adjs,
      *rgcn_w, sw["patch_w"], sw["patch_b"], sw["head_w"], sw["head_b"],
      uni_swin, uni_rgcn, gat["a_src_blk"], gat["a_dst_blk"], gat["w_out"])

    multi_compound_words = words.reshape(nc, num_graphs, E)
    chem_participate = multi_compound_words[compound_indices]                  # (B, ng, E)
    batch_size = chem_participate.shape[0]
    ctx_stacked = chem_participate.reshape(batch_size * num_graphs, E)

    # ---------------- kernel 2: fused time-series stages + expression ----------------
    ts = params["time_serise"]
    cls2 = params["cls_tokens"][cell_line_indices][:, 0, :]                    # (B, E)
    dose = ts["dose_emb"][dose_indices]                                        # (B, E)

    n_genes = express_gene_adj.shape[0]
    lfull = 1 + n_genes
    rows_total = batch_size * lfull

    gene0 = jnp.broadcast_to(params["landmark_embs"][None], (batch_size, n_genes, E))
    x_init = jnp.concatenate([(cls2 + dose)[:, None, :], gene0 + dose[:, None, :]],
                             axis=1).reshape(rows_total, E)
    base_full = jnp.concatenate(
        [(cls2 + dose)[:, None, :],
         jnp.broadcast_to(dose[:, None, :], (batch_size, n_genes, E))],
        axis=1).reshape(rows_total, E)
    gene_mask = jnp.concatenate(
        [jnp.zeros((batch_size, 1, E), jnp.float32),
         jnp.ones((batch_size, n_genes, E), jnp.float32)], axis=1).reshape(rows_total, E)

    row_id = jnp.repeat(jnp.arange(batch_size), lfull)
    ctx_id = jnp.repeat(jnp.arange(batch_size), num_graphs)
    self_mask = jnp.where(row_id[:, None] == row_id[None, :], 0.0, NEG_INF).astype(jnp.float32)
    cross_mask = jnp.where(row_id[:, None] == ctx_id[None, :], 0.0, NEG_INF).astype(jnp.float32)

    adjg = (express_gene_adj.astype(jnp.float32) * weight_gene_relations
            + jnp.eye(n_genes, dtype=jnp.float32))
    ahat = adjg / jnp.maximum(jnp.sum(adjg, axis=-1, keepdims=True), 1e-6)
    ahat_ext = jnp.zeros((lfull, lfull), jnp.float32).at[1:, 1:].set(ahat)
    ahat_blk = jnp.einsum("bc,ij->bicj", jnp.eye(batch_size, dtype=jnp.float32),
                          ahat_ext).reshape(rows_total, rows_total)

    stage_weights = []
    for layer in ts["trans_layers"]:
        for blk in ("cross", "self"):
            bp = layer[blk]
            stage_weights += [bp["wqkv"], bp["bqkv"], bp["wo"], bp["bo"], bp["ln_g"], bp["ln_b"]]
        fp = layer["ffn"]
        stage_weights += [fp["w1"], fp["b1"], fp["w2"], fp["b2"], fp["ln_g"], fp["ln_b"]]
    stage_weights += [ts["gcn_w1"], ts["gcn_b1"], ts["gcn_w2"], ts["gcn_b2"]]

    ex = params["express"]
    n_stages_total = len(DOSING_TIME_LIB) + 1
    n_express = len(DOSING_TIME_LIB)

    expr = pl.pallas_call(
        functools.partial(_ts_express_kernel, num_layers=len(ts["trans_layers"]),
                          num_stages=n_stages_total),
        out_shape=jax.ShapeDtypeStruct((n_express, rows_total), jnp.float32),
    )(x_init, base_full, gene_mask, ctx_stacked, self_mask, cross_mask, ahat_blk,
      *stage_weights, ex["w1"], ex["b1"], ex["w2"], ex["b2"])

    expr3 = expr.reshape(n_express, batch_size, lfull)[:, :, 1:]               # (S, B, G)
    out = expr3[time_indices, jnp.arange(batch_size), :][:, :, None]           # (B, G, 1)
    return out


# ------------------------------ parameter init -------------------------------
def _key_iter(key):
    while True:
        key, sub = jax.random.split(key)
        yield sub


def xavier(key, shape, gain=1.0):
    fan_in, fan_out = shape[-2], shape[-1]
    lim = gain * math.sqrt(6.0 / (fan_in + fan_out))
    return jax.random.uniform(key, shape, jnp.float32, -lim, lim)


def build_params():
    ki = _key_iter(jax.random.PRNGKey(0))
    p = {}
    uni = [xavier(next(ki), (DIM_OUT_RGCN + DIM_OUT_SWIN, DIM_HID_GAT), 1.414)
           for _ in range(NUM_HEAD_GAT)]
    p["uni_cat"] = jnp.concatenate(uni, axis=-1)                               # (32, H*F)
    p["cls_tokens"] = xavier(next(ki), (NUM_CELL_LINES, 1, E), 1.414)
    p["landmark_embs"] = xavier(next(ki), (NUM_LANDMARKS, E), 1.414)

    # RGCN with basis decomposition folded into per-relation weights (linear => exact).
    dims = [DIM_DA] + [DIM_HID_RGCN] * (NUM_LAYER_RGCN - 1) + [DIM_OUT_RGCN]
    rgcn_layers = []
    for l in range(NUM_LAYER_RGCN):
        bases = xavier(next(ki), (NUM_BASES_RGCN, dims[l], dims[l + 1]))
        comb = xavier(next(ki), (DIM_DB, NUM_BASES_RGCN))
        w_self = xavier(next(ki), (dims[l], dims[l + 1]))
        w_rel = jnp.einsum("rb,bio->rio", comb, bases)                         # (R, in, out)
        rgcn_layers.append({"w_self": w_self,
                            "w_rel_v": w_rel.reshape(DIM_DB * dims[l], dims[l + 1])})
    p["rgcn"] = rgcn_layers

    pdim = PATCH_SIZE_SWIN * PATCH_SIZE_SWIN * DIM_INCHANNEL_SWIN
    p["swin"] = {
        "patch_w": xavier(next(ki), (pdim, DIM_OUTCHANNEL_SWIN)),
        "patch_b": jnp.zeros((1, DIM_OUTCHANNEL_SWIN), jnp.float32),
        "head_w": xavier(next(ki), (DIM_OUTCHANNEL_SWIN, DIM_OUT_SWIN)),
        "head_b": jnp.zeros((1, DIM_OUT_SWIN), jnp.float32),
    }

    # GAT attention vectors laid out block-diagonally so all (graph, head) score
    # mat-vecs become one matmul.
    ghf = NUM_HEAD_GAT * DIM_HID_GAT
    ngh = len(MULTI_GRAPHS) * NUM_HEAD_GAT
    a_src_blk = jnp.zeros((ghf, ngh), jnp.float32)
    a_dst_blk = jnp.zeros((ghf, ngh), jnp.float32)
    w_out = []
    for g in range(len(MULTI_GRAPHS)):
        for k in range(NUM_HEAD_GAT):
            idx = g * NUM_HEAD_GAT + k
            asrc = xavier(next(ki), (DIM_HID_GAT, 1), 1.414)
            adst = xavier(next(ki), (DIM_HID_GAT, 1), 1.414)
            a_src_blk = a_src_blk.at[k * DIM_HID_GAT:(k + 1) * DIM_HID_GAT, idx].set(asrc[:, 0])
            a_dst_blk = a_dst_blk.at[k * DIM_HID_GAT:(k + 1) * DIM_HID_GAT, idx].set(adst[:, 0])
            w_out.append(xavier(next(ki), (DIM_HID_GAT, DIM_OUT_GAT), 1.414))
    p["gat"] = {"a_src_blk": a_src_blk, "a_dst_blk": a_dst_blk,
                "w_out": jnp.stack(w_out, axis=0)}                             # (G*H, F, DO)

    hd = NUM_HEADS_TRANS * DIM_HEAD_TRANS

    def attn_params():
        wq = xavier(next(ki), (E, hd))
        wk = xavier(next(ki), (E, hd))
        wv = xavier(next(ki), (E, hd))
        wo = xavier(next(ki), (hd, E))
        return {"wqkv": jnp.concatenate([wq, wk, wv], axis=-1),                # packed QKV
                "bqkv": jnp.zeros((1, 3 * hd), jnp.float32),
                "wo": wo, "bo": jnp.zeros((1, E), jnp.float32),
                "ln_g": jnp.ones((1, E), jnp.float32),
                "ln_b": jnp.zeros((1, E), jnp.float32)}

    trans_layers = []
    for _ in range(NUM_LAYERS_TRANS):
        trans_layers.append({
            "cross": attn_params(),
            "self": attn_params(),
            "ffn": {"w1": xavier(next(ki), (E, 4 * E)),
                    "b1": jnp.zeros((1, 4 * E), jnp.float32),
                    "w2": xavier(next(ki), (4 * E, E)),
                    "b2": jnp.zeros((1, E), jnp.float32),
                    "ln_g": jnp.ones((1, E), jnp.float32),
                    "ln_b": jnp.zeros((1, E), jnp.float32)},
        })
    p["time_serise"] = {
        "dose_emb": xavier(next(ki), (NUM_DOSES, E)),
        "trans_layers": trans_layers,
        "gcn_w1": xavier(next(ki), (E, DIM_HID_GCN)),
        "gcn_b1": jnp.zeros((1, DIM_HID_GCN), jnp.float32),
        "gcn_w2": xavier(next(ki), (DIM_HID_GCN, E)),
        "gcn_b2": jnp.zeros((1, E), jnp.float32),
    }
    p["express"] = {
        "w1": xavier(next(ki), (3 * E, 2 * E)), "b1": jnp.zeros((1, 2 * E), jnp.float32),
        "w2": xavier(next(ki), (2 * E, 1)), "b2": jnp.zeros((1, 1), jnp.float32),
    }
    return p


# ----------------------------------- main ------------------------------------
if __name__ == "__main__":
    key = jax.random.PRNGKey(0)
    k = iter(jax.random.split(key, 16))

    params = build_params()

    bond_feats = jax.random.bernoulli(next(k), 0.3,
                                      (NUM_COMPOUNDS, NUM_ATOMS, NUM_ATOMS, DIM_DB)).astype(jnp.float32)
    atom_feats = jax.random.normal(next(k), (NUM_COMPOUNDS, NUM_ATOMS, DIM_DA), jnp.float32)
    mol_props = jax.random.normal(next(k), (NUM_COMPOUNDS, DIM_MOL_PROPS), jnp.float32)
    ConMap = jax.random.uniform(next(k), (NUM_COMPOUNDS, DIM_INCHANNEL_SWIN,
                                          IMG_SIZE_SWIN, IMG_SIZE_SWIN), jnp.float32)

    eye_c = jnp.eye(NUM_COMPOUNDS, dtype=jnp.float32)
    adj_dict = {
        "tanimoto": jnp.clip(jax.random.bernoulli(next(k), 0.5,
                                                  (NUM_COMPOUNDS, NUM_COMPOUNDS)).astype(jnp.float32) + eye_c, 0, 1),
        "pathway": jnp.clip(jax.random.bernoulli(next(k), 0.5,
                                                 (NUM_COMPOUNDS, NUM_COMPOUNDS)).astype(jnp.float32) + eye_c, 0, 1),
    }

    express_gene_adj = jax.random.bernoulli(next(k), 0.3,
                                            (NUM_LANDMARKS, NUM_LANDMARKS)).astype(jnp.float32)
    weight_gene_relations = jax.random.uniform(next(k), (NUM_LANDMARKS, NUM_LANDMARKS), jnp.float32)

    # data_indices columns: [compound_idx, time_idx, cell_line_idx]
    data_indices = jnp.array([[0, 0, 1],
                              [2, 1, 2]], dtype=jnp.int32)
    dose_indices = jnp.array([0, 1], dtype=jnp.int32)

    out = firebird_forward(params, bond_feats, atom_feats, mol_props, ConMap,
                           tuple(MULTI_GRAPHS), adj_dict, express_gene_adj,
                           weight_gene_relations, data_indices, dose_indices)
    out = jax.block_until_ready(out)
    assert out.shape == (BATCH, NUM_LANDMARKS, 1), out.shape
    assert bool(jnp.all(jnp.isfinite(out)))
    print("KERNEL_OK")
</pallas_src>

<mosaic_0001>
module attributes {stable_mosaic.version = 11 : i64} {
  func.func @_compound_kernel(%arg0: memref<32x8xf32, #tpu.memory_space<vmem>>, %arg1: memref<32x96xf32, #tpu.memory_space<vmem>>, %arg2: memref<4x32xf32, #tpu.memory_space<vmem>>, %arg3: memref<64x16xf32, #tpu.memory_space<vmem>>, %arg4: memref<4x64xf32, #tpu.memory_space<vmem>>, %arg5: memref<2x4x4xf32, #tpu.memory_space<vmem>>, %arg6: memref<8x16xf32, #tpu.memory_space<vmem>>, %arg7: memref<24x16xf32, #tpu.memory_space<vmem>>, %arg8: memref<16x16xf32, #tpu.memory_space<vmem>>, %arg9: memref<48x16xf32, #tpu.memory_space<vmem>>, %arg10: memref<16x16xf32, #tpu.memory_space<vmem>>, %arg11: memref<1x16xf32, #tpu.memory_space<vmem>>, %arg12: memref<16x16xf32, #tpu.memory_space<vmem>>, %arg13: memref<1x16xf32, #tpu.memory_space<vmem>>, %arg14: memref<16x32xf32, #tpu.memory_space<vmem>>, %arg15: memref<16x32xf32, #tpu.memory_space<vmem>>, %arg16: memref<32x4xf32, #tpu.memory_space<vmem>>, %arg17: memref<32x4xf32, #tpu.memory_space<vmem>>, %arg18: memref<4x16x8xf32, #tpu.memory_space<vmem>>, %arg19: memref<4x32xf32, #tpu.memory_space<vmem>>) attributes {dimension_semantics = [], scalar_prefetch = 0 : i64, scratch_operands = 0 : i64, tpu.core_type = #tpu.core_type<tc>} {
    %c0 = arith.constant 0 : index
    %c0_0 = arith.constant 0 : index
    %0 = vector.load %arg6[%c0, %c0_0] : memref<8x16xf32, #tpu.memory_space<vmem>>, vector<8x16xf32>
    %c0_1 = arith.constant 0 : index
    %c0_2 = arith.constant 0 : index
    %1 = vector.load %arg7[%c0_1, %c0_2] : memref<24x16xf32, #tpu.memory_space<vmem>>, vector<24x16xf32>
    %c0_3 = arith.constant 0 : index
    %c0_4 = arith.constant 0 : index
    %2 = vector.load %arg8[%c0_3, %c0_4] : memref<16x16xf32, #tpu.memory_space<vmem>>, vector<16x16xf32>
    %c0_5 = arith.constant 0 : index
    %c0_6 = arith.constant 0 : index
    %3 = vector.load %arg9[%c0_5, %c0_6] : memref<48x16xf32, #tpu.memory_space<vmem>>, vector<48x16xf32>
    %c0_7 = arith.constant 0 : index
    %c0_8 = arith.constant 0 : index
    %4 = vector.load %arg10[%c0_7, %c0_8] : memref<16x16xf32, #tpu.memory_space<vmem>>, vector<16x16xf32>
    %c0_9 = arith.constant 0 : index
    %c0_10 = arith.constant 0 : index
    %5 = vector.load %arg11[%c0_9, %c0_10] : memref<1x16xf32, #tpu.memory_space<vmem>>, vector<1x16xf32>
    %c0_11 = arith.constant 0 : index
    %c0_12 = arith.constant 0 : index
    %6 = vector.load %arg12[%c0_11, %c0_12] : memref<16x16xf32, #tpu.memory_space<vmem>>, vector<16x16xf32>
    %c0_13 = arith.constant 0 : index
    %c0_14 = arith.constant 0 : index
    %7 = vector.load %arg13[%c0_13, %c0_14] : memref<1x16xf32, #tpu.memory_space<vmem>>, vector<1x16xf32>
    %c0_15 = arith.constant 0 : index
    %c0_16 = arith.constant 0 : index
    %8 = vector.load %arg14[%c0_15, %c0_16] : memref<16x32xf32, #tpu.memory_space<vmem>>, vector<16x32xf32>
    %c0_17 = arith.constant 0 : index
    %c0_18 = arith.constant 0 : index
    %9 = vector.load %arg15[%c0_17, %c0_18] : memref<16x32xf32, #tpu.memory_space<vmem>>, vector<16x32xf32>
    %c0_19 = arith.constant 0 : index
    %c0_20 = arith.constant 0 : index
    %10 = vector.load %arg16[%c0_19, %c0_20] : memref<32x4xf32, #tpu.memory_space<vmem>>, vector<32x4xf32>
    %c0_21 = arith.constant 0 : index
    %c0_22 = arith.constant 0 : index
    %11 = vector.load %arg17[%c0_21, %c0_22] : memref<32x4xf32, #tpu.memory_space<vmem>>, vector<32x4xf32>
    %c0_23 = arith.constant 0 : index
    %c0_24 = arith.constant 0 : index
    %c0_25 = arith.constant 0 : index
    %12 = vector.load %arg18[%c0_23, %c0_24, %c0_25] : memref<4x16x8xf32, #tpu.memory_space<vmem>>, vector<4x16x8xf32>
    %c0_26 = arith.constant 0 : index
    %c0_27 = arith.constant 0 : index
    %13 = vector.load %arg0[%c0_26, %c0_27] : memref<32x8xf32, #tpu.memory_space<vmem>>, vector<32x8xf32>
    %c0_28 = arith.constant 0 : index
    %c0_29 = arith.constant 0 : index
    %14 = vector.load %arg1[%c0_28, %c0_29] : memref<32x96xf32, #tpu.memory_space<vmem>>, vector<32x96xf32>
    %15 = vector.extract_strided_slice %1 {offsets = [0, 0], sizes = [8, 16], strides = [1, 1]} : vector<24x16xf32> to vector<8x16xf32>
    %cst = arith.constant dense<0.000000e+00> : vector<32x16xf32>
    %16 = tpu.matmul %13, %15, %cst {dimension_numbers = #tpu.dot_dimension_numbers<[1], [0], [0], [1], [0, 0, 1, 1], [], []>} : vector<32x8xf32>, vector<8x16xf32>, vector<32x16xf32> -> vector<32x16xf32>
    %17 = vector.extract_strided_slice %1 {offsets = [8, 0], sizes = [8, 16], strides = [1, 1]} : vector<24x16xf32> to vector<8x16xf32>
    %cst_30 = arith.constant dense<0.000000e+00> : vector<32x16xf32>
    %18 = tpu.matmul %13, %17, %cst_30 {dimension_numbers = #tpu.dot_dimension_numbers<[1], [0], [0], [1], [0, 0, 1, 1], [], []>} : vector<32x8xf32>, vector<8x16xf32>, vector<32x16xf32> -> vector<32x16xf32>
    %19 = vector.extract_strided_slice %1 {offsets = [16, 0], sizes = [8, 16], strides = [1, 1]} : vector<24x16xf32> to vector<8x16xf32>
    %cst_31 = arith.constant dense<0.000000e+00> : vector<32x16xf32>
    %20 = tpu.matmul %13, %19, %cst_31 {dimension_numbers = #tpu.dot_dimension_numbers<[1], [0], [0], [1], [0, 0, 1, 1], [], []>} : vector<32x8xf32>, vector<8x16xf32>, vector<32x16xf32> -> vector<32x16xf32>
    %21 = tpu.concatenate %16, %18, %20 in 0 : vector<32x16xf32>, vector<32x16xf32>, vector<32x16xf32> -> vector<96x16xf32>
    %cst_32 = arith.constant dense<0.000000e+00> : vector<32x16xf32>
    %22 = tpu.matmul %13, %0, %cst_32 {dimension_numbers = #tpu.dot_dimension_numbers<[1], [0], [0], [1], [0, 0, 1, 1], [], []>} : vector<32x8xf32>, vector<8x16xf32>, vector<32x16xf32> -> vector<32x16xf32>
    %cst_33 = arith.constant dense<0.000000e+00> : vector<32x16xf32>
    %23 = tpu.matmul %14, %21, %cst_33 {dimension_numbers = #tpu.dot_dimension_numbers<[1], [0], [0], [1], [0, 0, 1, 1], [], []>} : vector<32x96xf32>, vector<96x16xf32>, vector<32x16xf32> -> vector<32x16xf32>
    %24 = arith.addf %22, %23 : vector<32x16xf32>
    %cst_34 = arith.constant 0.000000e+00 : f32
    %25 = vector.broadcast %cst_34 : f32 to vector<32x16xf32>
    %26 = arith.maximumf %24, %25 : vector<32x16xf32>
    %27 = vector.extract_strided_slice %3 {offsets = [0, 0], sizes = [16, 16], strides = [1, 1]} : vector<48x16xf32> to vector<16x16xf32>
    %cst_35 = arith.constant dense<0.000000e+00> : vector<32x16xf32>
    %28 = tpu.matmul %26, %27, %cst_35 {dimension_numbers = #tpu.dot_dimension_numbers<[1], [0], [0], [1], [0, 0, 1, 1], [], []>} : vector<32x16xf32>, vector<16x16xf32>, vector<32x16xf32> -> vector<32x16xf32>
    %29 = vector.extract_strided_slice %3 {offsets = [16, 0], sizes = [16, 16], strides = [1, 1]} : vector<48x16xf32> to vector<16x16xf32>
    %cst_36 = arith.constant dense<0.000000e+00> : vector<32x16xf32>
    %30 = tpu.matmul %26, %29, %cst_36 {dimension_numbers = #tpu.dot_dimension_numbers<[1], [0], [0], [1], [0, 0, 1, 1], [], []>} : vector<32x16xf32>, vector<16x16xf32>, vector<32x16xf32> -> vector<32x16xf32>
    %31 = vector.extract_strided_slice %3 {offsets = [32, 0], sizes = [16, 16], strides = [1, 1]} : vector<48x16xf32> to vector<16x16xf32>
    %cst_37 = arith.constant dense<0.000000e+00> : vector<32x16xf32>
    %32 = tpu.matmul %26, %31, %cst_37 {dimension_numbers = #tpu.dot_dimension_numbers<[1], [0], [0], [1], [0, 0, 1, 1], [], []>} : vector<32x16xf32>, vector<16x16xf32>, vector<32x16xf32> -> vector<32x16xf32>
    %33 = tpu.concatenate %28, %30, %32 in 0 : vector<32x16xf32>, vector<32x16xf32>, vector<32x16xf32> -> vector<96x16xf32>
    %cst_38 = arith.constant dense<0.000000e+00> : vector<32x16xf32>
    %34 = tpu.matmul %26, %2, %cst_38 {dimension_numbers = #tpu.dot_dimension_numbers<[1], [0], [0], [1], [0, 0, 1, 1], [], []>} : vector<32x16xf32>, vector<16x16xf32>, vector<32x16xf32> -> vector<32x16xf32>
    %cst_39 = arith.constant dense<0.000000e+00> : vector<32x16xf32>
    %35 = tpu.matmul %14, %33, %cst_39 {dimension_numbers = #tpu.dot_dimension_numbers<[1], [0], [0], [1], [0, 0, 1, 1], [], []>} : vector<32x96xf32>, vector<96x16xf32>, vector<32x16xf32> -> vector<32x16xf32>
    %36 = arith.addf %34, %35 : vector<32x16xf32>
    %c0_40 = arith.constant 0 : index
    %c0_41 = arith.constant 0 : index
    %37 = vector.load %arg2[%c0_40, %c0_41] : memref<4x32xf32, #tpu.memory_space<vmem>>, vector<4x32xf32>
    %cst_42 = arith.constant dense<0.000000e+00> : vector<4x16xf32>
    %38 = tpu.matmul %37, %36, %cst_42 {dimension_numbers = #tpu.dot_dimension_numbers<[1], [0], [0], [1], [0, 0, 1, 1], [], []>} : vector<4x32xf32>, vector<32x16xf32>, vector<4x16xf32> -> vector<4x16xf32>
    %c0_43 = arith.constant 0 : index
    %c0_44 = arith.constant 0 : index
    %39 = vector.load %arg3[%c0_43, %c0_44] : memref<64x16xf32, #tpu.memory_space<vmem>>, vector<64x16xf32>
    %cst_45 = arith.constant dense<0.000000e+00> : vector<64x16xf32>
    %40 = tpu.matmul %39, %4, %cst_45 {dimension_numbers = #tpu.dot_dimension_numbers<[1], [0], [0], [1], [0, 0, 1, 1], [], []>} : vector<64x16xf32>, vector<16x16xf32>, vector<64x16xf32> -> vector<64x16xf32>
    %41 = vector.broadcast %5 : vector<1x16xf32> to vector<64x16xf32>
    %42 = arith.addf %40, %41 : vector<64x16xf32>
    %cst_46 = arith.constant 0.000000e+00 : f32
    %43 = vector.broadcast %cst_46 : f32 to vector<64x16xf32>
    %44 = arith.maximumf %42, %43 : vector<64x16xf32>
    %c0_47 = arith.constant 0 : index
    %c0_48 = arith.constant 0 : index
    %45 = vector.load %arg4[%c0_47, %c0_48] : memref<4x64xf32, #tpu.memory_space<vmem>>, vector<4x64xf32>
    %cst_49 = arith.constant dense<0.000000e+00> : vector<4x16xf32>
    %46 = tpu.matmul %45, %44, %cst_49 {dimension_numbers = #tpu.dot_dimension_numbers<[1], [0], [0], [1], [0, 0, 1, 1], [], []>} : vector<4x64xf32>, vector<64x16xf32>, vector<4x16xf32> -> vector<4x16xf32>
    %cst_50 = arith.constant dense<0.000000e+00> : vector<4x16xf32>
    %47 = tpu.matmul %46, %6, %cst_50 {dimension_numbers = #tpu.dot_dimension_numbers<[1], [0], [0], [1], [0, 0, 1, 1], [], []>} : vector<4x16xf32>, vector<16x16xf32>, vector<4x16xf32> -> vector<4x16xf32>
    %48 = vector.broadcast %7 : vector<1x16xf32> to vector<4x16xf32>
    %49 = arith.addf %47, %48 : vector<4x16xf32>
    %cst_51 = arith.constant dense<0.000000e+00> : vector<4x32xf32>
    %50 = tpu.matmul %49, %8, %cst_51 {dimension_numbers = #tpu.dot_dimension_numbers<[1], [0], [0], [1], [0, 0, 1, 1], [], []>} : vector<4x16xf32>, vector<16x32xf32>, vector<4x32xf32> -> vector<4x32xf32>
    %cst_52 = arith.constant dense<0.000000e+00> : vector<4x32xf32>
    %51 = tpu.matmul %38, %9, %cst_52 {dimension_numbers = #tpu.dot_dimension_numbers<[1], [0], [0], [1], [0, 0, 1, 1], [], []>} : vector<4x16xf32>, vector<16x32xf32>, vector<4x32xf32> -> vector<4x32xf32>
    %52 = arith.addf %50, %51 : vector<4x32xf32>
    %cst_53 = arith.constant dense<0.000000e+00> : vector<4x4xf32>
    %53 = tpu.matmul %52, %10, %cst_53 {dimension_numbers = #tpu.dot_dimension_numbers<[1], [0], [0], [1], [0, 0, 1, 1], [], []>} : vector<4x32xf32>, vector<32x4xf32>, vector<4x4xf32> -> vector<4x4xf32>
    %cst_54 = arith.constant dense<0.000000e+00> : vector<4x4xf32>
    %54 = tpu.matmul %11, %52, %cst_54 {dimension_numbers = #tpu.dot_dimension_numbers<[0], [1], [1], [0], [0, 1, 1, 0], [], []>} : vector<32x4xf32>, vector<4x32xf32>, vector<4x4xf32> -> vector<4x4xf32>
    %c0_55 = arith.constant 0 : index
    %c0_56 = arith.constant 0 : index
    %c0_57 = arith.constant 0 : index
    %55 = vector.load %arg5[%c0_55, %c0_56, %c0_57] : memref<2x4x4xf32, #tpu.memory_space<vmem>>, vector<1x4x4xf32>
    %56 = vector.shape_cast %55 : vector<1x4x4xf32> to vector<4x4xf32>
    %57 = vector.extract_strided_slice %52 {offsets = [0, 0], sizes = [4, 16], strides = [1, 1]} : vector<4x32xf32> to vector<4x16xf32>
    %58 = vector.extract_strided_slice %53 {offsets = [0, 0], sizes = [4, 1], strides = [1, 1]} : vector<4x4xf32> to vector<4x1xf32>
    %59 = vector.extract_strided_slice %54 {offsets = [0, 0], sizes = [1, 4], strides = [1, 1]} : vector<4x4xf32> to vector<1x4xf32>
    %60 = vector.broadcast %58 : vector<4x1xf32> to vector<4x4xf32>
    %61 = vector.broadcast %59 : vector<1x4xf32> to vector<4x4xf32>
    %62 = arith.addf %60, %61 : vector<4x4xf32>
    %cst_58 = arith.constant 0.000000e+00 : f32
    %63 = vector.broadcast %cst_58 : f32 to vector<4x4xf32>
    %64 = arith.cmpf ogt, %62, %63 : vector<4x4xf32>
    %cst_59 = arith.constant 2.000000e-01 : f32
    %65 = vector.broadcast %cst_59 : f32 to vector<4x4xf32>
    %66 = arith.mulf %65, %62 : vector<4x4xf32>
    %67 = arith.select %64, %62, %66 : vector<4x4xi1>, vector<4x4xf32>
    %cst_60 = arith.constant 0.000000e+00 : f32
    %68 = vector.broadcast %cst_60 : f32 to vector<4x4xf32>
    %69 = arith.cmpf ogt, %56, %68 : vector<4x4xf32>
    %cst_61 = arith.constant -1.000000e+09 : f32
    %70 = vector.broadcast %cst_61 : f32 to vector<4x4xf32>
    %71 = arith.select %69, %67, %70 : vector<4x4xi1>, vector<4x4xf32>
    %cst_62 = arith.constant dense<0xFF800000> : vector<4xf32>
    %72 = vector.multi_reduction <maximumf>, %71, %cst_62 [1] : vector<4x4xf32> to vector<4xf32>
    %73 = vector.shape_cast %72 : vector<4xf32> to vector<4x1xf32>
    %74 = vector.broadcast %73 : vector<4x1xf32> to vector<4x4xf32>
    %75 = arith.subf %71, %74 : vector<4x4xf32>
    %76 = math.exp %75 : vector<4x4xf32>
    %cst_63 = arith.constant dense<0.000000e+00> : vector<4xf32>
    %77 = vector.multi_reduction <add>, %76, %cst_63 [1] : vector<4x4xf32> to vector<4xf32>
    %78 = vector.shape_cast %77 : vector<4xf32> to vector<4x1xf32>
    %79 = vector.broadcast %78 : vector<4x1xf32> to vector<4x4xf32>
    %80 = arith.divf %76, %79 : vector<4x4xf32>
    %cst_64 = arith.constant dense<0.000000e+00> : vector<4x16xf32>
    %81 = tpu.matmul %80, %57, %cst_64 {dimension_numbers = #tpu.dot_dimension_numbers<[1], [0], [0], [1], [0, 0, 1, 1], [], []>} : vector<4x4xf32>, vector<4x16xf32>, vector<4x16xf32> -> vector<4x16xf32>
    %82 = vector.extract_strided_slice %12 {offsets = [0, 0, 0], sizes = [1, 16, 8], strides = [1, 1, 1]} : vector<4x16x8xf32> to vector<1x16x8xf32>
    %83 = vector.shape_cast %82 : vector<1x16x8xf32> to vector<16x8xf32>
    %cst_65 = arith.constant dense<0.000000e+00> : vector<4x8xf32>
    %84 = tpu.matmul %81, %83, %cst_65 {dimension_numbers = #tpu.dot_dimension_numbers<[1], [0], [0], [1], [0, 0, 1, 1], [], []>} : vector<4x16xf32>, vector<16x8xf32>, vector<4x8xf32> -> vector<4x8xf32>
    %cst_66 = arith.constant 0.000000e+00 : f32
    %85 = vector.broadcast %cst_66 : f32 to vector<4x8xf32>
    %86 = arith.cmpf ogt, %84, %85 : vector<4x8xf32>
    %cst_67 = arith.constant 0.000000e+00 : f32
    %87 = vector.broadcast %cst_67 : f32 to vector<4x8xf32>
    %88 = arith.minimumf %84, %87 : vector<4x8xf32>
    %89 = math.exp %88 : vector<4x8xf32>
    %cst_68 = arith.constant 1.000000e+00 : f32
    %90 = vector.broadcast %cst_68 : f32 to vector<4x8xf32>
    %91 = arith.subf %89, %90 : vector<4x8xf32>
    %92 = arith.select %86, %84, %91 : vector<4x8xi1>, vector<4x8xf32>
    %93 = vector.extract_strided_slice %52 {offsets = [0, 16], sizes = [4, 16], strides = [1, 1]} : vector<4x32xf32> to vector<4x16xf32>
    %94 = vector.extract_strided_slice %53 {offsets = [0, 1], sizes = [4, 1], strides = [1, 1]} : vector<4x4xf32> to vector<4x1xf32>
    %95 = vector.extract_strided_slice %54 {offsets = [1, 0], sizes = [1, 4], strides = [1, 1]} : vector<4x4xf32> to vector<1x4xf32>
    %96 = vector.broadcast %94 : vector<4x1xf32> to vector<4x4xf32>
    %97 = vector.broadcast %95 : vector<1x4xf32> to vector<4x4xf32>
    %98 = arith.addf %96, %97 : vector<4x4xf32>
    %cst_69 = arith.constant 0.000000e+00 : f32
    %99 = vector.broadcast %cst_69 : f32 to vector<4x4xf32>
    %100 = arith.cmpf ogt, %98, %99 : vector<4x4xf32>
    %cst_70 = arith.constant 2.000000e-01 : f32
    %101 = vector.broadcast %cst_70 : f32 to vector<4x4xf32>
    %102 = arith.mulf %101, %98 : vector<4x4xf32>
    %103 = arith.select %100, %98, %102 : vector<4x4xi1>, vector<4x4xf32>
    %cst_71 = arith.constant 0.000000e+00 : f32
    %104 = vector.broadcast %cst_71 : f32 to vector<4x4xf32>
    %105 = arith.cmpf ogt, %56, %104 : vector<4x4xf32>
    %cst_72 = arith.constant -1.000000e+09 : f32
    %106 = vector.broadcast %cst_72 : f32 to vector<4x4xf32>
    %107 = arith.select %105, %103, %106 : vector<4x4xi1>, vector<4x4xf32>
    %cst_73 = arith.constant dense<0xFF800000> : vector<4xf32>
    %108 = vector.multi_reduction <maximumf>, %107, %cst_73 [1] : vector<4x4xf32> to vector<4xf32>
    %109 = vector.shape_cast %108 : vector<4xf32> to vector<4x1xf32>
    %110 = vector.broadcast %109 : vector<4x1xf32> to vector<4x4xf32>
    %111 = arith.subf %107, %110 : vector<4x4xf32>
    %112 = math.exp %111 : vector<4x4xf32>
    %cst_74 = arith.constant dense<0.000000e+00> : vector<4xf32>
    %113 = vector.multi_reduction <add>, %112, %cst_74 [1] : vector<4x4xf32> to vector<4xf32>
    %114 = vector.shape_cast %113 : vector<4xf32> to vector<4x1xf32>
    %115 = vector.broadcast %114 : vector<4x1xf32> to vector<4x4xf32>
    %116 = arith.divf %112, %115 : vector<4x4xf32>
    %cst_75 = arith.constant dense<0.000000e+00> : vector<4x16xf32>
    %117 = tpu.matmul %116, %93, %cst_75 {dimension_numbers = #tpu.dot_dimension_numbers<[1], [0], [0], [1], [0, 0, 1, 1], [], []>} : vector<4x4xf32>, vector<4x16xf32>, vector<4x16xf32> -> vector<4x16xf32>
    %118 = vector.extract_strided_slice %12 {offsets = [1, 0, 0], sizes = [1, 16, 8], strides = [1, 1, 1]} : vector<4x16x8xf32> to vector<1x16x8xf32>
    %119 = vector.shape_cast %118 : vector<1x16x8xf32> to vector<16x8xf32>
    %cst_76 = arith.constant dense<0.000000e+00> : vector<4x8xf32>
    %120 = tpu.matmul %117, %119, %cst_76 {dimension_numbers = #tpu.dot_dimension_numbers<[1], [0], [0], [1], [0, 0, 1, 1], [], []>} : vector<4x16xf32>, vector<16x8xf32>, vector<4x8xf32> -> vector<4x8xf32>
    %cst_77 = arith.constant 0.000000e+00 : f32
    %121 = vector.broadcast %cst_77 : f32 to vector<4x8xf32>
    %122 = arith.cmpf ogt, %120, %121 : vector<4x8xf32>
    %cst_78 = arith.constant 0.000000e+00 : f32
    %123 = vector.broadcast %cst_78 : f32 to vector<4x8xf32>
    %124 = arith.minimumf %120, %123 : vector<4x8xf32>
    %125 = math.exp %124 : vector<4x8xf32>
    %cst_79 = arith.constant 1.000000e+00 : f32
    %126 = vector.broadcast %cst_79 : f32 to vector<4x8xf32>
    %127 = arith.subf %125, %126 : vector<4x8xf32>
    %128 = arith.select %122, %120, %127 : vector<4x8xi1>, vector<4x8xf32>
    %c1 = arith.constant 1 : index
    %c0_80 = arith.constant 0 : index
    %c0_81 = arith.constant 0 : index
    %129 = vector.load %arg5[%c1, %c0_80, %c0_81] : memref<2x4x4xf32, #tpu.memory_space<vmem>>, vector<1x4x4xf32>
    %130 = vector.shape_cast %129 : vector<1x4x4xf32> to vector<4x4xf32>
    %131 = vector.extract_strided_slice %52 {offsets = [0, 0], sizes = [4, 16], strides = [1, 1]} : vector<4x32xf32> to vector<4x16xf32>
    %132 = vector.extract_strided_slice %53 {offsets = [0, 2], sizes = [4, 1], strides = [1, 1]} : vector<4x4xf32> to vector<4x1xf32>
    %133 = vector.extract_strided_slice %54 {offsets = [2, 0], sizes = [1, 4], strides = [1, 1]} : vector<4x4xf32> to vector<1x4xf32>
    %134 = vector.broadcast %132 : vector<4x1xf32> to vector<4x4xf32>
    %135 = vector.broadcast %133 : vector<1x4xf32> to vector<4x4xf32>
    %136 = arith.addf %134, %135 : vector<4x4xf32>
    %cst_82 = arith.constant 0.000000e+00 : f32
    %137 = vector.broadcast %cst_82 : f32 to vector<4x4xf32>
    %138 = arith.cmpf ogt, %136, %137 : vector<4x4xf32>
    %cst_83 = arith.constant 2.000000e-01 : f32
    %139 = vector.broadcast %cst_83 : f32 to vector<4x4xf32>
    %140 = arith.mulf %139, %136 : vector<4x4xf32>
    %141 = arith.select %138, %136, %140 : vector<4x4xi1>, vector<4x4xf32>
    %cst_84 = arith.constant 0.000000e+00 : f32
    %142 = vector.broadcast %cst_84 : f32 to vector<4x4xf32>
    %143 = arith.cmpf ogt, %130, %142 : vector<4x4xf32>
    %cst_85 = arith.constant -1.000000e+09 : f32
    %144 = vector.broadcast %cst_85 : f32 to vector<4x4xf32>
    %145 = arith.select %143, %141, %144 : vector<4x4xi1>, vector<4x4xf32>
    %cst_86 = arith.constant dense<0xFF800000> : vector<4xf32>
    %146 = vector.multi_reduction <maximumf>, %145, %cst_86 [1] : vector<4x4xf32> to vector<4xf32>
    %147 = vector.shape_cast %146 : vector<4xf32> to vector<4x1xf32>
    %148 = vector.broadcast %147 : vector<4x1xf32> to vector<4x4xf32>
    %149 = arith.subf %145, %148 : vector<4x4xf32>
    %150 = math.exp %149 : vector<4x4xf32>
    %cst_87 = arith.constant dense<0.000000e+00> : vector<4xf32>
    %151 = vector.multi_reduction <add>, %150, %cst_87 [1] : vector<4x4xf32> to vector<4xf32>
    %152 = vector.shape_cast %151 : vector<4xf32> to vector<4x1xf32>
    %153 = vector.broadcast %152 : vector<4x1xf32> to vector<4x4xf32>
    %154 = arith.divf %150, %153 : vector<4x4xf32>
    %cst_88 = arith.constant dense<0.000000e+00> : vector<4x16xf32>
    %155 = tpu.matmul %154, %131, %cst_88 {dimension_numbers = #tpu.dot_dimension_numbers<[1], [0], [0], [1], [0, 0, 1, 1], [], []>} : vector<4x4xf32>, vector<4x16xf32>, vector<4x16xf32> -> vector<4x16xf32>
    %156 = vector.extract_strided_slice %12 {offsets = [2, 0, 0], sizes = [1, 16, 8], strides = [1, 1, 1]} : vector<4x16x8xf32> to vector<1x16x8xf32>
    %157 = vector.shape_cast %156 : vector<1x16x8xf32> to vector<16x8xf32>
    %cst_89 = arith.constant dense<0.000000e+00> : vector<4x8xf32>
    %158 = tpu.matmul %155, %157, %cst_89 {dimension_numbers = #tpu.dot_dimension_numbers<[1], [0], [0], [1], [0, 0, 1, 1], [], []>} : vector<4x16xf32>, vector<16x8xf32>, vector<4x8xf32> -> vector<4x8xf32>
    %cst_90 = arith.constant 0.000000e+00 : f32
    %159 = vector.broadcast %cst_90 : f32 to vector<4x8xf32>
    %160 = arith.cmpf ogt, %158, %159 : vector<4x8xf32>
    %cst_91 = arith.constant 0.000000e+00 : f32
    %161 = vector.broadcast %cst_91 : f32 to vector<4x8xf32>
    %162 = arith.minimumf %158, %161 : vector<4x8xf32>
    %163 = math.exp %162 : vector<4x8xf32>
    %cst_92 = arith.constant 1.000000e+00 : f32
    %164 = vector.broadcast %cst_92 : f32 to vector<4x8xf32>
    %165 = arith.subf %163, %164 : vector<4x8xf32>
    %166 = arith.select %160, %158, %165 : vector<4x8xi1>, vector<4x8xf32>
    %167 = vector.extract_strided_slice %52 {offsets = [0, 16], sizes = [4, 16], strides = [1, 1]} : vector<4x32xf32> to vector<4x16xf32>
    %168 = vector.extract_strided_slice %53 {offsets = [0, 3], sizes = [4, 1], strides = [1, 1]} : vector<4x4xf32> to vector<4x1xf32>
    %169 = vector.extract_strided_slice %54 {offsets = [3, 0], sizes = [1, 4], strides = [1, 1]} : vector<4x4xf32> to vector<1x4xf32>
    %170 = vector.broadcast %168 : vector<4x1xf32> to vector<4x4xf32>
    %171 = vector.broadcast %169 : vector<1x4xf32> to vector<4x4xf32>
    %172 = arith.addf %170, %171 : vector<4x4xf32>
    %cst_93 = arith.constant 0.000000e+00 : f32
    %173 = vector.broadcast %cst_93 : f32 to vector<4x4xf32>
    %174 = arith.cmpf ogt, %172, %173 : vector<4x4xf32>
    %cst_94 = arith.constant 2.000000e-01 : f32
    %175 = vector.broadcast %cst_94 : f32 to vector<4x4xf32>
    %176 = arith.mulf %175, %172 : vector<4x4xf32>
    %177 = arith.select %174, %172, %176 : vector<4x4xi1>, vector<4x4xf32>
    %cst_95 = arith.constant 0.000000e+00 : f32
    %178 = vector.broadcast %cst_95 : f32 to vector<4x4xf32>
    %179 = arith.cmpf ogt, %130, %178 : vector<4x4xf32>
    %cst_96 = arith.constant -1.000000e+09 : f32
    %180 = vector.broadcast %cst_96 : f32 to vector<4x4xf32>
    %181 = arith.select %179, %177, %180 : vector<4x4xi1>, vector<4x4xf32>
    %cst_97 = arith.constant dense<0xFF800000> : vector<4xf32>
    %182 = vector.multi_reduction <maximumf>, %181, %cst_97 [1] : vector<4x4xf32> to vector<4xf32>
    %183 = vector.shape_cast %182 : vector<4xf32> to vector<4x1xf32>
    %184 = vector.broadcast %183 : vector<4x1xf32> to vector<4x4xf32>
    %185 = arith.subf %181, %184 : vector<4x4xf32>
    %186 = math.exp %185 : vector<4x4xf32>
    %cst_98 = arith.constant dense<0.000000e+00> : vector<4xf32>
    %187 = vector.multi_reduction <add>, %186, %cst_98 [1] : vector<4x4xf32> to vector<4xf32>
    %188 = vector.shape_cast %187 : vector<4xf32> to vector<4x1xf32>
    %189 = vector.broadcast %188 : vector<4x1xf32> to vector<4x4xf32>
    %190 = arith.divf %186, %189 : vector<4x4xf32>
    %cst_99 = arith.constant dense<0.000000e+00> : vector<4x16xf32>
    %191 = tpu.matmul %190, %167, %cst_99 {dimension_numbers = #tpu.dot_dimension_numbers<[1], [0], [0], [1], [0, 0, 1, 1], [], []>} : vector<4x4xf32>, vector<4x16xf32>, vector<4x16xf32> -> vector<4x16xf32>
    %192 = vector.extract_strided_slice %12 {offsets = [3, 0, 0], sizes = [1, 16, 8], strides = [1, 1, 1]} : vector<4x16x8xf32> to vector<1x16x8xf32>
    %193 = vector.shape_cast %192 : vector<1x16x8xf32> to vector<16x8xf32>
    %cst_100 = arith.constant dense<0.000000e+00> : vector<4x8xf32>
    %194 = tpu.matmul %191, %193, %cst_100 {dimension_numbers = #tpu.dot_dimension_numbers<[1], [0], [0], [1], [0, 0, 1, 1], [], []>} : vector<4x16xf32>, vector<16x8xf32>, vector<4x8xf32> -> vector<4x8xf32>
    %cst_101 = arith.constant 0.000000e+00 : f32
    %195 = vector.broadcast %cst_101 : f32 to vector<4x8xf32>
    %196 = arith.cmpf ogt, %194, %195 : vector<4x8xf32>
    %cst_102 = arith.constant 0.000000e+00 : f32
    %197 = vector.broadcast %cst_102 : f32 to vector<4x8xf32>
    %198 = arith.minimumf %194, %197 : vector<4x8xf32>
    %199 = math.exp %198 : vector<4x8xf32>
    %cst_103 = arith.constant 1.000000e+00 : f32
    %200 = vector.broadcast %cst_103 : f32 to vector<4x8xf32>
    %201 = arith.subf %199, %200 : vector<4x8xf32>
    %202 = arith.select %196, %194, %201 : vector<4x8xi1>, vector<4x8xf32>
    %203 = tpu.concatenate %92, %128, %166, %202 in 1 : vector<4x8xf32>, vector<4x8xf32>, vector<4x8xf32>, vector<4x8xf32> -> vector<4x32xf32>
    %c0_104 = arith.constant 0 : index
    %c0_105 = arith.constant 0 : index
    %204 = vector.load %arg19[%c0_104, %c0_105] : memref<4x32xf32, #tpu.memory_space<vmem>>, vector<4x32xf32>
    tpu.vector_store %arg19[%c0_104, %c0_105], %203 {strides = array<i32>} : memref<4x32xf32, #tpu.memory_space<vmem>>, vector<4x32xf32>,
    return
  }
}

module attributes {stable_mosaic.version = 11 : i64} {
  func.func @_ts_express_kernel(%arg0: memref<34x16xf32, #tpu.memory_space<vmem>>, %arg1: memref<34x16xf32, #tpu.memory_space<vmem>>, %arg2: memref<34x16xf32, #tpu.memory_space<vmem>>, %arg3: memref<4x16xf32, #tpu.memory_space<vmem>>, %arg4: memref<34x34xf32, #tpu.memory_space<vmem>>, %arg5: memref<34x4xf32, #tpu.memory_space<vmem>>, %arg6: memref<34x34xf32, #tpu.memory_space<vmem>>, %arg7: memref<16x48xf32, #tpu.memory_space<vmem>>, %arg8: memref<1x48xf32, #tpu.memory_space<vmem>>, %arg9: memref<16x16xf32, #tpu.memory_space<vmem>>, %arg10: memref<1x16xf32, #tpu.memory_space<vmem>>, %arg11: memref<1x16xf32, #tpu.memory_space<vmem>>, %arg12: memref<1x16xf32, #tpu.memory_space<vmem>>, %arg13: memref<16x48xf32, #tpu.memory_space<vmem>>, %arg14: memref<1x48xf32, #tpu.memory_space<vmem>>, %arg15: memref<16x16xf32, #tpu.memory_space<vmem>>, %arg16: memref<1x16xf32, #tpu.memory_space<vmem>>, %arg17: memref<1x16xf32, #tpu.memory_space<vmem>>, %arg18: memref<1x16xf32, #tpu.memory_space<vmem>>, %arg19: memref<16x64xf32, #tpu.memory_space<vmem>>, %arg20: memref<1x64xf32, #tpu.memory_space<vmem>>, %arg21: memref<64x16xf32, #tpu.memory_space<vmem>>, %arg22: memref<1x16xf32, #tpu.memory_space<vmem>>, %arg23: memref<1x16xf32, #tpu.memory_space<vmem>>, %arg24: memref<1x16xf32, #tpu.memory_space<vmem>>, %arg25: memref<16x16xf32, #tpu.memory_space<vmem>>, %arg26: memref<1x16xf32, #tpu.memory_space<vmem>>, %arg27: memref<16x16xf32, #tpu.memory_space<vmem>>, %arg28: memref<1x16xf32, #tpu.memory_space<vmem>>, %arg29: memref<48x32xf32, #tpu.memory_space<vmem>>, %arg30: memref<1x32xf32, #tpu.memory_space<vmem>>, %arg31: memref<32x1xf32, #tpu.memory_space<vmem>>, %arg32: memref<1x1xf32, #tpu.memory_space<vmem>>, %arg33: memref<2x34xf32, #tpu.memory_space<vmem>>) attributes {dimension_semantics = [], scalar_prefetch = 0 : i64, scratch_operands = 0 : i64, tpu.core_type = #tpu.core_type<tc>} {
    %c0 = arith.constant 0 : index
    %c0_0 = arith.constant 0 : index
    %0 = vector.load %arg7[%c0, %c0_0] : memref<16x48xf32, #tpu.memory_space<vmem>>, vector<16x48xf32>
    %c0_1 = arith.constant 0 : index
    %c0_2 = arith.constant 0 : index
    %1 = vector.load %arg8[%c0_1, %c0_2] : memref<1x48xf32, #tpu.memory_space<vmem>>, vector<1x48xf32>
    %c0_3 = arith.constant 0 : index
    %c0_4 = arith.constant 0 : index
    %2 = vector.load %arg9[%c0_3, %c0_4] : memref<16x16xf32, #tpu.memory_space<vmem>>, vector<16x16xf32>
    %c0_5 = arith.constant 0 : index
    %c0_6 = arith.constant 0 : index
    %3 = vector.load %arg10[%c0_5, %c0_6] : memref<1x16xf32, #tpu.memory_space<vmem>>, vector<1x16xf32>
    %c0_7 = arith.constant 0 : index
    %c0_8 = arith.constant 0 : index
    %4 = vector.load %arg11[%c0_7, %c0_8] : memref<1x16xf32, #tpu.memory_space<vmem>>, vector<1x16xf32>
    %c0_9 = arith.constant 0 : index
    %c0_10 = arith.constant 0 : index
    %5 = vector.load %arg12[%c0_9, %c0_10] : memref<1x16xf32, #tpu.memory_space<vmem>>, vector<1x16xf32>
    %c0_11 = arith.constant 0 : index
    %c0_12 = arith.constant 0 : index
    %6 = vector.load %arg13[%c0_11, %c0_12] : memref<16x48xf32, #tpu.memory_space<vmem>>, vector<16x48xf32>
    %c0_13 = arith.constant 0 : index
    %c0_14 = arith.constant 0 : index
    %7 = vector.load %arg14[%c0_13, %c0_14] : memref<1x48xf32, #tpu.memory_space<vmem>>, vector<1x48xf32>
    %c0_15 = arith.constant 0 : index
    %c0_16 = arith.constant 0 : index
    %8 = vector.load %arg15[%c0_15, %c0_16] : memref<16x16xf32, #tpu.memory_space<vmem>>, vector<16x16xf32>
    %c0_17 = arith.constant 0 : index
    %c0_18 = arith.constant 0 : index
    %9 = vector.load %arg16[%c0_17, %c0_18] : memref<1x16xf32, #tpu.memory_space<vmem>>, vector<1x16xf32>
    %c0_19 = arith.constant 0 : index
    %c0_20 = arith.constant 0 : index
    %10 = vector.load %arg17[%c0_19, %c0_20] : memref<1x16xf32, #tpu.memory_space<vmem>>, vector<1x16xf32>
    %c0_21 = arith.constant 0 : index
    %c0_22 = arith.constant 0 : index
    %11 = vector.load %arg18[%c0_21, %c0_22] : memref<1x16xf32, #tpu.memory_space<vmem>>, vector<1x16xf32>
    %c0_23 = arith.constant 0 : index
    %c0_24 = arith.constant 0 : index
    %12 = vector.load %arg19[%c0_23, %c0_24] : memref<16x64xf32, #tpu.memory_space<vmem>>, vector<16x64xf32>
    %c0_25 = arith.constant 0 : index
    %c0_26 = arith.constant 0 : index
    %13 = vector.load %arg20[%c0_25, %c0_26] : memref<1x64xf32, #tpu.memory_space<vmem>>, vector<1x64xf32>
    %c0_27 = arith.constant 0 : index
    %c0_28 = arith.constant 0 : index
    %14 = vector.load %arg21[%c0_27, %c0_28] : memref<64x16xf32, #tpu.memory_space<vmem>>, vector<64x16xf32>
    %c0_29 = arith.constant 0 : index
    %c0_30 = arith.constant 0 : index
    %15 = vector.load %arg22[%c0_29, %c0_30] : memref<1x16xf32, #tpu.memory_space<vmem>>, vector<1x16xf32>
    %c0_31 = arith.constant 0 : index
    %c0_32 = arith.constant 0 : index
    %16 = vector.load %arg23[%c0_31, %c0_32] : memref<1x16xf32, #tpu.memory_space<vmem>>, vector<1x16xf32>
    %c0_33 = arith.constant 0 : index
    %c0_34 = arith.constant 0 : index
    %17 = vector.load %arg24[%c0_33, %c0_34] : memref<1x16xf32, #tpu.memory_space<vmem>>, vector<1x16xf32>
    %c0_35 = arith.constant 0 : index
    %c0_36 = arith.constant 0 : index
    %18 = vector.load %arg25[%c0_35, %c0_36] : memref<16x16xf32, #tpu.memory_space<vmem>>, vector<16x16xf32>
    %c0_37 = arith.constant 0 : index
    %c0_38 = arith.constant 0 : index
    %19 = vector.load %arg26[%c0_37, %c0_38] : memref<1x16xf32, #tpu.memory_space<vmem>>, vector<1x16xf32>
    %c0_39 = arith.constant 0 : index
    %c0_40 = arith.constant 0 : index
    %20 = vector.load %arg27[%c0_39, %c0_40] : memref<16x16xf32, #tpu.memory_space<vmem>>, vector<16x16xf32>
    %c0_41 = arith.constant 0 : index
    %c0_42 = arith.constant 0 : index
    %21 = vector.load %arg28[%c0_41, %c0_42] : memref<1x16xf32, #tpu.memory_space<vmem>>, vector<1x16xf32>
    %c0_43 = arith.constant 0 : index
    %c0_44 = arith.constant 0 : index
    %22 = vector.load %arg29[%c0_43, %c0_44] : memref<48x32xf32, #tpu.memory_space<vmem>>, vector<48x32xf32>
    %c0_45 = arith.constant 0 : index
    %c0_46 = arith.constant 0 : index
    %23 = vector.load %arg30[%c0_45, %c0_46] : memref<1x32xf32, #tpu.memory_space<vmem>>, vector<1x32xf32>
    %c0_47 = arith.constant 0 : index
    %c0_48 = arith.constant 0 : index
    %24 = vector.load %arg31[%c0_47, %c0_48] : memref<32x1xf32, #tpu.memory_space<vmem>>, vector<32x1xf32>
    %c0_49 = arith.constant 0 : index
    %c0_50 = arith.constant 0 : index
    %25 = vector.load %arg32[%c0_49, %c0_50] : memref<1x1xf32, #tpu.memory_space<vmem>>, vector<1x1xf32>
    %c0_51 = arith.constant 0 : index
    %c0_52 = arith.constant 0 : index
    %26 = vector.load %arg0[%c0_51, %c0_52] : memref<34x16xf32, #tpu.memory_space<vmem>>, vector<34x16xf32>
    %c0_53 = arith.constant 0 : index
    %c0_54 = arith.constant 0 : index
    %27 = vector.load %arg1[%c0_53, %c0_54] : memref<34x16xf32, #tpu.memory_space<vmem>>, vector<34x16xf32>
    %c0_55 = arith.constant 0 : index
    %c0_56 = arith.constant 0 : index
    %28 = vector.load %arg2[%c0_55, %c0_56] : memref<34x16xf32, #tpu.memory_space<vmem>>, vector<34x16xf32>
    %c0_57 = arith.constant 0 : index
    %c0_58 = arith.constant 0 : index
    %29 = vector.load %arg3[%c0_57, %c0_58] : memref<4x16xf32, #tpu.memory_space<vmem>>, vector<4x16xf32>
    %c0_59 = arith.constant 0 : index
    %c0_60 = arith.constant 0 : index
    %30 = vector.load %arg4[%c0_59, %c0_60] : memref<34x34xf32, #tpu.memory_space<vmem>>, vector<34x34xf32>
    %c0_61 = arith.constant 0 : index
    %c0_62 = arith.constant 0 : index
    %31 = vector.load %arg5[%c0_61, %c0_62] : memref<34x4xf32, #tpu.memory_space<vmem>>, vector<34x4xf32>
    %c0_63 = arith.constant 0 : index
    %c0_64 = arith.constant 0 : index
    %32 = vector.load %arg6[%c0_63, %c0_64] : memref<34x34xf32, #tpu.memory_space<vmem>>, vector<34x34xf32>
    %33 = vector.extract_strided_slice %0 {offsets = [0, 0], sizes = [16, 16], strides = [1, 1]} : vector<16x48xf32> to vector<16x16xf32>
    %cst = arith.constant dense<0.000000e+00> : vector<34x16xf32>
    %34 = tpu.matmul %26, %33, %cst {dimension_numbers = #tpu.dot_dimension_numbers<[1], [0], [0], [1], [0, 0, 1, 1], [], []>} : vector<34x16xf32>, vector<16x16xf32>, vector<34x16xf32> -> vector<34x16xf32>
    %35 = vector.extract_strided_slice %1 {offsets = [0, 0], sizes = [1, 16], strides = [1, 1]} : vector<1x48xf32> to vector<1x16xf32>
    %36 = vector.broadcast %35 : vector<1x16xf32> to vector<34x16xf32>
    %37 = arith.addf %34, %36 : vector<34x16xf32>
    %38 = vector.extract_strided_slice %0 {offsets = [0, 16], sizes = [16, 32], strides = [1, 1]} : vector<16x48xf32> to vector<16x32xf32>
    %cst_65 = arith.constant dense<0.000000e+00> : vector<4x32xf32>
    %39 = tpu.matmul %29, %38, %cst_65 {dimension_numbers = #tpu.dot_dimension_numbers<[1], [0], [0], [1], [0, 0, 1, 1], [], []>} : vector<4x16xf32>, vector<16x32xf32>, vector<4x32xf32> -> vector<4x32xf32>
    %40 = vector.extract_strided_slice %1 {offsets = [0, 16], sizes = [1, 32], strides = [1, 1]} : vector<1x48xf32> to vector<1x32xf32>
    %41 = vector.broadcast %40 : vector<1x32xf32> to vector<4x32xf32>
    %42 = arith.addf %39, %41 : vector<4x32xf32>
    %43 = vector.extract_strided_slice %42 {offsets = [0, 0], sizes = [4, 16], strides = [1, 1]} : vector<4x32xf32> to vector<4x16xf32>
    %44 = vector.extract_strided_slice %42 {offsets = [0, 16], sizes = [4, 16], strides = [1, 1]} : vector<4x32xf32> to vector<4x16xf32>
    %45 = vector.extract_strided_slice %37 {offsets = [0, 0], sizes = [34, 8], strides = [1, 1]} : vector<34x16xf32> to vector<34x8xf32>
    %46 = vector.extract_strided_slice %43 {offsets = [0, 0], sizes = [4, 8], strides = [1, 1]} : vector<4x16xf32> to vector<4x8xf32>
    %47 = vector.extract_strided_slice %44 {offsets = [0, 0], sizes = [4, 8], strides = [1, 1]} : vector<4x16xf32> to vector<4x8xf32>
    %cst_66 = arith.constant dense<0.000000e+00> : vector<34x4xf32>
    %48 = tpu.matmul %45, %46, %cst_66 {dimension_numbers = #tpu.dot_dimension_numbers<[1], [1], [0], [0], [0, 0, 1, 0], [], []>} : vector<34x8xf32>, vector<4x8xf32>, vector<34x4xf32> -> vector<34x4xf32>
    %cst_67 = arith.constant 0.353553385 : f32
    %49 = vector.broadcast %cst_67 : f32 to vector<34x4xf32>
    %50 = arith.mulf %48, %49 : vector<34x4xf32>
    %51 = arith.addf %50, %31 : vector<34x4xf32>
    %cst_68 = arith.constant dense<0xFF800000> : vector<34xf32>
    %52 = vector.multi_reduction <maximumf>, %51, %cst_68 [1] : vector<34x4xf32> to vector<34xf32>
    %53 = vector.shape_cast %52 : vector<34xf32> to vector<34x1xf32>
    %54 = vector.broadcast %53 : vector<34x1xf32> to vector<34x4xf32>
    %55 = arith.subf %51, %54 : vector<34x4xf32>
    %56 = math.exp %55 : vector<34x4xf32>
    %cst_69 = arith.constant dense<0.000000e+00> : vector<34xf32>
    %57 = vector.multi_reduction <add>, %56, %cst_69 [1] : vector<34x4xf32> to vector<34xf32>
    %58 = vector.shape_cast %57 : vector<34xf32> to vector<34x1xf32>
    %59 = vector.broadcast %58 : vector<34x1xf32> to vector<34x4xf32>
    %60 = arith.divf %56, %59 : vector<34x4xf32>
    %cst_70 = arith.constant dense<0.000000e+00> : vector<34x8xf32>
    %61 = tpu.matmul %60, %47, %cst_70 {dimension_numbers = #tpu.dot_dimension_numbers<[1], [0], [0], [1], [0, 0, 1, 1], [], []>} : vector<34x4xf32>, vector<4x8xf32>, vector<34x8xf32> -> vector<34x8xf32>
    %62 = vector.extract_strided_slice %2 {offsets = [0, 0], sizes = [8, 16], strides = [1, 1]} : vector<16x16xf32> to vector<8x16xf32>
    %cst_71 = arith.constant dense<0.000000e+00> : vector<34x16xf32>
    %63 = tpu.matmul %61, %62, %cst_71 {dimension_numbers = #tpu.dot_dimension_numbers<[1], [0], [0], [1], [0, 0, 1, 1], [], []>} : vector<34x8xf32>, vector<8x16xf32>, vector<34x16xf32> -> vector<34x16xf32>
    %64 = vector.extract_strided_slice %37 {offsets = [0, 8], sizes = [34, 8], strides = [1, 1]} : vector<34x16xf32> to vector<34x8xf32>
    %65 = vector.extract_strided_slice %43 {offsets = [0, 8], sizes = [4, 8], strides = [1, 1]} : vector<4x16xf32> to vector<4x8xf32>
    %66 = vector.extract_strided_slice %44 {offsets = [0, 8], sizes = [4, 8], strides = [1, 1]} : vector<4x16xf32> to vector<4x8xf32>
    %cst_72 = arith.constant dense<0.000000e+00> : vector<34x4xf32>
    %67 = tpu.matmul %64, %65, %cst_72 {dimension_numbers = #tpu.dot_dimension_numbers<[1], [1], [0], [0], [0, 0, 1, 0], [], []>} : vector<34x8xf32>, vector<4x8xf32>, vector<34x4xf32> -> vector<34x4xf32>
    %cst_73 = arith.constant 0.353553385 : f32
    %68 = vector.broadcast %cst_73 : f32 to vector<34x4xf32>
    %69 = arith.mulf %67, %68 : vector<34x4xf32>
    %70 = arith.addf %69, %31 : vector<34x4xf32>
    %cst_74 = arith.constant dense<0xFF800000> : vector<34xf32>
    %71 = vector.multi_reduction <maximumf>, %70, %cst_74 [1] : vector<34x4xf32> to vector<34xf32>
    %72 = vector.shape_cast %71 : vector<34xf32> to vector<34x1xf32>
    %73 = vector.broadcast %72 : vector<34x1xf32> to vector<34x4xf32>
    %74 = arith.subf %70, %73 : vector<34x4xf32>
    %75 = math.exp %74 : vector<34x4xf32>
    %cst_75 = arith.constant dense<0.000000e+00> : vector<34xf32>
    %76 = vector.multi_reduction <add>, %75, %cst_75 [1] : vector<34x4xf32> to vector<34xf32>
    %77 = vector.shape_cast %76 : vector<34xf32> to vector<34x1xf32>
    %78 = vector.broadcast %77 : vector<34x1xf32> to vector<34x4xf32>
    %79 = arith.divf %75, %78 : vector<34x4xf32>
    %cst_76 = arith.constant dense<0.000000e+00> : vector<34x8xf32>
    %80 = tpu.matmul %79, %66, %cst_76 {dimension_numbers = #tpu.dot_dimension_numbers<[1], [0], [0], [1], [0, 0, 1, 1], [], []>} : vector<34x4xf32>, vector<4x8xf32>, vector<34x8xf32> -> vector<34x8xf32>
    %81 = vector.extract_strided_slice %2 {offsets = [8, 0], sizes = [8, 16], strides = [1, 1]} : vector<16x16xf32> to vector<8x16xf32>
    %cst_77 = arith.constant dense<0.000000e+00> : vector<34x16xf32>
    %82 = tpu.matmul %80, %81, %cst_77 {dimension_numbers = #tpu.dot_dimension_numbers<[1], [0], [0], [1], [0, 0, 1, 1], [], []>} : vector<34x8xf32>, vector<8x16xf32>, vector<34x16xf32> -> vector<34x16xf32>
    %83 = arith.addf %63, %82 : vector<34x16xf32>
    %84 = arith.addf %26, %83 : vector<34x16xf32>
    %85 = vector.broadcast %3 : vector<1x16xf32> to vector<34x16xf32>
    %86 = arith.addf %84, %85 : vector<34x16xf32>
    %cst_78 = arith.constant dense<0.000000e+00> : vector<34xf32>
    %87 = vector.multi_reduction <add>, %86, %cst_78 [1] : vector<34x16xf32> to vector<34xf32>
    %88 = vector.shape_cast %87 : vector<34xf32> to vector<34x1xf32>
    %cst_79 = arith.constant 1.600000e+01 : f32
    %89 = vector.broadcast %cst_79 : f32 to vector<34x1xf32>
    %90 = arith.divf %88, %89 : vector<34x1xf32>
    %91 = vector.broadcast %90 : vector<34x1xf32> to vector<34x16xf32>
    %92 = arith.subf %86, %91 : vector<34x16xf32>
    %93 = arith.mulf %92, %92 : vector<34x16xf32>
    %cst_80 = arith.constant dense<0.000000e+00> : vector<34xf32>
    %94 = vector.multi_reduction <add>, %93, %cst_80 [1] : vector<34x16xf32> to vector<34xf32>
    %95 = vector.shape_cast %94 : vector<34xf32> to vector<34x1xf32>
    %cst_81 = arith.constant 1.600000e+01 : f32
    %96 = vector.broadcast %cst_81 : f32 to vector<34x1xf32>
    %97 = arith.divf %95, %96 : vector<34x1xf32>
    %98 = vector.broadcast %90 : vector<34x1xf32> to vector<34x16xf32>
    %99 = arith.subf %86, %98 : vector<34x16xf32>
    %cst_82 = arith.constant 9.99999974E-6 : f32
    %100 = vector.broadcast %cst_82 : f32 to vector<34x1xf32>
    %101 = arith.addf %97, %100 : vector<34x1xf32>
    %102 = math.rsqrt %101 : vector<34x1xf32>
    %103 = vector.broadcast %102 : vector<34x1xf32> to vector<34x16xf32>
    %104 = arith.mulf %99, %103 : vector<34x16xf32>
    %105 = vector.broadcast %4 : vector<1x16xf32> to vector<34x16xf32>
    %106 = arith.mulf %104, %105 : vector<34x16xf32>
    %107 = vector.broadcast %5 : vector<1x16xf32> to vector<34x16xf32>
    %108 = arith.addf %106, %107 : vector<34x16xf32>
    %109 = vector.extract_strided_slice %6 {offsets = [0, 0], sizes = [16, 16], strides = [1, 1]} : vector<16x48xf32> to vector<16x16xf32>
    %cst_83 = arith.constant dense<0.000000e+00> : vector<34x16xf32>
    %110 = tpu.matmul %108, %109, %cst_83 {dimension_numbers = #tpu.dot_dimension_numbers<[1], [0], [0], [1], [0, 0, 1, 1], [], []>} : vector<34x16xf32>, vector<16x16xf32>, vector<34x16xf32> -> vector<34x16xf32>
    %111 = vector.extract_strided_slice %7 {offsets = [0, 0], sizes = [1, 16], strides = [1, 1]} : vector<1x48xf32> to vector<1x16xf32>
    %112 = vector.broadcast %111 : vector<1x16xf32> to vector<34x16xf32>
    %113 = arith.addf %110, %112 : vector<34x16xf32>
    %114 = vector.extract_strided_slice %6 {offsets = [0, 16], sizes = [16, 32], strides = [1, 1]} : vector<16x48xf32> to vector<16x32xf32>
    %cst_84 = arith.constant dense<0.000000e+00> : vector<34x32xf32>
    %115 = tpu.matmul %108, %114, %cst_84 {dimension_numbers = #tpu.dot_dimension_numbers<[1], [0], [0], [1], [0, 0, 1, 1], [], []>} : vector<34x16xf32>, vector<16x32xf32>, vector<34x32xf32> -> vector<34x32xf32>
    %116 = vector.extract_strided_slice %7 {offsets = [0, 16], sizes = [1, 32], strides = [1, 1]} : vector<1x48xf32> to vector<1x32xf32>
    %117 = vector.broadcast %116 : vector<1x32xf32> to vector<34x32xf32>
    %118 = arith.addf %115, %117 : vector<34x32xf32>
    %119 = vector.extract_strided_slice %118 {offsets = [0, 0], sizes = [34, 16], strides = [1, 1]} : vector<34x32xf32> to vector<34x16xf32>
    %120 = vector.extract_strided_slice %118 {offsets = [0, 16], sizes = [34, 16], strides = [1, 1]} : vector<34x32xf32> to vector<34x16xf32>
    %121 = vector.extract_strided_slice %113 {offsets = [0, 0], sizes = [34, 8], strides = [1, 1]} : vector<34x16xf32> to vector<34x8xf32>
    %122 = vector.extract_strided_slice %119 {offsets = [0, 0], sizes = [34, 8], strides = [1, 1]} : vector<34x16xf32> to vector<34x8xf32>
    %123 = vector.extract_strided_slice %120 {offsets = [0, 0], sizes = [34, 8], strides = [1, 1]} : vector<34x16xf32> to vector<34x8xf32>
    %cst_85 = arith.constant dense<0.000000e+00> : vector<34x34xf32>
    %124 = tpu.matmul %121, %122, %cst_85 {dimension_numbers = #tpu.dot_dimension_numbers<[1], [1], [0], [0], [0, 0, 1, 0], [], []>} : vector<34x8xf32>, vector<34x8xf32>, vector<34x34xf32> -> vector<34x34xf32>
    %cst_86 = arith.constant 0.353553385 : f32
    %125 = vector.broadcast %cst_86 : f32 to vector<34x34xf32>
    %126 = arith.mulf %124, %125 : vector<34x34xf32>
    %127 = arith.addf %126, %30 : vector<34x34xf32>
    %cst_87 = arith.constant dense<0xFF800000> : vector<34xf32>
    %128 = vector.multi_reduction <maximumf>, %127, %cst_87 [1] : vector<34x34xf32> to vector<34xf32>
    %129 = vector.shape_cast %128 : vector<34xf32> to vector<34x1xf32>
    %130 = vector.broadcast %129 : vector<34x1xf32> to vector<34x34xf32>
    %131 = arith.subf %127, %130 : vector<34x34xf32>
    %132 = math.exp %131 : vector<34x34xf32>
    %cst_88 = arith.constant dense<0.000000e+00> : vector<34xf32>
    %133 = vector.multi_reduction <add>, %132, %cst_88 [1] : vector<34x34xf32> to vector<34xf32>
    %134 = vector.shape_cast %133 : vector<34xf32> to vector<34x1xf32>
    %135 = vector.broadcast %134 : vector<34x1xf32> to vector<34x34xf32>
    %136 = arith.divf %132, %135 : vector<34x34xf32>
    %cst_89 = arith.constant dense<0.000000e+00> : vector<34x8xf32>
    %137 = tpu.matmul %136, %123, %cst_89 {dimension_numbers = #tpu.dot_dimension_numbers<[1], [0], [0], [1], [0, 0, 1, 1], [], []>} : vector<34x34xf32>, vector<34x8xf32>, vector<34x8xf32> -> vector<34x8xf32>
    %138 = vector.extract_strided_slice %8 {offsets = [0, 0], sizes = [8, 16], strides = [1, 1]} : vector<16x16xf32> to vector<8x16xf32>
    %cst_90 = arith.constant dense<0.000000e+00> : vector<34x16xf32>
    %139 = tpu.matmul %137, %138, %cst_90 {dimension_numbers = #tpu.dot_dimension_numbers<[1], [0], [0], [1], [0, 0, 1, 1], [], []>} : vector<34x8xf32>, vector<8x16xf32>, vector<34x16xf32> -> vector<34x16xf32>
    %140 = vector.extract_strided_slice %113 {offsets = [0, 8], sizes = [34, 8], strides = [1, 1]} : vector<34x16xf32> to vector<34x8xf32>
    %141 = vector.extract_strided_slice %119 {offsets = [0, 8], sizes = [34, 8], strides = [1, 1]} : vector<34x16xf32> to vector<34x8xf32>
    %142 = vector.extract_strided_slice %120 {offsets = [0, 8], sizes = [34, 8], strides = [1, 1]} : vector<34x16xf32> to vector<34x8xf32>
    %cst_91 = arith.constant dense<0.000000e+00> : vector<34x34xf32>
    %143 = tpu.matmul %140, %141, %cst_91 {dimension_numbers = #tpu.dot_dimension_numbers<[1], [1], [0], [0], [0, 0, 1, 0], [], []>} : vector<34x8xf32>, vector<34x8xf32>, vector<34x34xf32> -> vector<34x34xf32>
    %cst_92 = arith.constant 0.353553385 : f32
    %144 = vector.broadcast %cst_92 : f32 to vector<34x34xf32>
    %145 = arith.mulf %143, %144 : vector<34x34xf32>
    %146 = arith.addf %145, %30 : vector<34x34xf32>
    %cst_93 = arith.constant dense<0xFF800000> : vector<34xf32>
    %147 = vector.multi_reduction <maximumf>, %146, %cst_93 [1] : vector<34x34xf32> to vector<34xf32>
    %148 = vector.shape_cast %147 : vector<34xf32> to vector<34x1xf32>
    %149 = vector.broadcast %148 : vector<34x1xf32> to vector<34x34xf32>
    %150 = arith.subf %146, %149 : vector<34x34xf32>
    %151 = math.exp %150 : vector<34x34xf32>
    %cst_94 = arith.constant dense<0.000000e+00> : vector<34xf32>
    %152 = vector.multi_reduction <add>, %151, %cst_94 [1] : vector<34x34xf32> to vector<34xf32>
    %153 = vector.shape_cast %152 : vector<34xf32> to vector<34x1xf32>
    %154 = vector.broadcast %153 : vector<34x1xf32> to vector<34x34xf32>
    %155 = arith.divf %151, %154 : vector<34x34xf32>
    %cst_95 = arith.constant dense<0.000000e+00> : vector<34x8xf32>
    %156 = tpu.matmul %155, %142, %cst_95 {dimension_numbers = #tpu.dot_dimension_numbers<[1], [0], [0], [1], [0, 0, 1, 1], [], []>} : vector<34x34xf32>, vector<34x8xf32>, vector<34x8xf32> -> vector<34x8xf32>
    %157 = vector.extract_strided_slice %8 {offsets = [8, 0], sizes = [8, 16], strides = [1, 1]} : vector<16x16xf32> to vector<8x16xf32>
    %cst_96 = arith.constant dense<0.000000e+00> : vector<34x16xf32>
    %158 = tpu.matmul %156, %157, %cst_96 {dimension_numbers = #tpu.dot_dimension_numbers<[1], [0], [0], [1], [0, 0, 1, 1], [], []>} : vector<34x8xf32>, vector<8x16xf32>, vector<34x16xf32> -> vector<34x16xf32>
    %159 = arith.addf %139, %158 : vector<34x16xf32>
    %160 = arith.addf %108, %159 : vector<34x16xf32>
    %161 = vector.broadcast %9 : vector<1x16xf32> to vector<34x16xf32>
    %162 = arith.addf %160, %161 : vector<34x16xf32>
    %cst_97 = arith.constant dense<0.000000e+00> : vector<34xf32>
    %163 = vector.multi_reduction <add>, %162, %cst_97 [1] : vector<34x16xf32> to vector<34xf32>
    %164 = vector.shape_cast %163 : vector<34xf32> to vector<34x1xf32>
    %cst_98 = arith.constant 1.600000e+01 : f32
    %165 = vector.broadcast %cst_98 : f32 to vector<34x1xf32>
    %166 = arith.divf %164, %165 : vector<34x1xf32>
    %167 = vector.broadcast %166 : vector<34x1xf32> to vector<34x16xf32>
    %168 = arith.subf %162, %167 : vector<34x16xf32>
    %169 = arith.mulf %168, %168 : vector<34x16xf32>
    %cst_99 = arith.constant dense<0.000000e+00> : vector<34xf32>
    %170 = vector.multi_reduction <add>, %169, %cst_99 [1] : vector<34x16xf32> to vector<34xf32>
    %171 = vector.shape_cast %170 : vector<34xf32> to vector<34x1xf32>
    %cst_100 = arith.constant 1.600000e+01 : f32
    %172 = vector.broadcast %cst_100 : f32 to vector<34x1xf32>
    %173 = arith.divf %171, %172 : vector<34x1xf32>
    %174 = vector.broadcast %166 : vector<34x1xf32> to vector<34x16xf32>
    %175 = arith.subf %162, %174 : vector<34x16xf32>
    %cst_101 = arith.constant 9.99999974E-6 : f32
    %176 = vector.broadcast %cst_101 : f32 to vector<34x1xf32>
    %177 = arith.addf %173, %176 : vector<34x1xf32>
    %178 = math.rsqrt %177 : vector<34x1xf32>
    %179 = vector.broadcast %178 : vector<34x1xf32> to vector<34x16xf32>
    %180 = arith.mulf %175, %179 : vector<34x16xf32>
    %181 = vector.broadcast %10 : vector<1x16xf32> to vector<34x16xf32>
    %182 = arith.mulf %180, %181 : vector<34x16xf32>
    %183 = vector.broadcast %11 : vector<1x16xf32> to vector<34x16xf32>
    %184 = arith.addf %182, %183 : vector<34x16xf32>
    %cst_102 = arith.constant dense<0.000000e+00> : vector<34x64xf32>
    %185 = tpu.matmul %184, %12, %cst_102 {dimension_numbers = #tpu.dot_dimension_numbers<[1], [0], [0], [1], [0, 0, 1, 1], [], []>} : vector<34x16xf32>, vector<16x64xf32>, vector<34x64xf32> -> vector<34x64xf32>
    %186 = vector.broadcast %13 : vector<1x64xf32> to vector<34x64xf32>
    %187 = arith.addf %185, %186 : vector<34x64xf32>
    %cst_103 = arith.constant 0.000000e+00 : f32
    %188 = vector.broadcast %cst_103 : f32 to vector<34x64xf32>
    %189 = arith.maximumf %187, %188 : vector<34x64xf32>
    %cst_104 = arith.constant dense<0.000000e+00> : vector<34x16xf32>
    %190 = tpu.matmul %189, %14, %cst_104 {dimension_numbers = #tpu.dot_dimension_numbers<[1], [0], [0], [1], [0, 0, 1, 1], [], []>} : vector<34x64xf32>, vector<64x16xf32>, vector<34x16xf32> -> vector<34x16xf32>
    %191 = vector.broadcast %15 : vector<1x16xf32> to vector<34x16xf32>
    %192 = arith.addf %190, %191 : vector<34x16xf32>
    %193 = arith.addf %184, %192 : vector<34x16xf32>
    %cst_105 = arith.constant dense<0.000000e+00> : vector<34xf32>
    %194 = vector.multi_reduction <add>, %193, %cst_105 [1] : vector<34x16xf32> to vector<34xf32>
    %195 = vector.shape_cast %194 : vector<34xf32> to vector<34x1xf32>
    %cst_106 = arith.constant 1.600000e+01 : f32
    %196 = vector.broadcast %cst_106 : f32 to vector<34x1xf32>
    %197 = arith.divf %195, %196 : vector<34x1xf32>
    %198 = vector.broadcast %197 : vector<34x1xf32> to vector<34x16xf32>
    %199 = arith.subf %193, %198 : vector<34x16xf32>
    %200 = arith.mulf %199, %199 : vector<34x16xf32>
    %cst_107 = arith.constant dense<0.000000e+00> : vector<34xf32>
    %201 = vector.multi_reduction <add>, %200, %cst_107 [1] : vector<34x16xf32> to vector<34xf32>
    %202 = vector.shape_cast %201 : vector<34xf32> to vector<34x1xf32>
    %cst_108 = arith.constant 1.600000e+01 : f32
    %203 = vector.broadcast %cst_108 : f32 to vector<34x1xf32>
    %204 = arith.divf %202, %203 : vector<34x1xf32>
    %205 = vector.broadcast %197 : vector<34x1xf32> to vector<34x16xf32>
    %206 = arith.subf %193, %205 : vector<34x16xf32>
    %cst_109 = arith.constant 9.99999974E-6 : f32
    %207 = vector.broadcast %cst_109 : f32 to vector<34x1xf32>
    %208 = arith.addf %204, %207 : vector<34x1xf32>
    %209 = math.rsqrt %208 : vector<34x1xf32>
    %210 = vector.broadcast %209 : vector<34x1xf32> to vector<34x16xf32>
    %211 = arith.mulf %206, %210 : vector<34x16xf32>
    %212 = vector.broadcast %16 : vector<1x16xf32> to vector<34x16xf32>
    %213 = arith.mulf %211, %212 : vector<34x16xf32>
    %214 = vector.broadcast %17 : vector<1x16xf32> to vector<34x16xf32>
    %215 = arith.addf %213, %214 : vector<34x16xf32>
    %cst_110 = arith.constant dense<0.000000e+00> : vector<34x16xf32>
    %216 = tpu.matmul %32, %215, %cst_110 {dimension_numbers = #tpu.dot_dimension_numbers<[1], [0], [0], [1], [0, 0, 1, 1], [], []>} : vector<34x34xf32>, vector<34x16xf32>, vector<34x16xf32> -> vector<34x16xf32>
    %cst_111 = arith.constant dense<0.000000e+00> : vector<34x16xf32>
    %217 = tpu.matmul %216, %18, %cst_111 {dimension_numbers = #tpu.dot_dimension_numbers<[1], [0], [0], [1], [0, 0, 1, 1], [], []>} : vector<34x16xf32>, vector<16x16xf32>, vector<34x16xf32> -> vector<34x16xf32>
    %218 = vector.broadcast %19 : vector<1x16xf32> to vector<34x16xf32>
    %219 = arith.addf %217, %218 : vector<34x16xf32>
    %cst_112 = arith.constant 0.000000e+00 : f32
    %220 = vector.broadcast %cst_112 : f32 to vector<34x16xf32>
    %221 = arith.maximumf %219, %220 : vector<34x16xf32>
    %cst_113 = arith.constant dense<0.000000e+00> : vector<34x16xf32>
    %222 = tpu.matmul %32, %221, %cst_113 {dimension_numbers = #tpu.dot_dimension_numbers<[1], [0], [0], [1], [0, 0, 1, 1], [], []>} : vector<34x34xf32>, vector<34x16xf32>, vector<34x16xf32> -> vector<34x16xf32>
    %cst_114 = arith.constant dense<0.000000e+00> : vector<34x16xf32>
    %223 = tpu.matmul %222, %20, %cst_114 {dimension_numbers = #tpu.dot_dimension_numbers<[1], [0], [0], [1], [0, 0, 1, 1], [], []>} : vector<34x16xf32>, vector<16x16xf32>, vector<34x16xf32> -> vector<34x16xf32>
    %224 = vector.broadcast %21 : vector<1x16xf32> to vector<34x16xf32>
    %225 = arith.addf %223, %224 : vector<34x16xf32>
    %226 = arith.addf %215, %225 : vector<34x16xf32>
    %227 = arith.mulf %28, %226 : vector<34x16xf32>
    %228 = arith.addf %27, %227 : vector<34x16xf32>
    %229 = vector.extract_strided_slice %0 {offsets = [0, 0], sizes = [16, 16], strides = [1, 1]} : vector<16x48xf32> to vector<16x16xf32>
    %cst_115 = arith.constant dense<0.000000e+00> : vector<34x16xf32>
    %230 = tpu.matmul %228, %229, %cst_115 {dimension_numbers = #tpu.dot_dimension_numbers<[1], [0], [0], [1], [0, 0, 1, 1], [], []>} : vector<34x16xf32>, vector<16x16xf32>, vector<34x16xf32> -> vector<34x16xf32>
    %231 = vector.extract_strided_slice %1 {offsets = [0, 0], sizes = [1, 16], strides = [1, 1]} : vector<1x48xf32> to vector<1x16xf32>
    %232 = vector.broadcast %231 : vector<1x16xf32> to vector<34x16xf32>
    %233 = arith.addf %230, %232 : vector<34x16xf32>
    %234 = vector.extract_strided_slice %0 {offsets = [0, 16], sizes = [16, 32], strides = [1, 1]} : vector<16x48xf32> to vector<16x32xf32>
    %cst_116 = arith.constant dense<0.000000e+00> : vector<4x32xf32>
    %235 = tpu.matmul %29, %234, %cst_116 {dimension_numbers = #tpu.dot_dimension_numbers<[1], [0], [0], [1], [0, 0, 1, 1], [], []>} : vector<4x16xf32>, vector<16x32xf32>, vector<4x32xf32> -> vector<4x32xf32>
    %236 = vector.extract_strided_slice %1 {offsets = [0, 16], sizes = [1, 32], strides = [1, 1]} : vector<1x48xf32> to vector<1x32xf32>
    %237 = vector.broadcast %236 : vector<1x32xf32> to vector<4x32xf32>
    %238 = arith.addf %235, %237 : vector<4x32xf32>
    %239 = vector.extract_strided_slice %238 {offsets = [0, 0], sizes = [4, 16], strides = [1, 1]} : vector<4x32xf32> to vector<4x16xf32>
    %240 = vector.extract_strided_slice %238 {offsets = [0, 16], sizes = [4, 16], strides = [1, 1]} : vector<4x32xf32> to vector<4x16xf32>
    %241 = vector.extract_strided_slice %233 {offsets = [0, 0], sizes = [34, 8], strides = [1, 1]} : vector<34x16xf32> to vector<34x8xf32>
    %242 = vector.extract_strided_slice %239 {offsets = [0, 0], sizes = [4, 8], strides = [1, 1]} : vector<4x16xf32> to vector<4x8xf32>
    %243 = vector.extract_strided_slice %240 {offsets = [0, 0], sizes = [4, 8], strides = [1, 1]} : vector<4x16xf32> to vector<4x8xf32>
    %cst_117 = arith.constant dense<0.000000e+00> : vector<34x4xf32>
    %244 = tpu.matmul %241, %242, %cst_117 {dimension_numbers = #tpu.dot_dimension_numbers<[1], [1], [0], [0], [0, 0, 1, 0], [], []>} : vector<34x8xf32>, vector<4x8xf32>, vector<34x4xf32> -> vector<34x4xf32>
    %cst_118 = arith.constant 0.353553385 : f32
    %245 = vector.broadcast %cst_118 : f32 to vector<34x4xf32>
    %246 = arith.mulf %244, %245 : vector<34x4xf32>
    %247 = arith.addf %246, %31 : vector<34x4xf32>
    %cst_119 = arith.constant dense<0xFF800000> : vector<34xf32>
    %248 = vector.multi_reduction <maximumf>, %247, %cst_119 [1] : vector<34x4xf32> to vector<34xf32>
    %249 = vector.shape_cast %248 : vector<34xf32> to vector<34x1xf32>
    %250 = vector.broadcast %249 : vector<34x1xf32> to vector<34x4xf32>
    %251 = arith.subf %247, %250 : vector<34x4xf32>
    %252 = math.exp %251 : vector<34x4xf32>
    %cst_120 = arith.constant dense<0.000000e+00> : vector<34xf32>
    %253 = vector.multi_reduction <add>, %252, %cst_120 [1] : vector<34x4xf32> to vector<34xf32>
    %254 = vector.shape_cast %253 : vector<34xf32> to vector<34x1xf32>
    %255 = vector.broadcast %254 : vector<34x1xf32> to vector<34x4xf32>
    %256 = arith.divf %252, %255 : vector<34x4xf32>
    %cst_121 = arith.constant dense<0.000000e+00> : vector<34x8xf32>
    %257 = tpu.matmul %256, %243, %cst_121 {dimension_numbers = #tpu.dot_dimension_numbers<[1], [0], [0], [1], [0, 0, 1, 1], [], []>} : vector<34x4xf32>, vector<4x8xf32>, vector<34x8xf32> -> vector<34x8xf32>
    %258 = vector.extract_strided_slice %2 {offsets = [0, 0], sizes = [8, 16], strides = [1, 1]} : vector<16x16xf32> to vector<8x16xf32>
    %cst_122 = arith.constant dense<0.000000e+00> : vector<34x16xf32>
    %259 = tpu.matmul %257, %258, %cst_122 {dimension_numbers = #tpu.dot_dimension_numbers<[1], [0], [0], [1], [0, 0, 1, 1], [], []>} : vector<34x8xf32>, vector<8x16xf32>, vector<34x16xf32> -> vector<34x16xf32>
    %260 = vector.extract_strided_slice %233 {offsets = [0, 8], sizes = [34, 8], strides = [1, 1]} : vector<34x16xf32> to vector<34x8xf32>
    %261 = vector.extract_strided_slice %239 {offsets = [0, 8], sizes = [4, 8], strides = [1, 1]} : vector<4x16xf32> to vector<4x8xf32>
    %262 = vector.extract_strided_slice %240 {offsets = [0, 8], sizes = [4, 8], strides = [1, 1]} : vector<4x16xf32> to vector<4x8xf32>
    %cst_123 = arith.constant dense<0.000000e+00> : vector<34x4xf32>
    %263 = tpu.matmul %260, %261, %cst_123 {dimension_numbers = #tpu.dot_dimension_numbers<[1], [1], [0], [0], [0, 0, 1, 0], [], []>} : vector<34x8xf32>, vector<4x8xf32>, vector<34x4xf32> -> vector<34x4xf32>
    %cst_124 = arith.constant 0.353553385 : f32
    %264 = vector.broadcast %cst_124 : f32 to vector<34x4xf32>
    %265 = arith.mulf %263, %264 : vector<34x4xf32>
    %266 = arith.addf %265, %31 : vector<34x4xf32>
    %cst_125 = arith.constant dense<0xFF800000> : vector<34xf32>
    %267 = vector.multi_reduction <maximumf>, %266, %cst_125 [1] : vector<34x4xf32> to vector<34xf32>
    %268 = vector.shape_cast %267 : vector<34xf32> to vector<34x1xf32>
    %269 = vector.broadcast %268 : vector<34x1xf32> to vector<34x4xf32>
    %270 = arith.subf %266, %269 : vector<34x4xf32>
    %271 = math.exp %270 : vector<34x4xf32>
    %cst_126 = arith.constant dense<0.000000e+00> : vector<34xf32>
    %272 = vector.multi_reduction <add>, %271, %cst_126 [1] : vector<34x4xf32> to vector<34xf32>
    %273 = vector.shape_cast %272 : vector<34xf32> to vector<34x1xf32>
    %274 = vector.broadcast %273 : vector<34x1xf32> to vector<34x4xf32>
    %275 = arith.divf %271, %274 : vector<34x4xf32>
    %cst_127 = arith.constant dense<0.000000e+00> : vector<34x8xf32>
    %276 = tpu.matmul %275, %262, %cst_127 {dimension_numbers = #tpu.dot_dimension_numbers<[1], [0], [0], [1], [0, 0, 1, 1], [], []>} : vector<34x4xf32>, vector<4x8xf32>, vector<34x8xf32> -> vector<34x8xf32>
    %277 = vector.extract_strided_slice %2 {offsets = [8, 0], sizes = [8, 16], strides = [1, 1]} : vector<16x16xf32> to vector<8x16xf32>
    %cst_128 = arith.constant dense<0.000000e+00> : vector<34x16xf32>
    %278 = tpu.matmul %276, %277, %cst_128 {dimension_numbers = #tpu.dot_dimension_numbers<[1], [0], [0], [1], [0, 0, 1, 1], [], []>} : vector<34x8xf32>, vector<8x16xf32>, vector<34x16xf32> -> vector<34x16xf32>
    %279 = arith.addf %259, %278 : vector<34x16xf32>
    %280 = arith.addf %228, %279 : vector<34x16xf32>
    %281 = vector.broadcast %3 : vector<1x16xf32> to vector<34x16xf32>
    %282 = arith.addf %280, %281 : vector<34x16xf32>
    %cst_129 = arith.constant dense<0.000000e+00> : vector<34xf32>
    %283 = vector.multi_reduction <add>, %282, %cst_129 [1] : vector<34x16xf32> to vector<34xf32>
    %284 = vector.shape_cast %283 : vector<34xf32> to vector<34x1xf32>
    %cst_130 = arith.constant 1.600000e+01 : f32
    %285 = vector.broadcast %cst_130 : f32 to vector<34x1xf32>
    %286 = arith.divf %284, %285 : vector<34x1xf32>
    %287 = vector.broadcast %286 : vector<34x1xf32> to vector<34x16xf32>
    %288 = arith.subf %282, %287 : vector<34x16xf32>
    %289 = arith.mulf %288, %288 : vector<34x16xf32>
    %cst_131 = arith.constant dense<0.000000e+00> : vector<34xf32>
    %290 = vector.multi_reduction <add>, %289, %cst_131 [1] : vector<34x16xf32> to vector<34xf32>
    %291 = vector.shape_cast %290 : vector<34xf32> to vector<34x1xf32>
    %cst_132 = arith.constant 1.600000e+01 : f32
    %292 = vector.broadcast %cst_132 : f32 to vector<34x1xf32>
    %293 = arith.divf %291, %292 : vector<34x1xf32>
    %294 = vector.broadcast %286 : vector<34x1xf32> to vector<34x16xf32>
    %295 = arith.subf %282, %294 : vector<34x16xf32>
    %cst_133 = arith.constant 9.99999974E-6 : f32
    %296 = vector.broadcast %cst_133 : f32 to vector<34x1xf32>
    %297 = arith.addf %293, %296 : vector<34x1xf32>
    %298 = math.rsqrt %297 : vector<34x1xf32>
    %299 = vector.broadcast %298 : vector<34x1xf32> to vector<34x16xf32>
    %300 = arith.mulf %295, %299 : vector<34x16xf32>
    %301 = vector.broadcast %4 : vector<1x16xf32> to vector<34x16xf32>
    %302 = arith.mulf %300, %301 : vector<34x16xf32>
    %303 = vector.broadcast %5 : vector<1x16xf32> to vector<34x16xf32>
    %304 = arith.addf %302, %303 : vector<34x16xf32>
    %305 = vector.extract_strided_slice %6 {offsets = [0, 0], sizes = [16, 16], strides = [1, 1]} : vector<16x48xf32> to vector<16x16xf32>
    %cst_134 = arith.constant dense<0.000000e+00> : vector<34x16xf32>
    %306 = tpu.matmul %304, %305, %cst_134 {dimension_numbers = #tpu.dot_dimension_numbers<[1], [0], [0], [1], [0, 0, 1, 1], [], []>} : vector<34x16xf32>, vector<16x16xf32>, vector<34x16xf32> -> vector<34x16xf32>
    %307 = vector.extract_strided_slice %7 {offsets = [0, 0], sizes = [1, 16], strides = [1, 1]} : vector<1x48xf32> to vector<1x16xf32>
    %308 = vector.broadcast %307 : vector<1x16xf32> to vector<34x16xf32>
    %309 = arith.addf %306, %308 : vector<34x16xf32>
    %310 = vector.extract_strided_slice %6 {offsets = [0, 16], sizes = [16, 32], strides = [1, 1]} : vector<16x48xf32> to vector<16x32xf32>
    %cst_135 = arith.constant dense<0.000000e+00> : vector<34x32xf32>
    %311 = tpu.matmul %304, %310, %cst_135 {dimension_numbers = #tpu.dot_dimension_numbers<[1], [0], [0], [1], [0, 0, 1, 1], [], []>} : vector<34x16xf32>, vector<16x32xf32>, vector<34x32xf32> -> vector<34x32xf32>
    %312 = vector.extract_strided_slice %7 {offsets = [0, 16], sizes = [1, 32], strides = [1, 1]} : vector<1x48xf32> to vector<1x32xf32>
    %313 = vector.broadcast %312 : vector<1x32xf32> to vector<34x32xf32>
    %314 = arith.addf %311, %313 : vector<34x32xf32>
    %315 = vector.extract_strided_slice %314 {offsets = [0, 0], sizes = [34, 16], strides = [1, 1]} : vector<34x32xf32> to vector<34x16xf32>
    %316 = vector.extract_strided_slice %314 {offsets = [0, 16], sizes = [34, 16], strides = [1, 1]} : vector<34x32xf32> to vector<34x16xf32>
    %317 = vector.extract_strided_slice %309 {offsets = [0, 0], sizes = [34, 8], strides = [1, 1]} : vector<34x16xf32> to vector<34x8xf32>
    %318 = vector.extract_strided_slice %315 {offsets = [0, 0], sizes = [34, 8], strides = [1, 1]} : vector<34x16xf32> to vector<34x8xf32>
    %319 = vector.extract_strided_slice %316 {offsets = [0, 0], sizes = [34, 8], strides = [1, 1]} : vector<34x16xf32> to vector<34x8xf32>
    %cst_136 = arith.constant dense<0.000000e+00> : vector<34x34xf32>
    %320 = tpu.matmul %317, %318, %cst_136 {dimension_numbers = #tpu.dot_dimension_numbers<[1], [1], [0], [0], [0, 0, 1, 0], [], []>} : vector<34x8xf32>, vector<34x8xf32>, vector<34x34xf32> -> vector<34x34xf32>
    %cst_137 = arith.constant 0.353553385 : f32
    %321 = vector.broadcast %cst_137 : f32 to vector<34x34xf32>
    %322 = arith.mulf %320, %321 : vector<34x34xf32>
    %323 = arith.addf %322, %30 : vector<34x34xf32>
    %cst_138 = arith.constant dense<0xFF800000> : vector<34xf32>
    %324 = vector.multi_reduction <maximumf>, %323, %cst_138 [1] : vector<34x34xf32> to vector<34xf32>
    %325 = vector.shape_cast %324 : vector<34xf32> to vector<34x1xf32>
    %326 = vector.broadcast %325 : vector<34x1xf32> to vector<34x34xf32>
    %327 = arith.subf %323, %326 : vector<34x34xf32>
    %328 = math.exp %327 : vector<34x34xf32>
    %cst_139 = arith.constant dense<0.000000e+00> : vector<34xf32>
    %329 = vector.multi_reduction <add>, %328, %cst_139 [1] : vector<34x34xf32> to vector<34xf32>
    %330 = vector.shape_cast %329 : vector<34xf32> to vector<34x1xf32>
    %331 = vector.broadcast %330 : vector<34x1xf32> to vector<34x34xf32>
    %332 = arith.divf %328, %331 : vector<34x34xf32>
    %cst_140 = arith.constant dense<0.000000e+00> : vector<34x8xf32>
    %333 = tpu.matmul %332, %319, %cst_140 {dimension_numbers = #tpu.dot_dimension_numbers<[1], [0], [0], [1], [0, 0, 1, 1], [], []>} : vector<34x34xf32>, vector<34x8xf32>, vector<34x8xf32> -> vector<34x8xf32>
    %334 = vector.extract_strided_slice %8 {offsets = [0, 0], sizes = [8, 16], strides = [1, 1]} : vector<16x16xf32> to vector<8x16xf32>
    %cst_141 = arith.constant dense<0.000000e+00> : vector<34x16xf32>
    %335 = tpu.matmul %333, %334, %cst_141 {dimension_numbers = #tpu.dot_dimension_numbers<[1], [0], [0], [1], [0, 0, 1, 1], [], []>} : vector<34x8xf32>, vector<8x16xf32>, vector<34x16xf32> -> vector<34x16xf32>
    %336 = vector.extract_strided_slice %309 {offsets = [0, 8], sizes = [34, 8], strides = [1, 1]} : vector<34x16xf32> to vector<34x8xf32>
    %337 = vector.extract_strided_slice %315 {offsets = [0, 8], sizes = [34, 8], strides = [1, 1]} : vector<34x16xf32> to vector<34x8xf32>
    %338 = vector.extract_strided_slice %316 {offsets = [0, 8], sizes = [34, 8], strides = [1, 1]} : vector<34x16xf32> to vector<34x8xf32>
    %cst_142 = arith.constant dense<0.000000e+00> : vector<34x34xf32>
    %339 = tpu.matmul %336, %337, %cst_142 {dimension_numbers = #tpu.dot_dimension_numbers<[1], [1], [0], [0], [0, 0, 1, 0], [], []>} : vector<34x8xf32>, vector<34x8xf32>, vector<34x34xf32> -> vector<34x34xf32>
    %cst_143 = arith.constant 0.353553385 : f32
    %340 = vector.broadcast %cst_143 : f32 to vector<34x34xf32>
    %341 = arith.mulf %339, %340 : vector<34x34xf32>
    %342 = arith.addf %341, %30 : vector<34x34xf32>
    %cst_144 = arith.constant dense<0xFF800000> : vector<34xf32>
    %343 = vector.multi_reduction <maximumf>, %342, %cst_144 [1] : vector<34x34xf32> to vector<34xf32>
    %344 = vector.shape_cast %343 : vector<34xf32> to vector<34x1xf32>
    %345 = vector.broadcast %344 : vector<34x1xf32> to vector<34x34xf32>
    %346 = arith.subf %342, %345 : vector<34x34xf32>
    %347 = math.exp %346 : vector<34x34xf32>
    %cst_145 = arith.constant dense<0.000000e+00> : vector<34xf32>
    %348 = vector.multi_reduction <add>, %347, %cst_145 [1] : vector<34x34xf32> to vector<34xf32>
    %349 = vector.shape_cast %348 : vector<34xf32> to vector<34x1xf32>
    %350 = vector.broadcast %349 : vector<34x1xf32> to vector<34x34xf32>
    %351 = arith.divf %347, %350 : vector<34x34xf32>
    %cst_146 = arith.constant dense<0.000000e+00> : vector<34x8xf32>
    %352 = tpu.matmul %351, %338, %cst_146 {dimension_numbers = #tpu.dot_dimension_numbers<[1], [0], [0], [1], [0, 0, 1, 1], [], []>} : vector<34x34xf32>, vector<34x8xf32>, vector<34x8xf32> -> vector<34x8xf32>
    %353 = vector.extract_strided_slice %8 {offsets = [8, 0], sizes = [8, 16], strides = [1, 1]} : vector<16x16xf32> to vector<8x16xf32>
    %cst_147 = arith.constant dense<0.000000e+00> : vector<34x16xf32>
    %354 = tpu.matmul %352, %353, %cst_147 {dimension_numbers = #tpu.dot_dimension_numbers<[1], [0], [0], [1], [0, 0, 1, 1], [], []>} : vector<34x8xf32>, vector<8x16xf32>, vector<34x16xf32> -> vector<34x16xf32>
    %355 = arith.addf %335, %354 : vector<34x16xf32>
    %356 = arith.addf %304, %355 : vector<34x16xf32>
    %357 = vector.broadcast %9 : vector<1x16xf32> to vector<34x16xf32>
    %358 = arith.addf %356, %357 : vector<34x16xf32>
    %cst_148 = arith.constant dense<0.000000e+00> : vector<34xf32>
    %359 = vector.multi_reduction <add>, %358, %cst_148 [1] : vector<34x16xf32> to vector<34xf32>
    %360 = vector.shape_cast %359 : vector<34xf32> to vector<34x1xf32>
    %cst_149 = arith.constant 1.600000e+01 : f32
    %361 = vector.broadcast %cst_149 : f32 to vector<34x1xf32>
    %362 = arith.divf %360, %361 : vector<34x1xf32>
    %363 = vector.broadcast %362 : vector<34x1xf32> to vector<34x16xf32>
    %364 = arith.subf %358, %363 : vector<34x16xf32>
    %365 = arith.mulf %364, %364 : vector<34x16xf32>
    %cst_150 = arith.constant dense<0.000000e+00> : vector<34xf32>
    %366 = vector.multi_reduction <add>, %365, %cst_150 [1] : vector<34x16xf32> to vector<34xf32>
    %367 = vector.shape_cast %366 : vector<34xf32> to vector<34x1xf32>
    %cst_151 = arith.constant 1.600000e+01 : f32
    %368 = vector.broadcast %cst_151 : f32 to vector<34x1xf32>
    %369 = arith.divf %367, %368 : vector<34x1xf32>
    %370 = vector.broadcast %362 : vector<34x1xf32> to vector<34x16xf32>
    %371 = arith.subf %358, %370 : vector<34x16xf32>
    %cst_152 = arith.constant 9.99999974E-6 : f32
    %372 = vector.broadcast %cst_152 : f32 to vector<34x1xf32>
    %373 = arith.addf %369, %372 : vector<34x1xf32>
    %374 = math.rsqrt %373 : vector<34x1xf32>
    %375 = vector.broadcast %374 : vector<34x1xf32> to vector<34x16xf32>
    %376 = arith.mulf %371, %375 : vector<34x16xf32>
    %377 = vector.broadcast %10 : vector<1x16xf32> to vector<34x16xf32>
    %378 = arith.mulf %376, %377 : vector<34x16xf32>
    %379 = vector.broadcast %11 : vector<1x16xf32> to vector<34x16xf32>
    %380 = arith.addf %378, %379 : vector<34x16xf32>
    %cst_153 = arith.constant dense<0.000000e+00> : vector<34x64xf32>
    %381 = tpu.matmul %380, %12, %cst_153 {dimension_numbers = #tpu.dot_dimension_numbers<[1], [0], [0], [1], [0, 0, 1, 1], [], []>} : vector<34x16xf32>, vector<16x64xf32>, vector<34x64xf32> -> vector<34x64xf32>
    %382 = vector.broadcast %13 : vector<1x64xf32> to vector<34x64xf32>
    %383 = arith.addf %381, %382 : vector<34x64xf32>
    %cst_154 = arith.constant 0.000000e+00 : f32
    %384 = vector.broadcast %cst_154 : f32 to vector<34x64xf32>
    %385 = arith.maximumf %383, %384 : vector<34x64xf32>
    %cst_155 = arith.constant dense<0.000000e+00> : vector<34x16xf32>
    %386 = tpu.matmul %385, %14, %cst_155 {dimension_numbers = #tpu.dot_dimension_numbers<[1], [0], [0], [1], [0, 0, 1, 1], [], []>} : vector<34x64xf32>, vector<64x16xf32>, vector<34x16xf32> -> vector<34x16xf32>
    %387 = vector.broadcast %15 : vector<1x16xf32> to vector<34x16xf32>
    %388 = arith.addf %386, %387 : vector<34x16xf32>
    %389 = arith.addf %380, %388 : vector<34x16xf32>
    %cst_156 = arith.constant dense<0.000000e+00> : vector<34xf32>
    %390 = vector.multi_reduction <add>, %389, %cst_156 [1] : vector<34x16xf32> to vector<34xf32>
    %391 = vector.shape_cast %390 : vector<34xf32> to vector<34x1xf32>
    %cst_157 = arith.constant 1.600000e+01 : f32
    %392 = vector.broadcast %cst_157 : f32 to vector<34x1xf32>
    %393 = arith.divf %391, %392 : vector<34x1xf32>
    %394 = vector.broadcast %393 : vector<34x1xf32> to vector<34x16xf32>
    %395 = arith.subf %389, %394 : vector<34x16xf32>
    %396 = arith.mulf %395, %395 : vector<34x16xf32>
    %cst_158 = arith.constant dense<0.000000e+00> : vector<34xf32>
    %397 = vector.multi_reduction <add>, %396, %cst_158 [1] : vector<34x16xf32> to vector<34xf32>
    %398 = vector.shape_cast %397 : vector<34xf32> to vector<34x1xf32>
    %cst_159 = arith.constant 1.600000e+01 : f32
    %399 = vector.broadcast %cst_159 : f32 to vector<34x1xf32>
    %400 = arith.divf %398, %399 : vector<34x1xf32>
    %401 = vector.broadcast %393 : vector<34x1xf32> to vector<34x16xf32>
    %402 = arith.subf %389, %401 : vector<34x16xf32>
    %cst_160 = arith.constant 9.99999974E-6 : f32
    %403 = vector.broadcast %cst_160 : f32 to vector<34x1xf32>
    %404 = arith.addf %400, %403 : vector<34x1xf32>
    %405 = math.rsqrt %404 : vector<34x1xf32>
    %406 = vector.broadcast %405 : vector<34x1xf32> to vector<34x16xf32>
    %407 = arith.mulf %402, %406 : vector<34x16xf32>
    %408 = vector.broadcast %16 : vector<1x16xf32> to vector<34x16xf32>
    %409 = arith.mulf %407, %408 : vector<34x16xf32>
    %410 = vector.broadcast %17 : vector<1x16xf32> to vector<34x16xf32>
    %411 = arith.addf %409, %410 : vector<34x16xf32>
    %cst_161 = arith.constant dense<0.000000e+00> : vector<34x16xf32>
    %412 = tpu.matmul %32, %411, %cst_161 {dimension_numbers = #tpu.dot_dimension_numbers<[1], [0], [0], [1], [0, 0, 1, 1], [], []>} : vector<34x34xf32>, vector<34x16xf32>, vector<34x16xf32> -> vector<34x16xf32>
    %cst_162 = arith.constant dense<0.000000e+00> : vector<34x16xf32>
    %413 = tpu.matmul %412, %18, %cst_162 {dimension_numbers = #tpu.dot_dimension_numbers<[1], [0], [0], [1], [0, 0, 1, 1], [], []>} : vector<34x16xf32>, vector<16x16xf32>, vector<34x16xf32> -> vector<34x16xf32>
    %414 = vector.broadcast %19 : vector<1x16xf32> to vector<34x16xf32>
    %415 = arith.addf %413, %414 : vector<34x16xf32>
    %cst_163 = arith.constant 0.000000e+00 : f32
    %416 = vector.broadcast %cst_163 : f32 to vector<34x16xf32>
    %417 = arith.maximumf %415, %416 : vector<34x16xf32>
    %cst_164 = arith.constant dense<0.000000e+00> : vector<34x16xf32>
    %418 = tpu.matmul %32, %417, %cst_164 {dimension_numbers = #tpu.dot_dimension_numbers<[1], [0], [0], [1], [0, 0, 1, 1], [], []>} : vector<34x34xf32>, vector<34x16xf32>, vector<34x16xf32> -> vector<34x16xf32>
    %cst_165 = arith.constant dense<0.000000e+00> : vector<34x16xf32>
    %419 = tpu.matmul %418, %20, %cst_165 {dimension_numbers = #tpu.dot_dimension_numbers<[1], [0], [0], [1], [0, 0, 1, 1], [], []>} : vector<34x16xf32>, vector<16x16xf32>, vector<34x16xf32> -> vector<34x16xf32>
    %420 = vector.broadcast %21 : vector<1x16xf32> to vector<34x16xf32>
    %421 = arith.addf %419, %420 : vector<34x16xf32>
    %422 = arith.addf %411, %421 : vector<34x16xf32>
    %423 = arith.mulf %28, %422 : vector<34x16xf32>
    %424 = arith.addf %27, %423 : vector<34x16xf32>
    %425 = vector.extract_strided_slice %0 {offsets = [0, 0], sizes = [16, 16], strides = [1, 1]} : vector<16x48xf32> to vector<16x16xf32>
    %cst_166 = arith.constant dense<0.000000e+00> : vector<34x16xf32>
    %426 = tpu.matmul %424, %425, %cst_166 {dimension_numbers = #tpu.dot_dimension_numbers<[1], [0], [0], [1], [0, 0, 1, 1], [], []>} : vector<34x16xf32>, vector<16x16xf32>, vector<34x16xf32> -> vector<34x16xf32>
    %427 = vector.extract_strided_slice %1 {offsets = [0, 0], sizes = [1, 16], strides = [1, 1]} : vector<1x48xf32> to vector<1x16xf32>
    %428 = vector.broadcast %427 : vector<1x16xf32> to vector<34x16xf32>
    %429 = arith.addf %426, %428 : vector<34x16xf32>
    %430 = vector.extract_strided_slice %0 {offsets = [0, 16], sizes = [16, 32], strides = [1, 1]} : vector<16x48xf32> to vector<16x32xf32>
    %cst_167 = arith.constant dense<0.000000e+00> : vector<4x32xf32>
    %431 = tpu.matmul %29, %430, %cst_167 {dimension_numbers = #tpu.dot_dimension_numbers<[1], [0], [0], [1], [0, 0, 1, 1], [], []>} : vector<4x16xf32>, vector<16x32xf32>, vector<4x32xf32> -> vector<4x32xf32>
    %432 = vector.extract_strided_slice %1 {offsets = [0, 16], sizes = [1, 32], strides = [1, 1]} : vector<1x48xf32> to vector<1x32xf32>
    %433 = vector.broadcast %432 : vector<1x32xf32> to vector<4x32xf32>
    %434 = arith.addf %431, %433 : vector<4x32xf32>
    %435 = vector.extract_strided_slice %434 {offsets = [0, 0], sizes = [4, 16], strides = [1, 1]} : vector<4x32xf32> to vector<4x16xf32>
    %436 = vector.extract_strided_slice %434 {offsets = [0, 16], sizes = [4, 16], strides = [1, 1]} : vector<4x32xf32> to vector<4x16xf32>
    %437 = vector.extract_strided_slice %429 {offsets = [0, 0], sizes = [34, 8], strides = [1, 1]} : vector<34x16xf32> to vector<34x8xf32>
    %438 = vector.extract_strided_slice %435 {offsets = [0, 0], sizes = [4, 8], strides = [1, 1]} : vector<4x16xf32> to vector<4x8xf32>
    %439 = vector.extract_strided_slice %436 {offsets = [0, 0], sizes = [4, 8], strides = [1, 1]} : vector<4x16xf32> to vector<4x8xf32>
    %cst_168 = arith.constant dense<0.000000e+00> : vector<34x4xf32>
    %440 = tpu.matmul %437, %438, %cst_168 {dimension_numbers = #tpu.dot_dimension_numbers<[1], [1], [0], [0], [0, 0, 1, 0], [], []>} : vector<34x8xf32>, vector<4x8xf32>, vector<34x4xf32> -> vector<34x4xf32>
    %cst_169 = arith.constant 0.353553385 : f32
    %441 = vector.broadcast %cst_169 : f32 to vector<34x4xf32>
    %442 = arith.mulf %440, %441 : vector<34x4xf32>
    %443 = arith.addf %442, %31 : vector<34x4xf32>
    %cst_170 = arith.constant dense<0xFF800000> : vector<34xf32>
    %444 = vector.multi_reduction <maximumf>, %443, %cst_170 [1] : vector<34x4xf32> to vector<34xf32>
    %445 = vector.shape_cast %444 : vector<34xf32> to vector<34x1xf32>
    %446 = vector.broadcast %445 : vector<34x1xf32> to vector<34x4xf32>
    %447 = arith.subf %443, %446 : vector<34x4xf32>
    %448 = math.exp %447 : vector<34x4xf32>
    %cst_171 = arith.constant dense<0.000000e+00> : vector<34xf32>
    %449 = vector.multi_reduction <add>, %448, %cst_171 [1] : vector<34x4xf32> to vector<34xf32>
    %450 = vector.shape_cast %449 : vector<34xf32> to vector<34x1xf32>
    %451 = vector.broadcast %450 : vector<34x1xf32> to vector<34x4xf32>
    %452 = arith.divf %448, %451 : vector<34x4xf32>
    %cst_172 = arith.constant dense<0.000000e+00> : vector<34x8xf32>
    %453 = tpu.matmul %452, %439, %cst_172 {dimension_numbers = #tpu.dot_dimension_numbers<[1], [0], [0], [1], [0, 0, 1, 1], [], []>} : vector<34x4xf32>, vector<4x8xf32>, vector<34x8xf32> -> vector<34x8xf32>
    %454 = vector.extract_strided_slice %2 {offsets = [0, 0], sizes = [8, 16], strides = [1, 1]} : vector<16x16xf32> to vector<8x16xf32>
    %cst_173 = arith.constant dense<0.000000e+00> : vector<34x16xf32>
    %455 = tpu.matmul %453, %454, %cst_173 {dimension_numbers = #tpu.dot_dimension_numbers<[1], [0], [0], [1], [0, 0, 1, 1], [], []>} : vector<34x8xf32>, vector<8x16xf32>, vector<34x16xf32> -> vector<34x16xf32>
    %456 = vector.extract_strided_slice %429 {offsets = [0, 8], sizes = [34, 8], strides = [1, 1]} : vector<34x16xf32> to vector<34x8xf32>
    %457 = vector.extract_strided_slice %435 {offsets = [0, 8], sizes = [4, 8], strides = [1, 1]} : vector<4x16xf32> to vector<4x8xf32>
    %458 = vector.extract_strided_slice %436 {offsets = [0, 8], sizes = [4, 8], strides = [1, 1]} : vector<4x16xf32> to vector<4x8xf32>
    %cst_174 = arith.constant dense<0.000000e+00> : vector<34x4xf32>
    %459 = tpu.matmul %456, %457, %cst_174 {dimension_numbers = #tpu.dot_dimension_numbers<[1], [1], [0], [0], [0, 0, 1, 0], [], []>} : vector<34x8xf32>, vector<4x8xf32>, vector<34x4xf32> -> vector<34x4xf32>
    %cst_175 = arith.constant 0.353553385 : f32
    %460 = vector.broadcast %cst_175 : f32 to vector<34x4xf32>
    %461 = arith.mulf %459, %460 : vector<34x4xf32>
    %462 = arith.addf %461, %31 : vector<34x4xf32>
    %cst_176 = arith.constant dense<0xFF800000> : vector<34xf32>
    %463 = vector.multi_reduction <maximumf>, %462, %cst_176 [1] : vector<34x4xf32> to vector<34xf32>
    %464 = vector.shape_cast %463 : vector<34xf32> to vector<34x1xf32>
    %465 = vector.broadcast %464 : vector<34x1xf32> to vector<34x4xf32>
    %466 = arith.subf %462, %465 : vector<34x4xf32>
    %467 = math.exp %466 : vector<34x4xf32>
    %cst_177 = arith.constant dense<0.000000e+00> : vector<34xf32>
    %468 = vector.multi_reduction <add>, %467, %cst_177 [1] : vector<34x4xf32> to vector<34xf32>
    %469 = vector.shape_cast %468 : vector<34xf32> to vector<34x1xf32>
    %470 = vector.broadcast %469 : vector<34x1xf32> to vector<34x4xf32>
    %471 = arith.divf %467, %470 : vector<34x4xf32>
    %cst_178 = arith.constant dense<0.000000e+00> : vector<34x8xf32>
    %472 = tpu.matmul %471, %458, %cst_178 {dimension_numbers = #tpu.dot_dimension_numbers<[1], [0], [0], [1], [0, 0, 1, 1], [], []>} : vector<34x4xf32>, vector<4x8xf32>, vector<34x8xf32> -> vector<34x8xf32>
    %473 = vector.extract_strided_slice %2 {offsets = [8, 0], sizes = [8, 16], strides = [1, 1]} : vector<16x16xf32> to vector<8x16xf32>
    %cst_179 = arith.constant dense<0.000000e+00> : vector<34x16xf32>
    %474 = tpu.matmul %472, %473, %cst_179 {dimension_numbers = #tpu.dot_dimension_numbers<[1], [0], [0], [1], [0, 0, 1, 1], [], []>} : vector<34x8xf32>, vector<8x16xf32>, vector<34x16xf32> -> vector<34x16xf32>
    %475 = arith.addf %455, %474 : vector<34x16xf32>
    %476 = arith.addf %424, %475 : vector<34x16xf32>
    %477 = vector.broadcast %3 : vector<1x16xf32> to vector<34x16xf32>
    %478 = arith.addf %476, %477 : vector<34x16xf32>
    %cst_180 = arith.constant dense<0.000000e+00> : vector<34xf32>
    %479 = vector.multi_reduction <add>, %478, %cst_180 [1] : vector<34x16xf32> to vector<34xf32>
    %480 = vector.shape_cast %479 : vector<34xf32> to vector<34x1xf32>
    %cst_181 = arith.constant 1.600000e+01 : f32
    %481 = vector.broadcast %cst_181 : f32 to vector<34x1xf32>
    %482 = arith.divf %480, %481 : vector<34x1xf32>
    %483 = vector.broadcast %482 : vector<34x1xf32> to vector<34x16xf32>
    %484 = arith.subf %478, %483 : vector<34x16xf32>
    %485 = arith.mulf %484, %484 : vector<34x16xf32>
    %cst_182 = arith.constant dense<0.000000e+00> : vector<34xf32>
    %486 = vector.multi_reduction <add>, %485, %cst_182 [1] : vector<34x16xf32> to vector<34xf32>
    %487 = vector.shape_cast %486 : vector<34xf32> to vector<34x1xf32>
    %cst_183 = arith.constant 1.600000e+01 : f32
    %488 = vector.broadcast %cst_183 : f32 to vector<34x1xf32>
    %489 = arith.divf %487, %488 : vector<34x1xf32>
    %490 = vector.broadcast %482 : vector<34x1xf32> to vector<34x16xf32>
    %491 = arith.subf %478, %490 : vector<34x16xf32>
    %cst_184 = arith.constant 9.99999974E-6 : f32
    %492 = vector.broadcast %cst_184 : f32 to vector<34x1xf32>
    %493 = arith.addf %489, %492 : vector<34x1xf32>
    %494 = math.rsqrt %493 : vector<34x1xf32>
    %495 = vector.broadcast %494 : vector<34x1xf32> to vector<34x16xf32>
    %496 = arith.mulf %491, %495 : vector<34x16xf32>
    %497 = vector.broadcast %4 : vector<1x16xf32> to vector<34x16xf32>
    %498 = arith.mulf %496, %497 : vector<34x16xf32>
    %499 = vector.broadcast %5 : vector<1x16xf32> to vector<34x16xf32>
    %500 = arith.addf %498, %499 : vector<34x16xf32>
    %501 = vector.extract_strided_slice %6 {offsets = [0, 0], sizes = [16, 16], strides = [1, 1]} : vector<16x48xf32> to vector<16x16xf32>
    %cst_185 = arith.constant dense<0.000000e+00> : vector<34x16xf32>
    %502 = tpu.matmul %500, %501, %cst_185 {dimension_numbers = #tpu.dot_dimension_numbers<[1], [0], [0], [1], [0, 0, 1, 1], [], []>} : vector<34x16xf32>, vector<16x16xf32>, vector<34x16xf32> -> vector<34x16xf32>
    %503 = vector.extract_strided_slice %7 {offsets = [0, 0], sizes = [1, 16], strides = [1, 1]} : vector<1x48xf32> to vector<1x16xf32>
    %504 = vector.broadcast %503 : vector<1x16xf32> to vector<34x16xf32>
    %505 = arith.addf %502, %504 : vector<34x16xf32>
    %506 = vector.extract_strided_slice %6 {offsets = [0, 16], sizes = [16, 32], strides = [1, 1]} : vector<16x48xf32> to vector<16x32xf32>
    %cst_186 = arith.constant dense<0.000000e+00> : vector<34x32xf32>
    %507 = tpu.matmul %500, %506, %cst_186 {dimension_numbers = #tpu.dot_dimension_numbers<[1], [0], [0], [1], [0, 0, 1, 1], [], []>} : vector<34x16xf32>, vector<16x32xf32>, vector<34x32xf32> -> vector<34x32xf32>
    %508 = vector.extract_strided_slice %7 {offsets = [0, 16], sizes = [1, 32], strides = [1, 1]} : vector<1x48xf32> to vector<1x32xf32>
    %509 = vector.broadcast %508 : vector<1x32xf32> to vector<34x32xf32>
    %510 = arith.addf %507, %509 : vector<34x32xf32>
    %511 = vector.extract_strided_slice %510 {offsets = [0, 0], sizes = [34, 16], strides = [1, 1]} : vector<34x32xf32> to vector<34x16xf32>
    %512 = vector.extract_strided_slice %510 {offsets = [0, 16], sizes = [34, 16], strides = [1, 1]} : vector<34x32xf32> to vector<34x16xf32>
    %513 = vector.extract_strided_slice %505 {offsets = [0, 0], sizes = [34, 8], strides = [1, 1]} : vector<34x16xf32> to vector<34x8xf32>
    %514 = vector.extract_strided_slice %511 {offsets = [0, 0], sizes = [34, 8], strides = [1, 1]} : vector<34x16xf32> to vector<34x8xf32>
    %515 = vector.extract_strided_slice %512 {offsets = [0, 0], sizes = [34, 8], strides = [1, 1]} : vector<34x16xf32> to vector<34x8xf32>
    %cst_187 = arith.constant dense<0.000000e+00> : vector<34x34xf32>
    %516 = tpu.matmul %513, %514, %cst_187 {dimension_numbers = #tpu.dot_dimension_numbers<[1], [1], [0], [0], [0, 0, 1, 0], [], []>} : vector<34x8xf32>, vector<34x8xf32>, vector<34x34xf32> -> vector<34x34xf32>
    %cst_188 = arith.constant 0.353553385 : f32
    %517 = vector.broadcast %cst_188 : f32 to vector<34x34xf32>
    %518 = arith.mulf %516, %517 : vector<34x34xf32>
    %519 = arith.addf %518, %30 : vector<34x34xf32>
    %cst_189 = arith.constant dense<0xFF800000> : vector<34xf32>
    %520 = vector.multi_reduction <maximumf>, %519, %cst_189 [1] : vector<34x34xf32> to vector<34xf32>
    %521 = vector.shape_cast %520 : vector<34xf32> to vector<34x1xf32>
    %522 = vector.broadcast %521 : vector<34x1xf32> to vector<34x34xf32>
    %523 = arith.subf %519, %522 : vector<34x34xf32>
    %524 = math.exp %523 : vector<34x34xf32>
    %cst_190 = arith.constant dense<0.000000e+00> : vector<34xf32>
    %525 = vector.multi_reduction <add>, %524, %cst_190 [1] : vector<34x34xf32> to vector<34xf32>
    %526 = vector.shape_cast %525 : vector<34xf32> to vector<34x1xf32>
    %527 = vector.broadcast %526 : vector<34x1xf32> to vector<34x34xf32>
    %528 = arith.divf %524, %527 : vector<34x34xf32>
    %cst_191 = arith.constant dense<0.000000e+00> : vector<34x8xf32>
    %529 = tpu.matmul %528, %515, %cst_191 {dimension_numbers = #tpu.dot_dimension_numbers<[1], [0], [0], [1], [0, 0, 1, 1], [], []>} : vector<34x34xf32>, vector<34x8xf32>, vector<34x8xf32> -> vector<34x8xf32>
    %530 = vector.extract_strided_slice %8 {offsets = [0, 0], sizes = [8, 16], strides = [1, 1]} : vector<16x16xf32> to vector<8x16xf32>
    %cst_192 = arith.constant dense<0.000000e+00> : vector<34x16xf32>
    %531 = tpu.matmul %529, %530, %cst_192 {dimension_numbers = #tpu.dot_dimension_numbers<[1], [0], [0], [1], [0, 0, 1, 1], [], []>} : vector<34x8xf32>, vector<8x16xf32>, vector<34x16xf32> -> vector<34x16xf32>
    %532 = vector.extract_strided_slice %505 {offsets = [0, 8], sizes = [34, 8], strides = [1, 1]} : vector<34x16xf32> to vector<34x8xf32>
    %533 = vector.extract_strided_slice %511 {offsets = [0, 8], sizes = [34, 8], strides = [1, 1]} : vector<34x16xf32> to vector<34x8xf32>
    %534 = vector.extract_strided_slice %512 {offsets = [0, 8], sizes = [34, 8], strides = [1, 1]} : vector<34x16xf32> to vector<34x8xf32>
    %cst_193 = arith.constant dense<0.000000e+00> : vector<34x34xf32>
    %535 = tpu.matmul %532, %533, %cst_193 {dimension_numbers = #tpu.dot_dimension_numbers<[1], [1], [0], [0], [0, 0, 1, 0], [], []>} : vector<34x8xf32>, vector<34x8xf32>, vector<34x34xf32> -> vector<34x34xf32>
    %cst_194 = arith.constant 0.353553385 : f32
    %536 = vector.broadcast %cst_194 : f32 to vector<34x34xf32>
    %537 = arith.mulf %535, %536 : vector<34x34xf32>
    %538 = arith.addf %537, %30 : vector<34x34xf32>
    %cst_195 = arith.constant dense<0xFF800000> : vector<34xf32>
    %539 = vector.multi_reduction <maximumf>, %538, %cst_195 [1] : vector<34x34xf32> to vector<34xf32>
    %540 = vector.shape_cast %539 : vector<34xf32> to vector<34x1xf32>
    %541 = vector.broadcast %540 : vector<34x1xf32> to vector<34x34xf32>
    %542 = arith.subf %538, %541 : vector<34x34xf32>
    %543 = math.exp %542 : vector<34x34xf32>
    %cst_196 = arith.constant dense<0.000000e+00> : vector<34xf32>
    %544 = vector.multi_reduction <add>, %543, %cst_196 [1] : vector<34x34xf32> to vector<34xf32>
    %545 = vector.shape_cast %544 : vector<34xf32> to vector<34x1xf32>
    %546 = vector.broadcast %545 : vector<34x1xf32> to vector<34x34xf32>
    %547 = arith.divf %543, %546 : vector<34x34xf32>
    %cst_197 = arith.constant dense<0.000000e+00> : vector<34x8xf32>
    %548 = tpu.matmul %547, %534, %cst_197 {dimension_numbers = #tpu.dot_dimension_numbers<[1], [0], [0], [1], [0, 0, 1, 1], [], []>} : vector<34x34xf32>, vector<34x8xf32>, vector<34x8xf32> -> vector<34x8xf32>
    %549 = vector.extract_strided_slice %8 {offsets = [8, 0], sizes = [8, 16], strides = [1, 1]} : vector<16x16xf32> to vector<8x16xf32>
    %cst_198 = arith.constant dense<0.000000e+00> : vector<34x16xf32>
    %550 = tpu.matmul %548, %549, %cst_198 {dimension_numbers = #tpu.dot_dimension_numbers<[1], [0], [0], [1], [0, 0, 1, 1], [], []>} : vector<34x8xf32>, vector<8x16xf32>, vector<34x16xf32> -> vector<34x16xf32>
    %551 = arith.addf %531, %550 : vector<34x16xf32>
    %552 = arith.addf %500, %551 : vector<34x16xf32>
    %553 = vector.broadcast %9 : vector<1x16xf32> to vector<34x16xf32>
    %554 = arith.addf %552, %553 : vector<34x16xf32>
    %cst_199 = arith.constant dense<0.000000e+00> : vector<34xf32>
    %555 = vector.multi_reduction <add>, %554, %cst_199 [1] : vector<34x16xf32> to vector<34xf32>
    %556 = vector.shape_cast %555 : vector<34xf32> to vector<34x1xf32>
    %cst_200 = arith.constant 1.600000e+01 : f32
    %557 = vector.broadcast %cst_200 : f32 to vector<34x1xf32>
    %558 = arith.divf %556, %557 : vector<34x1xf32>
    %559 = vector.broadcast %558 : vector<34x1xf32> to vector<34x16xf32>
    %560 = arith.subf %554, %559 : vector<34x16xf32>
    %561 = arith.mulf %560, %560 : vector<34x16xf32>
    %cst_201 = arith.constant dense<0.000000e+00> : vector<34xf32>
    %562 = vector.multi_reduction <add>, %561, %cst_201 [1] : vector<34x16xf32> to vector<34xf32>
    %563 = vector.shape_cast %562 : vector<34xf32> to vector<34x1xf32>
    %cst_202 = arith.constant 1.600000e+01 : f32
    %564 = vector.broadcast %cst_202 : f32 to vector<34x1xf32>
    %565 = arith.divf %563, %564 : vector<34x1xf32>
    %566 = vector.broadcast %558 : vector<34x1xf32> to vector<34x16xf32>
    %567 = arith.subf %554, %566 : vector<34x16xf32>
    %cst_203 = arith.constant 9.99999974E-6 : f32
    %568 = vector.broadcast %cst_203 : f32 to vector<34x1xf32>
    %569 = arith.addf %565, %568 : vector<34x1xf32>
    %570 = math.rsqrt %569 : vector<34x1xf32>
    %571 = vector.broadcast %570 : vector<34x1xf32> to vector<34x16xf32>
    %572 = arith.mulf %567, %571 : vector<34x16xf32>
    %573 = vector.broadcast %10 : vector<1x16xf32> to vector<34x16xf32>
    %574 = arith.mulf %572, %573 : vector<34x16xf32>
    %575 = vector.broadcast %11 : vector<1x16xf32> to vector<34x16xf32>
    %576 = arith.addf %574, %575 : vector<34x16xf32>
    %cst_204 = arith.constant dense<0.000000e+00> : vector<34x64xf32>
    %577 = tpu.matmul %576, %12, %cst_204 {dimension_numbers = #tpu.dot_dimension_numbers<[1], [0], [0], [1], [0, 0, 1, 1], [], []>} : vector<34x16xf32>, vector<16x64xf32>, vector<34x64xf32> -> vector<34x64xf32>
    %578 = vector.broadcast %13 : vector<1x64xf32> to vector<34x64xf32>
    %579 = arith.addf %577, %578 : vector<34x64xf32>
    %cst_205 = arith.constant 0.000000e+00 : f32
    %580 = vector.broadcast %cst_205 : f32 to vector<34x64xf32>
    %581 = arith.maximumf %579, %580 : vector<34x64xf32>
    %cst_206 = arith.constant dense<0.000000e+00> : vector<34x16xf32>
    %582 = tpu.matmul %581, %14, %cst_206 {dimension_numbers = #tpu.dot_dimension_numbers<[1], [0], [0], [1], [0, 0, 1, 1], [], []>} : vector<34x64xf32>, vector<64x16xf32>, vector<34x16xf32> -> vector<34x16xf32>
    %583 = vector.broadcast %15 : vector<1x16xf32> to vector<34x16xf32>
    %584 = arith.addf %582, %583 : vector<34x16xf32>
    %585 = arith.addf %576, %584 : vector<34x16xf32>
    %cst_207 = arith.constant dense<0.000000e+00> : vector<34xf32>
    %586 = vector.multi_reduction <add>, %585, %cst_207 [1] : vector<34x16xf32> to vector<34xf32>
    %587 = vector.shape_cast %586 : vector<34xf32> to vector<34x1xf32>
    %cst_208 = arith.constant 1.600000e+01 : f32
    %588 = vector.broadcast %cst_208 : f32 to vector<34x1xf32>
    %589 = arith.divf %587, %588 : vector<34x1xf32>
    %590 = vector.broadcast %589 : vector<34x1xf32> to vector<34x16xf32>
    %591 = arith.subf %585, %590 : vector<34x16xf32>
    %592 = arith.mulf %591, %591 : vector<34x16xf32>
    %cst_209 = arith.constant dense<0.000000e+00> : vector<34xf32>
    %593 = vector.multi_reduction <add>, %592, %cst_209 [1] : vector<34x16xf32> to vector<34xf32>
    %594 = vector.shape_cast %593 : vector<34xf32> to vector<34x1xf32>
    %cst_210 = arith.constant 1.600000e+01 : f32
    %595 = vector.broadcast %cst_210 : f32 to vector<34x1xf32>
    %596 = arith.divf %594, %595 : vector<34x1xf32>
    %597 = vector.broadcast %589 : vector<34x1xf32> to vector<34x16xf32>
    %598 = arith.subf %585, %597 : vector<34x16xf32>
    %cst_211 = arith.constant 9.99999974E-6 : f32
    %599 = vector.broadcast %cst_211 : f32 to vector<34x1xf32>
    %600 = arith.addf %596, %599 : vector<34x1xf32>
    %601 = math.rsqrt %600 : vector<34x1xf32>
    %602 = vector.broadcast %601 : vector<34x1xf32> to vector<34x16xf32>
    %603 = arith.mulf %598, %602 : vector<34x16xf32>
    %604 = vector.broadcast %16 : vector<1x16xf32> to vector<34x16xf32>
    %605 = arith.mulf %603, %604 : vector<34x16xf32>
    %606 = vector.broadcast %17 : vector<1x16xf32> to vector<34x16xf32>
    %607 = arith.addf %605, %606 : vector<34x16xf32>
    %cst_212 = arith.constant dense<0.000000e+00> : vector<34x16xf32>
    %608 = tpu.matmul %32, %607, %cst_212 {dimension_numbers = #tpu.dot_dimension_numbers<[1], [0], [0], [1], [0, 0, 1, 1], [], []>} : vector<34x34xf32>, vector<34x16xf32>, vector<34x16xf32> -> vector<34x16xf32>
    %cst_213 = arith.constant dense<0.000000e+00> : vector<34x16xf32>
    %609 = tpu.matmul %608, %18, %cst_213 {dimension_numbers = #tpu.dot_dimension_numbers<[1], [0], [0], [1], [0, 0, 1, 1], [], []>} : vector<34x16xf32>, vector<16x16xf32>, vector<34x16xf32> -> vector<34x16xf32>
    %610 = vector.broadcast %19 : vector<1x16xf32> to vector<34x16xf32>
    %611 = arith.addf %609, %610 : vector<34x16xf32>
    %cst_214 = arith.constant 0.000000e+00 : f32
    %612 = vector.broadcast %cst_214 : f32 to vector<34x16xf32>
    %613 = arith.maximumf %611, %612 : vector<34x16xf32>
    %cst_215 = arith.constant dense<0.000000e+00> : vector<34x16xf32>
    %614 = tpu.matmul %32, %613, %cst_215 {dimension_numbers = #tpu.dot_dimension_numbers<[1], [0], [0], [1], [0, 0, 1, 1], [], []>} : vector<34x34xf32>, vector<34x16xf32>, vector<34x16xf32> -> vector<34x16xf32>
    %cst_216 = arith.constant dense<0.000000e+00> : vector<34x16xf32>
    %615 = tpu.matmul %614, %20, %cst_216 {dimension_numbers = #tpu.dot_dimension_numbers<[1], [0], [0], [1], [0, 0, 1, 1], [], []>} : vector<34x16xf32>, vector<16x16xf32>, vector<34x16xf32> -> vector<34x16xf32>
    %616 = vector.broadcast %21 : vector<1x16xf32> to vector<34x16xf32>
    %617 = arith.addf %615, %616 : vector<34x16xf32>
    %618 = arith.addf %607, %617 : vector<34x16xf32>
    %619 = vector.extract_strided_slice %22 {offsets = [0, 0], sizes = [16, 32], strides = [1, 1]} : vector<48x32xf32> to vector<16x32xf32>
    %cst_217 = arith.constant dense<0.000000e+00> : vector<34x32xf32>
    %620 = tpu.matmul %226, %619, %cst_217 {dimension_numbers = #tpu.dot_dimension_numbers<[1], [0], [0], [1], [0, 0, 1, 1], [], []>} : vector<34x16xf32>, vector<16x32xf32>, vector<34x32xf32> -> vector<34x32xf32>
    %621 = vector.extract_strided_slice %22 {offsets = [16, 0], sizes = [16, 32], strides = [1, 1]} : vector<48x32xf32> to vector<16x32xf32>
    %cst_218 = arith.constant dense<0.000000e+00> : vector<34x32xf32>
    %622 = tpu.matmul %422, %621, %cst_218 {dimension_numbers = #tpu.dot_dimension_numbers<[1], [0], [0], [1], [0, 0, 1, 1], [], []>} : vector<34x16xf32>, vector<16x32xf32>, vector<34x32xf32> -> vector<34x32xf32>
    %623 = arith.addf %620, %622 : vector<34x32xf32>
    %624 = arith.subf %422, %226 : vector<34x16xf32>
    %625 = vector.extract_strided_slice %22 {offsets = [32, 0], sizes = [16, 32], strides = [1, 1]} : vector<48x32xf32> to vector<16x32xf32>
    %cst_219 = arith.constant dense<0.000000e+00> : vector<34x32xf32>
    %626 = tpu.matmul %624, %625, %cst_219 {dimension_numbers = #tpu.dot_dimension_numbers<[1], [0], [0], [1], [0, 0, 1, 1], [], []>} : vector<34x16xf32>, vector<16x32xf32>, vector<34x32xf32> -> vector<34x32xf32>
    %627 = arith.addf %623, %626 : vector<34x32xf32>
    %628 = vector.broadcast %23 : vector<1x32xf32> to vector<34x32xf32>
    %629 = arith.addf %627, %628 : vector<34x32xf32>
    %cst_220 = arith.constant 0.000000e+00 : f32
    %630 = vector.broadcast %cst_220 : f32 to vector<34x32xf32>
    %631 = arith.maximumf %629, %630 : vector<34x32xf32>
    %cst_221 = arith.constant dense<0.000000e+00> : vector<1x34xf32>
    %632 = tpu.matmul %24, %631, %cst_221 {dimension_numbers = #tpu.dot_dimension_numbers<[0], [1], [1], [0], [0, 1, 1, 0], [], []>} : vector<32x1xf32>, vector<34x32xf32>, vector<1x34xf32> -> vector<1x34xf32>
    %633 = vector.broadcast %25 : vector<1x1xf32> to vector<1x34xf32>
    %634 = arith.addf %632, %633 : vector<1x34xf32>
    %635 = vector.extract_strided_slice %22 {offsets = [0, 0], sizes = [16, 32], strides = [1, 1]} : vector<48x32xf32> to vector<16x32xf32>
    %cst_222 = arith.constant dense<0.000000e+00> : vector<34x32xf32>
    %636 = tpu.matmul %422, %635, %cst_222 {dimension_numbers = #tpu.dot_dimension_numbers<[1], [0], [0], [1], [0, 0, 1, 1], [], []>} : vector<34x16xf32>, vector<16x32xf32>, vector<34x32xf32> -> vector<34x32xf32>
    %637 = vector.extract_strided_slice %22 {offsets = [16, 0], sizes = [16, 32], strides = [1, 1]} : vector<48x32xf32> to vector<16x32xf32>
    %cst_223 = arith.constant dense<0.000000e+00> : vector<34x32xf32>
    %638 = tpu.matmul %618, %637, %cst_223 {dimension_numbers = #tpu.dot_dimension_numbers<[1], [0], [0], [1], [0, 0, 1, 1], [], []>} : vector<34x16xf32>, vector<16x32xf32>, vector<34x32xf32> -> vector<34x32xf32>
    %639 = arith.addf %636, %638 : vector<34x32xf32>
    %640 = arith.subf %618, %422 : vector<34x16xf32>
    %641 = vector.extract_strided_slice %22 {offsets = [32, 0], sizes = [16, 32], strides = [1, 1]} : vector<48x32xf32> to vector<16x32xf32>
    %cst_224 = arith.constant dense<0.000000e+00> : vector<34x32xf32>
    %642 = tpu.matmul %640, %641, %cst_224 {dimension_numbers = #tpu.dot_dimension_numbers<[1], [0], [0], [1], [0, 0, 1, 1], [], []>} : vector<34x16xf32>, vector<16x32xf32>, vector<34x32xf32> -> vector<34x32xf32>
    %643 = arith.addf %639, %642 : vector<34x32xf32>
    %644 = vector.broadcast %23 : vector<1x32xf32> to vector<34x32xf32>
    %645 = arith.addf %643, %644 : vector<34x32xf32>
    %cst_225 = arith.constant 0.000000e+00 : f32
    %646 = vector.broadcast %cst_225 : f32 to vector<34x32xf32>
    %647 = arith.maximumf %645, %646 : vector<34x32xf32>
    %cst_226 = arith.constant dense<0.000000e+00> : vector<1x34xf32>
    %648 = tpu.matmul %24, %647, %cst_226 {dimension_numbers = #tpu.dot_dimension_numbers<[0], [1], [1], [0], [0, 1, 1, 0], [], []>} : vector<32x1xf32>, vector<34x32xf32>, vector<1x34xf32> -> vector<1x34xf32>
    %649 = vector.broadcast %25 : vector<1x1xf32> to vector<1x34xf32>
    %650 = arith.addf %648, %649 : vector<1x34xf32>
    %651 = tpu.concatenate %634, %650 in 0 : vector<1x34xf32>, vector<1x34xf32> -> vector<2x34xf32>
    %c0_227 = arith.constant 0 : index
    %c0_228 = arith.constant 0 : index
    %652 = vector.load %arg33[%c0_227, %c0_228] : memref<2x34xf32, #tpu.memory_space<vmem>>, vector<2x34xf32>
    tpu.vector_store %arg33[%c0_227, %c0_228], %651 {strides = array<i32>} : memref<2x34xf32, #tpu.memory_space<vmem>>, vector<2x34xf32>,
    return
  }
}

</mosaic_0001>

<bundles_post_ra>
// kernel: eq.21
= control target key start
LH: loop header
LB: loop body
LE: loop exit
PB: predicated region body
PF: predicated region fallthrough
CT: control target
= control target key end

     0   :  { %vm7_vm0 = vcmask 138240   ;;  %vm13_vm1 = vcmask 277640   ;;  %s39_s0 = inlined_call_operand.vmem [shape: s32[2,17], index: 0, kind: input, shape index: {}]   ;;  %s40_s1 = inlined_call_operand.vmem [shape: s32[34], index: 1, kind: output, shape index: {}]  }
   0x1   :  { %v4_v0 = vld [vmem:[%s39_s0] sm:$0x3]  ;;  %s22_s0 = smov 17  }
   0x2   :  { %5 = vst [vmem:[#allocation1] sm:$0x3] %v4_v0 }
   0x9   :  { %v10_v1 = vld [vmem:[#allocation1 + $0x1] sm:$0x1]   ;;  %v6_v2 = vld [vmem:[#allocation1] sm:$0x1]  }
   0xa   :  { %11 = vrot.lane.b32.xlu0 %v10_v1, %s22_s0  ;;  %8 = vst.msk [vmem:[#allocation0] sm:$0x1] %vm7_vm0, %v6_v2  }
  0x7c   :  { %v12_v3 = vpop.permute.xlu0 %11  }
  0x7d   :  { %14 = vst.msk [vmem:[#allocation0] sm:$0x1] %vm13_vm1, %v12_v3  }
  0x84   :  { %v17_v4 = vld [vmem:[#allocation0] sm:$0x1] }
  0x85   :  { %20 = vst [vmem:[%s40_s1] sm:$0x1] %v17_v4 }

// kernel: eq.31
= control target key start
LH: loop header
LB: loop body
LE: loop exit
PB: predicated region body
PF: predicated region fallthrough
CT: control target
= control target key end

     0   :  { %vm7_vm0 = vcmask 15360   ;;  %vm13_vm1 = vcmask 31760   ;;  %s39_s0 = inlined_call_operand.vmem [shape: s32[2,2], index: 0, kind: input, shape index: {}]   ;;  %s40_s1 = inlined_call_operand.vmem [shape: s32[4], index: 1, kind: output, shape index: {}]  }
   0x1   :  { %v4_v0 = vld [vmem:[%s39_s0] sm:$0x3]  ;;  %s22_s0 = smov 2  }
   0x2   :  { %5 = vst [vmem:[#allocation1] sm:$0x3] %v4_v0 }
   0x9   :  { %v10_v1 = vld [vmem:[#allocation1 + $0x1] sm:$0x1]   ;;  %v6_v2 = vld [vmem:[#allocation1] sm:$0x1]  }
   0xa   :  { %11 = vrot.lane.b32.xlu0 %v10_v1, %s22_s0  ;;  %8 = vst.msk [vmem:[#allocation0] sm:$0x1] %vm7_vm0, %v6_v2  }
  0x7c   :  { %v12_v3 = vpop.permute.xlu0 %11  }
  0x7d   :  { %14 = vst.msk [vmem:[#allocation0] sm:$0x1] %vm13_vm1, %v12_v3  }
  0x84   :  { %v17_v4 = vld [vmem:[#allocation0] sm:$0x1] }
  0x85   :  { %20 = vst [vmem:[%s40_s1] sm:$0x1] %v17_v4 }

// kernel: firebird_forward.2
= control target key start
LH: loop header
LB: loop body
LE: loop exit
PB: predicated region body
PF: predicated region fallthrough
CT: control target
= control target key end

     0   :  { %vm108_vm0 = vcmask 64512   ;;  %vm208_vm1 = vcmask 785408   ;;  %vm283_vm2 = vcmask 130048   ;;  %vm442_vm3 = vcmask 261120   ;;  %s1224_s28 = smov 8   ;;  %s1609_s7 = inlined_call_operand.vmem [shape: f32[24,16], index: 7, kind: input, shape index: {}]   ;;  %s1610_s0 = inlined_call_operand.vmem [shape: f32[32,8], index: 0, kind: input, shape index: {}]   ;;  %s1611_s6 = inlined_call_operand.vmem [shape: f32[8,16], index: 6, kind: input, shape index: {}]   ;;  %s1612_s1 = inlined_call_operand.vmem [shape: f32[32,96], index: 1, kind: input, shape index: {}]   ;;  %s1613_s9 = inlined_call_operand.vmem [shape: f32[48,16], index: 9, kind: input, shape index: {}]   ;;  %s1614_s8 = inlined_call_operand.vmem [shape: f32[16,16], index: 8, kind: input, shape index: {}]   ;;  %s1615_s2 = inlined_call_operand.vmem [shape: f32[4,32], index: 2, kind: input, shape index: {}]   ;;  %s1616_s10 = inlined_call_operand.vmem [shape: f32[16,16], index: 10, kind: input, shape index: {}]   ;;  %s1617_s3 = inlined_call_operand.vmem [shape: f32[64,16], index: 3, kind: input, shape index: {}]   ;;  %s1618_s11 = inlined_call_operand.vmem [shape: f32[1,16], index: 11, kind: input, shape index: {}]   ;;  %s1619_s15 = inlined_call_operand.vmem [shape: f32[16,32], index: 15, kind: input, shape index: {}]   ;;  %s1620_s4 = inlined_call_operand.vmem [shape: f32[4,64], index: 4, kind: input, shape index: {}]   ;;  %s1621_s13 = inlined_call_operand.vmem [shape: f32[1,16], index: 13, kind: input, shape index: {}]   ;;  %s1622_s12 = inlined_call_operand.vmem [shape: f32[16,16], index: 12, kind: input, shape index: {}]   ;;  %s1623_s14 = inlined_call_operand.vmem [shape: f32[16,32], index: 14, kind: input, shape index: {}]   ;;  %s1624_s17 = inlined_call_operand.vmem [shape: f32[32,4], index: 17, kind: input, shape index: {}]   ;;  %s1625_s16 = inlined_call_operand.vmem [shape: f32[32,4], index: 16, kind: input, shape index: {}]   ;;  %s1626_s18 = inlined_call_operand.vmem [shape: f32[4,16,8], index: 18, kind: input, shape index: {}]   ;;  %s1627_s5 = inlined_call_operand.vmem [shape: f32[2,4,4], index: 5, kind: input, shape index: {}]   ;;  %s1628_s19 = inlined_call_operand.vmem [shape: f32[4,32], index: 19, kind: output, shape index: {}]  }
   0x1   :  { %1632 = sst [smem:[#allocation2_spill]] %s1609_s7  ;;  %v73_v21 = vld [vmem:[%s1613_s9 + $0x28] sm:$0xff]  ;;  %v71_v26 = vld [vmem:[%s1613_s9 + $0x18] sm:$0xff]  ;;  %v68_v27 = vld [vmem:[%s1613_s9] sm:$0xff]  ;;  %vm551_vm4 = vcmask 523264   ;;  %vm767_vm5 = vcmask 1043456  }
   0x2   :  { %1633 = sst [smem:[#allocation3_spill]] %s1610_s0  ;;  %v69_v25 = vld [vmem:[%s1613_s9 + $0x8] sm:$0xff]  ;;  %v70_v28 = vld [vmem:[%s1613_s9 + $0x10] sm:$0xff]  ;;  %v72_v29 = vld [vmem:[%s1613_s9 + $0x20] sm:$0xff]  ;;  %vm738_vm8 = vcmask 27648  }
   0x3   :  { %1634 = sst [smem:[#allocation4_spill]] %s1611_s6  ;;  %v67_v31 = vld [vmem:[%s1614_s8 + $0x8] sm:$0xff]  ;;  %v66_v32 = vld [vmem:[%s1614_s8] sm:$0xff] }
   0x4   :  { %1635 = sst [smem:[#allocation5_spill]] %s1612_s1 }
   0x5   :  { %s1636_s20 = sld [smem:[#allocation2_spill]] }
   0x6   :  { %s1637_s22 = sld [smem:[#allocation3_spill]] }
   0x7   :  { %s1638_s21 = sld [smem:[#allocation4_spill]] }
   0x8   :  { %s1639_s6 = sld [smem:[#allocation5_spill]] }
   0xb   :  { %v65_v0 = vld [vmem:[%s1636_s20 + $0x10] sm:$0xff]  ;;  %v64_v2 = vld [vmem:[%s1636_s20 + $0x8] sm:$0xff]  ;;  %v63_v3 = vld [vmem:[%s1636_s20] sm:$0xff]  ;;  %s1225_s20 = smov 16  }
   0xc   :  { %v100_v1 = vld [vmem:[%s1637_s22] sm:$0xff]  ;;  %194 = vmatpush.msra.mxu2 %v65_v0  ;;  %165 = vmatpush.msra.mxu1 %v64_v2  ;;  %v101_v4 = vld [vmem:[%s1637_s22 + $0x8] sm:$0xff]  ;;  %v102_v5 = vld [vmem:[%s1637_s22 + $0x10] sm:$0xff] }
   0xd   :  { %1114 = vmatmul.msk.f32.vlgmr.msra.gmra.mxu2 %vm108_vm0, %v100_v1  ;;  %1110 = vmatmul.msk.f32.vlgmr.msra.gmra.mxu1 %vm108_vm0, %v100_v1  ;;  %v103_v6 = vld [vmem:[%s1637_s22 + $0x18] sm:$0xff]  ;;  %v62_v12 = vld [vmem:[%s1638_s21] sm:$0xff] }
   0xe   :  { %136 = vmatpush.msra.mxu0 %v63_v3  ;;  %v1370_v20 = vld [vmem:[%s1639_s6] sm:$0xff]  ;;  %v1380_v22 = vld [vmem:[%s1639_s6 + $0x8] sm:$0xff]  ;;  %v1387_v23 = vld [vmem:[%s1639_s6 + $0x10] sm:$0xff]  ;;  %310 = vmatpush.msrb.mxu1 %v69_v25 }
   0xf   :  { %1106 = vmatmul.msk.f32.vlgmr.msra.gmra.mxu0 %vm108_vm0, %v100_v1  ;;  %v1394_v24 = vld [vmem:[%s1639_s6 + $0x18] sm:$0xff]  ;;  %339 = vmatpush.msrb.mxu2 %v71_v26 }
  0x10   :  { %265 = vmatpush.msrb.mxu0 %v62_v12  ;;  %311 = vmatpush.msrb.mxu1 %v68_v27  ;;  %v467_v12 = vld [vmem:[%s1617_s3 + $0x8] sm:$0xff] }
  0x11   :  { %340 = vmatpush.msrb.mxu2 %v70_v28 }
  0x12   :  { %426 = vmatpush.msra.mxu1 %v67_v31 }
  0x14   :  { %427 = vmatpush.msra.mxu1 %v66_v32 }
  0x15   :  { %1115 = vmatmul.msk.f32.gmra.mxu2 %vm108_vm0, %v101_v4  ;;  %1111 = vmatmul.msk.f32.gmra.mxu1 %vm108_vm0, %v101_v4 }
  0x17   :  { %1107 = vmatmul.msk.f32.gmra.mxu0 %vm108_vm0, %v101_v4 }
  0x1d   :  { %1116 = vmatmul.msk.f32.gmra.mxu2 %vm108_vm0, %v102_v5  ;;  %1112 = vmatmul.msk.f32.gmra.mxu1 %vm108_vm0, %v102_v5 }
  0x1f   :  { %1108 = vmatmul.msk.f32.gmra.mxu0 %vm108_vm0, %v102_v5 }
  0x25   :  { %1117 = vmatmul.msk.f32.gmra.mxu2 %vm108_vm0, %v103_v6  ;;  %1113 = vmatmul.msk.f32.gmra.mxu1 %vm108_vm0, %v103_v6 }
  0x27   :  { %1109 = vmatmul.msk.f32.gmra.mxu0 %vm108_vm0, %v103_v6 }
  0x2f   :  { %1122 = vmatmul.msk.f32.vlgmr.msrb.gmra.mxu0 %vm108_vm0, %v100_v1 }
  0x37   :  { %1123 = vmatmul.msk.f32.gmra.mxu0 %vm108_vm0, %v101_v4 }
  0x3f   :  { %1124 = vmatmul.msk.f32.gmra.mxu0 %vm108_vm0, %v102_v5 }
  0x47   :  { %1125 = vmatmul.msk.f32.gmra.mxu0 %vm108_vm0, %v103_v6 }
  0x8a   :  { %v167_v8 = vpop.f32.mrf.mxu1 }
  0x8c   :  { %v138_v10 = vpop.f32.mrf.mxu0 }
  0x90   :  { %v196_v7 = vpop.f32.mrf.mxu2 }
  0x92   :  { %v170_v11 = vpop.f32.mrf.mxu1 }
  0x94   :  { %v141_v14 = vpop.f32.mrf.mxu0 }
  0x98   :  { %v199_v9 = vpop.f32.mrf.mxu2 }
  0x9a   :  { %v173_v15 = vpop.f32.mrf.mxu1 }
  0x9c   :  { %v144_v17 = vpop.f32.mrf.mxu0 }
  0xa0   :  { %v202_v13 = vpop.f32.mrf.mxu2 }
  0xa2   :  { %v176_v18 = vpop.f32.mrf.mxu1 }
  0xa4   :  { %v147_v19 = vpop.f32.mrf.mxu0 }
  0xa8   :  { %v205_v16 = vpop.f32.mrf.mxu2 }
  0xa9   :  { %225 = vmatpush.msra.mxu3 %v205_v16  ;;  %v471_v16 = vld [vmem:[%s1617_s3 + $0x28] sm:$0xff] }
  0xab   :  { %226 = vmatpush.msra.mxu3 %v202_v13  ;;  %v468_v13 = vld [vmem:[%s1617_s3 + $0x10] sm:$0xff] }
  0xac   :  { %v267_v30 = vpop.f32.mrf.mxu0 }
  0xad   :  { %227 = vmatpush.msra.mxu3 %v199_v9  ;;  %v75_v9 = vld [vmem:[%s1616_s10 + $0x8] sm:$0xff] }
  0xaf   :  { %228 = vmatpush.msra.mxu3 %v196_v7 }
  0xb1   :  { %229 = vmatpush.msra.mxu3 %v176_v18  ;;  %v473_v18 = vld [vmem:[%s1617_s3 + $0x38] sm:$0xff] }
  0xb3   :  { %230 = vmatpush.msra.mxu3 %v173_v15  ;;  %v470_v15 = vld [vmem:[%s1617_s3 + $0x20] sm:$0xff] }
  0xb4   :  { %v270_v35 = vpop.f32.mrf.mxu0 }
  0xb5   :  { %231 = vmatpush.msra.mxu3 %v170_v11  ;;  %v466_v11 = vld [vmem:[%s1617_s3] sm:$0xff] }
  0xb7   :  { %232 = vmatpush.msra.mxu3 %v167_v8  ;;  %v441_v8 = vld [vmem:[%s1615_s2] sm:$0xf] }
  0xb9   :  { %233 = vmatpush.msra.mxu3 %v147_v19  ;;  %v83_v19 = vld [vmem:[%s1619_s15 + $0x8] sm:$0xff] }
  0xbb   :  { %234 = vmatpush.msra.mxu3 %v144_v17  ;;  %v472_v17 = vld [vmem:[%s1617_s3 + $0x30] sm:$0xff] }
  0xbc   :  { %v273_v40 = vpop.f32.mrf.mxu0 }
  0xbd   :  { %235 = vmatpush.msra.mxu3 %v141_v14  ;;  %v469_v14 = vld [vmem:[%s1617_s3 + $0x18] sm:$0xff] }
  0xbf   :  { %236 = vmatpush.msra.mxu3 %v138_v10  ;;  %v74_v10 = vld [vmem:[%s1616_s10] sm:$0xff]  ;;  %s1222_s10 = smov 112  }
  0xc0   :  { %1118 = vmatmul.msk.f32.vlgmr.msra.gmra.mxu3 %vm208_vm1, %v1370_v20 }
  0xc1   :  { %368 = vmatpush.msrb.mxu3 %v73_v21 }
  0xc3   :  { %369 = vmatpush.msrb.mxu3 %v72_v29  ;;  %v1193_v29 = vld [vmem:[%s1618_s11] ss:$0 sm:$0xff] }
  0xc4   :  { %v276_v44 = vpop.f32.mrf.mxu0 }
  0xc8   :  { %1119 = vmatmul.msk.f32.gmra.mxu3 %vm208_vm1, %v1380_v22 }
  0xd0   :  { %1120 = vmatmul.msk.f32.gmra.mxu3 %vm208_vm1, %v1387_v23 }
  0xd8   :  { %1121 = vmatmul.msk.f32.gmra.mxu3 %vm208_vm1, %v1394_v24 }
 0x143   :  { %v238_v33 = vpop.f32.mrf.mxu3 }
 0x144   :  { %v268_v34 = vadd.f32 %v267_v30, %v238_v33 }
 0x146   :  { %v279_v36 = vmax.f32 %v268_v34, 0.0 }
 0x148   :  { %1126 = vmatmul.msk.f32.vlgmr.msrb.gmra.mxu1 %vm283_vm2, %v279_v36  ;;  %1130 = vmatmul.msk.f32.vlgmr.msrb.gmra.mxu2 %vm283_vm2, %v279_v36 }
 0x149   :  { %1134 = vmatmul.msk.f32.vlgmr.msrb.gmra.mxu3 %vm283_vm2, %v279_v36 }
 0x14b   :  { %v241_v37 = vpop.f32.mrf.mxu3 }
 0x14c   :  { %v271_v38 = vadd.f32 %v270_v35, %v241_v37 }
 0x14e   :  { %v280_v39 = vmax.f32 %v271_v38, 0.0 }
 0x150   :  { %1127 = vmatmul.msk.f32.gmra.mxu1 %vm283_vm2, %v280_v39  ;;  %1131 = vmatmul.msk.f32.gmra.mxu2 %vm283_vm2, %v280_v39 }
 0x151   :  { %1135 = vmatmul.msk.f32.gmra.mxu3 %vm283_vm2, %v280_v39 }
 0x153   :  { %v244_v41 = vpop.f32.mrf.mxu3 }
 0x154   :  { %v274_v42 = vadd.f32 %v273_v40, %v244_v41 }
 0x156   :  { %v281_v43 = vmax.f32 %v274_v42, 0.0 }
 0x158   :  { %1128 = vmatmul.msk.f32.gmra.mxu1 %vm283_vm2, %v281_v43  ;;  %1132 = vmatmul.msk.f32.gmra.mxu2 %vm283_vm2, %v281_v43 }
 0x159   :  { %1136 = vmatmul.msk.f32.gmra.mxu3 %vm283_vm2, %v281_v43 }
 0x15b   :  { %v247_v45 = vpop.f32.mrf.mxu3 }
 0x15c   :  { %v277_v46 = vadd.f32 %v276_v44, %v247_v45 }
 0x15e   :  { %v282_v47 = vmax.f32 %v277_v46, 0.0 }
 0x160   :  { %1129 = vmatmul.msk.f32.gmra.mxu1 %vm283_vm2, %v282_v47  ;;  %1133 = vmatmul.msk.f32.gmra.mxu2 %vm283_vm2, %v282_v47 }
 0x161   :  { %1137 = vmatmul.msk.f32.gmra.mxu3 %vm283_vm2, %v282_v47 }
 0x168   :  { %1142 = vmatmul.msk.f32.vlgmr.msra.gmra.mxu1 %vm283_vm2, %v279_v36 }
 0x170   :  { %1143 = vmatmul.msk.f32.gmra.mxu1 %vm283_vm2, %v280_v39 }
 0x178   :  { %1144 = vmatmul.msk.f32.gmra.mxu1 %vm283_vm2, %v281_v43 }
 0x180   :  { %1145 = vmatmul.msk.f32.gmra.mxu1 %vm283_vm2, %v282_v47  ;;  %v550_v47 = vld [vmem:[%s1620_s4] sm:$0xf] }
 0x1c5   :  { %v313_v51 = vpop.f32.mrf.mxu1 }
 0x1cb   :  { %v342_v49 = vpop.f32.mrf.mxu2 }
 0x1cc   :  { %v371_v48 = vpop.f32.mrf.mxu3 }
 0x1cd   :  { %v316_v54 = vpop.f32.mrf.mxu1 }
 0x1d3   :  { %v345_v52 = vpop.f32.mrf.mxu2 }
 0x1d4   :  { %v374_v50 = vpop.f32.mrf.mxu3 }
 0x1d5   :  { %v319_v57 = vpop.f32.mrf.mxu1 }
 0x1db   :  { %v348_v55 = vpop.f32.mrf.mxu2 }
 0x1dc   :  { %v377_v53 = vpop.f32.mrf.mxu3 }
 0x1dd   :  { %v322_v59 = vpop.f32.mrf.mxu1 }
 0x1e3   :  { %v351_v58 = vpop.f32.mrf.mxu2 }
 0x1e4   :  { %v380_v56 = vpop.f32.mrf.mxu3 }
 0x1e5   :  { %387 = vmatpush.msra.mxu0 %v380_v56  ;;  %v429_v60 = vpop.f32.mrf.mxu1  ;;  %v85_v56 = vld [vmem:[%s1625_s16 + $0x8] sm:$0xff] }
 0x1e7   :  { %388 = vmatpush.msra.mxu0 %v377_v53  ;;  %v88_v53 = vld [vmem:[%s1624_s17] sm:$0xff] }
 0x1e8   :  { %670 = vxpose.xlu0.b32.start [1/4] (short) (narrow) %v88_v53, 8 }
 0x1e9   :  { %389 = vmatpush.msra.mxu0 %v374_v50  ;;  %v81_v50 = vld [vmem:[%s1623_s14 + $0x8] sm:$0xff] }
 0x1ea   :  { %641 = vmatpush.msrb.mxu1 %v81_v50 }
 0x1eb   :  { %390 = vmatpush.msra.mxu0 %v371_v48  ;;  %v78_v48 = vld [vmem:[%s1622_s12 + $0x8] sm:$0xff] }
 0x1ed   :  { %391 = vmatpush.msra.mxu0 %v351_v58  ;;  %v432_v62 = vpop.f32.mrf.mxu1  ;;  %v89_v58 = vld [vmem:[%s1624_s17 + $0x8] sm:$0xff] }
 0x1ef   :  { %392 = vmatpush.msra.mxu0 %v348_v55  ;;  %v86_v55 = vld [vmem:[%s1625_s16 + $0x10] sm:$0xff] }
 0x1f0   :  { %671 = vxpose.xlu0.b32.cont [2/4] (short) (narrow) %v89_v58, 8 }
 0x1f1   :  { %393 = vmatpush.msra.mxu0 %v345_v52  ;;  %v80_v52 = vld [vmem:[%s1623_s14] sm:$0xff] }
 0x1f2   :  { %642 = vmatpush.msrb.mxu1 %v80_v52 }
 0x1f3   :  { %394 = vmatpush.msra.mxu0 %v342_v49  ;;  %v77_v49 = vld [vmem:[%s1622_s12] sm:$0xff] }
 0x1f5   :  { %395 = vmatpush.msra.mxu0 %v322_v59  ;;  %v435_v0 = vpop.f32.mrf.mxu1  ;;  %v90_v59 = vld [vmem:[%s1624_s17 + $0x10] sm:$0xff] }
 0x1f7   :  { %396 = vmatpush.msra.mxu0 %v319_v57  ;;  %v84_v57 = vld [vmem:[%s1625_s16] sm:$0xff] }
 0x1f8   :  { %672 = vxpose.xlu0.b32.cont [3/4] (short) (narrow) %v90_v59, 8 }
 0x1f9   :  { %397 = vmatpush.msra.mxu0 %v316_v54  ;;  %v87_v54 = vld [vmem:[%s1625_s16 + $0x18] sm:$0xff] }
 0x1fb   :  { %398 = vmatpush.msra.mxu0 %v313_v51 }
 0x1fc   :  { %1138 = vmatmul.msk.f32.vlgmr.msra.gmra.mxu0 %vm208_vm1, %v1370_v20  ;;  %v82_v20 = vld [vmem:[%s1619_s15] sm:$0xff] }
 0x1fd   :  { %v438_v2 = vpop.f32.mrf.mxu1  ;;  %618 = vmatpush.msrb.mxu0 %v83_v19 }
 0x1ff   :  { %619 = vmatpush.msrb.mxu0 %v82_v20 }
 0x204   :  { %1139 = vmatmul.msk.f32.gmra.mxu0 %vm208_vm1, %v1380_v22 }
 0x20c   :  { %1140 = vmatmul.msk.f32.gmra.mxu0 %vm208_vm1, %v1387_v23 }
 0x214   :  { %1141 = vmatmul.msk.f32.gmra.mxu0 %vm208_vm1, %v1394_v24  ;;  %vm763_vm1 = vcmask 31744  }
 0x279   :  { %v400_v61 = vpop.f32.mrf.mxu0 }
 0x27a   :  { %v430_v7 = vadd.f32 %v429_v60, %v400_v61  ;;  %v91_v60 = vld [vmem:[%s1624_s17 + $0x18] sm:$0xff]  ;;  %v1194_v61 = vld [vmem:[%s1621_s13] ss:$0 sm:$0xff] }
 0x27b   :  { %673 = vxpose.xlu0.b32.end [4/4] (short) (narrow) %v91_v60, 8 }
 0x281   :  { %v403_v63 = vpop.f32.mrf.mxu0 }
 0x282   :  { %v433_v6 = vadd.f32 %v432_v62, %v403_v63 }
 0x289   :  { %v406_v1 = vpop.f32.mrf.mxu0 }
 0x28a   :  { %v436_v5 = vadd.f32 %v435_v0, %v406_v1  ;;  %v93_v0 = vld [vmem:[%s1626_s18 + $0x8] sm:$0xff]  ;;  %v92_v1 = vld [vmem:[%s1626_s18] sm:$0xff] }
 0x291   :  { %v409_v3 = vpop.f32.mrf.mxu0 }
 0x292   :  { %v439_v4 = vadd.f32 %v438_v2, %v409_v3  ;;  %v1219_v2 = vmov 0   ;;  %v1220_v3 = vmov 2  }
 0x293   :  { %1188 = vset.pattern.permute.xlu1 %v1219_v2 }
 0x294   :  { %458 = vmatpush.msra.mxu2 %v439_v4 }
 0x296   :  { %459 = vmatpush.msra.mxu2 %v436_v5 }
 0x298   :  { %460 = vmatpush.msra.mxu2 %v433_v6 }
 0x29a   :  { %461 = vmatpush.msra.mxu2 %v430_v7 }
 0x29b   :  { %1146 = vmatmul.msk.f32.vlgmr.msra.gmra.mxu2 %vm442_vm3, %v441_v8 }
 0x29c   :  { %515 = vmatpush.msrb.mxu2 %v75_v9  ;;  %v1221_v9 = vmov 1  }
 0x29e   :  { %516 = vmatpush.msrb.mxu2 %v74_v10 }
 0x2a3   :  { %1147 = vmatmul.msk.f32.vlgmr.msrb.gmra.mxu2 %vm283_vm2, %v466_v11 }
 0x2ab   :  { %1148 = vmatmul.msk.f32.gmra.mxu2 %vm283_vm2, %v467_v12 }
 0x2b3   :  { %1149 = vmatmul.msk.f32.gmra.mxu2 %vm283_vm2, %v468_v13  ;;  %v725_v13 = vld [vmem:[%s1627_s5] sm:$0xf] }
 0x2b4   :  { %vm736_vm7 = vcmp.gt.f32.partialorder %v725_v13, 0.0 }
 0x2bb   :  { %1150 = vmatmul.msk.f32.gmra.mxu2 %vm283_vm2, %v469_v14 }
 0x2c3   :  { %1151 = vmatmul.msk.f32.gmra.mxu2 %vm283_vm2, %v470_v15 }
 0x2cb   :  { %1152 = vmatmul.msk.f32.gmra.mxu2 %vm283_vm2, %v471_v16 }
 0x2d3   :  { %1153 = vmatmul.msk.f32.gmra.mxu2 %vm283_vm2, %v472_v17 }
 0x2db   :  { %1154 = vmatmul.msk.f32.gmra.mxu2 %vm283_vm2, %v473_v18 }
 0x2e2   :  { %1190 = vset.pattern.permute.xlu0 %v1220_v3 }
 0x307   :  { %v686_v7 = vpop.trf.xlu0 }
 0x31e   :  { %v463_v21 = vpop.f32.mrf.mxu2 }
 0x31f   :  { %1157 = vmatmul.msk.f32.vlgmr.msrb.gmra.mxu0 %vm283_vm2, %v463_v21 }
 0x326   :  { %v518_v22 = vpop.f32.mrf.mxu2 }
 0x327   :  { %v519_v43 = vadd.f32 %v1193_v29, %v518_v22 }
 0x329   :  { %v542_v46 = vmax.f32 %v519_v43, 0.0 }
 0x32e   :  { %v521_v23 = vpop.f32.mrf.mxu2 }
 0x32f   :  { %v522_v41 = vadd.f32 %v1193_v29, %v521_v23 }
 0x331   :  { %v543_v45 = vmax.f32 %v522_v41, 0.0 }
 0x336   :  { %v524_v24 = vpop.f32.mrf.mxu2 }
 0x337   :  { %v525_v39 = vadd.f32 %v1193_v29, %v524_v24 }
 0x339   :  { %v544_v44 = vmax.f32 %v525_v39, 0.0 }
 0x33e   :  { %v527_v25 = vpop.f32.mrf.mxu2 }
 0x33f   :  { %v528_v37 = vadd.f32 %v1193_v29, %v527_v25 }
 0x341   :  { %v545_v42 = vmax.f32 %v528_v37, 0.0 }
 0x346   :  { %v530_v26 = vpop.f32.mrf.mxu2 }
 0x347   :  { %v531_v35 = vadd.f32 %v1193_v29, %v530_v26  ;;  %v1223_v26 = vmov 3  }
 0x348   :  { %1191 = vset.pattern.permute.xlu2 %v1223_v26 }
 0x349   :  { %v546_v40 = vmax.f32 %v531_v35, 0.0 }
 0x34e   :  { %v533_v27 = vpop.f32.mrf.mxu2 }
 0x34f   :  { %v534_v33 = vadd.f32 %v1193_v29, %v533_v27 }
 0x351   :  { %v547_v38 = vmax.f32 %v534_v33, 0.0 }
 0x356   :  { %v536_v28 = vpop.f32.mrf.mxu2 }
 0x357   :  { %v537_v31 = vadd.f32 %v1193_v29, %v536_v28 }
 0x359   :  { %v548_v36 = vmax.f32 %v537_v31, 0.0 }
 0x35e   :  { %v539_v30 = vpop.f32.mrf.mxu2 }
 0x35f   :  { %v540_v32 = vadd.f32 %v1193_v29, %v539_v30 }
 0x361   :  { %v549_v34 = vmax.f32 %v540_v32, 0.0 }
 0x363   :  { %563 = vmatpush.msra.mxu3 %v549_v34 }
 0x365   :  { %564 = vmatpush.msra.mxu3 %v548_v36 }
 0x367   :  { %565 = vmatpush.msra.mxu3 %v547_v38 }
 0x369   :  { %566 = vmatpush.msra.mxu3 %v546_v40 }
 0x36b   :  { %567 = vmatpush.msra.mxu3 %v545_v42  ;;  %v1170_v42 = vld [vmem:[%s1627_s5 + $0x4] sm:$0xf] }
 0x36c   :  { %vm920_vm11 = vcmp.gt.f32.partialorder %v1170_v42, 0.0 }
 0x36d   :  { %568 = vmatpush.msra.mxu3 %v544_v44 }
 0x36f   :  { %569 = vmatpush.msra.mxu3 %v543_v45 }
 0x371   :  { %570 = vmatpush.msra.mxu3 %v542_v46  ;;  %v95_v46 = vld [vmem:[%s1626_s18 + $0x18] sm:$0xff] }
 0x372   :  { %1155 = vmatmul.msk.f32.vlgmr.msra.gmra.mxu3 %vm551_vm4, %v550_v47  ;;  %v94_v47 = vld [vmem:[%s1626_s18 + $0x10] sm:$0xff] }
 0x373   :  { %595 = vmatpush.msrb.mxu3 %v78_v48 }
 0x375   :  { %596 = vmatpush.msrb.mxu3 %v77_v49 }
 0x377   :  { %662 = vmatpush.msra.mxu3 %v87_v54 }
 0x379   :  { %663 = vmatpush.msra.mxu3 %v86_v55 }
 0x37b   :  { %664 = vmatpush.msra.mxu3 %v85_v56 }
 0x37d   :  { %665 = vmatpush.msra.mxu3 %v84_v57 }
 0x39c   :  { %v621_v4 = vpop.f32.mrf.mxu0 }
 0x3f5   :  { %v572_v51 = vpop.f32.mrf.mxu3 }
 0x3f6   :  { %1156 = vmatmul.msk.f32.vlgmr.msrb.gmra.mxu3 %vm283_vm2, %v572_v51 }
 0x3f7   :  { %807 = vmatpush.msrb.mxu3 %v93_v0 }
 0x3f9   :  { %808 = vmatpush.msrb.mxu3 %v92_v1 }
 0x479   :  { %v598_v62 = vpop.f32.mrf.mxu3 }
 0x47a   :  { %v599_v63 = vadd.f32 %v1194_v61, %v598_v62 }
 0x47c   :  { %1158 = vmatmul.msk.f32.vlgmr.msrb.gmra.mxu1 %vm283_vm2, %v599_v63 }
 0x4f9   :  { %v644_v5 = vpop.f32.mrf.mxu1 }
 0x4fa   :  { %v645_v6 = vadd.f32 %v644_v5, %v621_v4 }
 0x4fc   :  { %1159 = vmatmul.msk.f32.vlgmr.msra.gmra.mxu3 %vm442_vm3, %v645_v6  ;;  %1160 = vmatpush.xpose.msk.msra.mxu0 %vm442_vm3, %v645_v6 }
 0x4fd   :  { %1162 = vmatpush.msk.msra.mxu1 %vm767_vm5, %v645_v6  ;;  %1171 = vmatpush.msk.msra.mxu3 %vm767_vm5, %v645_v6 }
 0x4ff   :  { %1161 = vmatmul.msk.f32.vlgmr.msra.gmra.mxu0 %vm442_vm3, %v686_v7  ;;  %897 = vmatpush.msrb.mxu1 %v95_v46 }
 0x501   :  { %898 = vmatpush.msrb.mxu1 %v94_v47 }
 0x57c   :  { %v1550_v10 = vpop.f32.mrf.mxu0 }
 0x57d   :  { %v731_v11 = vperm.slane %v1550_v10, 0  ;;  %v823_v19 = vperm.slane %v1550_v10, 1  ;;  %v915_v38 = vperm.slane %v1550_v10, 2  ;;  %v1002_v60 = vperm.slane %v1550_v10, 3 }
 0x57f   :  { %v667_v8 = vpop.f32.mrf.mxu3 }
 0x580   :  { %912 = vperm.xlu0 %1190, %v667_v8   ;;  %728 = vperm.xlu1 %1188, %v667_v8  }
 0x588   :  { %1189 = vset.pattern.permute.xlu1 %v1221_v9  ;;  %1192 = vset.pattern.permute.xlu0 %v1223_v26 }
 0x589   :  { %820 = vperm.xlu1 %1189, %v667_v8  }
 0x5f2   :  { %v729_v12 = vpop.permute.xlu1 %728  ;;  %v913_v39 = vpop.permute.xlu0 %912 }
 0x5f3   :  { %v732_v14 = vadd.f32 %v731_v11, %v729_v12  ;;  %v916_v40 = vadd.f32 %v915_v38, %v913_v39  ;;  %v97_v39 = vld [vmem:[%s1626_s18 + $0x28] sm:$0xff] }
 0x5f5   :  { %v734_v15 = vmul.f32 0.2, %v732_v14  ;;  %vm733_vm6 = vcmp.gt.f32.partialorder %v732_v14, 0.0  ;;  %v918_v41 = vmul.f32 0.2, %v916_v40  ;;  %vm917_vm10 = vcmp.gt.f32.partialorder %v916_v40, 0.0 }
 0x5f7   :  { %v735_v16 = vsel %vm733_vm6, %v732_v14, %v734_v15  ;;  %v919_v43 = vsel %vm917_vm10, %v916_v40, %v918_v41 }
 0x5f8   :  { %v737_v17 = vsel %vm736_vm7, %v735_v16, -1e+09  ;;  %v921_v44 = vsel %vm920_vm11, %v919_v43, -1e+09 }
 0x5f9   :  { %v739_v18 = vsel %vm738_vm8, %v737_v17, -inf  ;;  %v922_v45 = vsel %vm738_vm8, %v921_v44, -inf }
 0x5fa   :  { %740 = vmax.xlane.f32.xlu2 %v739_v18 }
 0x5fb   :  { %v821_v20 = vpop.permute.xlu1 %820 }
 0x5fc   :  { %v824_v21 = vadd.f32 %v823_v19, %v821_v20 }
 0x5fe   :  { %v826_v22 = vmul.f32 0.2, %v824_v21  ;;  %vm825_vm9 = vcmp.gt.f32.partialorder %v824_v21, 0.0 }
 0x600   :  { %v827_v23 = vsel %vm825_vm9, %v824_v21, %v826_v22 }
 0x601   :  { %v828_v24 = vsel %vm736_vm7, %v827_v23, -1e+09 }
 0x602   :  { %v829_v25 = vsel %vm738_vm8, %v828_v24, -inf }
 0x603   :  { %830 = vmax.xlane.f32.xlu2 %v829_v25 }
 0x61b   :  { %853 = vrot.lane.b32.xlu2 %v645_v6, %s1222_s10 }
 0x66d   :  { %v741_v27 = vpop.xlane.xlu2 %740 }
 0x66e   :  { %v742_v28 = vsub.f32 %v737_v17, %v741_v27 }
 0x670   :  { %v743_v29 = vmul.f32 1.442695, %v742_v28 }
 0x672   :  { %1195 = vpow2.f32 %v743_v29 }
 0x676   :  { %v831_v30 = vpop.xlane.xlu2 %830 }
 0x677   :  { %v832_v31 = vsub.f32 %v828_v24, %v831_v30 }
 0x678   :  { %v1196_v32 = vpop.eup %1195 }
 0x679   :  { %v833_v33 = vmul.f32 1.442695, %v832_v31  ;;  %v745_v34 = vsel %vm738_vm8, %v1196_v32, 0.0 }
 0x67a   :  { %746 = vadd.xlane.f32.xlu1 %v745_v34 }
 0x67b   :  { %1197 = vpow2.f32 %v833_v33 }
 0x67e   :  { %v854_v35 = vpop.permute.xlu2 %853 }
 0x67f   :  { %1166 = vmatpush.msk.msrb.mxu0 %vm767_vm5, %v854_v35 }
 0x681   :  { %v1561_v36 = vpop.eup %1197  ;;  %986 = vmatpush.msra.mxu0 %v97_v39 }
 0x682   :  { %v835_v37 = vsel %vm738_vm8, %v1561_v36, 0.0 }
 0x683   :  { %836 = vadd.xlane.f32.xlu2 %v835_v37 }
 0x69b   :  { %999 = vperm.xlu2 %1191, %v667_v8  }
 0x6c4   :  { %923 = vmax.xlane.f32.xlu2 %v922_v45 }
 0x6ed   :  { %v747_v48 = vpop.xlane.xlu1 %746 }
 0x6ee   :  { %1199 = vrcp.f32 %v747_v48  ;;  %v759_v53 = vand.u32 2147483648, %v747_v48  ;;  %v757_v55 = vand.u32 2147483647, %v747_v48  ;;  %vm753_vm13 = vweird.f32 %v747_v48 }
 0x6f0   :  { %v760_v57 = vor.u32 1.1754944e-38, %v759_v53  ;;  %vm758_vm15 = vcmp.eq.f32.partialorder %v757_v55, 8.507059e+37 }
 0x6f4   :  { %v1200_v49 = vpop.eup %1199 }
 0x6f5   :  { %v749_v50 = vmul.f32 %v1200_v49, %v747_v48  ;;  %vm754_vm12 = vweird.f32 %v1200_v49 }
 0x6f6   :  { %v837_v51 = vpop.xlane.xlu2 %836  ;;  %vm755_vm14 = vmor %vm753_vm13, %vm754_vm12 }
 0x6f7   :  { %v750_v52 = vsub.f32 1.0, %v749_v50  ;;  %1201 = vrcp.f32 %v837_v51  ;;  %v849_v3 = vand.u32 2147483648, %v837_v51  ;;  %v847_v6 = vand.u32 2147483647, %v837_v51 }
 0x6f8   :  { %vm843_vm6 = vweird.f32 %v837_v51 }
 0x6f9   :  { %v751_v54 = vmul.f32 %v1200_v49, %v750_v52  ;;  %v850_v10 = vor.u32 1.1754944e-38, %v849_v3  ;;  %vm848_vm9 = vcmp.eq.f32.partialorder %v847_v6, 8.507059e+37 }
 0x6fb   :  { %v752_v56 = vadd.f32 %v1200_v49, %v751_v54 }
 0x6fd   :  { %v1202_v58 = vpop.eup %1201  ;;  %v756_v59 = vsel %vm755_vm14, %v1200_v49, %v752_v56 }
 0x6fe   :  { %v761_v61 = vsel %vm758_vm15, %v760_v57, %v756_v59  ;;  %v839_v62 = vmul.f32 %v1202_v58, %v837_v51  ;;  %v1000_v63 = vpop.permute.xlu2 %999  ;;  %vm844_vm4 = vweird.f32 %v1202_v58 }
 0x6ff   :  { %v1003_v0 = vadd.f32 %v1002_v60, %v1000_v63  ;;  %v762_v1 = vmul.f32 %v1196_v32, %v761_v61  ;;  %vm845_vm7 = vmor %vm843_vm6, %vm844_vm4  ;;  %v99_v61 = vld [vmem:[%s1626_s18 + $0x38] sm:$0xff] }
 0x700   :  { %v840_v2 = vsub.f32 1.0, %v839_v62  ;;  %v98_v62 = vld [vmem:[%s1626_s18 + $0x30] sm:$0xff] }
 0x701   :  { %v1005_v4 = vmul.f32 0.2, %v1003_v0  ;;  %1163 = vmatmul.msk.f32.vlgmr.msra.gmra.mxu1 %vm763_vm1, %v762_v1  ;;  %vm1004_vm3 = vcmp.gt.f32.partialorder %v1003_v0, 0.0 }
 0x702   :  { %v841_v5 = vmul.f32 %v1202_v58, %v840_v2  ;;  %1175 = vmatpush.msk.msra.mxu1 %vm767_vm5, %v854_v35 }
 0x703   :  { %v1006_v7 = vsel %vm1004_vm3, %v1003_v0, %v1005_v4 }
 0x704   :  { %v842_v8 = vadd.f32 %v1202_v58, %v841_v5  ;;  %v1007_v9 = vsel %vm920_vm11, %v1006_v7, -1e+09 }
 0x705   :  { %v1008_v11 = vsel %vm738_vm8, %v1007_v9, -inf }
 0x706   :  { %v846_v12 = vsel %vm845_vm7, %v1202_v58, %v842_v8  ;;  %1009 = vmax.xlane.f32.xlu1 %v1008_v11  ;;  %v96_v58 = vld [vmem:[%s1626_s18 + $0x20] sm:$0xff]  ;;  %s1226_s18 = smov 24   ;;  %vm1098_vm7 = vcmask 195584  }
 0x707   :  { %v851_v13 = vsel %vm848_vm9, %v850_v10, %v846_v12  ;;  %987 = vmatpush.msra.mxu0 %v96_v58  ;;  %vm1100_vm9 = vcmask 257024  }
 0x708   :  { %v852_v14 = vmul.f32 %v1561_v36, %v851_v13 }
 0x70a   :  { %1167 = vmatmul.msk.f32.vlgmr.msrb.gmra.mxu0 %vm763_vm1, %v852_v14 }
 0x737   :  { %v924_v15 = vpop.xlane.xlu2 %923 }
 0x738   :  { %v925_v16 = vsub.f32 %v921_v44, %v924_v15 }
 0x73a   :  { %v926_v17 = vmul.f32 1.442695, %v925_v16 }
 0x73c   :  { %1203 = vpow2.f32 %v926_v17 }
 0x742   :  { %v1204_v18 = vpop.eup %1203 }
 0x743   :  { %v928_v19 = vsel %vm738_vm8, %v1204_v18, 0.0 }
 0x744   :  { %929 = vadd.xlane.f32.xlu1 %v928_v19 }
 0x779   :  { %v1010_v20 = vpop.xlane.xlu1 %1009 }
 0x77a   :  { %v1011_v21 = vsub.f32 %v1007_v9, %v1010_v20 }
 0x77c   :  { %v1012_v22 = vmul.f32 1.442695, %v1011_v21 }
 0x77e   :  { %1205 = vpow2.f32 %v1012_v22  ;;  %v787_v23 = vpop.f32.mrf.mxu1 }
 0x77f   :  { %1164 = vmatmul.msk.f32.vlgmr.msrb.gmra.mxu3 %vm283_vm2, %v787_v23 }
 0x780   :  { %1072 = vmatpush.msrb.mxu3 %v99_v61 }
 0x782   :  { %1073 = vmatpush.msrb.mxu3 %v98_v62 }
 0x784   :  { %v1206_v24 = vpop.eup %1205 }
 0x785   :  { %v1014_v25 = vsel %vm738_vm8, %v1206_v24, 0.0 }
 0x786   :  { %1015 = vadd.xlane.f32.xlu1 %v1014_v25 }
 0x787   :  { %v877_v26 = vpop.f32.mrf.mxu0 }
 0x788   :  { %1168 = vmatmul.msk.f32.vlgmr.msrb.gmra.mxu1 %vm283_vm2, %v877_v26 }
 0x7b7   :  { %v930_v27 = vpop.xlane.xlu1 %929 }
 0x7b8   :  { %1207 = vrcp.f32 %v930_v27  ;;  %v942_v31 = vand.u32 2147483648, %v930_v27  ;;  %v940_v33 = vand.u32 2147483647, %v930_v27  ;;  %vm936_vm10 = vweird.f32 %v930_v27 }
 0x7ba   :  { %v943_v35 = vor.u32 1.1754944e-38, %v942_v31  ;;  %vm941_vm12 = vcmp.eq.f32.partialorder %v940_v33, 8.507059e+37 }
 0x7be   :  { %v1208_v28 = vpop.eup %1207 }
 0x7bf   :  { %v932_v29 = vmul.f32 %v1208_v28, %v930_v27  ;;  %vm937_vm5 = vweird.f32 %v1208_v28 }
 0x7c0   :  { %vm938_vm11 = vmor %vm936_vm10, %vm937_vm5 }
 0x7c1   :  { %v933_v30 = vsub.f32 1.0, %v932_v29 }
 0x7c3   :  { %v934_v32 = vmul.f32 %v1208_v28, %v933_v30 }
 0x7c5   :  { %v935_v34 = vadd.f32 %v1208_v28, %v934_v32 }
 0x7c7   :  { %v939_v36 = vsel %vm938_vm11, %v1208_v28, %v935_v34 }
 0x7c8   :  { %v944_v37 = vsel %vm941_vm12, %v943_v35, %v939_v36 }
 0x7c9   :  { %v945_v38 = vmul.f32 %v1204_v18, %v944_v37 }
 0x7cb   :  { %1172 = vmatmul.msk.f32.vlgmr.msra.gmra.mxu3 %vm763_vm1, %v945_v38 }
 0x7f9   :  { %v1016_v40 = vpop.xlane.xlu1 %1015 }
 0x7fa   :  { %1209 = vrcp.f32 %v1016_v40  ;;  %v1028_v44 = vand.u32 2147483648, %v1016_v40  ;;  %v1026_v46 = vand.u32 2147483647, %v1016_v40  ;;  %vm1022_vm13 = vweird.f32 %v1016_v40 }
 0x7fc   :  { %v1029_v50 = vor.u32 1.1754944e-38, %v1028_v44  ;;  %vm1027_vm15 = vcmp.eq.f32.partialorder %v1026_v46, 8.507059e+37 }
 0x800   :  { %v1210_v41 = vpop.eup %1209 }
 0x801   :  { %v1018_v42 = vmul.f32 %v1210_v41, %v1016_v40  ;;  %vm1023_vm8 = vweird.f32 %v1210_v41 }
 0x802   :  { %vm1024_vm14 = vmor %vm1022_vm13, %vm1023_vm8  ;;  %v810_v59 = vpop.f32.mrf.mxu3 }
 0x803   :  { %v1019_v43 = vsub.f32 1.0, %v1018_v42  ;;  %v814_v12 = vmin.f32 %v810_v59, 0.0  ;;  %vm813_vm6 = vcmp.gt.f32.partialorder %v810_v59, 0.0 }
 0x805   :  { %v1020_v45 = vmul.f32 %v1210_v41, %v1019_v43  ;;  %v900_v47 = vpop.f32.mrf.mxu1  ;;  %v815_v13 = vmul.f32 1.442695, %v814_v12 }
 0x806   :  { %v904_v48 = vmin.f32 %v900_v47, 0.0  ;;  %vm903_vm3 = vcmp.gt.f32.partialorder %v900_v47, 0.0 }
 0x807   :  { %v1021_v49 = vadd.f32 %v1210_v41, %v1020_v45 }
 0x808   :  { %v905_v51 = vmul.f32 1.442695, %v904_v48 }
 0x809   :  { %v1025_v52 = vsel %vm1024_vm14, %v1210_v41, %v1021_v49 }
 0x80a   :  { %v1030_v53 = vsel %vm1027_vm15, %v1029_v50, %v1025_v52  ;;  %1211 = vpow2.f32 %v905_v51 }
 0x80b   :  { %v1031_v54 = vmul.f32 %v1206_v24, %v1030_v53 }
 0x80d   :  { %1176 = vmatmul.msk.f32.vlgmr.msra.gmra.mxu1 %vm763_vm1, %v1031_v54 }
 0x810   :  { %v1212_v55 = vpop.eup %1211 }
 0x811   :  { %v1169_v56 = vadd.f32 -1.0, %v1212_v55 }
 0x813   :  { %v908_v57 = vsel %vm903_vm3, %v900_v47, %v1169_v56 }
 0x814   :  { %1085 = vrot.lane.b32.xlu1 %v908_v57, %s1224_s28 }
 0x84e   :  { %v966_v60 = vpop.f32.mrf.mxu3 }
 0x84f   :  { %1173 = vmatmul.msk.f32.vlgmr.msra.gmra.mxu0 %vm283_vm2, %v966_v60 }
 0x886   :  { %v1086_v15 = vpop.permute.xlu1 %1085 }
 0x88a   :  { %v1052_v63 = vpop.f32.mrf.mxu1 }
 0x88b   :  { %1177 = vmatmul.msk.f32.vlgmr.msrb.gmra.mxu3 %vm283_vm2, %v1052_v63 }
 0x8cc   :  { %v989_v0 = vpop.f32.mrf.mxu0 }
 0x8cd   :  { %v993_v1 = vmin.f32 %v989_v0, 0.0  ;;  %vm992_vm1 = vcmp.gt.f32.partialorder %v989_v0, 0.0 }
 0x8cf   :  { %v994_v2 = vmul.f32 1.442695, %v993_v1 }
 0x8d1   :  { %1213 = vpow2.f32 %v994_v2 }
 0x8d7   :  { %v1214_v3 = vpop.eup %1213 }
 0x8d8   :  { %v1174_v4 = vadd.f32 -1.0, %v1214_v3 }
 0x8da   :  { %v997_v5 = vsel %vm992_vm1, %v989_v0, %v1174_v4 }
 0x8db   :  { %1089 = vrot.lane.b32.xlu2 %v997_v5, %s1225_s20 }
 0x90e   :  { %v1075_v6 = vpop.f32.mrf.mxu3 }
 0x90f   :  { %v1079_v7 = vmin.f32 %v1075_v6, 0.0  ;;  %vm1078_vm4 = vcmp.gt.f32.partialorder %v1075_v6, 0.0 }
 0x911   :  { %v1080_v8 = vmul.f32 1.442695, %v1079_v7 }
 0x913   :  { %1215 = vpow2.f32 %v1080_v8 }
 0x914   :  { %1217 = vpow2.f32 %v815_v13 }
 0x919   :  { %v1216_v9 = vpop.eup %1215 }
 0x91a   :  { %v1178_v10 = vadd.f32 -1.0, %v1216_v9  ;;  %v1218_v14 = vpop.eup %1217 }
 0x91b   :  { %v1165_v16 = vadd.f32 -1.0, %v1218_v14 }
 0x91c   :  { %v1083_v11 = vsel %vm1078_vm4, %v1075_v6, %v1178_v10 }
 0x91d   :  { %1093 = vrot.lane.b32.xlu1 %v1083_v11, %s1226_s18  ;;  %v818_v18 = vsel %vm813_vm6, %v810_v59, %v1165_v16 }
 0x91e   :  { %v1096_v19 = vsel %vm108_vm0, %v818_v18, %v1086_v15 }
 0x935   :  { %v1090_v17 = vpop.permute.xlu2 %1089 }
 0x936   :  { %v1097_v20 = vsel %vm283_vm2, %v1096_v19, %v1090_v17 }
 0x98f   :  { %v1094_v21 = vpop.permute.xlu1 %1093 }
 0x990   :  { %v1099_v22 = vsel %vm1098_vm7, %v1097_v20, %v1094_v21 }
 0x991   :  { %1101 = vst.msk [vmem:[%s1628_s19] sm:$0xf] %vm1100_vm9, %v1099_v22 }

// kernel: firebird_forward.3
= control target key start
LH: loop header
LB: loop body
LE: loop exit
PB: predicated region body
PF: predicated region fallthrough
CT: control target
= control target key end

     0   :  { %s7658_s3 = smov 7   ;;  %s7659_s10 = smov 8   ;;  %vm222_vm0 = vcmask 130048   ;;  %vm304_vm1 = vcmask 64512   ;;  %vm10182_vm2 = vcmask 31744   ;;  %vm10181_vm3 = vcmask 25600   ;;  %s10179_s0 = inlined_call_operand.smem [shape: u32[34], index: -1, kind: input, shape index: {}] }
   0x1   :  { %s7704_s6 = sld [smem:[%s10179_s0 + %s7658_s3]]   ;;  %s10183_s14 = smov 112   ;;  %vm10196_vm4 = vcmask 1043456  }
   0x2   :  { %s1_s9 = sld [smem:[%s10179_s0]]   ;;  %s7661_s15 = smov 3  }
   0x3   :  { %s7712_s13 = sld [smem:[%s10179_s0 + %s7659_s10]]   ;;  %s10188_s19 = smov 120  }
   0x4   :  { %s6642_s18 = sld [smem:[%s10179_s0 + %s7661_s15]]   ;;  %s7663_s20 = smov 5  }
   0x5   :  { %s7769_s23 = sld [smem:[%s10179_s0 + %s7663_s20]]   ;;  %s10186_s24 = smov 104  }
   0x6   :  { %s7665_s25 = smov 9   ;;  %s7666_s29 = smov 10  }
   0x7   :  { %v140_v0 = vld [vmem:[%s7704_s6] sm:$0xff]  ;;  %v141_v1 = vld [vmem:[%s7704_s6 + $0x8] sm:$0xff]  ;;  %s7855_s28 = sld [smem:[%s10179_s0 + %s7665_s25]]   ;;  %s7667_s3 = smov 11  }
   0x8   :  { %v7127_v2 = vpack.i.bf16 %v140_v0, %v141_v1  ;;  %7085 = vmatpush.msra.mxu1 %v141_v1  ;;  %v7716_v3 = vld [vmem:[%s1_s9 + $0x20] sm:$0x3]  ;;  %252 = vmatpush.msra.mxu0 %v141_v1  ;;  %v7727_v6 = vld [vmem:[%s1_s9 + $0x8] sm:$0xff]  ;;  %v7731_v7 = vld [vmem:[%s1_s9 + $0x10] sm:$0xff]  ;;  %s7881_s2 = sld [smem:[%s10179_s0 + %s7666_s29]]   ;;  %s7669_s8 = smov 13  }
   0x9   :  { %v7721_v4 = vld [vmem:[%s1_s9] sm:$0xff]  ;;  %v7738_v8 = vld [vmem:[%s1_s9 + $0x18] sm:$0xff]  ;;  %s7902_s7 = sld [smem:[%s10179_s0 + %s7667_s3]]   ;;  %s7670_s12 = smov 12  }
   0xa   :  { %7128 = vrot.lane.b32.xlu0 %v7127_v2, %s10183_s14  ;;  %7086 = vmatpush.msra.mxu1 %v140_v0  ;;  %v7199_v5 = vld [vmem:[%s7712_s13] ss:$0 sm:$0xff]  ;;  %s7909_s11 = sld [smem:[%s10179_s0 + %s7669_s8]]   ;;  %s7672_s25 = smov 4  }
   0xb   :  { %6677 = vmatmul.msk.f32.vlgmr.msra.gmra.mxu1 %vm222_vm0, %v7716_v3  ;;  %253 = vmatpush.msra.mxu0 %v140_v0  ;;  %v203_v12 = vld [vmem:[%s6642_s18] sm:$0xf]  ;;  %v211_v34 = vld [vmem:[%s7769_s23 + $0x10] sm:$0xff]  ;;  %v212_v42 = vld [vmem:[%s7769_s23 + $0x18] sm:$0xff]  ;;  %s7929_s17 = sld [smem:[%s10179_s0 + %s7670_s12]]   ;;  %s7671_s18 = smov 14  }
   0xc   :  { %6673 = vmatmul.msk.f32.vlgmr.msra.gmra.mxu0 %vm222_vm0, %v7721_v4  ;;  %v209_v40 = vld [vmem:[%s7769_s23] sm:$0xff]  ;;  %v210_v47 = vld [vmem:[%s7769_s23 + $0x8] sm:$0xff]  ;;  %s7952_s22 = sld [smem:[%s10179_s0 + %s7671_s18]]   ;;  %s7673_s30 = smov 15  }
   0xd   :  { %v213_v52 = vld [vmem:[%s7769_s23 + $0x20] sm:$0x3]  ;;  %10197 = sst [smem:[#allocation3_spill]] %s7855_s28  ;;  %s7674_s5 = smov 25  }
   0xe   :  { %s8075_s29 = sld [smem:[%s10179_s0 + %s7672_s25]]   ;;  %s7675_s12 = smov 16  }
   0xf   :  { %s8236_s4 = sld [smem:[%s10179_s0 + %s7673_s30]]   ;;  %s7676_s20 = smov 17  }
  0x10   :  { %10198 = sst [smem:[#allocation4_spill]] %s7909_s11  ;;  %s7677_s27 = smov 18  }
  0x11   :  { %s8241_s10 = sld [smem:[%s10179_s0 + %s7674_s5]]   ;;  %s7678_s5 = smov 20  }
  0x12   :  { %278 = vrot.lane.b32.xlu0 %v7199_v5, %s10183_s14  ;;  %s8284_s18 = sld [smem:[%s10179_s0 + %s7675_s12]]   ;;  %s7679_s15 = smov 19  }
  0x13   :  { %s8307_s26 = sld [smem:[%s10179_s0 + %s7676_s20]]   ;;  %s7680_s25 = smov 21  }
  0x14   :  { %6674 = vmatmul.msk.f32.gmra.mxu0 %vm222_vm0, %v7727_v6  ;;  %s8326_s3 = sld [smem:[%s10179_s0 + %s7677_s27]]   ;;  %s7682_s16 = smov 27  }
  0x15   :  { %s8348_s12 = sld [smem:[%s10179_s0 + %s7678_s5]]   ;;  %s7681_s5 = smov 22  }
  0x16   :  { %s8353_s21 = sld [smem:[%s10179_s0 + %s7679_s15]]   ;;  %s7683_s30 = smov 23  }
  0x17   :  { %s8390_s1 = sld [smem:[%s10179_s0 + %s7680_s25]]   ;;  %s7686_s20 = smov 26  }
  0x18   :  { %s8412_s15 = sld [smem:[%s10179_s0 + %s7681_s5]]   ;;  %s7687_s8 = smov 28  }
  0x19   :  { %s8417_s27 = sld [smem:[%s10179_s0 + %s7682_s16]]   ;;  %s7684_s16 = smov 24  }
  0x1a   :  { %s8448_s9 = sld [smem:[%s10179_s0 + %s7683_s30]]   ;;  %s7685_s30 = smov 6  }
  0x1b   :  { %s8528_s5 = sld [smem:[%s10179_s0 + %s7686_s20]]  }
  0x1c   :  { %6675 = vmatmul.msk.f32.gmra.mxu0 %vm222_vm0, %v7731_v7  ;;  %s10250_s20 = sld [smem:[#allocation4_spill]] }
  0x21   :  { %10201 = sst [smem:[#allocation5_spill]] %s8528_s5 }
  0x24   :  { %6676 = vmatmul.msk.f32.gmra.mxu0 %vm222_vm0, %v7738_v8 }
  0x7c   :  { %v7129_v9 = vpop.permute.xlu0 %7128 }
  0x7d   :  { %v7130_v10 = vunpack.i.l.bf16 %v7129_v9  ;;  %v7131_v11 = vunpack.i.h.bf16 %v7129_v9 }
  0x7f   :  { %298 = vmatpush.msrb.mxu1 %v7130_v10 }
  0x81   :  { %299 = vmatpush.msrb.mxu1 %v7131_v11 }
  0x82   :  { %6678 = vmatmul.msk.f32.vlgmr.msrb.gmra.mxu1 %vm222_vm0, %v203_v12 }
  0x84   :  { %v279_v21 = vpop.permute.xlu0 %278 }
  0x88   :  { %v267_v18 = vpop.f32.mrf.mxu1 }
  0x89   :  { %v255_v13 = vpop.f32.mrf.mxu0  ;;  %v268_v25 = vadd.f32 %v7199_v5, %v267_v18 }
  0x8a   :  { %v256_v24 = vadd.f32 %v7199_v5, %v255_v13 }
  0x91   :  { %v258_v14 = vpop.f32.mrf.mxu0 }
  0x92   :  { %v259_v15 = vadd.f32 %v7199_v5, %v258_v14 }
  0x94   :  { %541 = vrot.lane.b32.xlu2 %v259_v15, %s10188_s19 }
  0x99   :  { %v261_v16 = vpop.f32.mrf.mxu0 }
  0x9a   :  { %v262_v17 = vadd.f32 %v7199_v5, %v261_v16 }
  0x9c   :  { %543 = vrot.lane.b32.xlu2 %v262_v17, %s10188_s19 }
  0xa1   :  { %v264_v19 = vpop.f32.mrf.mxu0 }
  0xa2   :  { %v265_v20 = vadd.f32 %v7199_v5, %v264_v19 }
  0xa4   :  { %545 = vrot.lane.b32.xlu0 %v265_v20, %s10188_s19 }
  0xee   :  { %v542_v28 = vpop.permute.xlu2 %541 }
  0xf6   :  { %v544_v30 = vpop.permute.xlu2 %543 }
  0xff   :  { %v301_v22 = vpop.f32.mrf.mxu1 }
 0x100   :  { %v7746_v23 = vadd.f32 %v301_v22, %v279_v21 }
 0x102   :  { %549 = vrot.lane.b32.xlu1 %v7746_v23, %s10188_s19  ;;  %6679 = vmatpush.xpose.msk.msra.mxu2 %vm304_vm1, %v7746_v23 }
 0x105   :  { %6680 = vmatmul.msk.f32.vlgmr.msra.gmra.mxu2 %vm304_vm1, %v256_v24 }
 0x10a   :  { %539 = vrot.lane.b32.xlu1 %v256_v24, %s10188_s19 }
 0x10d   :  { %6681 = vmatmul.msk.f32.gmra.mxu2 %vm304_vm1, %v259_v15 }
 0x112   :  { %547 = vrot.lane.b32.xlu1 %v268_v25, %s10188_s19 }
 0x115   :  { %6682 = vmatmul.msk.f32.gmra.mxu2 %vm304_vm1, %v262_v17 }
 0x116   :  { %v546_v32 = vpop.permute.xlu0 %545 }
 0x11d   :  { %6683 = vmatmul.msk.f32.gmra.mxu2 %vm304_vm1, %v265_v20 }
 0x125   :  { %6684 = vmatmul.msk.f32.gmra.mxu2 %vm304_vm1, %v268_v25 }
 0x174   :  { %v7759_v26 = vpop.permute.xlu1 %549 }
 0x175   :  { %6691 = vmatpush.xpose.msk.msra.mxu1 %vm304_vm1, %v7759_v26 }
 0x17c   :  { %v540_v27 = vpop.permute.xlu1 %539 }
 0x17d   :  { %6692 = vmatmul.msk.f32.vlgmr.msra.gmra.mxu1 %vm304_vm1, %v540_v27 }
 0x184   :  { %v548_v37 = vpop.permute.xlu1 %547 }
 0x185   :  { %6693 = vmatmul.msk.f32.gmra.mxu1 %vm304_vm1, %v542_v28 }
 0x188   :  { %v340_v29 = vpop.f32.mrf.mxu2 }
 0x189   :  { %v355_v38 = vmul.f32 0.35355338, %v340_v29 }
 0x18b   :  { %v360_v44 = vadd.f32 %v355_v38, %v209_v40 }
 0x18d   :  { %6694 = vmatmul.msk.f32.gmra.mxu1 %vm304_vm1, %v544_v30  ;;  %v366_v48 = vsel %vm10182_vm2, %v360_v44, -inf }
 0x190   :  { %v343_v31 = vpop.f32.mrf.mxu2 }
 0x191   :  { %v356_v45 = vmul.f32 0.35355338, %v343_v31 }
 0x193   :  { %v361_v50 = vadd.f32 %v356_v45, %v210_v47 }
 0x195   :  { %6695 = vmatmul.msk.f32.gmra.mxu1 %vm304_vm1, %v546_v32  ;;  %v369_v54 = vsel %vm10182_vm2, %v361_v50, -inf }
 0x198   :  { %v346_v33 = vpop.f32.mrf.mxu2 }
 0x199   :  { %v357_v35 = vmul.f32 0.35355338, %v346_v33 }
 0x19b   :  { %v362_v36 = vadd.f32 %v357_v35, %v211_v34 }
 0x19d   :  { %6696 = vmatmul.msk.f32.gmra.mxu1 %vm304_vm1, %v548_v37  ;;  %v372_v39 = vsel %vm10182_vm2, %v362_v36, -inf }
 0x19e   :  { %373 = vmax.xlane.f32.xlu2 %v372_v39 }
 0x1a0   :  { %v349_v41 = vpop.f32.mrf.mxu2 }
 0x1a1   :  { %v358_v43 = vmul.f32 0.35355338, %v349_v41 }
 0x1a3   :  { %v363_v46 = vadd.f32 %v358_v43, %v212_v42 }
 0x1a5   :  { %v375_v49 = vsel %vm10182_vm2, %v363_v46, -inf }
 0x1a6   :  { %367 = vmax.xlane.f32.xlu2 %v366_v48  ;;  %376 = vmax.xlane.f32.xlu0 %v375_v49 }
 0x1a8   :  { %v352_v51 = vpop.f32.mrf.mxu2 }
 0x1a9   :  { %v359_v53 = vmul.f32 0.35355338, %v352_v51 }
 0x1ab   :  { %v364_v55 = vadd.f32 %v359_v53, %v213_v52 }
 0x1ad   :  { %v379_v56 = vsel %vm10181_vm3, %v364_v55, -inf }
 0x1ae   :  { %370 = vmax.xlane.f32.xlu0 %v369_v54  ;;  %380 = vmax.xlane.f32.xlu1 %v379_v56 }
 0x1fa   :  { %v580_v57 = vpop.f32.mrf.mxu1 }
 0x1fb   :  { %v595_v58 = vmul.f32 0.35355338, %v580_v57 }
 0x1fd   :  { %v600_v59 = vadd.f32 %v595_v58, %v209_v40 }
 0x1ff   :  { %v605_v60 = vsel %vm10182_vm2, %v600_v59, -inf }
 0x200   :  { %606 = vmax.xlane.f32.xlu2 %v605_v60 }
 0x202   :  { %v583_v61 = vpop.f32.mrf.mxu1 }
 0x203   :  { %v596_v62 = vmul.f32 0.35355338, %v583_v61 }
 0x205   :  { %v601_v63 = vadd.f32 %v596_v62, %v210_v47 }
 0x207   :  { %v608_v0 = vsel %vm10182_vm2, %v601_v63, -inf }
 0x208   :  { %609 = vmax.xlane.f32.xlu1 %v608_v0 }
 0x20a   :  { %v586_v1 = vpop.f32.mrf.mxu1 }
 0x20b   :  { %v597_v2 = vmul.f32 0.35355338, %v586_v1 }
 0x20d   :  { %v7785_v5 = vadd.f32 %v597_v2, %v211_v34 }
 0x20f   :  { %v611_v9 = vsel %vm10182_vm2, %v7785_v5, -inf }
 0x210   :  { %612 = vmax.xlane.f32.xlu2 %v611_v9 }
 0x211   :  { %v374_v10 = vpop.xlane.xlu2 %373 }
 0x212   :  { %v384_v11 = vsub.f32 %v362_v36, %v374_v10  ;;  %v589_v12 = vpop.f32.mrf.mxu1 }
 0x213   :  { %v598_v13 = vmul.f32 0.35355338, %v589_v12 }
 0x214   :  { %v391_v14 = vmul.f32 1.442695, %v384_v11 }
 0x215   :  { %v603_v15 = vadd.f32 %v598_v13, %v212_v42 }
 0x216   :  { %7214 = vpow2.f32 %v391_v14 }
 0x217   :  { %v614_v16 = vsel %vm10182_vm2, %v603_v15, -inf }
 0x218   :  { %615 = vmax.xlane.f32.xlu0 %v614_v16 }
 0x219   :  { %v377_v17 = vpop.xlane.xlu0 %376  ;;  %v368_v18 = vpop.xlane.xlu2 %367 }
 0x21a   :  { %v385_v19 = vsub.f32 %v363_v46, %v377_v17  ;;  %v592_v20 = vpop.f32.mrf.mxu1  ;;  %v382_v25 = vsub.f32 %v360_v44, %v368_v18 }
 0x21b   :  { %v599_v21 = vmul.f32 0.35355338, %v592_v20 }
 0x21c   :  { %v7790_v22 = vpop.eup %7214  ;;  %v393_v24 = vmul.f32 1.442695, %v385_v19  ;;  %v387_v30 = vmul.f32 1.442695, %v382_v25 }
 0x21d   :  { %v403_v27 = vsel %vm10182_vm2, %v7790_v22, 0.0  ;;  %v604_v28 = vadd.f32 %v599_v21, %v213_v52 }
 0x21e   :  { %404 = vadd.xlane.f32.xlu1 %v403_v27  ;;  %7216 = vpow2.f32 %v393_v24 }
 0x21f   :  { %v617_v29 = vsel %vm10181_vm3, %v604_v28, -inf  ;;  %7218 = vpow2.f32 %v387_v30 }
 0x220   :  { %618 = vmax.xlane.f32.xlu2 %v617_v29 }
 0x221   :  { %v381_v31 = vpop.xlane.xlu1 %380  ;;  %v371_v32 = vpop.xlane.xlu0 %370 }
 0x222   :  { %v386_v33 = vsub.f32 %v364_v55, %v381_v31  ;;  %v383_v36 = vsub.f32 %v361_v50, %v371_v32 }
 0x224   :  { %v395_v34 = vmul.f32 1.442695, %v386_v33  ;;  %v7795_v35 = vpop.eup %7216  ;;  %v389_v38 = vmul.f32 1.442695, %v383_v36 }
 0x225   :  { %v406_v37 = vsel %vm10182_vm2, %v7795_v35, 0.0  ;;  %v7799_v39 = vpop.eup %7218 }
 0x226   :  { %7220 = vpow2.f32 %v395_v34  ;;  %407 = vadd.xlane.f32.xlu0 %v406_v37  ;;  %v397_v41 = vsel %vm10182_vm2, %v7799_v39, 0.0 }
 0x227   :  { %7222 = vpow2.f32 %v389_v38 }
 0x22c   :  { %v7801_v40 = vpop.eup %7220 }
 0x22d   :  { %v409_v42 = vsel %vm10181_vm3, %v7801_v40, 0.0  ;;  %v7807_v43 = vpop.eup %7222 }
 0x22e   :  { %398 = vadd.xlane.f32.xlu0 %v397_v41  ;;  %410 = vadd.xlane.f32.xlu1 %v409_v42  ;;  %v400_v44 = vsel %vm10182_vm2, %v7807_v43, 0.0 }
 0x236   :  { %401 = vadd.xlane.f32.xlu0 %v400_v44 }
 0x238   :  { %487 = vrot.lane.b32.xlu2 %v7746_v23, %s10183_s14 }
 0x273   :  { %v607_v45 = vpop.xlane.xlu2 %606 }
 0x274   :  { %v620_v46 = vsub.f32 %v600_v59, %v607_v45 }
 0x276   :  { %v625_v47 = vmul.f32 1.442695, %v620_v46 }
 0x278   :  { %7224 = vpow2.f32 %v625_v47 }
 0x27b   :  { %v610_v48 = vpop.xlane.xlu1 %609 }
 0x27c   :  { %v621_v49 = vsub.f32 %v601_v63, %v610_v48 }
 0x27e   :  { %v7813_v50 = vpop.eup %7224  ;;  %v627_v51 = vmul.f32 1.442695, %v621_v49 }
 0x27f   :  { %v635_v52 = vsel %vm10182_vm2, %v7813_v50, 0.0 }
 0x280   :  { %7226 = vpow2.f32 %v627_v51  ;;  %636 = vadd.xlane.f32.xlu1 %v635_v52 }
 0x283   :  { %v613_v53 = vpop.xlane.xlu2 %612 }
 0x284   :  { %v622_v54 = vsub.f32 %v7785_v5, %v613_v53 }
 0x286   :  { %v7818_v55 = vpop.eup %7226  ;;  %v629_v56 = vmul.f32 1.442695, %v622_v54 }
 0x287   :  { %v638_v57 = vsel %vm10182_vm2, %v7818_v55, 0.0 }
 0x288   :  { %7228 = vpow2.f32 %v629_v56  ;;  %639 = vadd.xlane.f32.xlu1 %v638_v57 }
 0x28b   :  { %v616_v58 = vpop.xlane.xlu0 %615 }
 0x28c   :  { %v623_v59 = vsub.f32 %v603_v15, %v616_v58 }
 0x28e   :  { %v7822_v60 = vpop.eup %7228  ;;  %v631_v61 = vmul.f32 1.442695, %v623_v59 }
 0x28f   :  { %v641_v62 = vsel %vm10182_vm2, %v7822_v60, 0.0 }
 0x290   :  { %7230 = vpow2.f32 %v631_v61  ;;  %642 = vadd.xlane.f32.xlu0 %v641_v62 }
 0x291   :  { %v405_v63 = vpop.xlane.xlu1 %404 }
 0x292   :  { %7232 = vrcp.f32 %v405_v63  ;;  %v453_v15 = vand.u32 2147483648, %v405_v63  ;;  %v451_v17 = vand.u32 2147483647, %v405_v63  ;;  %vm447_vm6 = vweird.f32 %v405_v63 }
 0x293   :  { %v619_v0 = vpop.xlane.xlu2 %618 }
 0x294   :  { %v624_v1 = vsub.f32 %v604_v28, %v619_v0  ;;  %v454_v21 = vor.u32 1.1754944e-38, %v453_v15  ;;  %vm452_vm8 = vcmp.eq.f32.partialorder %v451_v17, 8.507059e+37 }
 0x296   :  { %v7826_v2 = vpop.eup %7230  ;;  %v633_v5 = vmul.f32 1.442695, %v624_v1 }
 0x297   :  { %v644_v9 = vsel %vm10182_vm2, %v7826_v2, 0.0 }
 0x298   :  { %v7233_v10 = vpop.eup %7232  ;;  %7234 = vpow2.f32 %v633_v5  ;;  %645 = vadd.xlane.f32.xlu2 %v644_v9 }
 0x299   :  { %v443_v11 = vmul.f32 %v7233_v10, %v405_v63  ;;  %v408_v12 = vpop.xlane.xlu0 %407  ;;  %vm448_vm5 = vweird.f32 %v7233_v10 }
 0x29a   :  { %7236 = vrcp.f32 %v408_v12  ;;  %vm449_vm7 = vmor %vm447_vm6, %vm448_vm5  ;;  %v468_v33 = vand.u32 2147483648, %v408_v12  ;;  %v466_v36 = vand.u32 2147483647, %v408_v12  ;;  %vm462_vm10 = vweird.f32 %v408_v12 }
 0x29b   :  { %v444_v13 = vsub.f32 1.0, %v443_v11  ;;  %v7830_v14 = vpop.permute.xlu2 %487 }
 0x29c   :  { %6685 = vmatpush.msk.msrb.mxu0 %vm10196_vm4, %v7830_v14  ;;  %7087 = vmatpush.msk.msra.mxu3 %vm10196_vm4, %v7830_v14  ;;  %v469_v41 = vor.u32 1.1754944e-38, %v468_v33  ;;  %vm467_vm12 = vcmp.eq.f32.partialorder %v466_v36, 8.507059e+37 }
 0x29d   :  { %v445_v16 = vmul.f32 %v7233_v10, %v444_v13 }
 0x29e   :  { %v7836_v18 = vpop.eup %7234 }
 0x29f   :  { %v647_v19 = vsel %vm10181_vm3, %v7836_v18, 0.0  ;;  %v446_v20 = vadd.f32 %v7233_v10, %v445_v16 }
 0x2a0   :  { %648 = vadd.xlane.f32.xlu0 %v647_v19  ;;  %v7237_v24 = vpop.eup %7236 }
 0x2a1   :  { %725 = vrot.lane.b32.xlu1 %v7746_v23, %s10186_s24  ;;  %v450_v25 = vsel %vm449_vm7, %v7233_v10, %v446_v20  ;;  %v458_v27 = vmul.f32 %v7237_v24, %v408_v12  ;;  %v399_v28 = vpop.xlane.xlu0 %398  ;;  %v411_v29 = vpop.xlane.xlu1 %410  ;;  %vm463_vm9 = vweird.f32 %v7237_v24 }
 0x2a2   :  { %v455_v30 = vsel %vm452_vm8, %v454_v21, %v450_v25  ;;  %7238 = vrcp.f32 %v399_v28  ;;  %vm464_vm11 = vmor %vm462_vm10, %vm463_vm9  ;;  %v423_v51 = vand.u32 2147483648, %v399_v28  ;;  %v421_v54 = vand.u32 2147483647, %v399_v28 }
 0x2a3   :  { %v456_v31 = vmul.f32 %v7790_v22, %v455_v30  ;;  %v459_v32 = vsub.f32 1.0, %v458_v27  ;;  %7240 = vrcp.f32 %v411_v29  ;;  %v483_v56 = vand.u32 2147483648, %v411_v29 }
 0x2a4   :  { %v481_v58 = vand.u32 2147483647, %v411_v29  ;;  %vm417_vm15 = vweird.f32 %v399_v28  ;;  %v424_v62 = vor.u32 1.1754944e-38, %v423_v51  ;;  %vm477_vm6 = vweird.f32 %v411_v29 }
 0x2a5   :  { %6688 = vmatmul.msk.f32.vlgmr.msra.gmra.mxu3 %vm10182_vm2, %v456_v31  ;;  %v460_v34 = vmul.f32 %v7237_v24, %v459_v32  ;;  %vm422_vm7 = vcmp.eq.f32.partialorder %v421_v54, 8.507059e+37  ;;  %v484_v1 = vor.u32 1.1754944e-38, %v483_v56 }
 0x2a6   :  { %vm482_vm9 = vcmp.eq.f32.partialorder %v481_v58, 8.507059e+37 }
 0x2a7   :  { %v461_v37 = vadd.f32 %v7237_v24, %v460_v34 }
 0x2a8   :  { %v7239_v38 = vpop.eup %7238 }
 0x2a9   :  { %v7241_v42 = vpop.eup %7240  ;;  %v413_v44 = vmul.f32 %v7239_v38, %v399_v28  ;;  %v402_v45 = vpop.xlane.xlu0 %401  ;;  %v465_v46 = vsel %vm464_vm11, %v7237_v24, %v461_v37  ;;  %vm418_vm13 = vweird.f32 %v7239_v38 }
 0x2aa   :  { %v473_v47 = vmul.f32 %v7241_v42, %v411_v29  ;;  %7242 = vrcp.f32 %v402_v45  ;;  %v470_v22 = vsel %vm467_vm12, %v469_v41, %v465_v46  ;;  %vm478_vm14 = vweird.f32 %v7241_v42  ;;  %vm419_vm5 = vmor %vm417_vm15, %vm418_vm13 }
 0x2ab   :  { %v414_v48 = vsub.f32 1.0, %v413_v44  ;;  %v471_v49 = vmul.f32 %v7795_v35, %v470_v22  ;;  %vm479_vm8 = vmor %vm477_vm6, %vm478_vm14  ;;  %v438_v15 = vand.u32 2147483648, %v402_v45  ;;  %v436_v17 = vand.u32 2147483647, %v402_v45 }
 0x2ac   :  { %v474_v52 = vsub.f32 1.0, %v473_v47  ;;  %vm432_vm11 = vweird.f32 %v402_v45 }
 0x2ad   :  { %v415_v53 = vmul.f32 %v7239_v38, %v414_v48  ;;  %6689 = vmatmul.msk.f32.gmra.mxu3 %vm10182_vm2, %v471_v49  ;;  %v439_v20 = vor.u32 1.1754944e-38, %v438_v15  ;;  %vm437_vm13 = vcmp.eq.f32.partialorder %v436_v17, 8.507059e+37 }
 0x2ae   :  { %v475_v57 = vmul.f32 %v7241_v42, %v474_v52 }
 0x2af   :  { %v416_v59 = vadd.f32 %v7239_v38, %v415_v53 }
 0x2b0   :  { %v7243_v61 = vpop.eup %7242  ;;  %v476_v63 = vadd.f32 %v7241_v42, %v475_v57  ;;  %v143_v57 = vld [vmem:[%s7855_s28] sm:$0xff] }
 0x2b1   :  { %v428_v0 = vmul.f32 %v7243_v61, %v402_v45  ;;  %v420_v35 = vsel %vm419_vm5, %v7239_v38, %v416_v59  ;;  %vm433_vm10 = vweird.f32 %v7243_v61  ;;  %853 = vmatpush.msrb.mxu2 %v143_v57 }
 0x2b2   :  { %v425_v5 = vsel %vm422_vm7, %v424_v62, %v420_v35  ;;  %v480_v9 = vsel %vm479_vm8, %v7241_v42, %v476_v63  ;;  %vm434_vm12 = vmor %vm432_vm11, %vm433_vm10 }
 0x2b3   :  { %v429_v10 = vsub.f32 1.0, %v428_v0  ;;  %v426_v11 = vmul.f32 %v7799_v39, %v425_v5  ;;  %v485_v12 = vsel %vm482_vm9, %v484_v1, %v480_v9 }
 0x2b4   :  { %v486_v13 = vmul.f32 %v7801_v40, %v485_v12 }
 0x2b5   :  { %6686 = vmatmul.msk.f32.vlgmr.msrb.gmra.mxu0 %vm10182_vm2, %v426_v11  ;;  %v430_v16 = vmul.f32 %v7243_v61, %v429_v10 }
 0x2b6   :  { %6690 = vmatmul.msk.f32.gmra.mxu3 %vm10182_vm2, %v486_v13 }
 0x2b7   :  { %v431_v19 = vadd.f32 %v7243_v61, %v430_v16 }
 0x2b9   :  { %v435_v21 = vsel %vm434_vm12, %v7243_v61, %v431_v19 }
 0x2ba   :  { %v440_v24 = vsel %vm437_vm13, %v439_v20, %v435_v21 }
 0x2bb   :  { %v441_v39 = vmul.f32 %v7807_v43, %v440_v24 }
 0x2bd   :  { %6687 = vmatmul.msk.f32.gmra.mxu0 %vm10182_vm2, %v441_v39 }
 0x2f3   :  { %v637_v40 = vpop.xlane.xlu1 %636 }
 0x2f4   :  { %7244 = vrcp.f32 %v637_v40  ;;  %v661_v38 = vand.u32 2147483648, %v637_v40  ;;  %vm655_vm15 = vweird.f32 %v637_v40  ;;  %v659_v41 = vand.u32 2147483647, %v637_v40 }
 0x2f6   :  { %v662_v46 = vor.u32 1.1754944e-38, %v661_v38  ;;  %vm660_vm6 = vcmp.eq.f32.partialorder %v659_v41, 8.507059e+37  ;;  %v144_v38 = vld [vmem:[%s7855_s28 + $0x8] sm:$0xff] }
 0x2f7   :  { %806 = vmatpush.msra.mxu0 %v144_v38 }
 0x2fa   :  { %v7245_v25 = vpop.eup %7244 }
 0x2fb   :  { %v640_v27 = vpop.xlane.xlu1 %639  ;;  %v651_v28 = vmul.f32 %v7245_v25, %v637_v40  ;;  %vm656_vm14 = vweird.f32 %v7245_v25 }
 0x2fc   :  { %7246 = vrcp.f32 %v640_v27  ;;  %vm657_vm5 = vmor %vm655_vm15, %vm656_vm14  ;;  %v676_v51 = vand.u32 2147483648, %v640_v27  ;;  %vm670_vm8 = vweird.f32 %v640_v27  ;;  %v674_v56 = vand.u32 2147483647, %v640_v27 }
 0x2fd   :  { %v652_v29 = vsub.f32 1.0, %v651_v28 }
 0x2fe   :  { %v677_v62 = vor.u32 1.1754944e-38, %v676_v51  ;;  %vm675_vm10 = vcmp.eq.f32.partialorder %v674_v56, 8.507059e+37 }
 0x2ff   :  { %v653_v32 = vmul.f32 %v7245_v25, %v652_v29 }
 0x301   :  { %v654_v36 = vadd.f32 %v7245_v25, %v653_v32 }
 0x302   :  { %v7247_v30 = vpop.eup %7246 }
 0x303   :  { %v643_v31 = vpop.xlane.xlu0 %642  ;;  %v666_v33 = vmul.f32 %v7247_v30, %v640_v27  ;;  %v658_v44 = vsel %vm657_vm5, %v7245_v25, %v654_v36  ;;  %vm671_vm7 = vweird.f32 %v7247_v30 }
 0x304   :  { %7248 = vrcp.f32 %v643_v31  ;;  %v663_v47 = vsel %vm660_vm6, %v662_v46, %v658_v44  ;;  %vm672_vm9 = vmor %vm670_vm8, %vm671_vm7  ;;  %v691_v1 = vand.u32 2147483648, %v643_v31  ;;  %vm685_vm12 = vweird.f32 %v643_v31 }
 0x305   :  { %v667_v34 = vsub.f32 1.0, %v666_v33  ;;  %v664_v54 = vmul.f32 %v7813_v50, %v663_v47  ;;  %v689_v9 = vand.u32 2147483647, %v643_v31 }
 0x306   :  { %v692_v13 = vor.u32 1.1754944e-38, %v691_v1 }
 0x307   :  { %v668_v45 = vmul.f32 %v7247_v30, %v667_v34  ;;  %vm690_vm14 = vcmp.eq.f32.partialorder %v689_v9, 8.507059e+37 }
 0x309   :  { %v669_v48 = vadd.f32 %v7247_v30, %v668_v45 }
 0x30a   :  { %v7249_v37 = vpop.eup %7248 }
 0x30b   :  { %v646_v43 = vpop.xlane.xlu2 %645  ;;  %v681_v42 = vmul.f32 %v7249_v37, %v643_v31  ;;  %v673_v59 = vsel %vm672_vm9, %v7247_v30, %v669_v48  ;;  %vm686_vm11 = vweird.f32 %v7249_v37 }
 0x30c   :  { %7250 = vrcp.f32 %v646_v43  ;;  %v678_v63 = vsel %vm675_vm10, %v677_v62, %v673_v59  ;;  %vm687_vm13 = vmor %vm685_vm12, %vm686_vm11  ;;  %v706_v19 = vand.u32 2147483648, %v646_v43  ;;  %vm700_vm5 = vweird.f32 %v646_v43 }
 0x30d   :  { %v682_v22 = vsub.f32 1.0, %v681_v42  ;;  %v679_v5 = vmul.f32 %v7818_v55, %v678_v63  ;;  %v704_v21 = vand.u32 2147483647, %v646_v43  ;;  %vm895_vm12 = vcmask 123904  }
 0x30e   :  { %v707_v39 = vor.u32 1.1754944e-38, %v706_v19 }
 0x30f   :  { %v683_v61 = vmul.f32 %v7249_v37, %v682_v22  ;;  %vm705_vm7 = vcmp.eq.f32.partialorder %v704_v21, 8.507059e+37  ;;  %v7200_v22 = vld [vmem:[%s7881_s2] ss:$0 sm:$0xff] }
 0x311   :  { %v684_v35 = vadd.f32 %v7249_v37, %v683_v61 }
 0x312   :  { %v7251_v49 = vpop.eup %7250 }
 0x313   :  { %v649_v52 = vpop.xlane.xlu0 %648  ;;  %v7857_v53 = vpop.permute.xlu1 %725  ;;  %v696_v58 = vmul.f32 %v7251_v49, %v646_v43  ;;  %v688_v11 = vsel %vm687_vm13, %v7249_v37, %v684_v35  ;;  %vm701_vm15 = vweird.f32 %v7251_v49 }
 0x314   :  { %7252 = vrcp.f32 %v649_v52  ;;  %6697 = vmatpush.msk.msrb.mxu3 %vm10196_vm4, %v7857_v53  ;;  %v693_v15 = vsel %vm690_vm14, %v692_v13, %v688_v11  ;;  %vm702_vm6 = vmor %vm700_vm5, %vm701_vm15  ;;  %v721_v27 = vand.u32 2147483648, %v649_v52  ;;  %vm715_vm9 = vweird.f32 %v649_v52 }
 0x315   :  { %6698 = vmatmul.msk.f32.vlgmr.msrb.gmra.mxu3 %vm10182_vm2, %v664_v54  ;;  %v697_v0 = vsub.f32 1.0, %v696_v58  ;;  %v694_v20 = vmul.f32 %v7822_v60, %v693_v15  ;;  %v719_v29 = vand.u32 2147483647, %v649_v52 }
 0x316   :  { %v722_v30 = vor.u32 1.1754944e-38, %v721_v27 }
 0x317   :  { %v698_v12 = vmul.f32 %v7251_v49, %v697_v0  ;;  %vm720_vm11 = vcmp.eq.f32.partialorder %v719_v29, 8.507059e+37  ;;  %v149_v29 = vld [vmem:[%s7909_s11 + $0x8] sm:$0xff] }
 0x318   :  { %1049 = vmatpush.msrb.mxu1 %v149_v29 }
 0x319   :  { %v699_v17 = vadd.f32 %v7251_v49, %v698_v12 }
 0x31a   :  { %v7253_v50 = vpop.eup %7252 }
 0x31b   :  { %v711_v10 = vmul.f32 %v7253_v50, %v649_v52  ;;  %v703_v55 = vsel %vm702_vm6, %v7251_v49, %v699_v17  ;;  %vm716_vm8 = vweird.f32 %v7253_v50 }
 0x31c   :  { %v708_v40 = vsel %vm705_vm7, %v707_v39, %v703_v55  ;;  %vm717_vm10 = vmor %vm715_vm9, %vm716_vm8 }
 0x31d   :  { %6699 = vmatmul.msk.f32.gmra.mxu3 %vm10182_vm2, %v679_v5  ;;  %v712_v16 = vsub.f32 1.0, %v711_v10  ;;  %v709_v28 = vmul.f32 %v7826_v2, %v708_v40 }
 0x31f   :  { %v713_v24 = vmul.f32 %v7253_v50, %v712_v16 }
 0x321   :  { %v714_v25 = vadd.f32 %v7253_v50, %v713_v24 }
 0x323   :  { %v718_v60 = vsel %vm717_vm10, %v7253_v50, %v714_v25 }
 0x324   :  { %v723_v31 = vsel %vm720_vm11, %v722_v30, %v718_v60  ;;  %v148_v30 = vld [vmem:[%s7909_s11] sm:$0xff] }
 0x325   :  { %6700 = vmatmul.msk.f32.gmra.mxu3 %vm10182_vm2, %v694_v20  ;;  %v724_v33 = vmul.f32 %v7836_v18, %v723_v31  ;;  %1050 = vmatpush.msrb.mxu1 %v148_v30 }
 0x328   :  { %v530_v2 = vpop.f32.mrf.mxu3 }
 0x32d   :  { %6701 = vmatmul.msk.f32.gmra.mxu3 %vm10182_vm2, %v709_v28 }
 0x330   :  { %v533_v36 = vpop.f32.mrf.mxu3 }
 0x332   :  { %v524_v32 = vpop.f32.mrf.mxu0 }
 0x333   :  { %6708 = vmatmul.msk.f32.vlgmr.msrb.gmra.mxu2 %vm304_vm1, %v524_v32 }
 0x335   :  { %6702 = vmatmul.msk.f32.gmra.mxu3 %vm10182_vm2, %v724_v33 }
 0x339   :  { %v536_v37 = vpop.f32.mrf.mxu3 }
 0x33a   :  { %v527_v34 = vpop.f32.mrf.mxu0 }
 0x33b   :  { %6709 = vmatmul.msk.f32.gmra.mxu2 %vm304_vm1, %v527_v34 }
 0x343   :  { %6710 = vmatmul.msk.f32.gmra.mxu2 %vm304_vm1, %v530_v2 }
 0x34b   :  { %6711 = vmatmul.msk.f32.gmra.mxu2 %vm304_vm1, %v533_v36 }
 0x353   :  { %6712 = vmatmul.msk.f32.gmra.mxu2 %vm304_vm1, %v536_v37 }
 0x398   :  { %v761_v18 = vpop.f32.mrf.mxu3 }
 0x399   :  { %6703 = vmatmul.msk.f32.vlgmr.msra.gmra.mxu0 %vm304_vm1, %v761_v18 }
 0x3a0   :  { %v764_v43 = vpop.f32.mrf.mxu3 }
 0x3a1   :  { %6704 = vmatmul.msk.f32.gmra.mxu0 %vm304_vm1, %v764_v43 }
 0x3a8   :  { %v767_v41 = vpop.f32.mrf.mxu3 }
 0x3a9   :  { %6705 = vmatmul.msk.f32.gmra.mxu0 %vm304_vm1, %v767_v41 }
 0x3b0   :  { %v770_v42 = vpop.f32.mrf.mxu3 }
 0x3b1   :  { %6706 = vmatmul.msk.f32.gmra.mxu0 %vm304_vm1, %v770_v42 }
 0x3b6   :  { %v855_v45 = vpop.f32.mrf.mxu2 }
 0x3b8   :  { %v773_v44 = vpop.f32.mrf.mxu3 }
 0x3b9   :  { %6707 = vmatmul.msk.f32.gmra.mxu0 %vm304_vm1, %v773_v44 }
 0x3be   :  { %v858_v48 = vpop.f32.mrf.mxu2 }
 0x3c6   :  { %v861_v58 = vpop.f32.mrf.mxu2 }
 0x3ce   :  { %v864_v50 = vpop.f32.mrf.mxu2 }
 0x3d6   :  { %v867_v11 = vpop.f32.mrf.mxu2 }
 0x416   :  { %v808_v46 = vpop.f32.mrf.mxu0 }
 0x417   :  { %v856_v47 = vadd.f32 %v855_v45, %v808_v46 }
 0x419   :  { %v870_v49 = vadd.f32 %v856_v47, %v7721_v4 }
 0x41b   :  { %v878_v51 = vadd.f32 %v7200_v22, %v870_v49  ;;  %v7132_v49 = vpack.i.bf16 %v148_v30, %v149_v29 }
 0x41d   :  { %v883_v52 = vsel %vm222_vm0, %v878_v51, 0.0 }
 0x41e   :  { %884 = vadd.xlane.f32.xlu0 %v883_v52  ;;  %v811_v54 = vpop.f32.mrf.mxu0 }
 0x41f   :  { %v859_v56 = vadd.f32 %v858_v48, %v811_v54 }
 0x421   :  { %v871_v57 = vadd.f32 %v859_v56, %v7727_v6 }
 0x423   :  { %v879_v59 = vadd.f32 %v7200_v22, %v871_v57 }
 0x425   :  { %v886_v61 = vsel %vm222_vm0, %v879_v59, 0.0 }
 0x426   :  { %887 = vadd.xlane.f32.xlu0 %v886_v61  ;;  %v814_v62 = vpop.f32.mrf.mxu0 }
 0x427   :  { %v862_v63 = vadd.f32 %v861_v58, %v814_v62 }
 0x429   :  { %v872_v0 = vadd.f32 %v862_v63, %v7731_v7 }
 0x42b   :  { %v880_v35 = vadd.f32 %v7200_v22, %v872_v0 }
 0x42d   :  { %v889_v4 = vsel %vm222_vm0, %v880_v35, 0.0 }
 0x42e   :  { %890 = vadd.xlane.f32.xlu1 %v889_v4  ;;  %v817_v1 = vpop.f32.mrf.mxu0 }
 0x42f   :  { %v865_v5 = vadd.f32 %v864_v50, %v817_v1 }
 0x431   :  { %v873_v9 = vadd.f32 %v865_v5, %v7738_v8  ;;  %v7668_v8 = vmov 16.0  }
 0x432   :  { %7254 = vrcp.f32 %v7668_v8 }
 0x433   :  { %v881_v10 = vadd.f32 %v7200_v22, %v873_v9 }
 0x435   :  { %v892_v6 = vsel %vm222_vm0, %v881_v10, 0.0 }
 0x436   :  { %893 = vadd.xlane.f32.xlu0 %v892_v6  ;;  %v820_v12 = vpop.f32.mrf.mxu0 }
 0x437   :  { %v868_v13 = vadd.f32 %v867_v11, %v820_v12 }
 0x438   :  { %v7255_v17 = vpop.eup %7254 }
 0x439   :  { %v874_v15 = vadd.f32 %v868_v13, %v7716_v3  ;;  %v900_v19 = vmul.f32 16.0, %v7255_v17  ;;  %vm904_vm13 = vweird.f32 %v7255_v17  ;;  %v7962_v13 = vld [vmem:[%s7929_s17] ss:$0 sm:$0xff] }
 0x43b   :  { %v882_v7 = vadd.f32 %v7200_v22, %v874_v15  ;;  %v901_v20 = vsub.f32 1.0, %v900_v19  ;;  %v7967_v19 = vld [vmem:[%s7952_s22] ss:$0 sm:$0xff] }
 0x43d   :  { %v896_v16 = vsel %vm895_vm12, %v882_v7, 0.0  ;;  %v902_v21 = vmul.f32 %v7255_v17, %v901_v20 }
 0x43e   :  { %897 = vadd.xlane.f32.xlu0 %v896_v16 }
 0x43f   :  { %v903_v55 = vadd.f32 %v7255_v17, %v902_v21 }
 0x441   :  { %v7904_v3 = vsel %vm904_vm13, %v7255_v17, %v903_v55 }
 0x447   :  { %1075 = vrot.lane.b32.xlu1 %v7967_v19, %s10183_s14 }
 0x491   :  { %v885_v24 = vpop.xlane.xlu0 %884 }
 0x492   :  { %v906_v39 = vmul.f32 %v7904_v3, %v885_v24 }
 0x494   :  { %v7912_v40 = vsub.f32 %v878_v51, %v906_v39 }
 0x496   :  { %v916_v25 = vmul.f32 %v7912_v40, %v7912_v40 }
 0x498   :  { %v921_v27 = vsel %vm222_vm0, %v916_v25, 0.0 }
 0x499   :  { %v888_v28 = vpop.xlane.xlu0 %887  ;;  %922 = vadd.xlane.f32.xlu0 %v921_v27 }
 0x49a   :  { %v907_v60 = vmul.f32 %v7904_v3, %v888_v28 }
 0x49c   :  { %v7920_v31 = vsub.f32 %v879_v59, %v907_v60 }
 0x49e   :  { %v917_v32 = vmul.f32 %v7920_v31, %v7920_v31 }
 0x4a0   :  { %v924_v33 = vsel %vm222_vm0, %v917_v32, 0.0 }
 0x4a1   :  { %925 = vadd.xlane.f32.xlu2 %v924_v33  ;;  %v891_v34 = vpop.xlane.xlu1 %890 }
 0x4a2   :  { %v908_v2 = vmul.f32 %v7904_v3, %v891_v34 }
 0x4a4   :  { %v7931_v36 = vsub.f32 %v880_v35, %v908_v2 }
 0x4a6   :  { %v918_v37 = vmul.f32 %v7931_v36, %v7931_v36 }
 0x4a8   :  { %v927_v38 = vsel %vm222_vm0, %v918_v37, 0.0 }
 0x4a9   :  { %v894_v18 = vpop.xlane.xlu0 %893  ;;  %928 = vadd.xlane.f32.xlu0 %v927_v38 }
 0x4aa   :  { %v909_v43 = vmul.f32 %v7904_v3, %v894_v18 }
 0x4ac   :  { %v7937_v41 = vsub.f32 %v881_v10, %v909_v43  ;;  %v7958_v10 = vld [vmem:[%s7902_s7] ss:$0 sm:$0xff] }
 0x4ae   :  { %v919_v42 = vmul.f32 %v7937_v41, %v7937_v41 }
 0x4b0   :  { %v930_v44 = vsel %vm222_vm0, %v919_v42, 0.0 }
 0x4b1   :  { %931 = vadd.xlane.f32.xlu2 %v930_v44  ;;  %v898_v45 = vpop.xlane.xlu0 %897 }
 0x4b2   :  { %v910_v46 = vmul.f32 %v7904_v3, %v898_v45 }
 0x4b4   :  { %v7943_v47 = vsub.f32 %v882_v7, %v910_v46 }
 0x4b6   :  { %v920_v22 = vmul.f32 %v7943_v47, %v7943_v47 }
 0x4b8   :  { %v933_v48 = vsel %vm895_vm12, %v920_v22, 0.0 }
 0x4b9   :  { %934 = vadd.xlane.f32.xlu2 %v933_v48 }
 0x4bd   :  { %7133 = vrot.lane.b32.xlu0 %v7132_v49, %s10183_s14 }
 0x50c   :  { %v923_v51 = vpop.xlane.xlu0 %922 }
 0x50d   :  { %v936_v52 = vmul.f32 %v923_v51, %v7904_v3 }
 0x50f   :  { %v941_v54 = vadd.f32 1e-05, %v936_v52 }
 0x511   :  { %7256 = vrsqrt.f32 %v941_v54  ;;  %vm952_vm15 = vweird.f32 %v941_v54 }
 0x514   :  { %v926_v56 = vpop.xlane.xlu2 %925 }
 0x515   :  { %v937_v57 = vmul.f32 %v926_v56, %v7904_v3 }
 0x517   :  { %v7257_v58 = vpop.eup %7256  ;;  %v942_v59 = vadd.f32 1e-05, %v937_v57 }
 0x518   :  { %v947_v61 = vmul.f32 %v7257_v58, %v941_v54  ;;  %vm953_vm14 = vweird.f32 %v7257_v58 }
 0x519   :  { %7258 = vrsqrt.f32 %v942_v59  ;;  %vm954_vm5 = vmor %vm952_vm15, %vm953_vm14  ;;  %vm962_vm7 = vweird.f32 %v942_v59 }
 0x51a   :  { %v948_v62 = vmul.f32 %v7257_v58, %v947_v61 }
 0x51c   :  { %v949_v63 = vmul.f32 0.5, %v948_v62  ;;  %v929_v0 = vpop.xlane.xlu0 %928 }
 0x51d   :  { %v938_v35 = vmul.f32 %v929_v0, %v7904_v3 }
 0x51e   :  { %v950_v50 = vsub.f32 1.5, %v949_v63 }
 0x51f   :  { %v7259_v4 = vpop.eup %7258  ;;  %v943_v1 = vadd.f32 1e-05, %v938_v35 }
 0x520   :  { %v951_v5 = vmul.f32 %v7257_v58, %v950_v50  ;;  %v957_v9 = vmul.f32 %v7259_v4, %v942_v59  ;;  %vm963_vm6 = vweird.f32 %v7259_v4 }
 0x521   :  { %7260 = vrsqrt.f32 %v943_v1  ;;  %vm964_vm8 = vmor %vm962_vm7, %vm963_vm6  ;;  %vm972_vm10 = vweird.f32 %v943_v1 }
 0x522   :  { %v955_v6 = vsel %vm954_vm5, %v7257_v58, %v951_v5  ;;  %v958_v11 = vmul.f32 %v7259_v4, %v957_v9  ;;  %v8021_v9 = vpop.permute.xlu1 %1075 }
 0x523   :  { %v996_v12 = vmul.f32 %v955_v6, %v7912_v40 }
 0x524   :  { %v959_v15 = vmul.f32 0.5, %v958_v11  ;;  %v932_v7 = vpop.xlane.xlu2 %931 }
 0x525   :  { %v1004_v16 = vmul.f32 %v7958_v10, %v996_v12  ;;  %v939_v8 = vmul.f32 %v932_v7, %v7904_v3 }
 0x526   :  { %v960_v17 = vsub.f32 1.5, %v959_v15 }
 0x527   :  { %v7261_v20 = vpop.eup %7260  ;;  %v944_v21 = vadd.f32 1e-05, %v939_v8  ;;  %v7970_v55 = vadd.f32 %v7962_v13, %v1004_v16 }
 0x528   :  { %v961_v24 = vmul.f32 %v7259_v4, %v960_v17  ;;  %v967_v39 = vmul.f32 %v7261_v20, %v943_v1  ;;  %vm973_vm9 = vweird.f32 %v7261_v20 }
 0x529   :  { %7262 = vrsqrt.f32 %v944_v21  ;;  %6713 = vmatmul.msk.f32.vlgmr.msrb.gmra.mxu1 %vm222_vm0, %v7970_v55  ;;  %vm974_vm11 = vmor %vm972_vm10, %vm973_vm9  ;;  %vm982_vm14 = vweird.f32 %v944_v21  ;;  %vm1182_vm9 = vcmask 277504   ;;  %vm10180_vm10 = vcmask 271360  }
 0x52a   :  { %v968_v40 = vmul.f32 %v7261_v20, %v967_v39  ;;  %v965_v25 = vsel %vm964_vm8, %v7259_v4, %v961_v24  ;;  %vm1333_vm8 = vcmask 1041408  }
 0x52b   :  { %v997_v27 = vmul.f32 %v965_v25, %v7920_v31 }
 0x52c   :  { %v969_v28 = vmul.f32 0.5, %v968_v40  ;;  %v935_v29 = vpop.xlane.xlu2 %934 }
 0x52d   :  { %v940_v60 = vmul.f32 %v935_v29, %v7904_v3  ;;  %v1005_v30 = vmul.f32 %v7958_v10, %v997_v27 }
 0x52e   :  { %v970_v32 = vsub.f32 1.5, %v969_v28 }
 0x52f   :  { %v7263_v33 = vpop.eup %7262  ;;  %v945_v34 = vadd.f32 1e-05, %v940_v60  ;;  %v7134_v2 = vpop.permute.xlu0 %7133  ;;  %v7980_v37 = vadd.f32 %v7962_v13, %v1005_v30 }
 0x530   :  { %v971_v38 = vmul.f32 %v7261_v20, %v970_v32  ;;  %v977_v18 = vmul.f32 %v7263_v33, %v944_v21  ;;  %v7982_v31 = vunpack.i.l.bf16 %v7134_v2  ;;  %v7986_v44 = vunpack.i.h.bf16 %v7134_v2 }
 0x531   :  { %7264 = vrsqrt.f32 %v945_v34  ;;  %6714 = vmatmul.msk.f32.gmra.mxu1 %vm222_vm0, %v7980_v37  ;;  %vm983_vm13 = vweird.f32 %v7263_v33  ;;  %vm992_vm6 = vweird.f32 %v945_v34 }
 0x532   :  { %v978_v43 = vmul.f32 %v7263_v33, %v977_v18  ;;  %v975_v42 = vsel %vm974_vm11, %v7261_v20, %v971_v38  ;;  %1092 = vmatpush.msra.mxu3 %v7982_v31  ;;  %vm984_vm15 = vmor %vm982_vm14, %vm983_vm13 }
 0x533   :  { %v998_v45 = vmul.f32 %v975_v42, %v7931_v36 }
 0x534   :  { %v979_v46 = vmul.f32 0.5, %v978_v43  ;;  %1093 = vmatpush.msra.mxu3 %v7986_v44 }
 0x535   :  { %v1006_v22 = vmul.f32 %v7958_v10, %v998_v45  ;;  %6718 = vmatmul.msk.f32.vlgmr.msra.gmra.mxu3 %vm222_vm0, %v7970_v55 }
 0x536   :  { %v980_v48 = vsub.f32 1.5, %v979_v46 }
 0x537   :  { %v7265_v49 = vpop.eup %7264  ;;  %v7995_v51 = vadd.f32 %v7962_v13, %v1006_v22 }
 0x538   :  { %v981_v52 = vmul.f32 %v7263_v33, %v980_v48  ;;  %v987_v54 = vmul.f32 %v7265_v49, %v945_v34  ;;  %vm993_vm5 = vweird.f32 %v7265_v49  ;;  %v204_v48 = vld [vmem:[%s8075_s29] sm:$0xff] }
 0x539   :  { %6715 = vmatmul.msk.f32.gmra.mxu1 %vm222_vm0, %v7995_v51  ;;  %vm994_vm7 = vmor %vm992_vm6, %vm993_vm5 }
 0x53a   :  { %v988_v36 = vmul.f32 %v7265_v49, %v987_v54  ;;  %v985_v56 = vsel %vm984_vm15, %v7263_v33, %v981_v52 }
 0x53b   :  { %v999_v57 = vmul.f32 %v985_v56, %v7937_v41  ;;  %v205_v56 = vld [vmem:[%s8075_s29 + $0x8] sm:$0xff] }
 0x53c   :  { %v989_v58 = vmul.f32 0.5, %v988_v36 }
 0x53d   :  { %v1007_v59 = vmul.f32 %v7958_v10, %v999_v57  ;;  %6719 = vmatmul.msk.f32.gmra.mxu3 %vm222_vm0, %v7980_v37 }
 0x53e   :  { %v990_v61 = vsub.f32 1.5, %v989_v58 }
 0x53f   :  { %v8004_v62 = vadd.f32 %v7962_v13, %v1007_v59 }
 0x540   :  { %v991_v63 = vmul.f32 %v7265_v49, %v990_v61 }
 0x541   :  { %6716 = vmatmul.msk.f32.gmra.mxu1 %vm222_vm0, %v8004_v62 }
 0x542   :  { %v995_v0 = vsel %vm994_vm7, %v7265_v49, %v991_v63  ;;  %v206_v63 = vld [vmem:[%s8075_s29 + $0x10] sm:$0xff] }
 0x543   :  { %v1000_v41 = vmul.f32 %v995_v0, %v7943_v47 }
 0x545   :  { %v1008_v35 = vmul.f32 %v7958_v10, %v1000_v41  ;;  %6720 = vmatmul.msk.f32.gmra.mxu3 %vm222_vm0, %v7995_v51 }
 0x547   :  { %v8013_v50 = vadd.f32 %v7962_v13, %v1008_v35 }
 0x549   :  { %6717 = vmatmul.msk.f32.gmra.mxu1 %vm222_vm0, %v8013_v50 }
 0x54d   :  { %6721 = vmatmul.msk.f32.gmra.mxu3 %vm222_vm0, %v8004_v62 }
 0x555   :  { %6722 = vmatmul.msk.f32.gmra.mxu3 %vm222_vm0, %v8013_v50 }
 0x5a6   :  { %v1052_v4 = vpop.f32.mrf.mxu1 }
 0x5a7   :  { %v1053_v25 = vadd.f32 %v7967_v19, %v1052_v4 }
 0x5ae   :  { %v1055_v1 = vpop.f32.mrf.mxu1 }
 0x5af   :  { %v1056_v7 = vadd.f32 %v7967_v19, %v1055_v1  ;;  %v207_v1 = vld [vmem:[%s8075_s29 + $0x18] sm:$0xff] }
 0x5b6   :  { %v1058_v5 = vpop.f32.mrf.mxu1 }
 0x5b7   :  { %v1059_v27 = vadd.f32 %v7967_v19, %v1058_v5 }
 0x5b8   :  { %v1095_v47 = vpop.f32.mrf.mxu3 }
 0x5b9   :  { %v1096_v6 = vadd.f32 %v1095_v47, %v8021_v9 }
 0x5be   :  { %v1061_v13 = vpop.f32.mrf.mxu1 }
 0x5bf   :  { %v1062_v28 = vadd.f32 %v7967_v19, %v1061_v13 }
 0x5c0   :  { %v1098_v10 = vpop.f32.mrf.mxu3 }
 0x5c1   :  { %v1099_v11 = vadd.f32 %v1098_v10, %v8021_v9 }
 0x5c3   :  { %1380 = vrot.lane.b32.xlu1 %v1099_v11, %s10188_s19  ;;  %v8026_v12 = vpack.i.bf16 %v1096_v6, %v1099_v11 }
 0x5c6   :  { %v1064_v16 = vpop.f32.mrf.mxu1 }
 0x5c7   :  { %v1065_v17 = vadd.f32 %v7967_v19, %v1064_v16 }
 0x5c8   :  { %v1101_v15 = vpop.f32.mrf.mxu3 }
 0x5c9   :  { %v1102_v20 = vadd.f32 %v1101_v15, %v8021_v9 }
 0x5cb   :  { %1370 = vrot.lane.b32.xlu1 %v1056_v7, %s10188_s19 }
 0x5d0   :  { %v1104_v8 = vpop.f32.mrf.mxu3 }
 0x5d1   :  { %v1105_v21 = vadd.f32 %v1104_v8, %v8021_v9 }
 0x5d3   :  { %1384 = vrot.lane.b32.xlu0 %v1105_v21, %s10188_s19  ;;  %1376 = vrot.lane.b32.xlu1 %v1065_v17, %s10188_s19  ;;  %v8035_v24 = vpack.i.bf16 %v1102_v20, %v1105_v21 }
 0x5d8   :  { %v1107_v39 = vpop.f32.mrf.mxu3 }
 0x5d9   :  { %v8038_v40 = vadd.f32 %v1107_v39, %v8021_v9 }
 0x5db   :  { %1386 = vrot.lane.b32.xlu2 %v8038_v40, %s10188_s19  ;;  %6723 = vmatpush.xpose.msk.msrb.mxu0 %vm304_vm1, %v8038_v40 }
 0x5dc   :  { %1382 = vrot.lane.b32.xlu0 %v1102_v20, %s10188_s19  ;;  %7138 = vrot.lane.b32.xlu1 %v8035_v24, %s10183_s14 }
 0x5df   :  { %6724 = vmatpush.xpose.msk.msrb.mxu0 %vm304_vm1, %v1105_v21 }
 0x5e3   :  { %6725 = vmatpush.xpose.msk.msrb.mxu0 %vm304_vm1, %v1102_v20  ;;  %1378 = vrot.lane.b32.xlu2 %v1096_v6, %s10188_s19 }
 0x5e4   :  { %1368 = vrot.lane.b32.xlu0 %v1053_v25, %s10188_s19 }
 0x5e7   :  { %6726 = vmatpush.xpose.msk.msrb.mxu0 %vm304_vm1, %v1099_v11  ;;  %v208_v11 = vld [vmem:[%s8075_s29 + $0x20] sm:$0x3] }
 0x5eb   :  { %1372 = vrot.lane.b32.xlu2 %v1059_v27, %s10188_s19  ;;  %6727 = vmatpush.xpose.msk.msrb.mxu0 %vm304_vm1, %v1096_v6 }
 0x5ec   :  { %1374 = vrot.lane.b32.xlu0 %v1062_v28, %s10188_s19  ;;  %s7689_s19 = smov 1  }
 0x5ee   :  { %6728 = vmatmul.msk.f32.vlgmr.msrb.gmra.mxu0 %vm304_vm1, %v1053_v25 }
 0x5f4   :  { %1312 = vrot.lane.b32.xlu0 %v8038_v40, %s10183_s14 }
 0x5f6   :  { %6729 = vmatmul.msk.f32.gmra.mxu0 %vm304_vm1, %v1056_v7 }
 0x5fe   :  { %6730 = vmatmul.msk.f32.gmra.mxu0 %vm304_vm1, %v1059_v27 }
 0x606   :  { %6731 = vmatmul.msk.f32.gmra.mxu0 %vm304_vm1, %v1062_v28 }
 0x60e   :  { %6732 = vmatmul.msk.f32.gmra.mxu0 %vm304_vm1, %v1065_v17 }
 0x635   :  { %v1387_v19 = vpop.permute.xlu2 %1386  ;;  %v1381_v60 = vpop.permute.xlu1 %1380 }
 0x636   :  { %6739 = vmatpush.xpose.msk.msra.mxu1 %vm304_vm1, %v1387_v19 }
 0x63d   :  { %v1371_v32 = vpop.permute.xlu1 %1370  ;;  %v1379_v33 = vpop.permute.xlu2 %1378 }
 0x645   :  { %v1385_v29 = vpop.permute.xlu0 %1384  ;;  %v1377_v2 = vpop.permute.xlu1 %1376 }
 0x646   :  { %6740 = vmatpush.xpose.msk.msra.mxu1 %vm304_vm1, %v1385_v29  ;;  %v1373_v45 = vpop.permute.xlu2 %1372 }
 0x64e   :  { %v1383_v30 = vpop.permute.xlu0 %1382  ;;  %v7139_v18 = vpop.permute.xlu1 %7138 }
 0x64f   :  { %6741 = vmatpush.xpose.msk.msra.mxu1 %vm304_vm1, %v1383_v30  ;;  %v7140_v42 = vunpack.i.l.bf16 %v7139_v18  ;;  %v7141_v46 = vunpack.i.h.bf16 %v7139_v18 }
 0x653   :  { %6742 = vmatpush.xpose.msk.msra.mxu1 %vm304_vm1, %v1381_v60 }
 0x656   :  { %v1369_v34 = vpop.permute.xlu0 %1368 }
 0x657   :  { %6743 = vmatpush.xpose.msk.msra.mxu1 %vm304_vm1, %v1379_v33 }
 0x65a   :  { %6744 = vmatmul.msk.f32.vlgmr.msra.gmra.mxu1 %vm304_vm1, %v1369_v34 }
 0x65e   :  { %v1375_v38 = vpop.permute.xlu0 %1374 }
 0x662   :  { %6745 = vmatmul.msk.f32.gmra.mxu1 %vm304_vm1, %v1371_v32 }
 0x666   :  { %v1313_v43 = vpop.permute.xlu0 %1312 }
 0x667   :  { %6733 = vmatpush.msk.msra.mxu2 %vm1333_vm8, %v1313_v43 }
 0x669   :  { %1348 = vmatpush.msra.mxu2 %v7140_v42 }
 0x66a   :  { %6746 = vmatmul.msk.f32.gmra.mxu1 %vm304_vm1, %v1373_v45 }
 0x66b   :  { %1349 = vmatpush.msra.mxu2 %v7141_v46  ;;  %v1157_v22 = vpop.f32.mrf.mxu0 }
 0x66c   :  { %v1172_v49 = vmul.f32 0.35355338, %v1157_v22 }
 0x66e   :  { %v1177_v52 = vadd.f32 %v1172_v49, %v204_v48 }
 0x670   :  { %v1183_v54 = vsel %vm1182_vm9, %v1177_v52, -inf }
 0x671   :  { %1184 = vmax.xlane.f32.xlu2 %v1183_v54 }
 0x672   :  { %6747 = vmatmul.msk.f32.gmra.mxu1 %vm304_vm1, %v1375_v38 }
 0x673   :  { %v1160_v36 = vpop.f32.mrf.mxu0 }
 0x674   :  { %v1173_v57 = vmul.f32 0.35355338, %v1160_v36 }
 0x676   :  { %v1178_v58 = vadd.f32 %v1173_v57, %v205_v56 }
 0x678   :  { %v1186_v59 = vsel %vm1182_vm9, %v1178_v58, -inf }
 0x679   :  { %1187 = vmax.xlane.f32.xlu1 %v1186_v59 }
 0x67a   :  { %6748 = vmatmul.msk.f32.gmra.mxu1 %vm304_vm1, %v1377_v2 }
 0x67b   :  { %v1163_v61 = vpop.f32.mrf.mxu0 }
 0x67c   :  { %v1174_v0 = vmul.f32 0.35355338, %v1163_v61 }
 0x67e   :  { %v1179_v41 = vadd.f32 %v1174_v0, %v206_v63 }
 0x680   :  { %v1189_v35 = vsel %vm1182_vm9, %v1179_v41, -inf }
 0x681   :  { %1190 = vmax.xlane.f32.xlu0 %v1189_v35 }
 0x683   :  { %v1166_v4 = vpop.f32.mrf.mxu0 }
 0x684   :  { %v1175_v47 = vmul.f32 0.35355338, %v1166_v4 }
 0x686   :  { %v8088_v5 = vadd.f32 %v1175_v47, %v207_v1 }
 0x688   :  { %v1192_v10 = vsel %vm1182_vm9, %v8088_v5, -inf }
 0x689   :  { %1193 = vmax.xlane.f32.xlu2 %v1192_v10 }
 0x68b   :  { %v1169_v6 = vpop.f32.mrf.mxu0 }
 0x68c   :  { %v1176_v13 = vmul.f32 0.35355338, %v1169_v6 }
 0x68e   :  { %v8093_v15 = vadd.f32 %v1176_v13, %v208_v11 }
 0x690   :  { %v1196_v7 = vsel %vm10180_vm10, %v8093_v15, -inf }
 0x691   :  { %1197 = vmax.xlane.f32.xlu1 %v1196_v7 }
 0x6d7   :  { %v1425_v16 = vpop.f32.mrf.mxu1 }
 0x6d8   :  { %v1440_v8 = vmul.f32 0.35355338, %v1425_v16 }
 0x6da   :  { %v1445_v17 = vadd.f32 %v1440_v8, %v204_v48 }
 0x6dc   :  { %v1450_v20 = vsel %vm1182_vm9, %v1445_v17, -inf }
 0x6dd   :  { %1451 = vmax.xlane.f32.xlu0 %v1450_v20 }
 0x6df   :  { %v1428_v21 = vpop.f32.mrf.mxu1 }
 0x6e0   :  { %v1441_v39 = vmul.f32 0.35355338, %v1428_v21 }
 0x6e2   :  { %v1446_v25 = vadd.f32 %v1441_v39, %v205_v56 }
 0x6e4   :  { %v1185_v27 = vpop.xlane.xlu2 %1184  ;;  %v1453_v28 = vsel %vm1182_vm9, %v1446_v25, -inf }
 0x6e5   :  { %v1199_v19 = vsub.f32 %v1177_v52, %v1185_v27  ;;  %1454 = vmax.xlane.f32.xlu2 %v1453_v28 }
 0x6e7   :  { %v1204_v29 = vmul.f32 1.442695, %v1199_v19  ;;  %v1431_v60 = vpop.f32.mrf.mxu1 }
 0x6e8   :  { %v1442_v30 = vmul.f32 0.35355338, %v1431_v60 }
 0x6e9   :  { %7266 = vpow2.f32 %v1204_v29 }
 0x6ea   :  { %v1447_v32 = vadd.f32 %v1442_v30, %v206_v63 }
 0x6ec   :  { %v1188_v33 = vpop.xlane.xlu1 %1187  ;;  %v1456_v34 = vsel %vm1182_vm9, %v1447_v32, -inf }
 0x6ed   :  { %v1200_v2 = vsub.f32 %v1178_v58, %v1188_v33  ;;  %1457 = vmax.xlane.f32.xlu1 %v1456_v34 }
 0x6ef   :  { %v8100_v38 = vpop.eup %7266  ;;  %v1206_v18 = vmul.f32 1.442695, %v1200_v2  ;;  %v1434_v43 = vpop.f32.mrf.mxu1 }
 0x6f0   :  { %v1443_v42 = vmul.f32 0.35355338, %v1434_v43  ;;  %v1214_v45 = vsel %vm1182_vm9, %v8100_v38, 0.0 }
 0x6f1   :  { %7268 = vpow2.f32 %v1206_v18  ;;  %1215 = vadd.xlane.f32.xlu0 %v1214_v45 }
 0x6f2   :  { %v8104_v22 = vadd.f32 %v1443_v42, %v207_v1 }
 0x6f4   :  { %v1191_v46 = vpop.xlane.xlu0 %1190  ;;  %v1459_v54 = vsel %vm1182_vm9, %v8104_v22, -inf }
 0x6f5   :  { %v1201_v48 = vsub.f32 %v1179_v41, %v1191_v46 }
 0x6f7   :  { %v8106_v49 = vpop.eup %7268  ;;  %v1208_v52 = vmul.f32 1.442695, %v1201_v48  ;;  %v1437_v56 = vpop.f32.mrf.mxu1 }
 0x6f8   :  { %v1217_v36 = vsel %vm1182_vm9, %v8106_v49, 0.0  ;;  %v1444_v58 = vmul.f32 0.35355338, %v1437_v56 }
 0x6f9   :  { %7270 = vpow2.f32 %v1208_v52  ;;  %1460 = vmax.xlane.f32.xlu0 %v1459_v54  ;;  %1218 = vadd.xlane.f32.xlu2 %v1217_v36 }
 0x6fa   :  { %v1449_v61 = vadd.f32 %v1444_v58, %v208_v11 }
 0x6fc   :  { %v1462_v63 = vsel %vm10180_vm10, %v1449_v61, -inf  ;;  %v1194_v0 = vpop.xlane.xlu2 %1193 }
 0x6fd   :  { %v1202_v43 = vsub.f32 %v8088_v5, %v1194_v0 }
 0x6ff   :  { %v8112_v57 = vpop.eup %7270  ;;  %v1210_v45 = vmul.f32 1.442695, %v1202_v43 }
 0x700   :  { %v1220_v59 = vsel %vm1182_vm9, %v8112_v57, 0.0 }
 0x701   :  { %1221 = vadd.xlane.f32.xlu2 %v1220_v59 }
 0x704   :  { %v1198_v1 = vpop.xlane.xlu1 %1197 }
 0x709   :  { %1463 = vmax.xlane.f32.xlu2 %v1462_v63 }
 0x70d   :  { %1578 = vrot.lane.b32.xlu0 %v8038_v40, %s10186_s24  ;;  %v1203_v40 = vsub.f32 %v8093_v15, %v1198_v1 }
 0x70f   :  { %v1212_v21 = vmul.f32 1.442695, %v1203_v40 }
 0x750   :  { %v1452_v41 = vpop.xlane.xlu0 %1451 }
 0x751   :  { %v1465_v35 = vsub.f32 %v1445_v17, %v1452_v41 }
 0x753   :  { %v1470_v4 = vmul.f32 1.442695, %v1465_v35 }
 0x755   :  { %7272 = vpow2.f32 %v1470_v4 }
 0x758   :  { %v1455_v47 = vpop.xlane.xlu2 %1454 }
 0x759   :  { %v1466_v10 = vsub.f32 %v1446_v25, %v1455_v47 }
 0x75b   :  { %v8119_v6 = vpop.eup %7272  ;;  %v1472_v13 = vmul.f32 1.442695, %v1466_v10 }
 0x75c   :  { %v1480_v11 = vsel %vm1182_vm9, %v8119_v6, 0.0 }
 0x75d   :  { %7274 = vpow2.f32 %v1472_v13  ;;  %1481 = vadd.xlane.f32.xlu1 %v1480_v11 }
 0x760   :  { %v1458_v7 = vpop.xlane.xlu1 %1457 }
 0x761   :  { %v1467_v16 = vsub.f32 %v1447_v32, %v1458_v7 }
 0x763   :  { %v8123_v8 = vpop.eup %7274  ;;  %v1474_v17 = vmul.f32 1.442695, %v1467_v16 }
 0x764   :  { %v1483_v20 = vsel %vm1182_vm9, %v8123_v8, 0.0  ;;  %v1216_v28 = vpop.xlane.xlu0 %1215 }
 0x765   :  { %7276 = vpow2.f32 %v1474_v17  ;;  %1484 = vadd.xlane.f32.xlu2 %v1483_v20  ;;  %v1240_v4 = vand.u32 2147483648, %v1216_v28  ;;  %vm1234_vm13 = vweird.f32 %v1216_v28  ;;  %v1238_v1 = vand.u32 2147483647, %v1216_v28 }
 0x766   :  { %7278 = vpow2.f32 %v1212_v21 }
 0x767   :  { %v1241_v7 = vor.u32 1.1754944e-38, %v1240_v4  ;;  %vm1239_vm15 = vcmp.eq.f32.partialorder %v1238_v1, 8.507059e+37 }
 0x76b   :  { %v8128_v39 = vpop.eup %7276 }
 0x76c   :  { %v8130_v25 = vpop.xlane.xlu2 %1218  ;;  %v1486_v27 = vsel %vm1182_vm9, %v8128_v39, 0.0  ;;  %v8134_v19 = vpop.eup %7278 }
 0x76d   :  { %1487 = vadd.xlane.f32.xlu0 %v1486_v27  ;;  %v1226_v29 = vsel %vm10180_vm10, %v8134_v19, 0.0  ;;  %v1461_v60 = vpop.xlane.xlu0 %1460  ;;  %vm1249_vm6 = vweird.f32 %v8130_v25 }
 0x774   :  { %v8136_v15 = vpop.xlane.xlu2 %1221 }
 0x775   :  { %1227 = vadd.xlane.f32.xlu0 %v1226_v29  ;;  %v1268_v4 = vand.u32 2147483647, %v8136_v15 }
 0x776   :  { %7148 = vrot.lane.b32.xlu1 %v8035_v24, %s10186_s24  ;;  %v1468_v24 = vsub.f32 %v8104_v22, %v1461_v60 }
 0x778   :  { %v1476_v42 = vmul.f32 1.442695, %v1468_v24 }
 0x77c   :  { %v1464_v30 = vpop.xlane.xlu2 %1463 }
 0x77d   :  { %7143 = vrot.lane.b32.xlu2 %v8026_v12, %s10183_s14  ;;  %v1469_v32 = vsub.f32 %v1449_v61, %v1464_v30  ;;  %v1255_v30 = vand.u32 2147483648, %v8130_v25  ;;  %s8453_s14 = sld [smem:[%s10179_s0 + %s7684_s16]]  }
 0x77e   :  { %7153 = vrot.lane.b32.xlu1 %v8026_v12, %s10186_s24  ;;  %s8495_s16 = sld [smem:[%s10179_s0 + %s7685_s30]]  }
 0x77f   :  { %v1478_v33 = vmul.f32 1.442695, %v1469_v32  ;;  %v1579_v34 = vpop.permute.xlu0 %1578  ;;  %s8550_s30 = sld [smem:[%s10179_s0 + %s7687_s8]]   ;;  %s7688_s8 = smov 2  }
 0x780   :  { %6749 = vmatpush.msk.msrb.mxu3 %vm1333_vm8, %v1579_v34  ;;  %s8562_s24 = sld [smem:[%s10179_s0 + %s7688_s8]]  }
 0x781   :  { %7280 = vpow2.f32 %v1478_v33  ;;  %v1253_v33 = vand.u32 2147483647, %v8130_v25  ;;  %s10247_s8 = sld [smem:[#allocation3_spill]] }
 0x782   :  { %7282 = vpow2.f32 %v1476_v42  ;;  %v1256_v42 = vor.u32 1.1754944e-38, %v1255_v30 }
 0x783   :  { %7284 = vpow2.f32 %v1210_v45 }
 0x784   :  { %7286 = vrcp.f32 %v1216_v28 }
 0x785   :  { %7288 = vrcp.f32 %v8130_v25 }
 0x786   :  { %7290 = vrcp.f32 %v8136_v15 }
 0x787   :  { %v8147_v2 = vpop.eup %7280 }
 0x788   :  { %v1492_v18 = vsel %vm10180_vm10, %v8147_v2, 0.0  ;;  %v8153_v12 = vpop.eup %7282 }
 0x789   :  { %1493 = vadd.xlane.f32.xlu0 %v1492_v18  ;;  %v8155_v46 = vpop.eup %7284  ;;  %v1489_v48 = vsel %vm1182_vm9, %v8153_v12, 0.0 }
 0x78a   :  { %v1223_v52 = vsel %vm1182_vm9, %v8155_v46, 0.0  ;;  %v7287_v22 = vpop.eup %7286 }
 0x78b   :  { %v1230_v5 = vmul.f32 %v7287_v22, %v1216_v28  ;;  %v7289_v56 = vpop.eup %7288  ;;  %vm1235_vm11 = vweird.f32 %v7287_v22 }
 0x78c   :  { %v1245_v59 = vmul.f32 %v7289_v56, %v8130_v25  ;;  %v8169_v63 = vpop.eup %7290  ;;  %vm1236_vm14 = vmor %vm1234_vm13, %vm1235_vm11  ;;  %vm1250_vm5 = vweird.f32 %v7289_v56  ;;  %vm1254_vm11 = vcmp.eq.f32.partialorder %v1253_v33, 8.507059e+37 }
 0x78d   :  { %v1231_v54 = vsub.f32 1.0, %v1230_v5  ;;  %v1260_v10 = vmul.f32 %v8169_v63, %v8136_v15  ;;  %vm1251_vm7 = vmor %vm1249_vm6, %vm1250_vm5  ;;  %vm1265_vm13 = vweird.f32 %v8169_v63 }
 0x78e   :  { %v1246_v41 = vsub.f32 1.0, %v1245_v59 }
 0x78f   :  { %v1232_v58 = vmul.f32 %v7287_v22, %v1231_v54  ;;  %v1261_v20 = vsub.f32 1.0, %v1260_v10 }
 0x790   :  { %v1247_v11 = vmul.f32 %v7289_v56, %v1246_v41 }
 0x791   :  { %v1233_v0 = vadd.f32 %v7287_v22, %v1232_v58  ;;  %v1262_v43 = vmul.f32 %v8169_v63, %v1261_v20  ;;  %v1270_v58 = vand.u32 2147483648, %v8136_v15 }
 0x792   :  { %v1248_v28 = vadd.f32 %v7289_v56, %v1247_v11 }
 0x793   :  { %v1237_v47 = vsel %vm1236_vm14, %v7287_v22, %v1233_v0  ;;  %v1263_v22 = vadd.f32 %v8169_v63, %v1262_v43 }
 0x794   :  { %v1242_v17 = vsel %vm1239_vm15, %v1241_v7, %v1237_v47  ;;  %v1252_v24 = vsel %vm1251_vm7, %v7289_v56, %v1248_v28  ;;  %vm1264_vm15 = vweird.f32 %v8136_v15 }
 0x795   :  { %v1243_v32 = vmul.f32 %v8100_v38, %v1242_v17  ;;  %vm8202_vm6 = vmor %vm1264_vm15, %vm1265_vm13  ;;  %vm1269_vm13 = vcmp.eq.f32.partialorder %v1268_v4, 8.507059e+37 }
 0x7a6   :  { %1490 = vadd.xlane.f32.xlu2 %v1489_v48  ;;  %v1257_v48 = vsel %vm1254_vm11, %v1256_v42, %v1252_v24 }
 0x7a7   :  { %v1258_v0 = vmul.f32 %v8106_v49, %v1257_v48 }
 0x7a8   :  { %1224 = vadd.xlane.f32.xlu1 %v1223_v52 }
 0x7d0   :  { %v8162_v36 = vpop.xlane.xlu1 %1481 }
 0x7d1   :  { %7292 = vrcp.f32 %v8162_v36  ;;  %v1506_v54 = vand.u32 2147483648, %v8162_v36  ;;  %vm1500_vm5 = vweird.f32 %v8162_v36  ;;  %v1504_v59 = vand.u32 2147483647, %v8162_v36 }
 0x7d3   :  { %v1507_v10 = vor.u32 1.1754944e-38, %v1506_v54  ;;  %vm1505_vm11 = vcmp.eq.f32.partialorder %v1504_v59, 8.507059e+37 }
 0x7d7   :  { %v8171_v35 = vpop.eup %7292 }
 0x7d8   :  { %v8167_v61 = vpop.xlane.xlu2 %1484  ;;  %v1496_v13 = vmul.f32 %v8171_v35, %v8162_v36  ;;  %vm1501_vm14 = vweird.f32 %v8171_v35  ;;  %v1267_v36 = vsel %vm8202_vm6, %v8169_v63, %v1263_v22 }
 0x7d9   :  { %7294 = vrcp.f32 %v8167_v61  ;;  %vm1502_vm7 = vmor %vm1500_vm5, %vm1501_vm14  ;;  %v1521_v20 = vand.u32 2147483648, %v8167_v61  ;;  %vm1515_vm15 = vweird.f32 %v8167_v61  ;;  %v1519_v28 = vand.u32 2147483647, %v8167_v61 }
 0x7da   :  { %v1497_v21 = vsub.f32 1.0, %v1496_v13  ;;  %v1271_v13 = vor.u32 1.1754944e-38, %v1270_v58 }
 0x7db   :  { %vm1520_vm6 = vcmp.eq.f32.partialorder %v1519_v28, 8.507059e+37 }
 0x7dc   :  { %v1498_v34 = vmul.f32 %v8171_v35, %v1497_v21  ;;  %v1272_v7 = vsel %vm1269_vm13, %v1271_v13, %v1267_v36 }
 0x7dd   :  { %v1273_v63 = vmul.f32 %v8112_v57, %v1272_v7 }
 0x7de   :  { %v1499_v25 = vadd.f32 %v8171_v35, %v1498_v34 }
 0x7df   :  { %v8180_v29 = vpop.eup %7294 }
 0x7e0   :  { %v7144_v16 = vpop.permute.xlu2 %7143  ;;  %v8178_v27 = vpop.xlane.xlu0 %1487  ;;  %v1511_v18 = vmul.f32 %v8180_v29, %v8167_v61  ;;  %v1503_v1 = vsel %vm1502_vm7, %v8171_v35, %v1499_v25  ;;  %vm1516_vm14 = vweird.f32 %v8180_v29 }
 0x7e1   :  { %v7145_v40 = vunpack.i.l.bf16 %v7144_v16  ;;  %v7146_v60 = vunpack.i.h.bf16 %v7144_v16  ;;  %7296 = vrcp.f32 %v8178_v27  ;;  %v1508_v16 = vsel %vm1505_vm11, %v1507_v10, %v1503_v1  ;;  %vm1517_vm5 = vmor %vm1515_vm15, %vm1516_vm14 }
 0x7e2   :  { %v1512_v52 = vsub.f32 1.0, %v1511_v18  ;;  %v1509_v21 = vmul.f32 %v8119_v6, %v1508_v16  ;;  %v1536_v57 = vand.u32 2147483648, %v8178_v27  ;;  %vm1530_vm11 = vweird.f32 %v8178_v27 }
 0x7e3   :  { %1350 = vmatpush.msra.mxu2 %v7145_v40  ;;  %v1534_v61 = vand.u32 2147483647, %v8178_v27 }
 0x7e4   :  { %v1513_v49 = vmul.f32 %v8180_v29, %v1512_v52  ;;  %v1537_v24 = vor.u32 1.1754944e-38, %v1536_v57 }
 0x7e5   :  { %1351 = vmatpush.msra.mxu2 %v7146_v60  ;;  %vm1535_vm14 = vcmp.eq.f32.partialorder %v1534_v61, 8.507059e+37 }
 0x7e6   :  { %6734 = vmatmul.msk.f32.vlgmr.msra.gmra.mxu2 %vm1182_vm9, %v1243_v32  ;;  %v1514_v35 = vadd.f32 %v8180_v29, %v1513_v49  ;;  %v1522_v32 = vor.u32 1.1754944e-38, %v1521_v20 }
 0x7e7   :  { %v7297_v5 = vpop.eup %7296 }
 0x7e8   :  { %v7149_v38 = vpop.permute.xlu1 %7148  ;;  %v1526_v47 = vmul.f32 %v7297_v5, %v8178_v27  ;;  %v1518_v60 = vsel %vm1517_vm5, %v8180_v29, %v1514_v35  ;;  %vm1531_vm7 = vweird.f32 %v7297_v5  ;;  %v8231_v42 = vpop.xlane.xlu0 %1227  ;;  %v171_v27 = vld [vmem:[%s8241_s10 + $0x8] sm:$0xff] }
 0x7e9   :  { %v7150_v45 = vunpack.i.l.bf16 %v7149_v38  ;;  %v7151_v56 = vunpack.i.h.bf16 %v7149_v38  ;;  %v1523_v33 = vsel %vm1520_vm6, %v1522_v32, %v1518_v60  ;;  %vm1532_vm13 = vmor %vm1530_vm11, %vm1531_vm7  ;;  %7298 = vrcp.f32 %v8231_v42 }
 0x7ea   :  { %v1527_v40 = vsub.f32 1.0, %v1526_v47  ;;  %v1524_v6 = vmul.f32 %v8123_v8, %v1523_v33  ;;  %v1298_v61 = vand.u32 2147483647, %v8231_v42 }
 0x7eb   :  { %1613 = vmatpush.msrb.mxu3 %v7150_v45 }
 0x7ec   :  { %v1528_v30 = vmul.f32 %v7297_v5, %v1527_v40 }
 0x7ed   :  { %1614 = vmatpush.msrb.mxu3 %v7151_v56 }
 0x7ee   :  { %6735 = vmatmul.msk.f32.gmra.mxu2 %vm1182_vm9, %v1258_v0  ;;  %v1529_v34 = vadd.f32 %v7297_v5, %v1528_v30 }
 0x7ef   :  { %v8249_v38 = vpop.eup %7298 }
 0x7f0   :  { %v7154_v11 = vpop.permute.xlu1 %7153  ;;  %v1533_v18 = vsel %vm1532_vm13, %v7297_v5, %v1529_v34  ;;  %v1290_v52 = vmul.f32 %v8249_v38, %v8231_v42  ;;  %vm1295_vm6 = vweird.f32 %v8249_v38  ;;  %v1300_v34 = vand.u32 2147483648, %v8231_v42 }
 0x7f1   :  { %v7155_v15 = vunpack.i.l.bf16 %v7154_v11  ;;  %v7156_v17 = vunpack.i.h.bf16 %v7154_v11  ;;  %v1538_v29 = vsel %vm1535_vm14, %v1537_v24, %v1533_v18 }
 0x7f2   :  { %v1539_v43 = vmul.f32 %v8128_v39, %v1538_v29  ;;  %v151_v39 = vld [vmem:[%s8236_s4] sm:$0xff]  ;;  %v1291_v54 = vsub.f32 1.0, %v1290_v52  ;;  %v1301_v29 = vor.u32 1.1754944e-38, %v1300_v34 }
 0x7f3   :  { %1615 = vmatpush.msrb.mxu3 %v7155_v15  ;;  %1710 = vmatpush.msrb.mxu2 %v151_v39  ;;  %v152_v39 = vld [vmem:[%s8236_s4 + $0x8] sm:$0xff] }
 0x7f4   :  { %v1292_v47 = vmul.f32 %v8249_v38, %v1291_v54  ;;  %1663 = vmatpush.msra.mxu0 %v152_v39 }
 0x7f5   :  { %1616 = vmatpush.msrb.mxu3 %v7156_v17  ;;  %2185 = vmatpush.msra.mxu2 %v171_v27 }
 0x7f6   :  { %6736 = vmatmul.msk.f32.gmra.mxu2 %vm1182_vm9, %v1273_v63  ;;  %6750 = vmatmul.msk.f32.vlgmr.msrb.gmra.mxu3 %vm1182_vm9, %v1509_v21  ;;  %v1293_v35 = vadd.f32 %v8249_v38, %v1292_v47 }
 0x7fc   :  { %v8243_v8 = vpop.xlane.xlu0 %1493 }
 0x7fd   :  { %7300 = vrcp.f32 %v8243_v8  ;;  %vm1560_vm2 = vweird.f32 %v8243_v8  ;;  %v1566_v28 = vand.u32 2147483648, %v8243_v8  ;;  %v1564_v32 = vand.u32 2147483647, %v8243_v8 }
 0x7fe   :  { %6751 = vmatmul.msk.f32.gmra.mxu3 %vm1182_vm9, %v1524_v6 }
 0x803   :  { %v7301_v45 = vpop.eup %7300 }
 0x804   :  { %v1556_v22 = vmul.f32 %v7301_v45, %v8243_v8  ;;  %vm1561_vm13 = vweird.f32 %v7301_v45  ;;  %v170_v8 = vld [vmem:[%s8241_s10] sm:$0xff] }
 0x805   :  { %2186 = vmatpush.msra.mxu2 %v170_v8 }
 0x806   :  { %6752 = vmatmul.msk.f32.gmra.mxu3 %vm1182_vm9, %v1539_v43  ;;  %v1557_v56 = vsub.f32 1.0, %v1556_v22 }
 0x808   :  { %v1558_v1 = vmul.f32 %v7301_v45, %v1557_v56 }
 0x80a   :  { %v1559_v40 = vadd.f32 %v7301_v45, %v1558_v1 }
 0x819   :  { %v1491_v48 = vpop.xlane.xlu2 %1490 }
 0x81a   :  { %7302 = vrcp.f32 %v1491_v48  ;;  %v1551_v4 = vand.u32 2147483648, %v1491_v48  ;;  %v1549_v10 = vand.u32 2147483647, %v1491_v48  ;;  %vm1545_vm5 = vweird.f32 %v1491_v48 }
 0x81b   :  { %v1225_v25 = vpop.xlane.xlu1 %1224 }
 0x81c   :  { %7304 = vrcp.f32 %v1225_v25  ;;  %v1285_v13 = vand.u32 2147483648, %v1225_v25  ;;  %v1283_v7 = vand.u32 2147483647, %v1225_v25  ;;  %v1552_v16 = vor.u32 1.1754944e-38, %v1551_v4 }
 0x81d   :  { %vm1550_vm14 = vcmp.eq.f32.partialorder %v1549_v10, 8.507059e+37  ;;  %vm1279_vm10 = vweird.f32 %v1225_v25 }
 0x81e   :  { %v1286_v21 = vor.u32 1.1754944e-38, %v1285_v13 }
 0x820   :  { %v7303_v5 = vpop.eup %7302 }
 0x821   :  { %v1541_v58 = vmul.f32 %v7303_v5, %v1491_v48  ;;  %vm1546_vm15 = vweird.f32 %v7303_v5 }
 0x822   :  { %v7305_v59 = vpop.eup %7304  ;;  %vm1547_vm11 = vmor %vm1545_vm5, %vm1546_vm15  ;;  %vm1284_vm15 = vcmp.eq.f32.partialorder %v1283_v7, 8.507059e+37 }
 0x823   :  { %v1542_v0 = vsub.f32 1.0, %v1541_v58  ;;  %v1275_v41 = vmul.f32 %v7305_v59, %v1225_v25  ;;  %vm1280_vm7 = vweird.f32 %v7305_v59  ;;  %vm1562_vm5 = vmor %vm1560_vm2, %vm1561_vm13  ;;  %vm1565_vm2 = vcmp.eq.f32.partialorder %v1564_v32, 8.507059e+37 }
 0x824   :  { %vm1281_vm3 = vmor %vm1279_vm10, %vm1280_vm7  ;;  %v1563_v6 = vsel %vm1562_vm5, %v7301_v45, %v1559_v40  ;;  %vm1294_vm10 = vweird.f32 %v8231_v42  ;;  %vm1299_vm7 = vcmp.eq.f32.partialorder %v1298_v61, 8.507059e+37 }
 0x825   :  { %v1276_v36 = vsub.f32 1.0, %v1275_v41  ;;  %v1543_v49 = vmul.f32 %v7303_v5, %v1542_v0 }
 0x827   :  { %v1544_v11 = vadd.f32 %v7303_v5, %v1543_v49  ;;  %v1277_v15 = vmul.f32 %v7305_v59, %v1276_v36 }
 0x829   :  { %v1548_v17 = vsel %vm1547_vm11, %v7303_v5, %v1544_v11  ;;  %v1278_v20 = vadd.f32 %v7305_v59, %v1277_v15 }
 0x82a   :  { %v1553_v63 = vsel %vm1550_vm14, %v1552_v16, %v1548_v17 }
 0x82b   :  { %v1554_v60 = vmul.f32 %v8153_v12, %v1553_v63  ;;  %v1282_v30 = vsel %vm1281_vm3, %v7305_v59, %v1278_v20  ;;  %v1567_v12 = vor.u32 1.1754944e-38, %v1566_v28  ;;  %vm1296_vm3 = vmor %vm1294_vm10, %vm1295_vm6  ;;  %v7204_v59 = vld [vmem:[%s8284_s18] ss:$0 sm:$0xff] }
 0x82c   :  { %v1287_v33 = vsel %vm1284_vm15, %v1286_v21, %v1282_v30  ;;  %v1297_v18 = vsel %vm1296_vm3, %v8249_v38, %v1293_v35 }
 0x82d   :  { %6753 = vmatmul.msk.f32.gmra.mxu3 %vm1182_vm9, %v1554_v60  ;;  %v1288_v57 = vmul.f32 %v8155_v46, %v1287_v33  ;;  %v1568_v24 = vsel %vm1565_vm2, %v1567_v12, %v1563_v6  ;;  %v1302_v46 = vsel %vm1299_vm7, %v1301_v29, %v1297_v18 }
 0x82e   :  { %v1569_v43 = vmul.f32 %v8147_v2, %v1568_v24  ;;  %v1303_v42 = vmul.f32 %v8134_v19, %v1302_v46 }
 0x82f   :  { %6737 = vmatmul.msk.f32.gmra.mxu2 %vm1182_vm9, %v1288_v57 }
 0x835   :  { %6754 = vmatmul.msk.f32.gmra.mxu3 %vm1182_vm9, %v1569_v43 }
 0x837   :  { %6738 = vmatmul.msk.f32.gmra.mxu2 %vm1182_vm9, %v1303_v42 }
 0x869   :  { %v1353_v27 = vpop.f32.mrf.mxu2 }
 0x86a   :  { %6760 = vmatmul.msk.f32.vlgmr.msrb.gmra.mxu2 %vm304_vm1, %v1353_v27 }
 0x86b   :  { %6802 = vmatpush.xpose.msk.msrb.mxu2 %vm304_vm1, %v7746_v23 }
 0x871   :  { %v1356_v38 = vpop.f32.mrf.mxu2 }
 0x872   :  { %6761 = vmatmul.msk.f32.gmra.mxu2 %vm304_vm1, %v1356_v38 }
 0x879   :  { %v1359_v19 = vpop.f32.mrf.mxu2  ;;  %v1618_v2 = vpop.f32.mrf.mxu3 }
 0x87a   :  { %6755 = vmatmul.msk.f32.vlgmr.msra.gmra.mxu0 %vm304_vm1, %v1618_v2  ;;  %6762 = vmatmul.msk.f32.gmra.mxu2 %vm304_vm1, %v1359_v19 }
 0x881   :  { %v1621_v45 = vpop.f32.mrf.mxu3 }
 0x882   :  { %6756 = vmatmul.msk.f32.gmra.mxu0 %vm304_vm1, %v1621_v45 }
 0x889   :  { %v1624_v48 = vpop.f32.mrf.mxu3 }
 0x88a   :  { %6757 = vmatmul.msk.f32.gmra.mxu0 %vm304_vm1, %v1624_v48 }
 0x8b0   :  { %v1627_v25 = vpop.f32.mrf.mxu3 }
 0x8b1   :  { %6758 = vmatmul.msk.f32.gmra.mxu0 %vm304_vm1, %v1627_v25 }
 0x8b2   :  { %v1362_v52 = vpop.f32.mrf.mxu2 }
 0x8b3   :  { %6763 = vmatmul.msk.f32.gmra.mxu2 %vm304_vm1, %v1362_v52 }
 0x8b8   :  { %v1630_v22 = vpop.f32.mrf.mxu3 }
 0x8b9   :  { %6759 = vmatmul.msk.f32.gmra.mxu0 %vm304_vm1, %v1630_v22 }
 0x8ba   :  { %v1365_v5 = vpop.f32.mrf.mxu2 }
 0x8bb   :  { %6764 = vmatmul.msk.f32.gmra.mxu2 %vm304_vm1, %v1365_v5 }
 0x8ed   :  { %v1712_v54 = vpop.f32.mrf.mxu2 }
 0x8f5   :  { %v1715_v4 = vpop.f32.mrf.mxu2 }
 0x8f7   :  { %v1665_v56 = vpop.f32.mrf.mxu0 }
 0x8f8   :  { %v1713_v58 = vadd.f32 %v1712_v54, %v1665_v56  ;;  %v157_v54 = vld [vmem:[%s8353_s21 + $0x8] sm:$0xff]  ;;  %v156_v56 = vld [vmem:[%s8353_s21] sm:$0xff] }
 0x8f9   :  { %1898 = vmatpush.msrb.mxu1 %v157_v54  ;;  %v162_v54 = vld [vmem:[%s8390_s1 + $0x18] sm:$0xff] }
 0x8fa   :  { %v1727_v0 = vadd.f32 %v1713_v58, %v7970_v55 }
 0x8fb   :  { %1899 = vmatpush.msrb.mxu1 %v156_v56 }
 0x8fc   :  { %v1735_v41 = vadd.f32 %v7204_v59, %v1727_v0 }
 0x8fd   :  { %v1718_v11 = vpop.f32.mrf.mxu2 }
 0x8fe   :  { %v1740_v1 = vsel %vm222_vm0, %v1735_v41, 0.0 }
 0x8ff   :  { %1741 = vadd.xlane.f32.xlu1 %v1740_v1  ;;  %v1668_v47 = vpop.f32.mrf.mxu0 }
 0x900   :  { %v1716_v36 = vadd.f32 %v1715_v4, %v1668_v47 }
 0x902   :  { %v1728_v49 = vadd.f32 %v1716_v36, %v7980_v37 }
 0x904   :  { %v1736_v10 = vadd.f32 %v7204_v59, %v1728_v49 }
 0x906   :  { %v1743_v13 = vsel %vm222_vm0, %v1736_v10, 0.0 }
 0x907   :  { %1744 = vadd.xlane.f32.xlu2 %v1743_v13  ;;  %v1671_v15 = vpop.f32.mrf.mxu0 }
 0x908   :  { %v1719_v7 = vadd.f32 %v1718_v11, %v1671_v15 }
 0x90a   :  { %v1729_v16 = vadd.f32 %v1719_v7, %v7995_v51 }
 0x90c   :  { %v1737_v40 = vadd.f32 %v7204_v59, %v1729_v16 }
 0x90e   :  { %v1746_v55 = vsel %vm222_vm0, %v1737_v40, 0.0 }
 0x90f   :  { %1747 = vadd.xlane.f32.xlu0 %v1746_v55 }
 0x92e   :  { %v1674_v35 = vpop.f32.mrf.mxu0 }
 0x936   :  { %v1721_v17 = vpop.f32.mrf.mxu2  ;;  %v1677_v28 = vpop.f32.mrf.mxu0 }
 0x937   :  { %v1722_v20 = vadd.f32 %v1721_v17, %v1674_v35  ;;  %v8361_v35 = vld [vmem:[%s8307_s26] ss:$0 sm:$0xff] }
 0x939   :  { %v1730_v63 = vadd.f32 %v1722_v20, %v8004_v62 }
 0x93b   :  { %v1738_v21 = vadd.f32 %v7204_v59, %v1730_v63 }
 0x93d   :  { %v1749_v37 = vsel %vm222_vm0, %v1738_v21, 0.0 }
 0x93e   :  { %v1724_v60 = vpop.f32.mrf.mxu2  ;;  %1750 = vadd.xlane.f32.xlu1 %v1749_v37 }
 0x93f   :  { %v1725_v30 = vadd.f32 %v1724_v60, %v1677_v28 }
 0x941   :  { %v1731_v32 = vadd.f32 %v1725_v30, %v8013_v50 }
 0x943   :  { %v1739_v51 = vadd.f32 %v7204_v59, %v1731_v32 }
 0x945   :  { %v1752_v33 = vsel %vm895_vm12, %v1739_v51, 0.0 }
 0x946   :  { %1753 = vadd.xlane.f32.xlu2 %v1752_v33 }
 0x972   :  { %v1742_v62 = vpop.xlane.xlu1 %1741 }
 0x973   :  { %v1755_v34 = vmul.f32 %v1742_v62, %v7904_v3 }
 0x975   :  { %v8311_v57 = vsub.f32 %v1735_v41, %v1755_v34 }
 0x977   :  { %v1765_v6 = vmul.f32 %v8311_v57, %v8311_v57 }
 0x979   :  { %v1770_v50 = vsel %vm222_vm0, %v1765_v6, 0.0 }
 0x97a   :  { %v1745_v61 = vpop.xlane.xlu2 %1744  ;;  %1771 = vadd.xlane.f32.xlu0 %v1770_v50 }
 0x97b   :  { %v1756_v12 = vmul.f32 %v1745_v61, %v7904_v3 }
 0x97d   :  { %v8317_v18 = vsub.f32 %v1736_v10, %v1756_v12 }
 0x97f   :  { %v1766_v24 = vmul.f32 %v8317_v18, %v8317_v18 }
 0x981   :  { %v1773_v29 = vsel %vm222_vm0, %v1766_v24, 0.0 }
 0x982   :  { %v1748_v46 = vpop.xlane.xlu0 %1747  ;;  %1774 = vadd.xlane.f32.xlu1 %v1773_v29 }
 0x983   :  { %v1757_v43 = vmul.f32 %v1748_v46, %v7904_v3 }
 0x985   :  { %v8328_v42 = vsub.f32 %v1737_v40, %v1757_v43 }
 0x987   :  { %v1767_v8 = vmul.f32 %v8328_v42, %v8328_v42 }
 0x989   :  { %v1776_v39 = vsel %vm222_vm0, %v1767_v8, 0.0 }
 0x98a   :  { %1777 = vadd.xlane.f32.xlu2 %v1776_v39 }
 0x9b1   :  { %v1751_v27 = vpop.xlane.xlu1 %1750 }
 0x9b2   :  { %v1758_v38 = vmul.f32 %v1751_v27, %v7904_v3  ;;  %v166_v27 = vld [vmem:[%s8390_s1 + $0x38] sm:$0xff] }
 0x9b3   :  { %1948 = vmatpush.msra.mxu3 %v166_v27 }
 0x9b4   :  { %v8334_v19 = vsub.f32 %v1738_v21, %v1758_v38  ;;  %v8365_v21 = vld [vmem:[%s8326_s3] ss:$0 sm:$0xff]  ;;  %v165_v38 = vld [vmem:[%s8390_s1 + $0x30] sm:$0xff] }
 0x9b5   :  { %1949 = vmatpush.msra.mxu3 %v165_v38 }
 0x9b6   :  { %v1768_v2 = vmul.f32 %v8334_v19, %v8334_v19 }
 0x9b8   :  { %v1779_v45 = vsel %vm222_vm0, %v1768_v2, 0.0  ;;  %v164_v2 = vld [vmem:[%s8390_s1 + $0x28] sm:$0xff] }
 0x9b9   :  { %1780 = vadd.xlane.f32.xlu0 %v1779_v45  ;;  %v1754_v48 = vpop.xlane.xlu2 %1753  ;;  %1950 = vmatpush.msra.mxu3 %v164_v2 }
 0x9ba   :  { %v1759_v25 = vmul.f32 %v1754_v48, %v7904_v3 }
 0x9bc   :  { %v8340_v52 = vsub.f32 %v1739_v51, %v1759_v25  ;;  %v163_v25 = vld [vmem:[%s8390_s1 + $0x20] sm:$0xff] }
 0x9bd   :  { %1951 = vmatpush.msra.mxu3 %v163_v25 }
 0x9be   :  { %v1769_v22 = vmul.f32 %v8340_v52, %v8340_v52 }
 0x9bf   :  { %1952 = vmatpush.msra.mxu3 %v162_v54 }
 0x9c0   :  { %v1782_v5 = vsel %vm895_vm12, %v1769_v22, 0.0 }
 0x9c1   :  { %1783 = vadd.xlane.f32.xlu1 %v1782_v5 }
 0x9ed   :  { %v1772_v58 = vpop.xlane.xlu0 %1771 }
 0x9ee   :  { %v1785_v59 = vmul.f32 %v1772_v58, %v7904_v3  ;;  %v161_v58 = vld [vmem:[%s8390_s1 + $0x10] sm:$0xff] }
 0x9ef   :  { %1953 = vmatpush.msra.mxu3 %v161_v58 }
 0x9f0   :  { %v1790_v0 = vadd.f32 1e-05, %v1785_v59 }
 0x9f2   :  { %7306 = vrsqrt.f32 %v1790_v0  ;;  %vm1801_vm11 = vweird.f32 %v1790_v0 }
 0x9f5   :  { %v1775_v41 = vpop.xlane.xlu1 %1774 }
 0x9f6   :  { %v1786_v4 = vmul.f32 %v1775_v41, %v7904_v3 }
 0x9f8   :  { %v7307_v1 = vpop.eup %7306  ;;  %v1791_v47 = vadd.f32 1e-05, %v1786_v4 }
 0x9f9   :  { %v1796_v36 = vmul.f32 %v7307_v1, %v1790_v0  ;;  %vm1802_vm6 = vweird.f32 %v7307_v1  ;;  %v160_v0 = vld [vmem:[%s8390_s1 + $0x8] sm:$0xff] }
 0x9fa   :  { %7308 = vrsqrt.f32 %v1791_v47  ;;  %vm1803_vm13 = vmor %vm1801_vm11, %vm1802_vm6  ;;  %vm1811_vm15 = vweird.f32 %v1791_v47  ;;  %1954 = vmatpush.msra.mxu3 %v160_v0 }
 0x9fb   :  { %v1797_v49 = vmul.f32 %v7307_v1, %v1796_v36 }
 0x9fd   :  { %v1798_v10 = vmul.f32 0.5, %v1797_v49  ;;  %v1778_v13 = vpop.xlane.xlu2 %1777 }
 0x9fe   :  { %v1787_v11 = vmul.f32 %v1778_v13, %v7904_v3 }
 0x9ff   :  { %v1799_v15 = vsub.f32 1.5, %v1798_v10 }
 0xa00   :  { %v7309_v7 = vpop.eup %7308  ;;  %v1792_v16 = vadd.f32 1e-05, %v1787_v11 }
 0xa01   :  { %v1800_v40 = vmul.f32 %v7307_v1, %v1799_v15  ;;  %v1806_v55 = vmul.f32 %v7309_v7, %v1791_v47  ;;  %vm1812_vm14 = vweird.f32 %v7309_v7 }
 0xa02   :  { %7310 = vrsqrt.f32 %v1792_v16  ;;  %vm1813_vm5 = vmor %vm1811_vm15, %vm1812_vm14  ;;  %vm1821_vm3 = vweird.f32 %v1792_v16 }
 0xa03   :  { %v1804_v17 = vsel %vm1803_vm13, %v7307_v1, %v1800_v40  ;;  %v1807_v20 = vmul.f32 %v7309_v7, %v1806_v55 }
 0xa04   :  { %v1845_v63 = vmul.f32 %v1804_v17, %v8311_v57 }
 0xa05   :  { %v1808_v37 = vmul.f32 0.5, %v1807_v20 }
 0xa06   :  { %v1853_v28 = vmul.f32 %v8361_v35, %v1845_v63  ;;  %v173_v63 = vld [vmem:[%s8417_s27] sm:$0xff] }
 0xa07   :  { %v1809_v60 = vsub.f32 1.5, %v1808_v37 }
 0xa08   :  { %v7311_v30 = vpop.eup %7310  ;;  %v8369_v32 = vadd.f32 %v8365_v21, %v1853_v28 }
 0xa09   :  { %v1810_v51 = vmul.f32 %v7309_v7, %v1809_v60  ;;  %v1816_v33 = vmul.f32 %v7311_v30, %v1792_v16  ;;  %vm1822_vm10 = vweird.f32 %v7311_v30 }
 0xa0a   :  { %6765 = vmatmul.msk.f32.vlgmr.msrb.gmra.mxu1 %vm222_vm0, %v8369_v32  ;;  %vm1823_vm2 = vmor %vm1821_vm3, %vm1822_vm10 }
 0xa0b   :  { %v1817_v62 = vmul.f32 %v7311_v30, %v1816_v33  ;;  %v1814_v34 = vsel %vm1813_vm5, %v7309_v7, %v1810_v51  ;;  %vm10185_vm5 = vcmask 523264  }
 0xa0c   :  { %v1846_v57 = vmul.f32 %v1814_v34, %v8317_v18 }
 0xa0d   :  { %v1818_v6 = vmul.f32 0.5, %v1817_v62 }
 0xa0e   :  { %v1854_v50 = vmul.f32 %v8361_v35, %v1846_v57 }
 0xa0f   :  { %v1819_v61 = vsub.f32 1.5, %v1818_v6 }
 0xa10   :  { %v8376_v12 = vadd.f32 %v8365_v21, %v1854_v50 }
 0xa11   :  { %v1820_v24 = vmul.f32 %v7311_v30, %v1819_v61 }
 0xa12   :  { %6766 = vmatmul.msk.f32.gmra.mxu1 %vm222_vm0, %v8376_v12 }
 0xa13   :  { %v1824_v29 = vsel %vm1823_vm2, %v7311_v30, %v1820_v24 }
 0xa14   :  { %v1847_v46 = vmul.f32 %v1824_v29, %v8328_v42 }
 0xa16   :  { %v1855_v43 = vmul.f32 %v8361_v35, %v1847_v46 }
 0xa18   :  { %v8383_v18 = vadd.f32 %v8365_v21, %v1855_v43 }
 0xa1a   :  { %6767 = vmatmul.msk.f32.gmra.mxu1 %vm222_vm0, %v8383_v18 }
 0xa2c   :  { %v1781_v42 = vpop.xlane.xlu0 %1780 }
 0xa2d   :  { %v1788_v8 = vmul.f32 %v1781_v42, %v7904_v3 }
 0xa2f   :  { %v1793_v39 = vadd.f32 1e-05, %v1788_v8  ;;  %v7208_v8 = vld [vmem:[%s8412_s15] ss:$0 sm:$0xff] }
 0xa31   :  { %7312 = vrsqrt.f32 %v1793_v39  ;;  %vm1831_vm6 = vweird.f32 %v1793_v39 }
 0xa34   :  { %v1784_v45 = vpop.xlane.xlu1 %1783 }
 0xa35   :  { %v1789_v48 = vmul.f32 %v1784_v45, %v7904_v3 }
 0xa37   :  { %v7313_v22 = vpop.eup %7312  ;;  %v1794_v5 = vadd.f32 1e-05, %v1789_v48 }
 0xa38   :  { %v1826_v56 = vmul.f32 %v7313_v22, %v1793_v39  ;;  %vm1832_vm7 = vweird.f32 %v7313_v22 }
 0xa39   :  { %7314 = vrsqrt.f32 %v1794_v5  ;;  %vm1833_vm11 = vmor %vm1831_vm6, %vm1832_vm7  ;;  %vm1841_vm14 = vweird.f32 %v1794_v5 }
 0xa3a   :  { %v1827_v59 = vmul.f32 %v7313_v22, %v1826_v56 }
 0xa3c   :  { %v1828_v41 = vmul.f32 0.5, %v1827_v59 }
 0xa3e   :  { %v1829_v4 = vsub.f32 1.5, %v1828_v41 }
 0xa3f   :  { %v7315_v1 = vpop.eup %7314 }
 0xa40   :  { %v1830_v47 = vmul.f32 %v7313_v22, %v1829_v4  ;;  %v1836_v36 = vmul.f32 %v7315_v1, %v1794_v5  ;;  %vm1842_vm13 = vweird.f32 %v7315_v1 }
 0xa41   :  { %vm1843_vm15 = vmor %vm1841_vm14, %vm1842_vm13 }
 0xa42   :  { %v1837_v49 = vmul.f32 %v7315_v1, %v1836_v36  ;;  %v1834_v10 = vsel %vm1833_vm11, %v7313_v22, %v1830_v47 }
 0xa43   :  { %v1848_v13 = vmul.f32 %v1834_v10, %v8334_v19 }
 0xa44   :  { %v1838_v11 = vmul.f32 0.5, %v1837_v49 }
 0xa45   :  { %v1856_v15 = vmul.f32 %v8361_v35, %v1848_v13 }
 0xa46   :  { %v1839_v7 = vsub.f32 1.5, %v1838_v11 }
 0xa47   :  { %v1864_v16 = vadd.f32 %v8365_v21, %v1856_v15 }
 0xa48   :  { %v1840_v40 = vmul.f32 %v7315_v1, %v1839_v7 }
 0xa49   :  { %6768 = vmatmul.msk.f32.gmra.mxu1 %vm222_vm0, %v1864_v16 }
 0xa4a   :  { %v1844_v55 = vsel %vm1843_vm15, %v7315_v1, %v1840_v40 }
 0xa4b   :  { %v1849_v17 = vmul.f32 %v1844_v55, %v8340_v52  ;;  %v159_v52 = vld [vmem:[%s8390_s1] sm:$0xff] }
 0xa4c   :  { %1955 = vmatpush.msra.mxu3 %v159_v52 }
 0xa4d   :  { %v1857_v20 = vmul.f32 %v8361_v35, %v1849_v17  ;;  %v174_v35 = vld [vmem:[%s8417_s27 + $0x8] sm:$0xff] }
 0xa4e   :  { %2275 = vmatpush.msrb.mxu3 %v174_v35 }
 0xa4f   :  { %v1865_v19 = vadd.f32 %v8365_v21, %v1857_v20  ;;  %v7207_v21 = vld [vmem:[%s8348_s12] ss:$0 sm:$0xff] }
 0xa50   :  { %2276 = vmatpush.msrb.mxu3 %v173_v63 }
 0xa51   :  { %6769 = vmatmul.msk.f32.gmra.mxu1 %vm222_vm0, %v1865_v19 }
 0xa87   :  { %v1901_v37 = vpop.f32.mrf.mxu1 }
 0xa88   :  { %v1902_v28 = vadd.f32 %v7207_v21, %v1901_v37 }
 0xa8a   :  { %v1916_v60 = vmax.f32 %v1902_v28, 0.0 }
 0xa8c   :  { %6770 = vmatmul.msk.f32.vlgmr.msra.gmra.mxu3 %vm10185_vm5, %v1916_v60 }
 0xa8d   :  { %6814 = vmatpush.xpose.msk.msra.mxu3 %vm304_vm1, %v7759_v26 }
 0xa8f   :  { %v1904_v30 = vpop.f32.mrf.mxu1 }
 0xa90   :  { %v1905_v51 = vadd.f32 %v7207_v21, %v1904_v30 }
 0xa92   :  { %v1917_v33 = vmax.f32 %v1905_v51, 0.0 }
 0xa94   :  { %6771 = vmatmul.msk.f32.gmra.mxu3 %vm10185_vm5, %v1917_v33 }
 0xa97   :  { %v1907_v62 = vpop.f32.mrf.mxu1 }
 0xa98   :  { %v1908_v34 = vadd.f32 %v7207_v21, %v1907_v62 }
 0xa9a   :  { %v1918_v57 = vmax.f32 %v1908_v34, 0.0 }
 0xa9c   :  { %6772 = vmatmul.msk.f32.gmra.mxu3 %vm10185_vm5, %v1918_v57 }
 0xac6   :  { %v1910_v6 = vpop.f32.mrf.mxu1 }
 0xac7   :  { %v1911_v50 = vadd.f32 %v7207_v21, %v1910_v6 }
 0xac9   :  { %v1919_v61 = vmax.f32 %v1911_v50, 0.0 }
 0xacb   :  { %6773 = vmatmul.msk.f32.gmra.mxu3 %vm10185_vm5, %v1919_v61 }
 0xace   :  { %v1913_v24 = vpop.f32.mrf.mxu1 }
 0xacf   :  { %v1914_v29 = vadd.f32 %v7207_v21, %v1913_v24 }
 0xad1   :  { %v1920_v46 = vmax.f32 %v1914_v29, 0.0 }
 0xad3   :  { %6774 = vmatmul.msk.f32.gmra.mxu3 %vm10185_vm5, %v1920_v46 }
 0xb0f   :  { %v1957_v43 = vpop.f32.mrf.mxu3 }
 0xb10   :  { %v1958_v22 = vadd.f32 %v7208_v8, %v1957_v43 }
 0xb12   :  { %v1972_v58 = vadd.f32 %v1958_v22, %v8369_v32 }
 0xb17   :  { %v1960_v42 = vpop.f32.mrf.mxu3 }
 0xb18   :  { %v1961_v0 = vadd.f32 %v7208_v8, %v1960_v42 }
 0xb1a   :  { %v1973_v4 = vadd.f32 %v1961_v0, %v8376_v12 }
 0xb1c   :  { %v1980_v1 = vsel %vm222_vm0, %v1973_v4, 0.0 }
 0xb1f   :  { %v1963_v39 = vpop.f32.mrf.mxu3 }
 0xb20   :  { %v1964_v27 = vadd.f32 %v7208_v8, %v1963_v39 }
 0xb22   :  { %v1974_v38 = vadd.f32 %v1964_v27, %v8383_v18  ;;  %v1977_v18 = vsel %vm222_vm0, %v1972_v58, 0.0 }
 0xb24   :  { %v1983_v2 = vsel %vm222_vm0, %v1974_v38, 0.0 }
 0xb25   :  { %1984 = vadd.xlane.f32.xlu1 %v1983_v2 }
 0xb4e   :  { %v1966_v45 = vpop.f32.mrf.mxu3 }
 0xb4f   :  { %v1967_v48 = vadd.f32 %v7208_v8, %v1966_v45 }
 0xb51   :  { %v1975_v25 = vadd.f32 %v1967_v48, %v1864_v16 }
 0xb53   :  { %v1986_v5 = vsel %vm222_vm0, %v1975_v25, 0.0 }
 0xb54   :  { %1987 = vadd.xlane.f32.xlu0 %v1986_v5 }
 0xb56   :  { %v1969_v54 = vpop.f32.mrf.mxu3 }
 0xb57   :  { %v1970_v56 = vadd.f32 %v7208_v8, %v1969_v54 }
 0xb59   :  { %v1976_v59 = vadd.f32 %v1970_v56, %v1865_v19 }
 0xb5b   :  { %v1989_v41 = vsel %vm895_vm12, %v1976_v59, 0.0 }
 0xb5c   :  { %1990 = vadd.xlane.f32.xlu2 %v1989_v41  ;;  %1978 = vadd.xlane.f32.xlu0 %v1977_v18 }
 0xb64   :  { %1981 = vadd.xlane.f32.xlu2 %v1980_v1 }
 0xb98   :  { %v1985_v47 = vpop.xlane.xlu1 %1984 }
 0xb99   :  { %v1994_v36 = vmul.f32 %v1985_v47, %v7904_v3 }
 0xb9b   :  { %v8440_v49 = vsub.f32 %v1974_v38, %v1994_v36 }
 0xb9d   :  { %v2004_v32 = vmul.f32 %v8440_v49, %v8440_v49 }
 0xb9f   :  { %v2013_v10 = vsel %vm222_vm0, %v2004_v32, 0.0 }
 0xba0   :  { %2014 = vadd.xlane.f32.xlu0 %v2013_v10 }
 0xbc7   :  { %v1988_v12 = vpop.xlane.xlu0 %1987 }
 0xbc8   :  { %v1995_v13 = vmul.f32 %v1988_v12, %v7904_v3 }
 0xbca   :  { %v8456_v11 = vsub.f32 %v1975_v25, %v1995_v13 }
 0xbcc   :  { %v2005_v15 = vmul.f32 %v8456_v11, %v8456_v11 }
 0xbce   :  { %v2016_v7 = vsel %vm222_vm0, %v2005_v15, 0.0 }
 0xbcf   :  { %v1991_v16 = vpop.xlane.xlu2 %1990  ;;  %2017 = vadd.xlane.f32.xlu2 %v2016_v7  ;;  %v1979_v40 = vpop.xlane.xlu0 %1978 }
 0xbd0   :  { %v1996_v55 = vmul.f32 %v1991_v16, %v7904_v3  ;;  %v1992_v17 = vmul.f32 %v1979_v40, %v7904_v3 }
 0xbd2   :  { %v8463_v20 = vsub.f32 %v1976_v59, %v1996_v55  ;;  %v8465_v19 = vsub.f32 %v1972_v58, %v1992_v17 }
 0xbd4   :  { %v2002_v52 = vmul.f32 %v8465_v19, %v8465_v19  ;;  %v2006_v35 = vmul.f32 %v8463_v20, %v8463_v20 }
 0xbd6   :  { %v2007_v63 = vsel %vm222_vm0, %v2002_v52, 0.0  ;;  %v2019_v21 = vsel %vm895_vm12, %v2006_v35, 0.0 }
 0xbd7   :  { %v1982_v37 = vpop.xlane.xlu2 %1981  ;;  %2008 = vadd.xlane.f32.xlu2 %v2007_v63  ;;  %2020 = vadd.xlane.f32.xlu1 %v2019_v21  ;;  %v7209_v63 = vld [vmem:[%s8448_s9] ss:$0 sm:$0xff] }
 0xbd8   :  { %v1993_v28 = vmul.f32 %v1982_v37, %v7904_v3 }
 0xbda   :  { %v8474_v60 = vsub.f32 %v1973_v4, %v1993_v28 }
 0xbdc   :  { %v2003_v30 = vmul.f32 %v8474_v60, %v8474_v60 }
 0xbde   :  { %v2010_v51 = vsel %vm222_vm0, %v2003_v30, 0.0 }
 0xbdf   :  { %2011 = vadd.xlane.f32.xlu1 %v2010_v51 }
 0xc13   :  { %v2015_v33 = vpop.xlane.xlu0 %2014 }
 0xc14   :  { %v2024_v62 = vmul.f32 %v2015_v33, %v7904_v3 }
 0xc16   :  { %v2029_v34 = vadd.f32 1e-05, %v2024_v62 }
 0xc18   :  { %7316 = vrsqrt.f32 %v2029_v34  ;;  %vm2058_vm6 = vweird.f32 %v2029_v34 }
 0xc1e   :  { %v7317_v61 = vpop.eup %7316 }
 0xc1f   :  { %v2053_v46 = vmul.f32 %v7317_v61, %v2029_v34  ;;  %vm2059_vm2 = vweird.f32 %v7317_v61 }
 0xc20   :  { %vm2060_vm13 = vmor %vm2058_vm6, %vm2059_vm2 }
 0xc21   :  { %v2054_v2 = vmul.f32 %v7317_v61, %v2053_v46 }
 0xc23   :  { %v2055_v22 = vmul.f32 0.5, %v2054_v2  ;;  %v217_v2 = vld [vmem:[%s8495_s16 + $0x18] sm:$0xff] }
 0xc25   :  { %v2056_v41 = vsub.f32 1.5, %v2055_v22 }
 0xc27   :  { %v2057_v32 = vmul.f32 %v7317_v61, %v2056_v41 }
 0xc29   :  { %v2061_v17 = vsel %vm2060_vm13, %v7317_v61, %v2057_v32 }
 0xc2a   :  { %v2084_v30 = vmul.f32 %v2061_v17, %v8440_v49  ;;  %v7550_v17 = vld [vmem:[%s7909_s11 + $0x8] sm:$0xff] }
 0xc42   :  { %v2018_v57 = vpop.xlane.xlu2 %2017 }
 0xc43   :  { %v2025_v6 = vmul.f32 %v2018_v57, %v7904_v3 }
 0xc45   :  { %v2030_v50 = vadd.f32 1e-05, %v2025_v6 }
 0xc47   :  { %7318 = vrsqrt.f32 %v2030_v50  ;;  %vm2068_vm3 = vweird.f32 %v2030_v50 }
 0xc4a   :  { %v2009_v24 = vpop.xlane.xlu2 %2008  ;;  %v2021_v29 = vpop.xlane.xlu1 %2020 }
 0xc4b   :  { %v2022_v43 = vmul.f32 %v2009_v24, %v7904_v3  ;;  %v2026_v42 = vmul.f32 %v2021_v29, %v7904_v3 }
 0xc4d   :  { %v7319_v8 = vpop.eup %7318  ;;  %v2027_v39 = vadd.f32 1e-05, %v2022_v43  ;;  %v2031_v27 = vadd.f32 1e-05, %v2026_v42 }
 0xc4e   :  { %v2063_v38 = vmul.f32 %v7319_v8, %v2030_v50  ;;  %vm2069_vm10 = vweird.f32 %v7319_v8  ;;  %v2092_v50 = vmul.f32 %v7209_v63, %v2084_v30 }
 0xc4f   :  { %7320 = vrsqrt.f32 %v2027_v39  ;;  %vm2070_vm7 = vmor %vm2068_vm3, %vm2069_vm10  ;;  %vm2078_vm14 = vweird.f32 %v2031_v27  ;;  %vm2038_vm10 = vweird.f32 %v2027_v39 }
 0xc50   :  { %v2064_v45 = vmul.f32 %v7319_v8, %v2063_v38  ;;  %7322 = vrsqrt.f32 %v2031_v27  ;;  %v216_v38 = vld [vmem:[%s8495_s16 + $0x10] sm:$0xff] }
 0xc52   :  { %v2065_v48 = vmul.f32 0.5, %v2064_v45  ;;  %v2012_v25 = vpop.xlane.xlu1 %2011  ;;  %v218_v45 = vld [vmem:[%s8495_s16 + $0x20] sm:$0x3] }
 0xc53   :  { %v2023_v5 = vmul.f32 %v2012_v25, %v7904_v3  ;;  %v7548_v25 = vld [vmem:[%s7855_s28 + $0x8] sm:$0xff] }
 0xc54   :  { %v2066_v54 = vsub.f32 1.5, %v2065_v48 }
 0xc55   :  { %v7321_v56 = vpop.eup %7320  ;;  %v2028_v58 = vadd.f32 1e-05, %v2023_v5 }
 0xc56   :  { %v7323_v59 = vpop.eup %7322  ;;  %v2033_v0 = vmul.f32 %v7321_v56, %v2027_v39  ;;  %v2067_v4 = vmul.f32 %v7319_v8, %v2066_v54  ;;  %vm2039_vm15 = vweird.f32 %v7321_v56  ;;  %v7547_v39 = vld [vmem:[%s7704_s6] sm:$0xff] }
 0xc57   :  { %v2073_v18 = vmul.f32 %v7323_v59, %v2031_v27  ;;  %7324 = vrsqrt.f32 %v2028_v58  ;;  %vm2079_vm11 = vweird.f32 %v7323_v59  ;;  %vm2040_vm3 = vmor %vm2038_vm10, %vm2039_vm15  ;;  %v215_v27 = vld [vmem:[%s8495_s16 + $0x8] sm:$0xff] }
 0xc58   :  { %v2034_v1 = vmul.f32 %v7321_v56, %v2033_v0  ;;  %v2071_v13 = vsel %vm2070_vm7, %v7319_v8, %v2067_v4  ;;  %vm2080_vm5 = vmor %vm2078_vm14, %vm2079_vm11  ;;  %vm2048_vm7 = vweird.f32 %v2028_v58  ;;  %v214_v8 = vld [vmem:[%s8495_s16] sm:$0xff] }
 0xc59   :  { %v2074_v47 = vmul.f32 %v7323_v59, %v2073_v18  ;;  %v2085_v55 = vmul.f32 %v2071_v13, %v8456_v11  ;;  %v7210_v11 = vld [vmem:[%s8453_s14] ss:$0 sm:$0xff] }
 0xc5a   :  { %v2035_v36 = vmul.f32 0.5, %v2034_v1  ;;  %v7211_v18 = vld [vmem:[%s8528_s5] ss:$0 sm:$0xff]  ;;  %s10235_s5 = smov 112  }
 0xc5b   :  { %v2075_v10 = vmul.f32 0.5, %v2074_v47  ;;  %v2093_v51 = vmul.f32 %v7209_v63, %v2085_v55 }
 0xc5c   :  { %v2036_v12 = vsub.f32 1.5, %v2035_v36 }
 0xc5d   :  { %v7325_v15 = vpop.eup %7324  ;;  %v2076_v7 = vsub.f32 1.5, %v2075_v10  ;;  %v8499_v49 = vadd.f32 %v7210_v11, %v2093_v51 }
 0xc5e   :  { %v2043_v16 = vmul.f32 %v7325_v15, %v2028_v58  ;;  %v2037_v52 = vmul.f32 %v7321_v56, %v2036_v12  ;;  %vm2049_vm2 = vweird.f32 %v7325_v15 }
 0xc5f   :  { %v2077_v40 = vmul.f32 %v7323_v59, %v2076_v7  ;;  %vm2050_vm6 = vmor %vm2048_vm7, %vm2049_vm2  ;;  %vm10211_vm7 = vcmask 25600  }
 0xc60   :  { %v2044_v35 = vmul.f32 %v7325_v15, %v2043_v16  ;;  %v2041_v34 = vsel %vm2040_vm3, %v7321_v56, %v2037_v52  ;;  %v7551_v52 = vld [vmem:[%s7909_s11] sm:$0xff]  ;;  %s10232_s11 = smov 104  }
 0xc61   :  { %v2081_v21 = vsel %vm2080_vm5, %v7323_v59, %v2077_v40  ;;  %v2082_v61 = vmul.f32 %v2041_v34, %v8465_v19  ;;  %v8503_v19 = vadd.f32 %v7210_v11, %v2092_v50  ;;  %v7549_v40 = vld [vmem:[%s7855_s28] sm:$0xff]  ;;  %s8567_s28 = sld [smem:[%s10179_s0 + %s7689_s19]]   ;;  %s10202_s19 = smov 120   ;;  %vm10203_vm5 = vcmask 31744  }
 0xc62   :  { %v2086_v37 = vmul.f32 %v2081_v21, %v8463_v20  ;;  %v2045_v28 = vmul.f32 0.5, %v2044_v35  ;;  %vm10204_vm11 = vmmov %vm10203_vm5 }
 0xc63   :  { %v2090_v46 = vmul.f32 %v7209_v63, %v2082_v61  ;;  %vm10205_vm13 = vmmov %vm10203_vm5 }
 0xc64   :  { %v2094_v33 = vmul.f32 %v7209_v63, %v2086_v37  ;;  %v2046_v62 = vsub.f32 1.5, %v2045_v28  ;;  %v7212_v28 = vld [vmem:[%s8550_s30] ss:$0 sm:$0xff]  ;;  %vm10206_vm14 = vmmov %vm10203_vm5 }
 0xc65   :  { %v8509_v42 = vadd.f32 %v7210_v11, %v2090_v46  ;;  %vm10207_vm15 = vmmov %vm10203_vm5 }
 0xc66   :  { %v2047_v57 = vmul.f32 %v7325_v15, %v2046_v62  ;;  %v8489_v6 = vadd.f32 %v7210_v11, %v2094_v33  ;;  %v198_v33 = vld [vmem:[%s8562_s24] sm:$0xff]  ;;  %vm10208_vm10 = vmmov %vm10203_vm5 }
 0xc67   :  { %vm10209_vm3 = vmmov %vm10203_vm5 }
 0xc68   :  { %6775 = vmatpush.msk.msrb.mxu0 %vm1333_vm8, %v8489_v6  ;;  %v2051_v20 = vsel %vm2050_vm6, %v7325_v15, %v2047_v57  ;;  %vm10210_vm2 = vmmov %vm10209_vm3 }
 0xc69   :  { %v2083_v24 = vmul.f32 %v2051_v20, %v8474_v60  ;;  %v7546_v60 = vld [vmem:[%s7704_s6 + $0x8] sm:$0xff]  ;;  %vm10212_vm6 = vmmov %vm10211_vm7 }
 0xc6a   :  { %2133 = vmatpush.msrb.mxu0 %v8499_v49  ;;  %v199_v20 = vld [vmem:[%s8562_s24 + $0x8] sm:$0xff] }
 0xc6b   :  { %v2091_v29 = vmul.f32 %v7209_v63, %v2083_v24 }
 0xc6c   :  { %2134 = vmatpush.msrb.mxu0 %v8503_v19 }
 0xc6d   :  { %v8506_v43 = vadd.f32 %v7210_v11, %v2091_v29  ;;  %v193_v11 = vld [vmem:[%s8567_s28] sm:$0xff]  ;;  %v194_v29 = vld [vmem:[%s8567_s28 + $0x8] sm:$0xff] }
 0xc6f   :  { %2135 = vmatpush.msrb.mxu0 %v8506_v43 }
 0xc71   :  { %2136 = vmatpush.msrb.mxu0 %v8509_v42 }
 0xc72   :  { %6776 = vmatmul.msk.f32.vlgmr.msrb.gmra.mxu0 %vm1182_vm9, %v214_v8 }
 0xc73   :  { %2337 = vmatpush.msra.mxu0 %v7546_v60 }
 0xc75   :  { %2338 = vmatpush.msra.mxu0 %v7547_v39  ;;  %v200_v39 = vld [vmem:[%s8562_s24 + $0x10] sm:$0xff] }
 0xc77   :  { %6820 = vmatpush.msk.msrb.mxu0 %vm10196_vm4, %v7857_v53 }
 0xc7a   :  { %6777 = vmatmul.msk.f32.gmra.mxu0 %vm1182_vm9, %v215_v27 }
 0xc82   :  { %6778 = vmatmul.msk.f32.gmra.mxu0 %vm1182_vm9, %v216_v38 }
 0xc8a   :  { %6779 = vmatmul.msk.f32.gmra.mxu0 %vm1182_vm9, %v217_v2 }
 0xc92   :  { %6780 = vmatmul.msk.f32.gmra.mxu0 %vm1182_vm9, %v218_v45 }
 0xcef   :  { %v2138_v48 = vpop.f32.mrf.mxu0 }
 0xcf0   :  { %6781 = vmatmul.msk.f32.vlgmr.msra.gmra.mxu2 %vm222_vm0, %v2138_v48 }
 0xcf1   :  { %2838 = vmatpush.msra.mxu2 %v7548_v25  ;;  %v201_v25 = vld [vmem:[%s8562_s24 + $0x18] sm:$0xff] }
 0xcf7   :  { %v2141_v22 = vpop.f32.mrf.mxu0 }
 0xcf8   :  { %6782 = vmatmul.msk.f32.gmra.mxu2 %vm222_vm0, %v2141_v22 }
 0xcff   :  { %v2144_v5 = vpop.f32.mrf.mxu0 }
 0xd00   :  { %6783 = vmatmul.msk.f32.gmra.mxu2 %vm222_vm0, %v2144_v5  ;;  %v196_v5 = vld [vmem:[%s8567_s28 + $0x18] sm:$0xff] }
 0xd07   :  { %v2147_v54 = vpop.f32.mrf.mxu0 }
 0xd08   :  { %6784 = vmatmul.msk.f32.gmra.mxu2 %vm222_vm0, %v2147_v54 }
 0xd0f   :  { %v2150_v56 = vpop.f32.mrf.mxu0 }
 0xd10   :  { %6785 = vmatmul.msk.f32.gmra.mxu2 %vm222_vm0, %v2150_v56 }
 0xd73   :  { %v2188_v58 = vpop.f32.mrf.mxu2 }
 0xd74   :  { %v2189_v13 = vadd.f32 %v7211_v18, %v2188_v58 }
 0xd76   :  { %v2203_v16 = vmax.f32 %v2189_v13, 0.0 }
 0xd7b   :  { %v2191_v59 = vpop.f32.mrf.mxu2 }
 0xd7c   :  { %v2192_v10 = vadd.f32 %v7211_v18, %v2191_v59  ;;  %v202_v59 = vld [vmem:[%s8562_s24 + $0x20] sm:$0x3] }
 0xd7e   :  { %v2204_v7 = vmax.f32 %v2192_v10, 0.0 }
 0xd83   :  { %v2194_v0 = vpop.f32.mrf.mxu2 }
 0xd84   :  { %v2195_v36 = vadd.f32 %v7211_v18, %v2194_v0 }
 0xd86   :  { %v2205_v15 = vmax.f32 %v2195_v36, 0.0 }
 0xd8b   :  { %v2197_v41 = vpop.f32.mrf.mxu2 }
 0xd8c   :  { %v2198_v1 = vadd.f32 %v7211_v18, %v2197_v41  ;;  %v197_v41 = vld [vmem:[%s8567_s28 + $0x20] sm:$0x3] }
 0xd8e   :  { %v2206_v12 = vmax.f32 %v2198_v1, 0.0  ;;  %v7552_v1 = vld [vmem:[%s7712_s13] ss:$0 sm:$0xff] }
 0xd93   :  { %v2200_v4 = vpop.f32.mrf.mxu2 }
 0xd94   :  { %v2201_v47 = vadd.f32 %v7211_v18, %v2200_v4 }
 0xd96   :  { %v2207_v32 = vmax.f32 %v2201_v47, 0.0 }
 0xd98   :  { %6786 = vmatpush.msk.msra.mxu1 %vm1333_vm8, %v2207_v32 }
 0xd9a   :  { %2223 = vmatpush.msra.mxu1 %v2206_v12 }
 0xd9c   :  { %2224 = vmatpush.msra.mxu1 %v2205_v15 }
 0xd9e   :  { %2225 = vmatpush.msra.mxu1 %v2204_v7 }
 0xda0   :  { %2226 = vmatpush.msra.mxu1 %v2203_v16 }
 0xda1   :  { %6787 = vmatmul.msk.f32.vlgmr.msra.gmra.mxu1 %vm1182_vm9, %v214_v8 }
 0xda2   :  { %6808 = vmatpush.msk.msrb.mxu1 %vm10196_vm4, %v7830_v14 }
 0xda4   :  { %2885 = vmatpush.msra.mxu1 %v7549_v40 }
 0xda9   :  { %6788 = vmatmul.msk.f32.gmra.mxu1 %vm1182_vm9, %v215_v27 }
 0xdb1   :  { %6789 = vmatmul.msk.f32.gmra.mxu1 %vm1182_vm9, %v216_v38 }
 0xdb9   :  { %6790 = vmatmul.msk.f32.gmra.mxu1 %vm1182_vm9, %v217_v2 }
 0xdc1   :  { %6791 = vmatmul.msk.f32.gmra.mxu1 %vm1182_vm9, %v218_v45 }
 0xe1e   :  { %v2228_v55 = vpop.f32.mrf.mxu1 }
 0xe1f   :  { %6792 = vmatmul.msk.f32.vlgmr.msrb.gmra.mxu3 %vm222_vm0, %v2228_v55 }
 0xe20   :  { %3061 = vmatpush.msrb.mxu3 %v7550_v17 }
 0xe22   :  { %3062 = vmatpush.msrb.mxu3 %v7551_v52 }
 0xe26   :  { %v2231_v35 = vpop.f32.mrf.mxu1 }
 0xe27   :  { %6793 = vmatmul.msk.f32.gmra.mxu3 %vm222_vm0, %v2231_v35  ;;  %v7553_v35 = vld [vmem:[%s7769_s23] sm:$0xff] }
 0xe2e   :  { %v2234_v63 = vpop.f32.mrf.mxu1 }
 0xe2f   :  { %6794 = vmatmul.msk.f32.gmra.mxu3 %vm222_vm0, %v2234_v63 }
 0xe36   :  { %v2237_v21 = vpop.f32.mrf.mxu1 }
 0xe37   :  { %6795 = vmatmul.msk.f32.gmra.mxu3 %vm222_vm0, %v2237_v21 }
 0xe3e   :  { %v2240_v37 = vpop.f32.mrf.mxu1 }
 0xe3f   :  { %6796 = vmatmul.msk.f32.gmra.mxu3 %vm222_vm0, %v2240_v37 }
 0xea2   :  { %v2278_v30 = vpop.f32.mrf.mxu3 }
 0xea3   :  { %v2279_v51 = vadd.f32 %v7212_v28, %v2278_v30 }
 0xea5   :  { %v8572_v62 = vadd.f32 %v2279_v51, %v8509_v42  ;;  %v7554_v51 = vld [vmem:[%s7769_s23 + $0x8] sm:$0xff] }
 0xea7   :  { %v2298_v34 = vmul.f32 %v8572_v62, %v198_v33 }
 0xea9   :  { %v8576_v57 = vadd.f32 %v2298_v34, %v193_v11 }
 0xeaa   :  { %v2281_v50 = vpop.f32.mrf.mxu3 }
 0xeab   :  { %v2282_v61 = vadd.f32 %v7212_v28, %v2281_v50  ;;  %6797 = vmatmul.msk.f32.vlgmr.msra.gmra.mxu0 %vm222_vm0, %v8576_v57 }
 0xeac   :  { %3093 = vmatpush.msra.mxu0 %v7982_v31 }
 0xead   :  { %v8583_v24 = vadd.f32 %v2282_v61, %v8506_v43  ;;  %v195_v43 = vld [vmem:[%s8567_s28 + $0x10] sm:$0xff] }
 0xeae   :  { %3094 = vmatpush.msra.mxu0 %v7986_v44 }
 0xeaf   :  { %v2299_v46 = vmul.f32 %v8583_v24, %v199_v20 }
 0xeb1   :  { %v8588_v42 = vadd.f32 %v2299_v46, %v194_v29 }
 0xeb2   :  { %v2284_v8 = vpop.f32.mrf.mxu3 }
 0xeb3   :  { %v2285_v60 = vadd.f32 %v7212_v28, %v2284_v8  ;;  %6798 = vmatmul.msk.f32.gmra.mxu0 %vm222_vm0, %v8588_v42 }
 0xeb5   :  { %v8594_v27 = vadd.f32 %v2285_v60, %v8503_v19 }
 0xeb7   :  { %v2300_v38 = vmul.f32 %v8594_v27, %v200_v39 }
 0xeb9   :  { %v8598_v2 = vadd.f32 %v2300_v38, %v195_v43 }
 0xeba   :  { %v2287_v45 = vpop.f32.mrf.mxu3 }
 0xebb   :  { %v2288_v48 = vadd.f32 %v7212_v28, %v2287_v45  ;;  %6799 = vmatmul.msk.f32.gmra.mxu0 %vm222_vm0, %v8598_v2 }
 0xebd   :  { %v8604_v22 = vadd.f32 %v2288_v48, %v8499_v49 }
 0xebf   :  { %v2301_v19 = vmul.f32 %v8604_v22, %v201_v25 }
 0xec1   :  { %v8608_v54 = vadd.f32 %v2301_v19, %v196_v5  ;;  %v7555_v5 = vld [vmem:[%s7769_s23 + $0x10] sm:$0xff] }
 0xec2   :  { %v2290_v56 = vpop.f32.mrf.mxu3 }
 0xec3   :  { %v2291_v58 = vadd.f32 %v7212_v28, %v2290_v56  ;;  %6800 = vmatmul.msk.f32.gmra.mxu0 %vm222_vm0, %v8608_v54 }
 0xec5   :  { %v8614_v0 = vadd.f32 %v2291_v58, %v8489_v6 }
 0xec7   :  { %v2302_v18 = vmul.f32 %v8614_v0, %v202_v59 }
 0xec9   :  { %v8618_v4 = vadd.f32 %v2302_v18, %v197_v41 }
 0xecb   :  { %6801 = vmatmul.msk.f32.gmra.mxu0 %vm222_vm0, %v8618_v4 }
 0xf28   :  { %v2340_v49 = vpop.f32.mrf.mxu0 }
 0xf29   :  { %v2341_v47 = vadd.f32 %v7552_v1, %v2340_v49 }
 0xf2b   :  { %2579 = vrot.lane.b32.xlu0 %v2341_v47, %s10202_s19  ;;  %6803 = vmatmul.msk.f32.vlgmr.msrb.gmra.mxu2 %vm304_vm1, %v2341_v47  ;;  %v7556_v47 = vld [vmem:[%s7769_s23 + $0x18] sm:$0xff] }
 0xf30   :  { %v2343_v36 = vpop.f32.mrf.mxu0 }
 0xf31   :  { %v2344_v32 = vadd.f32 %v7552_v1, %v2343_v36 }
 0xf33   :  { %2581 = vrot.lane.b32.xlu1 %v2344_v32, %s10202_s19  ;;  %6804 = vmatmul.msk.f32.gmra.mxu2 %vm304_vm1, %v2344_v32 }
 0xf38   :  { %v2346_v6 = vpop.f32.mrf.mxu0 }
 0xf39   :  { %v2347_v10 = vadd.f32 %v7552_v1, %v2346_v6 }
 0xf3b   :  { %2583 = vrot.lane.b32.xlu2 %v2347_v10, %s10202_s19  ;;  %6805 = vmatmul.msk.f32.gmra.mxu2 %vm304_vm1, %v2347_v10 }
 0xf40   :  { %v2349_v12 = vpop.f32.mrf.mxu0 }
 0xf41   :  { %v2350_v13 = vadd.f32 %v7552_v1, %v2349_v12 }
 0xf43   :  { %2585 = vrot.lane.b32.xlu0 %v2350_v13, %s10202_s19  ;;  %6806 = vmatmul.msk.f32.gmra.mxu2 %vm304_vm1, %v2350_v13 }
 0xf48   :  { %v2352_v15 = vpop.f32.mrf.mxu0 }
 0xf49   :  { %v2353_v7 = vadd.f32 %v7552_v1, %v2352_v15 }
 0xf4b   :  { %2587 = vrot.lane.b32.xlu0 %v2353_v7, %s10202_s19  ;;  %6807 = vmatmul.msk.f32.gmra.mxu2 %vm304_vm1, %v2353_v7 }
 0xf95   :  { %v2584_v55 = vpop.permute.xlu2 %2583 }
 0xf9d   :  { %v2580_v16 = vpop.permute.xlu0 %2579 }
 0xf9e   :  { %6815 = vmatmul.msk.f32.vlgmr.msra.gmra.mxu3 %vm304_vm1, %v2580_v16 }
 0xfa5   :  { %v2582_v40 = vpop.permute.xlu1 %2581 }
 0xfa6   :  { %6816 = vmatmul.msk.f32.gmra.mxu3 %vm304_vm1, %v2582_v40 }
 0xfae   :  { %v2387_v17 = vpop.f32.mrf.mxu2  ;;  %6817 = vmatmul.msk.f32.gmra.mxu3 %vm304_vm1, %v2584_v55  ;;  %v7557_v55 = vld [vmem:[%s7769_s23 + $0x20] sm:$0x3] }
 0xfaf   :  { %v2402_v52 = vmul.f32 0.35355338, %v2387_v17 }
 0xfb1   :  { %v2407_v63 = vadd.f32 %v7553_v35, %v2402_v52 }
 0xfb3   :  { %v2412_v21 = vsel %vm10203_vm5, %v2407_v63, -inf  ;;  %vm10213_vm5 = vmmov %vm10210_vm2 }
 0xfb4   :  { %2413 = vmax.xlane.f32.xlu2 %v2412_v21 }
 0xfb5   :  { %v2586_v37 = vpop.permute.xlu0 %2585 }
 0xfb6   :  { %v2390_v28 = vpop.f32.mrf.mxu2  ;;  %6818 = vmatmul.msk.f32.gmra.mxu3 %vm304_vm1, %v2586_v37 }
 0xfb7   :  { %v2403_v30 = vmul.f32 0.35355338, %v2390_v28 }
 0xfb9   :  { %v2408_v33 = vadd.f32 %v7554_v51, %v2403_v30 }
 0xfbb   :  { %v2415_v11 = vsel %vm10204_vm11, %v2408_v33, -inf  ;;  %vm10214_vm11 = vmmov %vm10210_vm2 }
 0xfbc   :  { %2416 = vmax.xlane.f32.xlu2 %v2415_v11 }
 0xfbd   :  { %v2588_v34 = vpop.permute.xlu0 %2587 }
 0xfbe   :  { %6819 = vmatmul.msk.f32.gmra.mxu3 %vm304_vm1, %v2588_v34  ;;  %v2393_v46 = vpop.f32.mrf.mxu2 }
 0xfbf   :  { %v2404_v43 = vmul.f32 0.35355338, %v2393_v46 }
 0xfc1   :  { %v2409_v19 = vadd.f32 %v7555_v5, %v2404_v43 }
 0xfc3   :  { %v2418_v41 = vsel %vm10208_vm10, %v2409_v19, -inf  ;;  %vm10218_vm10 = vmmov %vm10210_vm2 }
 0xfc6   :  { %v2396_v45 = vpop.f32.mrf.mxu2 }
 0xfc7   :  { %v2405_v58 = vmul.f32 0.35355338, %v2396_v45 }
 0xfc9   :  { %v2410_v36 = vadd.f32 %v7556_v47, %v2405_v58 }
 0xfcb   :  { %v2421_v13 = vsel %vm10209_vm3, %v2410_v36, -inf  ;;  %vm10219_vm3 = vmmov %vm10210_vm2 }
 0xfce   :  { %v2399_v32 = vpop.f32.mrf.mxu2 }
 0xfcf   :  { %v2406_v12 = vmul.f32 0.35355338, %v2399_v32 }
 0xfd1   :  { %v2411_v17 = vadd.f32 %v7557_v55, %v2406_v12 }
 0xfd3   :  { %v2424_v21 = vsel %vm10212_vm6, %v2411_v17, -inf }
0x1021   :  { %v2616_v50 = vpop.f32.mrf.mxu3 }
0x1022   :  { %v2631_v61 = vmul.f32 0.35355338, %v2616_v50 }
0x1024   :  { %v2636_v20 = vadd.f32 %v7553_v35, %v2631_v61 }
0x1026   :  { %v2641_v29 = vsel %vm10205_vm13, %v2636_v20, -inf  ;;  %vm10215_vm13 = vmmov %vm10210_vm2 }
0x1027   :  { %2642 = vmax.xlane.f32.xlu1 %v2641_v29  ;;  %v2414_v49 = vpop.xlane.xlu2 %2413 }
0x1028   :  { %v2427_v10 = vsub.f32 %v2407_v63, %v2414_v49 }
0x1029   :  { %v2619_v8 = vpop.f32.mrf.mxu3 }
0x102a   :  { %v2632_v60 = vmul.f32 0.35355338, %v2619_v8  ;;  %v2432_v7 = vmul.f32 1.442695, %v2427_v10 }
0x102c   :  { %v2637_v39 = vadd.f32 %v7554_v51, %v2632_v60  ;;  %7326 = vpow2.f32 %v2432_v7 }
0x102e   :  { %v2644_v38 = vsel %vm10206_vm14, %v2637_v39, -inf  ;;  %vm10216_vm14 = vmmov %vm10210_vm2 }
0x102f   :  { %2645 = vmax.xlane.f32.xlu0 %v2644_v38  ;;  %v2417_v28 = vpop.xlane.xlu2 %2416 }
0x1030   :  { %v2428_v11 = vsub.f32 %v2408_v33, %v2417_v28 }
0x1031   :  { %v2622_v48 = vpop.f32.mrf.mxu3 }
0x1032   :  { %v2633_v25 = vmul.f32 0.35355338, %v2622_v48  ;;  %v8653_v63 = vpop.eup %7326  ;;  %v2434_v50 = vmul.f32 1.442695, %v2428_v11 }
0x1033   :  { %v2442_v37 = vsel %vm10213_vm5, %v8653_v63, 0.0 }
0x1034   :  { %v2638_v56 = vadd.f32 %v7555_v5, %v2633_v25 }
0x1036   :  { %v2647_v59 = vsel %vm10207_vm15, %v2638_v56, -inf  ;;  %vm10217_vm15 = vmmov %vm10210_vm2 }
0x1037   :  { %2648 = vmax.xlane.f32.xlu1 %v2647_v59  ;;  %2419 = vmax.xlane.f32.xlu0 %v2418_v41 }
0x1039   :  { %v2625_v18 = vpop.f32.mrf.mxu3 }
0x103a   :  { %v2634_v1 = vmul.f32 0.35355338, %v2625_v18 }
0x103c   :  { %v2639_v6 = vadd.f32 %v7556_v47, %v2634_v1 }
0x103e   :  { %v2650_v15 = vsel %vm10210_vm2, %v2639_v6, -inf }
0x103f   :  { %2422 = vmax.xlane.f32.xlu1 %v2421_v13  ;;  %2651 = vmax.xlane.f32.xlu2 %v2650_v15 }
0x1041   :  { %v2628_v16 = vpop.f32.mrf.mxu3 }
0x1042   :  { %v2635_v40 = vmul.f32 0.35355338, %v2628_v16 }
0x1044   :  { %v2640_v52 = vadd.f32 %v7557_v55, %v2635_v40 }
0x1046   :  { %v2653_v35 = vsel %vm10211_vm7, %v2640_v52, -inf  ;;  %vm10220_vm7 = vmmov %vm10212_vm6 }
0x1047   :  { %2654 = vmax.xlane.f32.xlu0 %v2653_v35  ;;  %2425 = vmax.xlane.f32.xlu2 %v2424_v21 }
0x104f   :  { %2443 = vadd.xlane.f32.xlu0 %v2442_v37 }
0x109a   :  { %v2643_v30 = vpop.xlane.xlu1 %2642 }
0x109b   :  { %v2656_v51 = vsub.f32 %v2636_v20, %v2643_v30 }
0x109d   :  { %v2661_v34 = vmul.f32 1.442695, %v2656_v51 }
0x109f   :  { %7328 = vpow2.f32 %v2661_v34 }
0x10a0   :  { %7330 = vpow2.f32 %v2434_v50 }
0x10a2   :  { %v2646_v61 = vpop.xlane.xlu0 %2645 }
0x10a3   :  { %v2657_v29 = vsub.f32 %v2637_v39, %v2646_v61 }
0x10a5   :  { %v8657_v46 = vpop.eup %7328  ;;  %v2663_v8 = vmul.f32 1.442695, %v2657_v29 }
0x10a6   :  { %v2671_v60 = vsel %vm10214_vm11, %v8657_v46, 0.0  ;;  %v8661_v45 = vpop.eup %7330 }
0x10a7   :  { %7332 = vpow2.f32 %v2663_v8  ;;  %2672 = vadd.xlane.f32.xlu1 %v2671_v60  ;;  %v2445_v39 = vsel %vm10215_vm13, %v8661_v45, 0.0 }
0x10aa   :  { %v2649_v43 = vpop.xlane.xlu1 %2648  ;;  %v2420_v38 = vpop.xlane.xlu0 %2419 }
0x10ab   :  { %v2658_v20 = vsub.f32 %v2638_v56, %v2649_v43  ;;  %v2429_v33 = vsub.f32 %v2409_v19, %v2420_v38 }
0x10ad   :  { %v8663_v48 = vpop.eup %7332  ;;  %v2665_v25 = vmul.f32 1.442695, %v2658_v20  ;;  %v2436_v5 = vmul.f32 1.442695, %v2429_v33 }
0x10ae   :  { %v2674_v58 = vsel %vm10216_vm14, %v8663_v48, 0.0 }
0x10af   :  { %7334 = vpow2.f32 %v2665_v25  ;;  %2446 = vadd.xlane.f32.xlu1 %v2445_v39  ;;  %2675 = vadd.xlane.f32.xlu2 %v2674_v58 }
0x10b0   :  { %7336 = vpow2.f32 %v2436_v5 }
0x10b2   :  { %v2423_v59 = vpop.xlane.xlu1 %2422  ;;  %v2652_v41 = vpop.xlane.xlu2 %2651 }
0x10b3   :  { %v2430_v18 = vsub.f32 %v2410_v36, %v2423_v59  ;;  %v2659_v49 = vsub.f32 %v2639_v6, %v2652_v41 }
0x10b5   :  { %v8669_v56 = vpop.eup %7334  ;;  %v2438_v19 = vmul.f32 1.442695, %v2430_v18  ;;  %v2667_v1 = vmul.f32 1.442695, %v2659_v49 }
0x10b6   :  { %v8671_v47 = vpop.eup %7336  ;;  %v2677_v32 = vsel %vm10217_vm15, %v8669_v56, 0.0  ;;  %vm10221_vm15 = vmmov %vm10210_vm2 }
0x10b7   :  { %7338 = vpow2.f32 %v2438_v19  ;;  %2678 = vadd.xlane.f32.xlu0 %v2677_v32  ;;  %v2448_v10 = vsel %vm10218_vm10, %v8671_v47, 0.0 }
0x10b8   :  { %7340 = vpow2.f32 %v2667_v1  ;;  %2449 = vadd.xlane.f32.xlu2 %v2448_v10 }
0x10ba   :  { %v2655_v12 = vpop.xlane.xlu0 %2654  ;;  %v2426_v13 = vpop.xlane.xlu2 %2425 }
0x10bb   :  { %v2660_v36 = vsub.f32 %v2640_v52, %v2655_v12  ;;  %v2431_v6 = vsub.f32 %v2411_v17, %v2426_v13 }
0x10bd   :  { %v8677_v15 = vpop.eup %7338  ;;  %v2669_v7 = vmul.f32 1.442695, %v2660_v36  ;;  %v2440_v16 = vmul.f32 1.442695, %v2431_v6 }
0x10be   :  { %v8679_v40 = vpop.eup %7340  ;;  %v2451_v55 = vsel %vm10219_vm3, %v8677_v15, 0.0 }
0x10bf   :  { %7342 = vpow2.f32 %v2669_v7  ;;  %v2680_v35 = vsel %vm10210_vm2, %v8679_v40, 0.0  ;;  %2452 = vadd.xlane.f32.xlu0 %v2451_v55 }
0x10c0   :  { %7344 = vpow2.f32 %v2440_v16  ;;  %2681 = vadd.xlane.f32.xlu1 %v2680_v35 }
0x10c2   :  { %v2444_v21 = vpop.xlane.xlu0 %2443 }
0x10c3   :  { %7346 = vrcp.f32 %v2444_v21  ;;  %v2468_v34 = vand.u32 2147483648, %v2444_v21  ;;  %v2466_v61 = vand.u32 2147483647, %v2444_v21  ;;  %vm2462_vm11 = vweird.f32 %v2444_v21 }
0x10c5   :  { %v8685_v52 = vpop.eup %7342  ;;  %v2469_v8 = vor.u32 1.1754944e-38, %v2468_v34  ;;  %vm2467_vm14 = vcmp.eq.f32.partialorder %v2466_v61, 8.507059e+37 }
0x10c6   :  { %v8687_v17 = vpop.eup %7344  ;;  %v2683_v37 = vsel %vm10220_vm7, %v8685_v52, 0.0 }
0x10c7   :  { %2684 = vadd.xlane.f32.xlu2 %v2683_v37  ;;  %v2454_v28 = vsel %vm10212_vm6, %v8687_v17, 0.0 }
0x10c8   :  { %2455 = vadd.xlane.f32.xlu1 %v2454_v28 }
0x10c9   :  { %v7347_v30 = vpop.eup %7346 }
0x10ca   :  { %v2458_v51 = vmul.f32 %v7347_v30, %v2444_v21  ;;  %vm2463_vm5 = vweird.f32 %v7347_v30 }
0x10cb   :  { %vm2464_vm13 = vmor %vm2462_vm11, %vm2463_vm5 }
0x10cc   :  { %v2459_v11 = vsub.f32 1.0, %v2458_v51  ;;  %vm10222_vm5 = vmmov %vm10221_vm15 }
0x10ce   :  { %v2460_v50 = vmul.f32 %v7347_v30, %v2459_v11 }
0x10d0   :  { %v2461_v29 = vadd.f32 %v7347_v30, %v2460_v50 }
0x10d2   :  { %v2465_v60 = vsel %vm2464_vm13, %v7347_v30, %v2461_v29 }
0x10d3   :  { %v2470_v43 = vsel %vm2467_vm14, %v2469_v8, %v2465_v60 }
0x10d4   :  { %v2471_v38 = vmul.f32 %v8653_v63, %v2470_v43 }
0x10d6   :  { %6809 = vmatmul.msk.f32.vlgmr.msrb.gmra.mxu1 %vm10221_vm15, %v2471_v38 }
0x111a   :  { %v2673_v20 = vpop.xlane.xlu1 %2672 }
0x111b   :  { %7348 = vrcp.f32 %v2673_v20  ;;  %v2697_v59 = vand.u32 2147483648, %v2673_v20  ;;  %v2695_v18 = vand.u32 2147483647, %v2673_v20  ;;  %vm2691_vm3 = vweird.f32 %v2673_v20 }
0x111d   :  { %v2698_v63 = vor.u32 1.1754944e-38, %v2697_v59  ;;  %vm2696_vm7 = vcmp.eq.f32.partialorder %v2695_v18, 8.507059e+37 }
0x1121   :  { %v7349_v33 = vpop.eup %7348 }
0x1122   :  { %v2687_v25 = vmul.f32 %v7349_v33, %v2673_v20  ;;  %v2447_v5 = vpop.xlane.xlu1 %2446  ;;  %v2676_v39 = vpop.xlane.xlu2 %2675  ;;  %vm2692_vm10 = vweird.f32 %v7349_v33 }
0x1123   :  { %7350 = vrcp.f32 %v2447_v5  ;;  %vm2693_vm2 = vmor %vm2691_vm3, %vm2692_vm10  ;;  %v2483_v55 = vand.u32 2147483648, %v2447_v5  ;;  %v2481_v21 = vand.u32 2147483647, %v2447_v5  ;;  %vm2477_vm11 = vweird.f32 %v2447_v5 }
0x1124   :  { %v2688_v58 = vsub.f32 1.0, %v2687_v25  ;;  %7352 = vrcp.f32 %v2676_v39  ;;  %v2712_v30 = vand.u32 2147483648, %v2676_v39  ;;  %v2710_v50 = vand.u32 2147483647, %v2676_v39 }
0x1125   :  { %v2484_v34 = vor.u32 1.1754944e-38, %v2483_v55  ;;  %vm2482_vm14 = vcmp.eq.f32.partialorder %v2481_v21, 8.507059e+37  ;;  %vm2706_vm10 = vweird.f32 %v2676_v39 }
0x1126   :  { %v2689_v41 = vmul.f32 %v7349_v33, %v2688_v58  ;;  %v2713_v20 = vor.u32 1.1754944e-38, %v2712_v30 }
0x1128   :  { %v2690_v49 = vadd.f32 %v7349_v33, %v2689_v41 }
0x1129   :  { %v7351_v19 = vpop.eup %7350 }
0x112a   :  { %v7353_v1 = vpop.eup %7352  ;;  %v2694_v32 = vsel %vm2693_vm2, %v7349_v33, %v2690_v49  ;;  %v2473_v10 = vmul.f32 %v7351_v19, %v2447_v5  ;;  %v8695_v12 = vpop.xlane.xlu0 %2678  ;;  %vm2478_vm6 = vweird.f32 %v7351_v19  ;;  %vm2711_vm2 = vcmp.eq.f32.partialorder %v2710_v50, 8.507059e+37 }
0x112b   :  { %v2699_v13 = vsel %vm2696_vm7, %v2698_v63, %v2694_v32  ;;  %v2702_v36 = vmul.f32 %v7353_v1, %v2676_v39  ;;  %7354 = vrcp.f32 %v8695_v12  ;;  %v8698_v6 = vpop.xlane.xlu2 %2449  ;;  %vm2479_vm13 = vmor %vm2477_vm11, %vm2478_vm6  ;;  %vm2707_vm15 = vweird.f32 %v7353_v1 }
0x112c   :  { %v2700_v7 = vmul.f32 %v8657_v46, %v2699_v13  ;;  %v2474_v16 = vsub.f32 1.0, %v2473_v10  ;;  %7356 = vrcp.f32 %v8698_v6  ;;  %vm2708_vm3 = vmor %vm2706_vm10, %vm2707_vm15  ;;  %v2727_v5 = vand.u32 2147483648, %v8695_v12 }
0x112d   :  { %v2703_v35 = vsub.f32 1.0, %v2702_v36  ;;  %v2498_v58 = vand.u32 2147483648, %v8698_v6  ;;  %vm10223_vm6 = vmmov %vm10222_vm5  ;;  %v2725_v63 = vand.u32 2147483647, %v8695_v12 }
0x112e   :  { %v2475_v37 = vmul.f32 %v7351_v19, %v2474_v16  ;;  %6821 = vmatmul.msk.f32.vlgmr.msrb.gmra.mxu0 %vm10222_vm5, %v2700_v7  ;;  %vm2721_vm5 = vweird.f32 %v8695_v12  ;;  %v2728_v7 = vor.u32 1.1754944e-38, %v2727_v5  ;;  %vm10226_vm15 = vmmov %vm10223_vm6 }
0x112f   :  { %v2704_v28 = vmul.f32 %v7353_v1, %v2703_v35  ;;  %v2499_v16 = vor.u32 1.1754944e-38, %v2498_v58 }
0x1130   :  { %v2476_v51 = vadd.f32 %v7351_v19, %v2475_v37 }
0x1131   :  { %v7355_v11 = vpop.eup %7354  ;;  %v2705_v8 = vadd.f32 %v7353_v1, %v2704_v28 }
0x1132   :  { %v2717_v46 = vmul.f32 %v7355_v11, %v8695_v12  ;;  %v8704_v61 = vpop.xlane.xlu0 %2452  ;;  %v2480_v29 = vsel %vm2479_vm13, %v7351_v19, %v2476_v51  ;;  %v7357_v60 = vpop.eup %7356  ;;  %vm2722_vm7 = vweird.f32 %v7355_v11  ;;  %v2496_v19 = vand.u32 2147483647, %v8698_v6 }
0x1133   :  { %v8706_v43 = vpop.xlane.xlu1 %2681  ;;  %7358 = vrcp.f32 %v8704_v61  ;;  %v2485_v38 = vsel %vm2482_vm14, %v2484_v34, %v2480_v29  ;;  %v2488_v25 = vmul.f32 %v7357_v60, %v8698_v6  ;;  %v2709_v18 = vsel %vm2708_vm3, %v7353_v1, %v2705_v8  ;;  %vm8719_vm11 = vmor %vm2721_vm5, %vm2722_vm7 }
0x1134   :  { %v2718_v33 = vsub.f32 1.0, %v2717_v46  ;;  %7360 = vrcp.f32 %v8706_v43  ;;  %v2486_v59 = vmul.f32 %v8661_v45, %v2485_v38  ;;  %v2714_v49 = vsel %vm2711_vm2, %v2713_v20, %v2709_v18 }
0x1135   :  { %v2489_v41 = vsub.f32 1.0, %v2488_v25  ;;  %v2715_v10 = vmul.f32 %v8663_v48, %v2714_v49  ;;  %vm2492_vm13 = vweird.f32 %v8698_v6  ;;  %vm2493_vm14 = vweird.f32 %v7357_v60 }
0x1136   :  { %v2719_v39 = vmul.f32 %v7355_v11, %v2718_v33  ;;  %6810 = vmatmul.msk.f32.gmra.mxu1 %vm10223_vm6, %v2486_v59  ;;  %vm2497_vm10 = vcmp.eq.f32.partialorder %v2496_v19, 8.507059e+37  ;;  %vm2726_vm3 = vcmp.eq.f32.partialorder %v2725_v63, 8.507059e+37  ;;  %vm2494_vm2 = vmor %vm2492_vm13, %vm2493_vm14  ;;  %v2742_v6 = vand.u32 2147483648, %v8706_v43 }
0x1137   :  { %v2490_v32 = vmul.f32 %v7357_v60, %v2489_v41  ;;  %6822 = vmatmul.msk.f32.gmra.mxu0 %vm10226_vm15, %v2715_v10  ;;  %v2513_v30 = vand.u32 2147483648, %v8704_v61  ;;  %v2740_v33 = vand.u32 2147483647, %v8706_v43  ;;  %vm2507_vm5 = vweird.f32 %v8704_v61  ;;  %vm10227_vm14 = vmmov %vm10226_vm15 }
0x1138   :  { %v2720_v13 = vadd.f32 %v7355_v11, %v2719_v39 }
0x1139   :  { %v7359_v36 = vpop.eup %7358  ;;  %v2491_v35 = vadd.f32 %v7357_v60, %v2490_v32 }
0x113a   :  { %v7361_v1 = vpop.eup %7360  ;;  %v2503_v55 = vmul.f32 %v7359_v36, %v8704_v61  ;;  %v8726_v12 = vpop.xlane.xlu2 %2684  ;;  %v2724_v48 = vsel %vm8719_vm11, %v7355_v11, %v2720_v13  ;;  %v2511_v11 = vand.u32 2147483647, %v8704_v61  ;;  %vm2508_vm7 = vweird.f32 %v7359_v36 }
0x113b   :  { %v2732_v21 = vmul.f32 %v7361_v1, %v8706_v43  ;;  %v8731_v37 = vpop.xlane.xlu1 %2455  ;;  %7362 = vrcp.f32 %v8726_v12  ;;  %v2495_v34 = vsel %vm2494_vm2, %v7357_v60, %v2491_v35  ;;  %v2729_v50 = vsel %vm2726_vm3, %v2728_v7, %v2724_v48  ;;  %vm2509_vm13 = vmor %vm2507_vm5, %vm2508_vm7 }
0x113c   :  { %v2504_v28 = vsub.f32 1.0, %v2503_v55  ;;  %7364 = vrcp.f32 %v8731_v37  ;;  %v2500_v29 = vsel %vm2497_vm10, %v2499_v16, %v2495_v34  ;;  %v2730_v8 = vmul.f32 %v8669_v56, %v2729_v50  ;;  %vm10228_vm10 = vmmov %vm10227_vm14 }
0x113d   :  { %v2733_v51 = vsub.f32 1.0, %v2732_v21  ;;  %vm2737_vm6 = vweird.f32 %v7361_v1  ;;  %v2501_v20 = vmul.f32 %v8671_v47, %v2500_v29  ;;  %vm2736_vm11 = vweird.f32 %v8706_v43  ;;  %vm10230_vm4 = vmmov %vm10228_vm10 }
0x113e   :  { %v2505_v46 = vmul.f32 %v7359_v36, %v2504_v28  ;;  %v2514_v60 = vor.u32 1.1754944e-38, %v2513_v30  ;;  %vm2738_vm15 = vmor %vm2736_vm11, %vm2737_vm6  ;;  %v2743_v56 = vor.u32 1.1754944e-38, %v2742_v6  ;;  %vm2512_vm3 = vcmp.eq.f32.partialorder %v2511_v11, 8.507059e+37 }
0x113f   :  { %v2734_v38 = vmul.f32 %v7361_v1, %v2733_v51  ;;  %6811 = vmatmul.msk.f32.gmra.mxu1 %vm10227_vm14, %v2501_v20  ;;  %6823 = vmatmul.msk.f32.gmra.mxu0 %vm10228_vm10, %v2730_v8  ;;  %vm2741_vm2 = vcmp.eq.f32.partialorder %v2740_v33, 8.507059e+37  ;;  %v2528_v63 = vand.u32 2147483648, %v8731_v37  ;;  %v2757_v32 = vand.u32 2147483648, %v8726_v12  ;;  %vm10229_vm14 = vmmov %vm10228_vm10 }
0x1140   :  { %v2506_v25 = vadd.f32 %v7359_v36, %v2505_v46  ;;  %vm2751_vm5 = vweird.f32 %v8726_v12  ;;  %vm2522_vm11 = vweird.f32 %v8731_v37 }
0x1141   :  { %v7363_v5 = vpop.eup %7362  ;;  %v2735_v58 = vadd.f32 %v7361_v1, %v2734_v38  ;;  %v2758_v55 = vor.u32 1.1754944e-38, %v2757_v32  ;;  %v2529_v35 = vor.u32 1.1754944e-38, %v2528_v63 }
0x1142   :  { %v7365_v59 = vpop.eup %7364  ;;  %v2747_v39 = vmul.f32 %v7363_v5, %v8726_v12  ;;  %v2510_v47 = vsel %vm2509_vm13, %v7359_v36, %v2506_v25  ;;  %vm2752_vm7 = vweird.f32 %v7363_v5  ;;  %v2755_v36 = vand.u32 2147483647, %v8726_v12  ;;  %v7558_v25 = vld [vmem:[%s7881_s2] ss:$0 sm:$0xff] }
0x1143   :  { %v2518_v61 = vmul.f32 %v7365_v59, %v8731_v37  ;;  %v2515_v41 = vsel %vm2512_vm3, %v2514_v60, %v2510_v47  ;;  %v2739_v18 = vsel %vm2738_vm15, %v7361_v1, %v2735_v58  ;;  %vm2523_vm6 = vweird.f32 %v7365_v59  ;;  %vm2753_vm13 = vmor %vm2751_vm5, %vm2752_vm7 }
0x1144   :  { %v2748_v43 = vsub.f32 1.0, %v2747_v39  ;;  %v2744_v49 = vsel %vm2741_vm2, %v2743_v56, %v2739_v18  ;;  %v2516_v10 = vmul.f32 %v8677_v15, %v2515_v41  ;;  %v2526_v1 = vand.u32 2147483647, %v8731_v37  ;;  %vm2524_vm15 = vmor %vm2522_vm11, %vm2523_vm6 }
0x1145   :  { %v2519_v19 = vsub.f32 1.0, %v2518_v61  ;;  %v2745_v45 = vmul.f32 %v8679_v40, %v2744_v49  ;;  %vm2756_vm3 = vcmp.eq.f32.partialorder %v2755_v36, 8.507059e+37  ;;  %vm10231_vm7 = vmmov %vm10230_vm4 }
0x1146   :  { %v2749_v13 = vmul.f32 %v7363_v5, %v2748_v43  ;;  %vm2527_vm2 = vcmp.eq.f32.partialorder %v2526_v1, 8.507059e+37 }
0x1147   :  { %v2520_v7 = vmul.f32 %v7365_v59, %v2519_v19  ;;  %6812 = vmatmul.msk.f32.gmra.mxu1 %vm10229_vm14, %v2516_v10  ;;  %6824 = vmatmul.msk.f32.gmra.mxu0 %vm10228_vm10, %v2745_v45 }
0x1148   :  { %v2750_v16 = vadd.f32 %v7363_v5, %v2749_v13 }
0x1149   :  { %v2521_v15 = vadd.f32 %v7365_v59, %v2520_v7 }
0x114a   :  { %v2754_v40 = vsel %vm2753_vm13, %v7363_v5, %v2750_v16 }
0x114b   :  { %v2525_v48 = vsel %vm2524_vm15, %v7365_v59, %v2521_v15  ;;  %v2759_v21 = vsel %vm2756_vm3, %v2758_v55, %v2754_v40 }
0x114c   :  { %v2530_v6 = vsel %vm2527_vm2, %v2529_v35, %v2525_v48  ;;  %v2760_v28 = vmul.f32 %v8685_v52, %v2759_v21 }
0x114d   :  { %v2531_v12 = vmul.f32 %v8687_v17, %v2530_v6 }
0x114f   :  { %6813 = vmatmul.msk.f32.gmra.mxu1 %vm10230_vm4, %v2531_v12  ;;  %6825 = vmatmul.msk.f32.gmra.mxu0 %vm10231_vm7, %v2760_v28 }
0x1153   :  { %v2564_v37 = vpop.f32.mrf.mxu1 }
0x1157   :  { %6831 = vmatmul.msk.f32.vlgmr.msra.gmra.mxu1 %vm304_vm1, %v2564_v37 }
0x11ab   :  { %v2793_v30 = vpop.f32.mrf.mxu0 }
0x11ac   :  { %6826 = vmatmul.msk.f32.vlgmr.msra.gmra.mxu2 %vm304_vm1, %v2793_v30 }
0x11b3   :  { %v2567_v51 = vpop.f32.mrf.mxu1 }
0x11b4   :  { %6832 = vmatmul.msk.f32.gmra.mxu1 %vm304_vm1, %v2567_v51  ;;  %v2796_v34 = vpop.f32.mrf.mxu0 }
0x11b5   :  { %6827 = vmatmul.msk.f32.gmra.mxu2 %vm304_vm1, %v2796_v34 }
0x11bc   :  { %v2570_v50 = vpop.f32.mrf.mxu1  ;;  %v2799_v17 = vpop.f32.mrf.mxu0 }
0x11bd   :  { %6833 = vmatmul.msk.f32.gmra.mxu1 %vm304_vm1, %v2570_v50  ;;  %6828 = vmatmul.msk.f32.gmra.mxu2 %vm304_vm1, %v2799_v17 }
0x11c4   :  { %v2573_v52 = vpop.f32.mrf.mxu1  ;;  %v2802_v11 = vpop.f32.mrf.mxu0 }
0x11c5   :  { %6834 = vmatmul.msk.f32.gmra.mxu1 %vm304_vm1, %v2573_v52  ;;  %6829 = vmatmul.msk.f32.gmra.mxu2 %vm304_vm1, %v2802_v11 }
0x11cc   :  { %v2576_v46 = vpop.f32.mrf.mxu1  ;;  %v2805_v29 = vpop.f32.mrf.mxu0 }
0x11cd   :  { %6835 = vmatmul.msk.f32.gmra.mxu1 %vm304_vm1, %v2576_v46  ;;  %6830 = vmatmul.msk.f32.gmra.mxu2 %vm304_vm1, %v2805_v29 }
0x11d4   :  { %v2887_v8 = vpop.f32.mrf.mxu1 }
0x122f   :  { %v2840_v38 = vpop.f32.mrf.mxu2 }
0x1230   :  { %v2888_v20 = vadd.f32 %v2887_v8, %v2840_v38 }
0x1231   :  { %v2890_v60 = vpop.f32.mrf.mxu1 }
0x1232   :  { %v2902_v33 = vadd.f32 %v2888_v20, %v8576_v57 }
0x1234   :  { %v2907_v5 = vadd.f32 %v7558_v25, %v2902_v33 }
0x1236   :  { %v2912_v58 = vsel %vm222_vm0, %v2907_v5, 0.0 }
0x1237   :  { %2913 = vadd.xlane.f32.xlu0 %v2912_v58 }
0x1238   :  { %v2843_v59 = vpop.f32.mrf.mxu2 }
0x1239   :  { %v2891_v56 = vadd.f32 %v2890_v60, %v2843_v59 }
0x123a   :  { %v2893_v47 = vpop.f32.mrf.mxu1 }
0x123b   :  { %v2903_v39 = vadd.f32 %v2891_v56, %v8588_v42 }
0x123d   :  { %v2908_v61 = vadd.f32 %v7558_v25, %v2903_v39 }
0x123f   :  { %v2915_v41 = vsel %vm222_vm0, %v2908_v61, 0.0 }
0x1240   :  { %v2846_v18 = vpop.f32.mrf.mxu2  ;;  %2916 = vadd.xlane.f32.xlu2 %v2915_v41 }
0x1241   :  { %v2894_v43 = vadd.f32 %v2893_v47, %v2846_v18 }
0x1242   :  { %v2896_v19 = vpop.f32.mrf.mxu1 }
0x1243   :  { %v2904_v49 = vadd.f32 %v2894_v43, %v8598_v2 }
0x1245   :  { %v2909_v57 = vadd.f32 %v7558_v25, %v2904_v49 }
0x1247   :  { %v2918_v63 = vsel %vm222_vm0, %v2909_v57, 0.0 }
0x1248   :  { %v2849_v32 = vpop.f32.mrf.mxu2  ;;  %2919 = vadd.xlane.f32.xlu1 %v2918_v63 }
0x1249   :  { %v2897_v10 = vadd.f32 %v2896_v19, %v2849_v32 }
0x124a   :  { %v2899_v36 = vpop.f32.mrf.mxu1 }
0x124b   :  { %v2905_v13 = vadd.f32 %v2897_v10, %v8608_v54 }
0x124d   :  { %v2910_v45 = vadd.f32 %v7558_v25, %v2905_v13 }
0x124f   :  { %v2921_v42 = vsel %vm222_vm0, %v2910_v45, 0.0 }
0x1250   :  { %2922 = vadd.xlane.f32.xlu0 %v2921_v42  ;;  %v2852_v7 = vpop.f32.mrf.mxu2  ;;  %v8812_v42 = vld [vmem:[%s7902_s7] ss:$0 sm:$0xff] }
0x1251   :  { %v2900_v1 = vadd.f32 %v2899_v36, %v2852_v7 }
0x1253   :  { %v2906_v16 = vadd.f32 %v2900_v1, %v8618_v4  ;;  %v8816_v1 = vld [vmem:[%s7929_s17] ss:$0 sm:$0xff] }
0x1255   :  { %v2911_v55 = vadd.f32 %v7558_v25, %v2906_v16 }
0x1257   :  { %v2924_v2 = vsel %vm895_vm12, %v2911_v55, 0.0 }
0x1258   :  { %2925 = vadd.xlane.f32.xlu2 %v2924_v2 }
0x12aa   :  { %v2914_v15 = vpop.xlane.xlu0 %2913 }
0x12ab   :  { %v2927_v35 = vmul.f32 %v2914_v15, %v7904_v3 }
0x12ad   :  { %v2932_v40 = vsub.f32 %v2907_v5, %v2927_v35 }
0x12af   :  { %v2937_v48 = vmul.f32 %v2932_v40, %v2932_v40 }
0x12b1   :  { %v2942_v54 = vsel %vm222_vm0, %v2937_v48, 0.0 }
0x12b2   :  { %2943 = vadd.xlane.f32.xlu1 %v2942_v54 }
0x12b3   :  { %v2917_v21 = vpop.xlane.xlu2 %2916 }
0x12b4   :  { %v2928_v6 = vmul.f32 %v2917_v21, %v7904_v3 }
0x12b6   :  { %v8785_v12 = vsub.f32 %v2908_v61, %v2928_v6 }
0x12b8   :  { %v2938_v4 = vmul.f32 %v8785_v12, %v8785_v12 }
0x12ba   :  { %v2945_v28 = vsel %vm222_vm0, %v2938_v4, 0.0 }
0x12bb   :  { %v2920_v37 = vpop.xlane.xlu1 %2919  ;;  %2946 = vadd.xlane.f32.xlu0 %v2945_v28 }
0x12bc   :  { %v2929_v30 = vmul.f32 %v2920_v37, %v7904_v3 }
0x12be   :  { %v8791_v51 = vsub.f32 %v2909_v57, %v2929_v30 }
0x12c0   :  { %v2939_v34 = vmul.f32 %v8791_v51, %v8791_v51 }
0x12c2   :  { %v2948_v50 = vsel %vm222_vm0, %v2939_v34, 0.0 }
0x12c3   :  { %v2923_v17 = vpop.xlane.xlu0 %2922  ;;  %2949 = vadd.xlane.f32.xlu2 %v2948_v50 }
0x12c4   :  { %v2930_v52 = vmul.f32 %v2923_v17, %v7904_v3 }
0x12c6   :  { %v8797_v11 = vsub.f32 %v2910_v45, %v2930_v52 }
0x12c8   :  { %v2940_v46 = vmul.f32 %v8797_v11, %v8797_v11 }
0x12ca   :  { %v2951_v29 = vsel %vm222_vm0, %v2940_v46, 0.0 }
0x12cb   :  { %2952 = vadd.xlane.f32.xlu1 %v2951_v29  ;;  %v2926_v8 = vpop.xlane.xlu2 %2925 }
0x12cc   :  { %v2931_v38 = vmul.f32 %v2926_v8, %v7904_v3 }
0x12ce   :  { %v8803_v20 = vsub.f32 %v2911_v55, %v2931_v38 }
0x12d0   :  { %v2941_v33 = vmul.f32 %v8803_v20, %v8803_v20 }
0x12d2   :  { %v2954_v25 = vsel %vm895_vm12, %v2941_v33, 0.0 }
0x12d3   :  { %2955 = vadd.xlane.f32.xlu0 %v2954_v25 }
0x1325   :  { %v2944_v5 = vpop.xlane.xlu1 %2943 }
0x1326   :  { %v2957_v60 = vmul.f32 %v2944_v5, %v7904_v3 }
0x1328   :  { %v2962_v58 = vadd.f32 1e-05, %v2957_v60 }
0x132a   :  { %7366 = vrsqrt.f32 %v2962_v58  ;;  %vm2973_vm6 = vweird.f32 %v2962_v58 }
0x132e   :  { %v2947_v39 = vpop.xlane.xlu0 %2946 }
0x132f   :  { %v2958_v47 = vmul.f32 %v2947_v39, %v7904_v3 }
0x1330   :  { %v7367_v59 = vpop.eup %7366 }
0x1331   :  { %v2968_v56 = vmul.f32 %v7367_v59, %v2962_v58  ;;  %v2963_v41 = vadd.f32 1e-05, %v2958_v47  ;;  %vm2974_vm4 = vweird.f32 %v7367_v59 }
0x1332   :  { %vm2975_vm5 = vmor %vm2973_vm6, %vm2974_vm4 }
0x1333   :  { %v2969_v61 = vmul.f32 %v7367_v59, %v2968_v56  ;;  %7368 = vrsqrt.f32 %v2963_v41  ;;  %vm2983_vm13 = vweird.f32 %v2963_v41 }
0x1335   :  { %v2970_v18 = vmul.f32 0.5, %v2969_v61 }
0x1336   :  { %v2950_v57 = vpop.xlane.xlu2 %2949 }
0x1337   :  { %v2971_v43 = vsub.f32 1.5, %v2970_v18  ;;  %v2959_v19 = vmul.f32 %v2950_v57, %v7904_v3 }
0x1339   :  { %v2972_v49 = vmul.f32 %v7367_v59, %v2971_v43  ;;  %v7369_v32 = vpop.eup %7368  ;;  %v2964_v13 = vadd.f32 1e-05, %v2959_v19 }
0x133a   :  { %v2978_v45 = vmul.f32 %v7369_v32, %v2963_v41  ;;  %vm2984_vm11 = vweird.f32 %v7369_v32 }
0x133b   :  { %v2976_v63 = vsel %vm2975_vm5, %v7367_v59, %v2972_v49  ;;  %7370 = vrsqrt.f32 %v2964_v13  ;;  %vm2985_vm14 = vmor %vm2983_vm13, %vm2984_vm11  ;;  %vm2993_vm10 = vweird.f32 %v2964_v13  ;;  %vm10233_vm13 = vcmask 271360  }
0x133c   :  { %v3017_v10 = vmul.f32 %v2976_v63, %v2932_v40  ;;  %v2979_v7 = vmul.f32 %v7369_v32, %v2978_v45 }
0x133e   :  { %v3022_v36 = vmul.f32 %v8812_v42, %v3017_v10  ;;  %v2980_v55 = vmul.f32 0.5, %v2979_v7  ;;  %v2953_v2 = vpop.xlane.xlu1 %2952 }
0x133f   :  { %v2960_v15 = vmul.f32 %v2953_v2, %v7904_v3 }
0x1340   :  { %v8819_v16 = vadd.f32 %v8816_v1, %v3022_v36  ;;  %v2981_v35 = vsub.f32 1.5, %v2980_v55 }
0x1341   :  { %v7371_v40 = vpop.eup %7370  ;;  %v2965_v48 = vadd.f32 1e-05, %v2960_v15 }
0x1342   :  { %6836 = vmatmul.msk.f32.vlgmr.msrb.gmra.mxu3 %vm222_vm0, %v8819_v16  ;;  %6841 = vmatmul.msk.f32.vlgmr.msra.gmra.mxu0 %vm222_vm0, %v8819_v16  ;;  %v2982_v54 = vmul.f32 %v7369_v32, %v2981_v35  ;;  %v2988_v21 = vmul.f32 %v7371_v40, %v2964_v13  ;;  %vm2994_vm15 = vweird.f32 %v7371_v40 }
0x1343   :  { %7372 = vrsqrt.f32 %v2965_v48  ;;  %vm2995_vm3 = vmor %vm2993_vm10, %vm2994_vm15  ;;  %vm3003_vm7 = vweird.f32 %v2965_v48 }
0x1344   :  { %v2986_v6 = vsel %vm2985_vm14, %v7369_v32, %v2982_v54  ;;  %v2989_v4 = vmul.f32 %v7371_v40, %v2988_v21  ;;  %vm10234_vm14 = vmmov %vm10233_vm13 }
0x1345   :  { %v3018_v28 = vmul.f32 %v2986_v6, %v8785_v12  ;;  %vm10236_vm15 = vmmov %vm10233_vm13 }
0x1346   :  { %v2990_v37 = vmul.f32 0.5, %v2989_v4  ;;  %v2956_v30 = vpop.xlane.xlu0 %2955  ;;  %vm10237_vm10 = vmmov %vm10233_vm13 }
0x1347   :  { %v2961_v34 = vmul.f32 %v2956_v30, %v7904_v3  ;;  %v3023_v50 = vmul.f32 %v8812_v42, %v3018_v28 }
0x1348   :  { %v2991_v17 = vsub.f32 1.5, %v2990_v37 }
0x1349   :  { %v7373_v52 = vpop.eup %7372  ;;  %v2966_v46 = vadd.f32 1e-05, %v2961_v34  ;;  %v8830_v29 = vadd.f32 %v8816_v1, %v3023_v50  ;;  %v7562_v50 = vld [vmem:[%s8236_s4 + $0x8] sm:$0xff] }
0x134a   :  { %v2992_v8 = vmul.f32 %v7371_v40, %v2991_v17  ;;  %v2998_v38 = vmul.f32 %v7373_v52, %v2965_v48  ;;  %vm3004_vm2 = vweird.f32 %v7373_v52 }
0x134b   :  { %7374 = vrsqrt.f32 %v2966_v46  ;;  %6837 = vmatmul.msk.f32.gmra.mxu3 %vm222_vm0, %v8830_v29  ;;  %6842 = vmatmul.msk.f32.gmra.mxu0 %vm222_vm0, %v8830_v29  ;;  %vm3005_vm4 = vmor %vm3003_vm7, %vm3004_vm2  ;;  %vm3013_vm5 = vweird.f32 %v2966_v46 }
0x134c   :  { %v2996_v12 = vsel %vm2995_vm3, %v7371_v40, %v2992_v8  ;;  %v2999_v33 = vmul.f32 %v7373_v52, %v2998_v38  ;;  %v7561_v40 = vld [vmem:[%s7952_s22] ss:$0 sm:$0xff] }
0x134d   :  { %v3019_v25 = vmul.f32 %v2996_v12, %v8791_v51 }
0x134e   :  { %v3000_v5 = vmul.f32 0.5, %v2999_v33 }
0x134f   :  { %v3024_v60 = vmul.f32 %v8812_v42, %v3019_v25 }
0x1350   :  { %v3001_v58 = vsub.f32 1.5, %v3000_v5 }
0x1351   :  { %v7375_v59 = vpop.eup %7374  ;;  %v8839_v56 = vadd.f32 %v8816_v1, %v3024_v60  ;;  %v7563_v60 = vld [vmem:[%s8353_s21 + $0x8] sm:$0xff] }
0x1352   :  { %v3002_v39 = vmul.f32 %v7373_v52, %v3001_v58  ;;  %v3008_v47 = vmul.f32 %v7375_v59, %v2966_v46  ;;  %vm3014_vm6 = vweird.f32 %v7375_v59 }
0x1353   :  { %6838 = vmatmul.msk.f32.gmra.mxu3 %vm222_vm0, %v8839_v56  ;;  %6843 = vmatmul.msk.f32.gmra.mxu0 %vm222_vm0, %v8839_v56  ;;  %vm3015_vm11 = vmor %vm3013_vm5, %vm3014_vm6 }
0x1354   :  { %v3006_v51 = vsel %vm3005_vm4, %v7373_v52, %v3002_v39  ;;  %v3009_v61 = vmul.f32 %v7375_v59, %v3008_v47 }
0x1355   :  { %v3020_v41 = vmul.f32 %v3006_v51, %v8797_v11 }
0x1356   :  { %v3010_v18 = vmul.f32 0.5, %v3009_v61 }
0x1357   :  { %v3025_v43 = vmul.f32 %v8812_v42, %v3020_v41 }
0x1358   :  { %v3011_v49 = vsub.f32 1.5, %v3010_v18  ;;  %v7565_v18 = vld [vmem:[%s8075_s29] sm:$0xff] }
0x1359   :  { %v8848_v57 = vadd.f32 %v8816_v1, %v3025_v43 }
0x135a   :  { %v3012_v19 = vmul.f32 %v7375_v59, %v3011_v49 }
0x135b   :  { %6839 = vmatmul.msk.f32.gmra.mxu3 %vm222_vm0, %v8848_v57  ;;  %6844 = vmatmul.msk.f32.gmra.mxu0 %vm222_vm0, %v8848_v57 }
0x135c   :  { %v3016_v63 = vsel %vm3015_vm11, %v7375_v59, %v3012_v19  ;;  %v7564_v59 = vld [vmem:[%s8353_s21] sm:$0xff] }
0x135d   :  { %v3021_v11 = vmul.f32 %v3016_v63, %v8803_v20 }
0x135f   :  { %v3026_v32 = vmul.f32 %v8812_v42, %v3021_v11  ;;  %v7566_v11 = vld [vmem:[%s8075_s29 + $0x8] sm:$0xff] }
0x1361   :  { %v8857_v10 = vadd.f32 %v8816_v1, %v3026_v32 }
0x1363   :  { %6840 = vmatmul.msk.f32.gmra.mxu3 %vm222_vm0, %v8857_v10  ;;  %6845 = vmatmul.msk.f32.gmra.mxu0 %vm222_vm0, %v8857_v10 }
0x13bf   :  { %v3096_v13 = vpop.f32.mrf.mxu0 }
0x13c0   :  { %v3097_v7 = vadd.f32 %v3096_v13, %v8021_v9 }
0x13c5   :  { %v3064_v45 = vpop.f32.mrf.mxu3 }
0x13c6   :  { %v3065_v48 = vadd.f32 %v7561_v40, %v3064_v45 }
0x13c8   :  { %v3099_v36 = vpop.f32.mrf.mxu0 }
0x13c9   :  { %v3100_v55 = vadd.f32 %v3099_v36, %v8021_v9 }
0x13cb   :  { %v8865_v20 = vpack.i.bf16 %v3097_v7, %v3100_v55 }
0x13ce   :  { %v3067_v42 = vpop.f32.mrf.mxu3 }
0x13cf   :  { %v3068_v34 = vadd.f32 %v7561_v40, %v3067_v42 }
0x13d0   :  { %v3102_v2 = vpop.f32.mrf.mxu0 }
0x13d1   :  { %v3103_v1 = vadd.f32 %v3102_v2, %v8021_v9 }
0x13d3   :  { %3380 = vrot.lane.b32.xlu0 %v3103_v1, %s10202_s19 }
0x13d6   :  { %v3070_v15 = vpop.f32.mrf.mxu3 }
0x13d7   :  { %v3071_v30 = vadd.f32 %v7561_v40, %v3070_v15  ;;  %v7568_v15 = vld [vmem:[%s8075_s29 + $0x18] sm:$0xff] }
0x13d8   :  { %v3105_v35 = vpop.f32.mrf.mxu0 }
0x13d9   :  { %v3106_v54 = vadd.f32 %v3105_v35, %v8021_v9 }
0x13db   :  { %3382 = vrot.lane.b32.xlu1 %v3106_v54, %s10202_s19  ;;  %3366 = vrot.lane.b32.xlu0 %v3065_v48, %s10202_s19  ;;  %v8873_v21 = vpack.i.bf16 %v3103_v1, %v3106_v54 }
0x13de   :  { %v3073_v6 = vpop.f32.mrf.mxu3 }
0x13df   :  { %v3074_v37 = vadd.f32 %v7561_v40, %v3073_v6  ;;  %v7569_v6 = vld [vmem:[%s8075_s29 + $0x20] sm:$0x3] }
0x13e0   :  { %v3108_v4 = vpop.f32.mrf.mxu0 }
0x13e1   :  { %v8876_v28 = vadd.f32 %v3108_v4, %v8021_v9 }
0x13e3   :  { %3384 = vrot.lane.b32.xlu2 %v8876_v28, %s10202_s19  ;;  %6846 = vmatpush.xpose.msk.msrb.mxu2 %vm304_vm1, %v8876_v28 }
0x13e4   :  { %3376 = vrot.lane.b32.xlu1 %v3097_v7, %s10202_s19  ;;  %3372 = vrot.lane.b32.xlu0 %v3074_v37, %s10202_s19 }
0x13e6   :  { %v3076_v17 = vpop.f32.mrf.mxu3 }
0x13e7   :  { %6847 = vmatpush.xpose.msk.msrb.mxu2 %vm304_vm1, %v3106_v54  ;;  %v3077_v52 = vadd.f32 %v7561_v40, %v3076_v17 }
0x13eb   :  { %3378 = vrot.lane.b32.xlu2 %v3100_v55, %s10202_s19  ;;  %6848 = vmatpush.xpose.msk.msrb.mxu2 %vm304_vm1, %v3103_v1 }
0x13ec   :  { %3576 = vrot.lane.b32.xlu0 %v8876_v28, %s10232_s11  ;;  %3370 = vrot.lane.b32.xlu1 %v3071_v30, %s10202_s19 }
0x13ef   :  { %6849 = vmatpush.xpose.msk.msrb.mxu2 %vm304_vm1, %v3100_v55 }
0x13f3   :  { %3368 = vrot.lane.b32.xlu2 %v3068_v34, %s10202_s19  ;;  %6850 = vmatpush.xpose.msk.msrb.mxu2 %vm304_vm1, %v3097_v7  ;;  %v7567_v7 = vld [vmem:[%s8075_s29 + $0x10] sm:$0xff] }
0x13f6   :  { %6851 = vmatmul.msk.f32.vlgmr.msrb.gmra.mxu2 %vm304_vm1, %v3065_v48 }
0x13f7   :  { %3661 = vmatpush.msra.mxu2 %v7562_v50 }
0x13fb   :  { %3374 = vrot.lane.b32.xlu2 %v3077_v52, %s10202_s19 }
0x13fe   :  { %6852 = vmatmul.msk.f32.gmra.mxu2 %vm304_vm1, %v3068_v34 }
0x1406   :  { %6853 = vmatmul.msk.f32.gmra.mxu2 %vm304_vm1, %v3071_v30 }
0x140e   :  { %6854 = vmatmul.msk.f32.gmra.mxu2 %vm304_vm1, %v3074_v37 }
0x1416   :  { %6855 = vmatmul.msk.f32.gmra.mxu2 %vm304_vm1, %v3077_v52 }
0x143d   :  { %v3385_v46 = vpop.permute.xlu2 %3384 }
0x143e   :  { %6862 = vmatpush.xpose.msk.msra.mxu3 %vm304_vm1, %v3385_v46 }
0x1445   :  { %v3381_v8 = vpop.permute.xlu0 %3380  ;;  %v3379_v33 = vpop.permute.xlu2 %3378 }
0x144d   :  { %v3383_v38 = vpop.permute.xlu1 %3382  ;;  %v3367_v12 = vpop.permute.xlu0 %3366 }
0x144e   :  { %6863 = vmatpush.xpose.msk.msra.mxu3 %vm304_vm1, %v3383_v38  ;;  %v3369_v39 = vpop.permute.xlu2 %3368 }
0x1452   :  { %6864 = vmatpush.xpose.msk.msra.mxu3 %vm304_vm1, %v3381_v8 }
0x1456   :  { %v3373_v25 = vpop.permute.xlu0 %3372  ;;  %6865 = vmatpush.xpose.msk.msra.mxu3 %vm304_vm1, %v3379_v33  ;;  %v3377_v5 = vpop.permute.xlu1 %3376 }
0x1457   :  { %v3375_v41 = vpop.permute.xlu2 %3374 }
0x145a   :  { %6866 = vmatpush.xpose.msk.msra.mxu3 %vm304_vm1, %v3377_v5 }
0x145d   :  { %6867 = vmatmul.msk.f32.vlgmr.msra.gmra.mxu3 %vm304_vm1, %v3367_v12 }
0x145e   :  { %3884 = vmatpush.msrb.mxu3 %v7563_v60  ;;  %v3577_v58 = vpop.permute.xlu0 %3576  ;;  %v3371_v47 = vpop.permute.xlu1 %3370 }
0x145f   :  { %6872 = vmatpush.msk.msrb.mxu0 %vm1333_vm8, %v3577_v58 }
0x1460   :  { %3885 = vmatpush.msrb.mxu3 %v7564_v59 }
0x1465   :  { %6868 = vmatmul.msk.f32.gmra.mxu3 %vm304_vm1, %v3369_v39 }
0x146d   :  { %6869 = vmatmul.msk.f32.gmra.mxu3 %vm304_vm1, %v3371_v47 }
0x1475   :  { %6870 = vmatmul.msk.f32.gmra.mxu3 %vm304_vm1, %v3373_v25 }
0x1479   :  { %v3158_v51 = vpop.f32.mrf.mxu2 }
0x147a   :  { %v3173_v61 = vmul.f32 0.35355338, %v3158_v51 }
0x147c   :  { %v3178_v43 = vadd.f32 %v7565_v18, %v3173_v61 }
0x147d   :  { %6871 = vmatmul.msk.f32.gmra.mxu3 %vm304_vm1, %v3375_v41 }
0x147e   :  { %v3183_v49 = vsel %vm1182_vm9, %v3178_v43, -inf }
0x147f   :  { %3184 = vmax.xlane.f32.xlu0 %v3183_v49 }
0x1481   :  { %v3161_v19 = vpop.f32.mrf.mxu2 }
0x1482   :  { %v3174_v63 = vmul.f32 0.35355338, %v3161_v19 }
0x1484   :  { %v3179_v32 = vadd.f32 %v7566_v11, %v3174_v63 }
0x1486   :  { %v3186_v13 = vsel %vm1182_vm9, %v3179_v32, -inf }
0x1487   :  { %3187 = vmax.xlane.f32.xlu1 %v3186_v13 }
0x1489   :  { %v3164_v45 = vpop.f32.mrf.mxu2 }
0x148a   :  { %v3175_v36 = vmul.f32 0.35355338, %v3164_v45 }
0x148c   :  { %v3180_v55 = vadd.f32 %v7567_v7, %v3175_v36 }
0x148e   :  { %v3189_v42 = vsel %vm1182_vm9, %v3180_v55, -inf }
0x148f   :  { %3190 = vmax.xlane.f32.xlu2 %v3189_v42 }
0x1491   :  { %v3167_v2 = vpop.f32.mrf.mxu2 }
0x1492   :  { %v3176_v1 = vmul.f32 0.35355338, %v3167_v2 }
0x1494   :  { %v8920_v35 = vadd.f32 %v7568_v15, %v3176_v1 }
0x1496   :  { %v3192_v40 = vsel %vm1182_vm9, %v8920_v35, -inf }
0x1497   :  { %3193 = vmax.xlane.f32.xlu0 %v3192_v40 }
0x1499   :  { %v3170_v48 = vpop.f32.mrf.mxu2 }
0x149a   :  { %v3177_v54 = vmul.f32 0.35355338, %v3170_v48 }
0x149c   :  { %v8925_v4 = vadd.f32 %v7569_v6, %v3177_v54 }
0x149e   :  { %v3195_v37 = vsel %vm10233_vm13, %v8925_v4, -inf }
0x149f   :  { %3196 = vmax.xlane.f32.xlu1 %v3195_v37 }
0x14e0   :  { %v3423_v30 = vpop.f32.mrf.mxu3 }
0x14e1   :  { %v3438_v34 = vmul.f32 0.35355338, %v3423_v30 }
0x14e3   :  { %v3443_v50 = vadd.f32 %v7565_v18, %v3438_v34 }
0x14e5   :  { %v3448_v17 = vsel %vm1182_vm9, %v3443_v50, -inf }
0x14e6   :  { %3449 = vmax.xlane.f32.xlu1 %v3448_v17 }
0x14e8   :  { %v3426_v52 = vpop.f32.mrf.mxu3 }
0x14e9   :  { %v3439_v46 = vmul.f32 0.35355338, %v3426_v52 }
0x14eb   :  { %v3444_v8 = vadd.f32 %v7566_v11, %v3439_v46 }
0x14ed   :  { %v3451_v38 = vsel %vm1182_vm9, %v3444_v8, -inf }
0x14ee   :  { %3452 = vmax.xlane.f32.xlu2 %v3451_v38 }
0x14f0   :  { %v3429_v12 = vpop.f32.mrf.mxu3 }
0x14f1   :  { %v3440_v33 = vmul.f32 0.35355338, %v3429_v12 }
0x14f2   :  { %v3185_v25 = vpop.xlane.xlu0 %3184 }
0x14f3   :  { %v3198_v5 = vsub.f32 %v3178_v43, %v3185_v25  ;;  %v3445_v60 = vadd.f32 %v7567_v7, %v3440_v33 }
0x14f5   :  { %v3203_v58 = vmul.f32 1.442695, %v3198_v5  ;;  %v3454_v59 = vsel %vm1182_vm9, %v3445_v60, -inf }
0x14f6   :  { %3455 = vmax.xlane.f32.xlu0 %v3454_v59 }
0x14f7   :  { %7376 = vpow2.f32 %v3203_v58 }
0x14f8   :  { %v3432_v39 = vpop.f32.mrf.mxu3 }
0x14f9   :  { %v3441_v47 = vmul.f32 0.35355338, %v3432_v39 }
0x14fa   :  { %v3188_v51 = vpop.xlane.xlu1 %3187 }
0x14fb   :  { %v3199_v61 = vsub.f32 %v3179_v32, %v3188_v51  ;;  %v8932_v41 = vadd.f32 %v7568_v15, %v3441_v47 }
0x14fd   :  { %v8934_v18 = vpop.eup %7376  ;;  %v3205_v49 = vmul.f32 1.442695, %v3199_v61  ;;  %v3457_v19 = vsel %vm1182_vm9, %v8932_v41, -inf }
0x14fe   :  { %3458 = vmax.xlane.f32.xlu1 %v3457_v19  ;;  %v3213_v43 = vsel %vm1182_vm9, %v8934_v18, 0.0 }
0x14ff   :  { %7378 = vpow2.f32 %v3205_v49  ;;  %3214 = vadd.xlane.f32.xlu2 %v3213_v43 }
0x1500   :  { %v3435_v63 = vpop.f32.mrf.mxu3 }
0x1501   :  { %v3442_v11 = vmul.f32 0.35355338, %v3435_v63 }
0x1502   :  { %v3191_v7 = vpop.xlane.xlu2 %3190 }
0x1503   :  { %v3447_v13 = vadd.f32 %v7569_v6, %v3442_v11  ;;  %v3200_v42 = vsub.f32 %v3180_v55, %v3191_v7 }
0x1505   :  { %v8940_v45 = vpop.eup %7378  ;;  %v3460_v32 = vsel %vm10234_vm14, %v3447_v13, -inf  ;;  %v3207_v2 = vmul.f32 1.442695, %v3200_v42 }
0x1506   :  { %v3216_v36 = vsel %vm1182_vm9, %v8940_v45, 0.0 }
0x1507   :  { %3461 = vmax.xlane.f32.xlu2 %v3460_v32  ;;  %3217 = vadd.xlane.f32.xlu1 %v3216_v36  ;;  %7380 = vpow2.f32 %v3207_v2 }
0x150a   :  { %3311 = vrot.lane.b32.xlu0 %v8876_v28, %s10235_s5  ;;  %v3194_v37 = vpop.xlane.xlu0 %3193 }
0x150b   :  { %v3201_v32 = vsub.f32 %v8920_v35, %v3194_v37 }
0x150d   :  { %v8949_v1 = vpop.eup %7380  ;;  %v3209_v7 = vmul.f32 1.442695, %v3201_v32 }
0x150e   :  { %v3219_v15 = vsel %vm1182_vm9, %v8949_v1, 0.0 }
0x1512   :  { %v3197_v40 = vpop.xlane.xlu1 %3196 }
0x1513   :  { %v3202_v59 = vsub.f32 %v8925_v4, %v3197_v40 }
0x1515   :  { %v3211_v47 = vmul.f32 1.442695, %v3202_v59 }
0x151f   :  { %7158 = vrot.lane.b32.xlu2 %v8873_v21, %s10232_s11 }
0x1548   :  { %3220 = vadd.xlane.f32.xlu2 %v3219_v15 }
0x1559   :  { %v3450_v48 = vpop.xlane.xlu1 %3449 }
0x155a   :  { %v3463_v54 = vsub.f32 %v3443_v50, %v3450_v48 }
0x155c   :  { %v3468_v6 = vmul.f32 1.442695, %v3463_v54 }
0x155e   :  { %7382 = vpow2.f32 %v3468_v6 }
0x1561   :  { %v3453_v28 = vpop.xlane.xlu2 %3452 }
0x1562   :  { %v3464_v30 = vsub.f32 %v3444_v8, %v3453_v28 }
0x1564   :  { %v8953_v34 = vpop.eup %7382  ;;  %v3470_v17 = vmul.f32 1.442695, %v3464_v30 }
0x1565   :  { %v3478_v55 = vsel %vm1182_vm9, %v8953_v34, 0.0 }
0x1566   :  { %7384 = vpow2.f32 %v3470_v17  ;;  %3479 = vadd.xlane.f32.xlu0 %v3478_v55 }
0x1569   :  { %v3456_v52 = vpop.xlane.xlu0 %3455 }
0x156a   :  { %v3465_v46 = vsub.f32 %v3445_v60, %v3456_v52 }
0x156c   :  { %v8957_v38 = vpop.eup %7384  ;;  %v3472_v12 = vmul.f32 1.442695, %v3465_v46 }
0x156d   :  { %v3481_v50 = vsel %vm1182_vm9, %v8957_v38, 0.0 }
0x156e   :  { %7386 = vpow2.f32 %v3472_v12  ;;  %3482 = vadd.xlane.f32.xlu1 %v3481_v50 }
0x1571   :  { %v3459_v63 = vpop.xlane.xlu1 %3458 }
0x1572   :  { %v8961_v33 = vpop.xlane.xlu2 %3214  ;;  %v3466_v11 = vsub.f32 %v8932_v41, %v3459_v63 }
0x1573   :  { %vm3233_vm2 = vweird.f32 %v8961_v33 }
0x1574   :  { %v8963_v8 = vpop.eup %7386 }
0x1575   :  { %v3484_v25 = vsel %vm1182_vm9, %v8963_v8, 0.0 }
0x1576   :  { %3485 = vadd.xlane.f32.xlu1 %v3484_v25  ;;  %v3239_v25 = vand.u32 2147483648, %v8961_v33 }
0x157a   :  { %v3462_v5 = vpop.xlane.xlu2 %3461  ;;  %7168 = vrot.lane.b32.xlu0 %v8873_v21, %s10235_s5  ;;  %v8994_v41 = vpop.xlane.xlu1 %3217 }
0x157b   :  { %v3467_v60 = vsub.f32 %v3447_v13, %v3462_v5  ;;  %v3474_v13 = vmul.f32 1.442695, %v3466_v11  ;;  %v3254_v32 = vand.u32 2147483648, %v8994_v41  ;;  %vm3248_vm5 = vweird.f32 %v8994_v41 }
0x157c   :  { %v3312_v58 = vpop.permute.xlu0 %3311 }
0x157d   :  { %v3476_v39 = vmul.f32 1.442695, %v3467_v60  ;;  %6856 = vmatpush.msk.msrb.mxu1 %vm1333_vm8, %v3312_v58  ;;  %v3237_v58 = vand.u32 2147483647, %v8961_v33 }
0x157f   :  { %7388 = vpow2.f32 %v3476_v39  ;;  %vm3238_vm4 = vcmp.eq.f32.partialorder %v3237_v58, 8.507059e+37  ;;  %v7572_v58 = vld [vmem:[%s8241_s10] sm:$0xff] }
0x1580   :  { %7390 = vpow2.f32 %v3211_v47 }
0x1581   :  { %7392 = vpow2.f32 %v3474_v13 }
0x1582   :  { %v7159_v51 = vpop.permute.xlu2 %7158  ;;  %7173 = vrot.lane.b32.xlu0 %v8865_v20, %s10235_s5  ;;  %7394 = vpow2.f32 %v3209_v7 }
0x1583   :  { %v7160_v61 = vunpack.i.l.bf16 %v7159_v51  ;;  %v7161_v19 = vunpack.i.h.bf16 %v7159_v51  ;;  %7396 = vrcp.f32 %v8961_v33  ;;  %v3240_v51 = vor.u32 1.1754944e-38, %v3239_v25  ;;  %v7571_v25 = vld [vmem:[%s8241_s10 + $0x8] sm:$0xff] }
0x1584   :  { %7398 = vrcp.f32 %v8994_v41 }
0x1585   :  { %v8973_v49 = vpop.eup %7388  ;;  %3611 = vmatpush.msrb.mxu0 %v7160_v61 }
0x1586   :  { %v3490_v21 = vsel %vm10236_vm15, %v8973_v49, 0.0  ;;  %v8977_v4 = vpop.eup %7390 }
0x1587   :  { %3491 = vadd.xlane.f32.xlu2 %v3490_v21  ;;  %3612 = vmatpush.msrb.mxu0 %v7161_v19  ;;  %v3225_v43 = vsel %vm10237_vm10, %v8977_v4, 0.0  ;;  %v8985_v36 = vpop.eup %7392 }
0x1588   :  { %v3487_v42 = vsel %vm1182_vm9, %v8985_v36, 0.0  ;;  %v8989_v2 = vpop.eup %7394 }
0x1589   :  { %v7397_v15 = vpop.eup %7396 }
0x158a   :  { %v3229_v35 = vmul.f32 %v7397_v15, %v8961_v33  ;;  %v9003_v6 = vpop.eup %7398  ;;  %vm3234_vm3 = vweird.f32 %v7397_v15 }
0x158b   :  { %v3244_v30 = vmul.f32 %v9003_v6, %v8994_v41  ;;  %vm3235_vm7 = vmor %vm3233_vm2, %vm3234_vm3  ;;  %vm3249_vm6 = vweird.f32 %v9003_v6 }
0x158c   :  { %v3230_v48 = vsub.f32 1.0, %v3229_v35  ;;  %v3252_v35 = vand.u32 2147483647, %v8994_v41  ;;  %vm9037_vm11 = vmor %vm3248_vm5, %vm3249_vm6 }
0x158d   :  { %v3245_v12 = vsub.f32 1.0, %v3244_v30 }
0x158e   :  { %v3231_v28 = vmul.f32 %v7397_v15, %v3230_v48  ;;  %vm3253_vm14 = vcmp.eq.f32.partialorder %v3252_v35, 8.507059e+37 }
0x158f   :  { %7163 = vrot.lane.b32.xlu1 %v8865_v20, %s10232_s11  ;;  %3226 = vadd.xlane.f32.xlu2 %v3225_v43  ;;  %v3222_v20 = vsel %vm1182_vm9, %v8989_v2, 0.0  ;;  %v3246_v39 = vmul.f32 %v9003_v6, %v3245_v12 }
0x1590   :  { %v3232_v46 = vadd.f32 %v7397_v15, %v3231_v28 }
0x1591   :  { %v3247_v33 = vadd.f32 %v9003_v6, %v3246_v39 }
0x1592   :  { %v3236_v59 = vsel %vm3235_vm7, %v7397_v15, %v3232_v46 }
0x1593   :  { %v3241_v63 = vsel %vm3238_vm4, %v3240_v51, %v3236_v59  ;;  %v3251_v30 = vsel %vm9037_vm11, %v9003_v6, %v3247_v33 }
0x1594   :  { %v3242_v15 = vmul.f32 %v8934_v18, %v3241_v63 }
0x15ac   :  { %3488 = vadd.xlane.f32.xlu0 %v3487_v42 }
0x15b9   :  { %3223 = vadd.xlane.f32.xlu1 %v3222_v20 }
0x15bb   :  { %v9000_v54 = vpop.xlane.xlu2 %3220 }
0x15bc   :  { %v3269_v59 = vand.u32 2147483648, %v9000_v54  ;;  %vm3263_vm2 = vweird.f32 %v9000_v54 }
0x15d9   :  { %v8998_v40 = vpop.xlane.xlu0 %3479 }
0x15da   :  { %7400 = vrcp.f32 %v8998_v40  ;;  %v3504_v12 = vand.u32 2147483648, %v8998_v40  ;;  %vm3498_vm15 = vweird.f32 %v8998_v40  ;;  %v3502_v6 = vand.u32 2147483647, %v8998_v40 }
0x15db   :  { %7402 = vrcp.f32 %v9000_v54 }
0x15dc   :  { %vm3503_vm4 = vcmp.eq.f32.partialorder %v3502_v6, 8.507059e+37 }
0x15e0   :  { %v9010_v17 = vpop.eup %7400 }
0x15e1   :  { %v9006_v37 = vpop.xlane.xlu1 %3482  ;;  %v9013_v50 = vpop.eup %7402  ;;  %v3494_v5 = vmul.f32 %v9010_v17, %v8998_v40  ;;  %vm3499_vm13 = vweird.f32 %v9010_v17  ;;  %v3267_v40 = vand.u32 2147483647, %v9000_v54 }
0x15e2   :  { %7404 = vrcp.f32 %v9006_v37  ;;  %v3259_v47 = vmul.f32 %v9013_v50, %v9000_v54  ;;  %vm3264_vm10 = vweird.f32 %v9013_v50  ;;  %vm3500_vm3 = vmor %vm3498_vm15, %vm3499_vm13  ;;  %vm3513_vm11 = vweird.f32 %v9006_v37 }
0x15e3   :  { %v3495_v61 = vsub.f32 1.0, %v3494_v5  ;;  %vm9066_vm7 = vmor %vm3263_vm2, %vm3264_vm10  ;;  %vm3268_vm5 = vcmp.eq.f32.partialorder %v3267_v40, 8.507059e+37 }
0x15e4   :  { %v3260_v13 = vsub.f32 1.0, %v3259_v47 }
0x15e5   :  { %v3496_v7 = vmul.f32 %v9010_v17, %v3495_v61  ;;  %v3505_v61 = vor.u32 1.1754944e-38, %v3504_v12  ;;  %v7576_v12 = vld [vmem:[%s8390_s1 + $0x20] sm:$0xff] }
0x15e6   :  { %v3261_v28 = vmul.f32 %v9013_v50, %v3260_v13 }
0x15e7   :  { %v3497_v18 = vadd.f32 %v9010_v17, %v3496_v7  ;;  %v3519_v7 = vand.u32 2147483648, %v9006_v37 }
0x15e8   :  { %v9025_v21 = vpop.eup %7404 }
0x15e9   :  { %v9023_v19 = vpop.xlane.xlu1 %3485  ;;  %v3509_v42 = vmul.f32 %v9025_v21, %v9006_v37  ;;  %v3501_v39 = vsel %vm3500_vm3, %v9010_v17, %v3497_v18  ;;  %vm3514_vm6 = vweird.f32 %v9025_v21 }
0x15ea   :  { %7406 = vrcp.f32 %v9023_v19  ;;  %v3506_v33 = vsel %vm3503_vm4, %v3505_v61, %v3501_v39  ;;  %vm3515_vm13 = vmor %vm3513_vm11, %vm3514_vm6  ;;  %vm3528_vm10 = vweird.f32 %v9023_v19 }
0x15eb   :  { %v3510_v41 = vsub.f32 1.0, %v3509_v42 }
0x15ec   :  { %v7169_v55 = vpop.permute.xlu0 %7168 }
0x15ed   :  { %v7170_v52 = vunpack.i.l.bf16 %v7169_v55  ;;  %v7171_v60 = vunpack.i.h.bf16 %v7169_v55  ;;  %v3255_v55 = vor.u32 1.1754944e-38, %v3254_v32  ;;  %v3511_v47 = vmul.f32 %v9025_v21, %v3510_v41 }
0x15ee   :  { %v3270_v32 = vor.u32 1.1754944e-38, %v3269_v59  ;;  %v3534_v41 = vand.u32 2147483648, %v9023_v19  ;;  %v7580_v59 = vld [vmem:[%s8390_s1] sm:$0xff] }
0x15ef   :  { %3346 = vmatpush.msrb.mxu1 %v7170_v52  ;;  %v7570_v52 = vld [vmem:[%s8236_s4] sm:$0xff]  ;;  %v3256_v5 = vsel %vm3253_vm14, %v3255_v55, %v3251_v30  ;;  %v3512_v54 = vadd.f32 %v9025_v21, %v3511_v47  ;;  %v7573_v55 = vld [vmem:[%s8390_s1 + $0x38] sm:$0xff]  ;;  %v7581_v47 = vld [vmem:[%s8417_s27 + $0x8] sm:$0xff] }
0x15f0   :  { %v9049_v46 = vpop.eup %7406  ;;  %v3535_v6 = vor.u32 1.1754944e-38, %v3534_v41 }
0x15f1   :  { %3347 = vmatpush.msrb.mxu1 %v7171_v60  ;;  %v3262_v60 = vadd.f32 %v9013_v50, %v3261_v28  ;;  %v3524_v51 = vmul.f32 %v9049_v46, %v9023_v19  ;;  %v3516_v48 = vsel %vm3515_vm13, %v9025_v21, %v3512_v54  ;;  %v3520_v28 = vor.u32 1.1754944e-38, %v3519_v7  ;;  %v7575_v21 = vld [vmem:[%s8390_s1 + $0x28] sm:$0xff] }
0x15f2   :  { %vm3529_vm15 = vweird.f32 %v9049_v46 }
0x15f3   :  { %v3266_v13 = vsel %vm9066_vm7, %v9013_v50, %v3262_v60  ;;  %vm3530_vm3 = vmor %vm3528_vm10, %vm3529_vm15 }
0x15f4   :  { %v7174_v43 = vpop.permute.xlu0 %7173  ;;  %v3271_v50 = vsel %vm3268_vm5, %v3270_v32, %v3266_v13 }
0x15f5   :  { %v7175_v11 = vunpack.i.l.bf16 %v7174_v43  ;;  %v7176_v20 = vunpack.i.h.bf16 %v7174_v43  ;;  %v3257_v43 = vmul.f32 %v8940_v45, %v3256_v5  ;;  %v3525_v45 = vsub.f32 1.0, %v3524_v51  ;;  %v7577_v5 = vld [vmem:[%s8390_s1 + $0x18] sm:$0xff] }
0x15f6   :  { %v3272_v30 = vmul.f32 %v8949_v1, %v3271_v50  ;;  %v3532_v1 = vand.u32 2147483647, %v9023_v19  ;;  %v7579_v19 = vld [vmem:[%s8390_s1 + $0x8] sm:$0xff] }
0x15f7   :  { %3348 = vmatpush.msrb.mxu1 %v7175_v11  ;;  %v3526_v35 = vmul.f32 %v9049_v46, %v3525_v45 }
0x15f8   :  { %vm3533_vm2 = vcmp.eq.f32.partialorder %v3532_v1, 8.507059e+37 }
0x15f9   :  { %3349 = vmatpush.msrb.mxu1 %v7176_v20  ;;  %v3507_v20 = vmul.f32 %v8953_v34, %v3506_v33  ;;  %v3527_v18 = vadd.f32 %v9049_v46, %v3526_v35 }
0x15fa   :  { %6857 = vmatmul.msk.f32.vlgmr.msrb.gmra.mxu1 %vm1182_vm9, %v3242_v15  ;;  %v3517_v15 = vand.u32 2147483647, %v9006_v37  ;;  %v7574_v37 = vld [vmem:[%s8390_s1 + $0x30] sm:$0xff]  ;;  %v3492_v39 = vpop.xlane.xlu2 %3491 }
0x15fb   :  { %3708 = vmatpush.msra.mxu1 %v7570_v52  ;;  %7408 = vrcp.f32 %v3492_v39  ;;  %v3564_v35 = vand.u32 2147483648, %v3492_v39  ;;  %vm3558_vm13 = vweird.f32 %v3492_v39 }
0x15fc   :  { %vm3518_vm14 = vcmp.eq.f32.partialorder %v3517_v15, 8.507059e+37 }
0x15fd   :  { %4143 = vmatpush.msrb.mxu1 %v7571_v25  ;;  %v3521_v34 = vsel %vm3518_vm14, %v3520_v28, %v3516_v48  ;;  %v3531_v25 = vsel %vm3530_vm3, %v9049_v46, %v3527_v18  ;;  %v7582_v46 = vld [vmem:[%s8417_s27] sm:$0xff]  ;;  %v3565_v18 = vor.u32 1.1754944e-38, %v3564_v35 }
0x15fe   :  { %v3522_v52 = vmul.f32 %v8957_v38, %v3521_v34  ;;  %v3536_v60 = vsel %vm3533_vm2, %v3535_v6, %v3531_v25 }
0x15ff   :  { %4144 = vmatpush.msrb.mxu1 %v7572_v58  ;;  %v7578_v58 = vld [vmem:[%s8390_s1 + $0x10] sm:$0xff]  ;;  %v3537_v38 = vmul.f32 %v8963_v8, %v3536_v60 }
0x1601   :  { %v7164_v11 = vpop.permute.xlu1 %7163  ;;  %v7409_v40 = vpop.eup %7408 }
0x1602   :  { %v7165_v17 = vunpack.i.l.bf16 %v7164_v11  ;;  %6858 = vmatmul.msk.f32.gmra.mxu1 %vm1182_vm9, %v3257_v43  ;;  %v7166_v42 = vunpack.i.h.bf16 %v7164_v11  ;;  %v3554_v61 = vmul.f32 %v7409_v40, %v3492_v39  ;;  %v3227_v43 = vpop.xlane.xlu2 %3226  ;;  %vm3559_vm5 = vweird.f32 %v7409_v40 }
0x1603   :  { %vm3560_vm14 = vmor %vm3558_vm13, %vm3559_vm5 }
0x1604   :  { %3613 = vmatpush.msrb.mxu0 %v7165_v17  ;;  %v3555_v11 = vsub.f32 1.0, %v3554_v61 }
0x1606   :  { %3614 = vmatpush.msrb.mxu0 %v7166_v42  ;;  %v3556_v13 = vmul.f32 %v7409_v40, %v3555_v11 }
0x1607   :  { %6873 = vmatmul.msk.f32.vlgmr.msrb.gmra.mxu0 %vm1182_vm9, %v3507_v20 }
0x1608   :  { %3930 = vmatpush.msra.mxu0 %v7573_v55  ;;  %v3557_v15 = vadd.f32 %v7409_v40, %v3556_v13 }
0x160a   :  { %6859 = vmatmul.msk.f32.gmra.mxu1 %vm1182_vm9, %v3272_v30  ;;  %3931 = vmatpush.msra.mxu0 %v7574_v37  ;;  %v3562_v30 = vand.u32 2147483647, %v3492_v39  ;;  %v3561_v37 = vsel %vm3560_vm14, %v7409_v40, %v3557_v15 }
0x160c   :  { %3932 = vmatpush.msra.mxu0 %v7575_v21  ;;  %vm3563_vm15 = vcmp.eq.f32.partialorder %v3562_v30, 8.507059e+37 }
0x160e   :  { %3933 = vmatpush.msra.mxu0 %v7576_v12 }
0x160f   :  { %6874 = vmatmul.msk.f32.gmra.mxu0 %vm1182_vm9, %v3522_v52  ;;  %v3566_v52 = vsel %vm3563_vm15, %v3565_v18, %v3561_v37 }
0x1610   :  { %3934 = vmatpush.msra.mxu0 %v7577_v5  ;;  %v3567_v60 = vmul.f32 %v8973_v49, %v3566_v52 }
0x1612   :  { %3935 = vmatpush.msra.mxu0 %v7578_v58 }
0x1614   :  { %3936 = vmatpush.msra.mxu0 %v7579_v19 }
0x1616   :  { %3937 = vmatpush.msra.mxu0 %v7580_v59  ;;  %v3299_v59 = vand.u32 2147483648, %v3227_v43 }
0x1617   :  { %6875 = vmatmul.msk.f32.gmra.mxu0 %vm1182_vm9, %v3537_v38 }
0x1618   :  { %4230 = vmatpush.msrb.mxu0 %v7581_v47  ;;  %v3297_v47 = vand.u32 2147483647, %v3227_v43 }
0x161a   :  { %4231 = vmatpush.msrb.mxu0 %v7582_v46 }
0x161f   :  { %v3489_v51 = vpop.xlane.xlu0 %3488 }
0x1620   :  { %7410 = vrcp.f32 %v3489_v51  ;;  %v3549_v17 = vand.u32 2147483648, %v3489_v51  ;;  %v3547_v54 = vand.u32 2147483647, %v3489_v51  ;;  %vm3543_vm4 = vweird.f32 %v3489_v51 }
0x1621   :  { %7412 = vrcp.f32 %v3227_v43 }
0x1622   :  { %v3550_v20 = vor.u32 1.1754944e-38, %v3549_v17  ;;  %vm3548_vm11 = vcmp.eq.f32.partialorder %v3547_v54, 8.507059e+37 }
0x1626   :  { %v7411_v63 = vpop.eup %7410 }
0x1627   :  { %v3539_v33 = vmul.f32 %v7411_v63, %v3489_v51  ;;  %vm3544_vm7 = vweird.f32 %v7411_v63  ;;  %v7413_v7 = vpop.eup %7412  ;;  %v3300_v51 = vor.u32 1.1754944e-38, %v3299_v59 }
0x1628   :  { %vm3545_vm6 = vmor %vm3543_vm4, %vm3544_vm7  ;;  %v3289_v48 = vmul.f32 %v7413_v7, %v3227_v43  ;;  %vm3294_vm7 = vweird.f32 %v7413_v7 }
0x1629   :  { %v3540_v8 = vsub.f32 1.0, %v3539_v33 }
0x162a   :  { %v3290_v41 = vsub.f32 1.0, %v3289_v48 }
0x162b   :  { %v3541_v32 = vmul.f32 %v7411_v63, %v3540_v8 }
0x162c   :  { %v3224_v45 = vpop.xlane.xlu1 %3223  ;;  %v3291_v25 = vmul.f32 %v7413_v7, %v3290_v41 }
0x162d   :  { %v3542_v42 = vadd.f32 %v7411_v63, %v3541_v32  ;;  %7414 = vrcp.f32 %v3224_v45  ;;  %v3284_v12 = vand.u32 2147483648, %v3224_v45  ;;  %v3282_v5 = vand.u32 2147483647, %v3224_v45 }
0x162e   :  { %vm3278_vm3 = vweird.f32 %v3224_v45  ;;  %v3292_v19 = vadd.f32 %v7413_v7, %v3291_v25 }
0x162f   :  { %v3546_v50 = vsel %vm3545_vm6, %v7411_v63, %v3542_v42  ;;  %vm3283_vm4 = vcmp.eq.f32.partialorder %v3282_v5, 8.507059e+37  ;;  %vm3293_vm6 = vweird.f32 %v3227_v43  ;;  %v7583_v42 = vld [vmem:[%s8284_s18] ss:$0 sm:$0xff] }
0x1630   :  { %v3551_v28 = vsel %vm3548_vm11, %v3550_v20, %v3546_v50  ;;  %vm3295_vm5 = vmor %vm3293_vm6, %vm3294_vm7  ;;  %vm3298_vm11 = vcmp.eq.f32.partialorder %v3297_v47, 8.507059e+37 }
0x1631   :  { %v3552_v55 = vmul.f32 %v8985_v36, %v3551_v28  ;;  %v3285_v36 = vor.u32 1.1754944e-38, %v3284_v12  ;;  %v3296_v49 = vsel %vm3295_vm5, %v7413_v7, %v3292_v19 }
0x1632   :  { %v3301_v40 = vsel %vm3298_vm11, %v3300_v51, %v3296_v49 }
0x1633   :  { %v7415_v34 = vpop.eup %7414  ;;  %6876 = vmatmul.msk.f32.gmra.mxu0 %vm1182_vm9, %v3552_v55  ;;  %v3302_v61 = vmul.f32 %v8977_v4, %v3301_v40 }
0x1634   :  { %v3274_v21 = vmul.f32 %v7415_v34, %v3224_v45  ;;  %vm3279_vm10 = vweird.f32 %v7415_v34 }
0x1635   :  { %vm3280_vm2 = vmor %vm3278_vm3, %vm3279_vm10 }
0x1636   :  { %v3275_v1 = vsub.f32 1.0, %v3274_v21 }
0x1638   :  { %v3276_v6 = vmul.f32 %v7415_v34, %v3275_v1 }
0x163a   :  { %v3277_v58 = vadd.f32 %v7415_v34, %v3276_v6 }
0x163b   :  { %6877 = vmatmul.msk.f32.gmra.mxu0 %vm1182_vm9, %v3567_v60 }
0x163c   :  { %v3281_v38 = vsel %vm3280_vm2, %v7415_v34, %v3277_v58 }
0x163d   :  { %v3286_v39 = vsel %vm3283_vm4, %v3285_v36, %v3281_v38 }
0x163e   :  { %v3287_v46 = vmul.f32 %v8989_v2, %v3286_v39 }
0x1640   :  { %6860 = vmatmul.msk.f32.gmra.mxu1 %vm1182_vm9, %v3287_v46 }
0x1648   :  { %6861 = vmatmul.msk.f32.gmra.mxu1 %vm1182_vm9, %v3302_v61 }
0x1677   :  { %v3351_v63 = vpop.f32.mrf.mxu1 }
0x1678   :  { %6883 = vmatmul.msk.f32.vlgmr.msra.gmra.mxu1 %vm304_vm1, %v3351_v63 }
0x1679   :  { %6925 = vmatpush.xpose.msk.msra.mxu1 %vm304_vm1, %v7746_v23 }
0x167f   :  { %v3354_v43 = vpop.f32.mrf.mxu1 }
0x1680   :  { %6884 = vmatmul.msk.f32.gmra.mxu1 %vm304_vm1, %v3354_v43 }
0x1684   :  { %v3616_v2 = vpop.f32.mrf.mxu0 }
0x1685   :  { %6878 = vmatmul.msk.f32.vlgmr.msra.gmra.mxu2 %vm304_vm1, %v3616_v2 }
0x1687   :  { %v3357_v11 = vpop.f32.mrf.mxu1 }
0x1688   :  { %6885 = vmatmul.msk.f32.gmra.mxu1 %vm304_vm1, %v3357_v11 }
0x168c   :  { %v3619_v33 = vpop.f32.mrf.mxu0 }
0x168d   :  { %6879 = vmatmul.msk.f32.gmra.mxu2 %vm304_vm1, %v3619_v33 }
0x1694   :  { %v3622_v4 = vpop.f32.mrf.mxu0 }
0x1695   :  { %6880 = vmatmul.msk.f32.gmra.mxu2 %vm304_vm1, %v3622_v4 }
0x16b0   :  { %v3625_v8 = vpop.f32.mrf.mxu0 }
0x16b1   :  { %6881 = vmatmul.msk.f32.gmra.mxu2 %vm304_vm1, %v3625_v8 }
0x16b8   :  { %v3628_v23 = vpop.f32.mrf.mxu0 }
0x16b9   :  { %6882 = vmatmul.msk.f32.gmra.mxu2 %vm304_vm1, %v3628_v23 }
0x16bd   :  { %v3360_v17 = vpop.f32.mrf.mxu1 }
0x16be   :  { %6886 = vmatmul.msk.f32.gmra.mxu1 %vm304_vm1, %v3360_v17 }
0x16c5   :  { %v3363_v13 = vpop.f32.mrf.mxu1 }
0x16c6   :  { %6887 = vmatmul.msk.f32.gmra.mxu1 %vm304_vm1, %v3363_v13 }
0x16f5   :  { %v3710_v32 = vpop.f32.mrf.mxu1 }
0x16fd   :  { %v3713_v15 = vpop.f32.mrf.mxu1 }
0x1705   :  { %v3716_v34 = vpop.f32.mrf.mxu1 }
0x1708   :  { %v3663_v54 = vpop.f32.mrf.mxu2 }
0x1709   :  { %v3711_v45 = vadd.f32 %v3710_v32, %v3663_v54 }
0x170b   :  { %v3725_v7 = vadd.f32 %v3711_v45, %v8819_v16 }
0x170d   :  { %v3730_v20 = vadd.f32 %v7583_v42, %v3725_v7 }
0x170f   :  { %v3735_v50 = vsel %vm222_vm0, %v3730_v20, 0.0 }
0x1710   :  { %3736 = vadd.xlane.f32.xlu2 %v3735_v50  ;;  %v3666_v35 = vpop.f32.mrf.mxu2 }
0x1711   :  { %v3714_v48 = vadd.f32 %v3713_v15, %v3666_v35 }
0x1713   :  { %v3726_v28 = vadd.f32 %v3714_v48, %v8830_v29 }
0x1715   :  { %v3731_v30 = vadd.f32 %v7583_v42, %v3726_v28 }
0x1717   :  { %v3738_v55 = vsel %vm222_vm0, %v3731_v30, 0.0 }
0x1718   :  { %3739 = vadd.xlane.f32.xlu0 %v3738_v55  ;;  %v3669_v37 = vpop.f32.mrf.mxu2 }
0x1719   :  { %v3717_v18 = vadd.f32 %v3716_v34, %v3669_v37 }
0x171b   :  { %v3727_v41 = vadd.f32 %v3717_v18, %v8839_v56 }
0x171d   :  { %v3732_v16 = vadd.f32 %v7583_v42, %v3727_v41 }
0x171f   :  { %v3741_v21 = vsel %vm222_vm0, %v3732_v16, 0.0 }
0x1720   :  { %3742 = vadd.xlane.f32.xlu1 %v3741_v21 }
0x1734   :  { %v3672_v1 = vpop.f32.mrf.mxu2 }
0x173b   :  { %v3719_v52 = vpop.f32.mrf.mxu1 }
0x173c   :  { %v3720_v12 = vadd.f32 %v3719_v52, %v3672_v1  ;;  %v3675_v5 = vpop.f32.mrf.mxu2 }
0x173e   :  { %v3728_v25 = vadd.f32 %v3720_v12, %v8848_v57 }
0x1740   :  { %v3733_v6 = vadd.f32 %v7583_v42, %v3728_v25 }
0x1742   :  { %v3744_v29 = vsel %vm222_vm0, %v3733_v6, 0.0 }
0x1743   :  { %v3722_v60 = vpop.f32.mrf.mxu1  ;;  %3745 = vadd.xlane.f32.xlu2 %v3744_v29 }
0x1744   :  { %v3723_v58 = vadd.f32 %v3722_v60, %v3675_v5  ;;  %v7584_v5 = vld [vmem:[%s8307_s26] ss:$0 sm:$0xff] }
0x1746   :  { %v3729_v36 = vadd.f32 %v3723_v58, %v8857_v10 }
0x1748   :  { %v3734_v19 = vadd.f32 %v7583_v42, %v3729_v36 }
0x174a   :  { %v3747_v56 = vsel %vm895_vm12, %v3734_v19, 0.0 }
0x174b   :  { %3748 = vadd.xlane.f32.xlu0 %v3747_v56 }
0x1783   :  { %v3737_v38 = vpop.xlane.xlu2 %3736 }
0x1784   :  { %v3750_v59 = vmul.f32 %v3737_v38, %v7904_v3 }
0x1786   :  { %v3755_v39 = vsub.f32 %v3730_v20, %v3750_v59 }
0x1788   :  { %v3760_v47 = vmul.f32 %v3755_v39, %v3755_v39 }
0x178a   :  { %v3765_v57 = vsel %vm222_vm0, %v3760_v47, 0.0 }
0x178b   :  { %v3740_v46 = vpop.xlane.xlu0 %3739  ;;  %3766 = vadd.xlane.f32.xlu1 %v3765_v57 }
0x178c   :  { %v3751_v49 = vmul.f32 %v3740_v46, %v7904_v3 }
0x178e   :  { %v9139_v51 = vsub.f32 %v3731_v30, %v3751_v49 }
0x1790   :  { %v3761_v10 = vmul.f32 %v9139_v51, %v9139_v51 }
0x1792   :  { %v3768_v40 = vsel %vm222_vm0, %v3761_v10, 0.0 }
0x1793   :  { %v3743_v61 = vpop.xlane.xlu1 %3742  ;;  %3769 = vadd.xlane.f32.xlu2 %v3768_v40 }
0x1794   :  { %v3752_v63 = vmul.f32 %v3743_v61, %v7904_v3 }
0x1796   :  { %v9145_v43 = vsub.f32 %v3732_v16, %v3752_v63 }
0x1798   :  { %v3762_v2 = vmul.f32 %v9145_v43, %v9145_v43 }
0x179a   :  { %v3771_v11 = vsel %vm222_vm0, %v3762_v2, 0.0 }
0x179b   :  { %3772 = vadd.xlane.f32.xlu0 %v3771_v11 }
0x17b6   :  { %v3746_v33 = vpop.xlane.xlu2 %3745 }
0x17b7   :  { %v3753_v4 = vmul.f32 %v3746_v33, %v7904_v3 }
0x17b9   :  { %v9151_v8 = vsub.f32 %v3733_v6, %v3753_v4 }
0x17bb   :  { %v3763_v23 = vmul.f32 %v9151_v8, %v9151_v8 }
0x17bd   :  { %v3774_v17 = vsel %vm222_vm0, %v3763_v23, 0.0 }
0x17be   :  { %3775 = vadd.xlane.f32.xlu1 %v3774_v17  ;;  %v3749_v13 = vpop.xlane.xlu0 %3748 }
0x17bf   :  { %v3754_v32 = vmul.f32 %v3749_v13, %v7904_v3 }
0x17c1   :  { %v9157_v54 = vsub.f32 %v3734_v19, %v3754_v32  ;;  %v7585_v19 = vld [vmem:[%s8326_s3] ss:$0 sm:$0xff] }
0x17c3   :  { %v3764_v45 = vmul.f32 %v9157_v54, %v9157_v54 }
0x17c5   :  { %v3777_v7 = vsel %vm895_vm12, %v3764_v45, 0.0 }
0x17c6   :  { %3778 = vadd.xlane.f32.xlu2 %v3777_v7 }
0x17fe   :  { %v3767_v42 = vpop.xlane.xlu1 %3766 }
0x17ff   :  { %v3780_v20 = vmul.f32 %v3767_v42, %v7904_v3 }
0x1801   :  { %v3785_v15 = vadd.f32 1e-05, %v3780_v20 }
0x1803   :  { %7416 = vrsqrt.f32 %v3785_v15  ;;  %vm3796_vm14 = vweird.f32 %v3785_v15 }
0x1806   :  { %v3770_v50 = vpop.xlane.xlu2 %3769 }
0x1807   :  { %v3781_v35 = vmul.f32 %v3770_v50, %v7904_v3 }
0x1809   :  { %v7417_v48 = vpop.eup %7416  ;;  %v3786_v28 = vadd.f32 1e-05, %v3781_v35 }
0x180a   :  { %v3791_v30 = vmul.f32 %v7417_v48, %v3785_v15  ;;  %vm3797_vm13 = vweird.f32 %v7417_v48 }
0x180b   :  { %7418 = vrsqrt.f32 %v3786_v28  ;;  %vm3798_vm15 = vmor %vm3796_vm14, %vm3797_vm13  ;;  %vm3806_vm3 = vweird.f32 %v3786_v28 }
0x180c   :  { %v3792_v55 = vmul.f32 %v7417_v48, %v3791_v30 }
0x180e   :  { %v3793_v34 = vmul.f32 0.5, %v3792_v55  ;;  %v3773_v37 = vpop.xlane.xlu0 %3772 }
0x180f   :  { %v3782_v18 = vmul.f32 %v3773_v37, %v7904_v3 }
0x1810   :  { %v3794_v41 = vsub.f32 1.5, %v3793_v34 }
0x1811   :  { %v7419_v16 = vpop.eup %7418  ;;  %v3787_v21 = vadd.f32 1e-05, %v3782_v18 }
0x1812   :  { %v3795_v1 = vmul.f32 %v7417_v48, %v3794_v41  ;;  %v3801_v52 = vmul.f32 %v7419_v16, %v3786_v28  ;;  %vm3807_vm10 = vweird.f32 %v7419_v16 }
0x1813   :  { %7420 = vrsqrt.f32 %v3787_v21  ;;  %vm3808_vm2 = vmor %vm3806_vm3, %vm3807_vm10  ;;  %vm3816_vm4 = vweird.f32 %v3787_v21  ;;  %vm10242_vm3 = vcmask 523264  }
0x1814   :  { %v3799_v12 = vsel %vm3798_vm15, %v7417_v48, %v3795_v1  ;;  %v3802_v25 = vmul.f32 %v7419_v16, %v3801_v52 }
0x1815   :  { %v3840_v6 = vmul.f32 %v3799_v12, %v3755_v39 }
0x1816   :  { %v3803_v29 = vmul.f32 0.5, %v3802_v25 }
0x1817   :  { %v3845_v60 = vmul.f32 %v7584_v5, %v3840_v6 }
0x1818   :  { %v3804_v58 = vsub.f32 1.5, %v3803_v29 }
0x1819   :  { %v7421_v36 = vpop.eup %7420  ;;  %v9167_v56 = vadd.f32 %v7585_v19, %v3845_v60 }
0x181a   :  { %v3805_v38 = vmul.f32 %v7419_v16, %v3804_v58  ;;  %v3811_v59 = vmul.f32 %v7421_v36, %v3787_v21  ;;  %vm3817_vm7 = vweird.f32 %v7421_v36 }
0x181b   :  { %6888 = vmatmul.msk.f32.vlgmr.msrb.gmra.mxu3 %vm222_vm0, %v9167_v56  ;;  %vm3818_vm6 = vmor %vm3816_vm4, %vm3817_vm7 }
0x181c   :  { %v3809_v47 = vsel %vm3808_vm2, %v7419_v16, %v3805_v38  ;;  %v3812_v57 = vmul.f32 %v7421_v36, %v3811_v59  ;;  %vm10243_vm2 = vmmov %vm10242_vm3 }
0x181d   :  { %v3841_v39 = vmul.f32 %v3809_v47, %v9139_v51  ;;  %vm10244_vm7 = vmmov %vm10243_vm2 }
0x181e   :  { %v3813_v46 = vmul.f32 0.5, %v3812_v57  ;;  %vm10245_vm4 = vmmov %vm10243_vm2 }
0x181f   :  { %v3846_v49 = vmul.f32 %v7584_v5, %v3841_v39 }
0x1820   :  { %v3814_v10 = vsub.f32 1.5, %v3813_v46 }
0x1821   :  { %v9172_v40 = vadd.f32 %v7585_v19, %v3846_v49 }
0x1822   :  { %v3815_v61 = vmul.f32 %v7421_v36, %v3814_v10  ;;  %v7587_v10 = vld [vmem:[%s8412_s15] ss:$0 sm:$0xff] }
0x1823   :  { %6889 = vmatmul.msk.f32.gmra.mxu3 %vm222_vm0, %v9172_v40 }
0x1824   :  { %v3819_v63 = vsel %vm3818_vm6, %v7421_v36, %v3815_v61  ;;  %vm10246_vm6 = vmmov %vm10243_vm2 }
0x1825   :  { %v3842_v2 = vmul.f32 %v3819_v63, %v9145_v43 }
0x1827   :  { %v3847_v11 = vmul.f32 %v7584_v5, %v3842_v2 }
0x1829   :  { %v9177_v33 = vadd.f32 %v7585_v19, %v3847_v11 }
0x182b   :  { %6890 = vmatmul.msk.f32.gmra.mxu3 %vm222_vm0, %v9177_v33 }
0x1831   :  { %v3776_v51 = vpop.xlane.xlu1 %3775 }
0x1832   :  { %v3783_v4 = vmul.f32 %v3776_v51, %v7904_v3 }
0x1834   :  { %v3788_v23 = vadd.f32 1e-05, %v3783_v4 }
0x1836   :  { %7422 = vrsqrt.f32 %v3788_v23  ;;  %vm3826_vm11 = vweird.f32 %v3788_v23 }
0x1839   :  { %v3779_v17 = vpop.xlane.xlu2 %3778 }
0x183a   :  { %v3784_v13 = vmul.f32 %v3779_v17, %v7904_v3 }
0x183c   :  { %v7423_v32 = vpop.eup %7422  ;;  %v3789_v45 = vadd.f32 1e-05, %v3784_v13 }
0x183d   :  { %v3821_v7 = vmul.f32 %v7423_v32, %v3788_v23  ;;  %vm3827_vm5 = vweird.f32 %v7423_v32 }
0x183e   :  { %7424 = vrsqrt.f32 %v3789_v45  ;;  %vm3828_vm13 = vmor %vm3826_vm11, %vm3827_vm5  ;;  %vm3836_vm15 = vweird.f32 %v3789_v45 }
0x183f   :  { %v3822_v42 = vmul.f32 %v7423_v32, %v3821_v7 }
0x1841   :  { %v3823_v43 = vmul.f32 0.5, %v3822_v42 }
0x1843   :  { %v3824_v20 = vsub.f32 1.5, %v3823_v43 }
0x1844   :  { %v7425_v15 = vpop.eup %7424 }
0x1845   :  { %v3825_v50 = vmul.f32 %v7423_v32, %v3824_v20  ;;  %v3831_v35 = vmul.f32 %v7425_v15, %v3789_v45  ;;  %vm3837_vm14 = vweird.f32 %v7425_v15 }
0x1846   :  { %vm3838_vm10 = vmor %vm3836_vm15, %vm3837_vm14 }
0x1847   :  { %v3829_v48 = vsel %vm3828_vm13, %v7423_v32, %v3825_v50  ;;  %v3832_v28 = vmul.f32 %v7425_v15, %v3831_v35 }
0x1848   :  { %v3843_v30 = vmul.f32 %v3829_v48, %v9151_v8  ;;  %v7586_v8 = vld [vmem:[%s8348_s12] ss:$0 sm:$0xff] }
0x1849   :  { %v3833_v55 = vmul.f32 0.5, %v3832_v28 }
0x184a   :  { %v3848_v34 = vmul.f32 %v7584_v5, %v3843_v30 }
0x184b   :  { %v3834_v37 = vsub.f32 1.5, %v3833_v55 }
0x184c   :  { %v3853_v18 = vadd.f32 %v7585_v19, %v3848_v34 }
0x184d   :  { %v3835_v41 = vmul.f32 %v7425_v15, %v3834_v37 }
0x184e   :  { %6891 = vmatmul.msk.f32.gmra.mxu3 %vm222_vm0, %v3853_v18 }
0x184f   :  { %v3839_v16 = vsel %vm3838_vm10, %v7425_v15, %v3835_v41 }
0x1850   :  { %v3844_v21 = vmul.f32 %v3839_v16, %v9157_v54 }
0x1852   :  { %v3849_v1 = vmul.f32 %v7584_v5, %v3844_v21 }
0x1854   :  { %v3854_v52 = vadd.f32 %v7585_v19, %v3849_v1 }
0x1856   :  { %6892 = vmatmul.msk.f32.gmra.mxu3 %vm222_vm0, %v3854_v52 }
0x189e   :  { %v3887_v12 = vpop.f32.mrf.mxu3 }
0x189f   :  { %v3888_v25 = vadd.f32 %v7586_v8, %v3887_v12 }
0x18a1   :  { %v3902_v6 = vmax.f32 %v3888_v25, 0.0 }
0x18a3   :  { %6893 = vmatmul.msk.f32.vlgmr.msra.gmra.mxu0 %vm10242_vm3, %v3902_v6 }
0x18a4   :  { %6937 = vmatpush.xpose.msk.msra.mxu0 %vm304_vm1, %v7759_v26 }
0x18a6   :  { %v3890_v29 = vpop.f32.mrf.mxu3 }
0x18a7   :  { %v3891_v60 = vadd.f32 %v7586_v8, %v3890_v29 }
0x18a9   :  { %v3903_v58 = vmax.f32 %v3891_v60, 0.0 }
0x18ab   :  { %6894 = vmatmul.msk.f32.gmra.mxu0 %vm10243_vm2, %v3903_v58 }
0x18ae   :  { %v3893_v54 = vpop.f32.mrf.mxu3 }
0x18af   :  { %v3894_v5 = vadd.f32 %v7586_v8, %v3893_v54 }
0x18b1   :  { %v3904_v36 = vmax.f32 %v3894_v5, 0.0 }
0x18b3   :  { %6895 = vmatmul.msk.f32.gmra.mxu0 %vm10244_vm7, %v3904_v36 }
0x18d1   :  { %v3896_v19 = vpop.f32.mrf.mxu3 }
0x18d2   :  { %v3897_v38 = vadd.f32 %v7586_v8, %v3896_v19 }
0x18d4   :  { %v3905_v59 = vmax.f32 %v3897_v38, 0.0 }
0x18d6   :  { %6896 = vmatmul.msk.f32.gmra.mxu0 %vm10245_vm4, %v3905_v59 }
0x18d9   :  { %v3899_v47 = vpop.f32.mrf.mxu3 }
0x18da   :  { %v3900_v57 = vadd.f32 %v7586_v8, %v3899_v47 }
0x18dc   :  { %v3906_v39 = vmax.f32 %v3900_v57, 0.0 }
0x18de   :  { %6897 = vmatmul.msk.f32.gmra.mxu0 %vm10246_vm6, %v3906_v39 }
0x1920   :  { %v3939_v26 = vpop.f32.mrf.mxu0 }
0x1921   :  { %v3940_v23 = vadd.f32 %v7587_v10, %v3939_v26 }
0x1923   :  { %v3954_v45 = vadd.f32 %v3940_v23, %v9167_v56 }
0x1928   :  { %v3942_v46 = vpop.f32.mrf.mxu0 }
0x1929   :  { %v3943_v42 = vadd.f32 %v7587_v10, %v3942_v46 }
0x192b   :  { %v3955_v20 = vadd.f32 %v3943_v42, %v9172_v40 }
0x192d   :  { %v3962_v15 = vsel %vm222_vm0, %v3955_v20, 0.0 }
0x1930   :  { %v3945_v49 = vpop.f32.mrf.mxu0 }
0x1931   :  { %v3946_v61 = vadd.f32 %v7587_v10, %v3945_v49 }
0x1933   :  { %v3956_v63 = vadd.f32 %v3946_v61, %v9177_v33  ;;  %v3959_v33 = vsel %vm222_vm0, %v3954_v45, 0.0 }
0x1935   :  { %v3965_v2 = vsel %vm222_vm0, %v3956_v63, 0.0 }
0x1936   :  { %3966 = vadd.xlane.f32.xlu2 %v3965_v2 }
0x1953   :  { %v3948_v11 = vpop.f32.mrf.mxu0 }
0x1954   :  { %v3949_v51 = vadd.f32 %v7587_v10, %v3948_v11 }
0x1956   :  { %v3957_v4 = vadd.f32 %v3949_v51, %v3853_v18 }
0x1958   :  { %v3968_v17 = vsel %vm222_vm0, %v3957_v4, 0.0 }
0x1959   :  { %3969 = vadd.xlane.f32.xlu1 %v3968_v17 }
0x195b   :  { %v3951_v13 = vpop.f32.mrf.mxu0 }
0x195c   :  { %v3952_v32 = vadd.f32 %v7587_v10, %v3951_v13 }
0x195e   :  { %v3958_v7 = vadd.f32 %v3952_v32, %v3854_v52 }
0x1960   :  { %v3971_v43 = vsel %vm895_vm12, %v3958_v7, 0.0 }
0x1961   :  { %3972 = vadd.xlane.f32.xlu0 %v3971_v43  ;;  %3960 = vadd.xlane.f32.xlu1 %v3959_v33 }
0x1969   :  { %3963 = vadd.xlane.f32.xlu0 %v3962_v15 }
0x19a9   :  { %v3967_v50 = vpop.xlane.xlu2 %3966 }
0x19aa   :  { %v3976_v35 = vmul.f32 %v3967_v50, %v7904_v3 }
0x19ac   :  { %v9205_v48 = vsub.f32 %v3956_v63, %v3976_v35 }
0x19ae   :  { %v3986_v56 = vmul.f32 %v9205_v48, %v9205_v48 }
0x19b0   :  { %v3995_v28 = vsel %vm222_vm0, %v3986_v56, 0.0 }
0x19b1   :  { %3996 = vadd.xlane.f32.xlu1 %v3995_v28 }
0x19cc   :  { %v3970_v30 = vpop.xlane.xlu1 %3969 }
0x19cd   :  { %v3977_v55 = vmul.f32 %v3970_v30, %v7904_v3 }
0x19cf   :  { %v9211_v34 = vsub.f32 %v3957_v4, %v3977_v55 }
0x19d1   :  { %v3987_v40 = vmul.f32 %v9211_v34, %v9211_v34 }
0x19d3   :  { %v3998_v37 = vsel %vm222_vm0, %v3987_v40, 0.0 }
0x19d4   :  { %v3973_v18 = vpop.xlane.xlu0 %3972  ;;  %3999 = vadd.xlane.f32.xlu0 %v3998_v37  ;;  %v3961_v41 = vpop.xlane.xlu1 %3960 }
0x19d5   :  { %v3978_v16 = vmul.f32 %v3973_v18, %v7904_v3  ;;  %v3974_v21 = vmul.f32 %v3961_v41, %v7904_v3 }
0x19d7   :  { %v9218_v1 = vsub.f32 %v3958_v7, %v3978_v16  ;;  %v9220_v52 = vsub.f32 %v3954_v45, %v3974_v21 }
0x19d9   :  { %v3984_v12 = vmul.f32 %v9220_v52, %v9220_v52  ;;  %v3988_v8 = vmul.f32 %v9218_v1, %v9218_v1 }
0x19db   :  { %v3989_v25 = vsel %vm222_vm0, %v3984_v12, 0.0  ;;  %v4001_v6 = vsel %vm895_vm12, %v3988_v8, 0.0 }
0x19dc   :  { %v3964_v29 = vpop.xlane.xlu0 %3963  ;;  %3990 = vadd.xlane.f32.xlu0 %v3989_v25  ;;  %4002 = vadd.xlane.f32.xlu2 %v4001_v6 }
0x19dd   :  { %v3975_v60 = vmul.f32 %v3964_v29, %v7904_v3 }
0x19df   :  { %v9229_v58 = vsub.f32 %v3955_v20, %v3975_v60 }
0x19e1   :  { %v3985_v54 = vmul.f32 %v9229_v58, %v9229_v58 }
0x19e3   :  { %v3992_v5 = vsel %vm222_vm0, %v3985_v54, 0.0 }
0x19e4   :  { %3993 = vadd.xlane.f32.xlu2 %v3992_v5 }
0x1a24   :  { %v3997_v36 = vpop.xlane.xlu1 %3996 }
0x1a25   :  { %v4006_v19 = vmul.f32 %v3997_v36, %v7904_v3 }
0x1a27   :  { %v4011_v38 = vadd.f32 1e-05, %v4006_v19  ;;  %v7588_v19 = vld [vmem:[%s8448_s9] ss:$0 sm:$0xff] }
0x1a29   :  { %7426 = vrsqrt.f32 %v4011_v38  ;;  %vm4040_vm15 = vweird.f32 %v4011_v38 }
0x1a2f   :  { %v7427_v39 = vpop.eup %7426 }
0x1a30   :  { %v4035_v49 = vmul.f32 %v7427_v39, %v4011_v38  ;;  %vm4041_vm13 = vweird.f32 %v7427_v39 }
0x1a31   :  { %vm4042_vm3 = vmor %vm4040_vm15, %vm4041_vm13  ;;  %vm10248_vm15 = vcmask 1043456  }
0x1a32   :  { %v4036_v4 = vmul.f32 %v7427_v39, %v4035_v49 }
0x1a34   :  { %v4037_v32 = vmul.f32 0.5, %v4036_v4  ;;  %v7592_v4 = vld [vmem:[%s7704_s6] sm:$0xff] }
0x1a36   :  { %v4038_v15 = vsub.f32 1.5, %v4037_v32  ;;  %v7596_v32 = vld [vmem:[%s8495_s16 + $0x20] sm:$0x3] }
0x1a38   :  { %v4039_v55 = vmul.f32 %v7427_v39, %v4038_v15 }
0x1a3a   :  { %v4043_v12 = vsel %vm4042_vm3, %v7427_v39, %v4039_v55  ;;  %v7589_v39 = vld [vmem:[%s8453_s14] ss:$0 sm:$0xff]  ;;  %vm10252_vm3 = vcmask 31744  }
0x1a3b   :  { %v4066_v36 = vmul.f32 %v4043_v12, %v9205_v48 }
0x1a47   :  { %v4000_v59 = vpop.xlane.xlu0 %3999 }
0x1a48   :  { %v4007_v47 = vmul.f32 %v4000_v59, %v7904_v3 }
0x1a4a   :  { %v4012_v57 = vadd.f32 1e-05, %v4007_v47 }
0x1a4c   :  { %7428 = vrsqrt.f32 %v4012_v57  ;;  %vm4050_vm11 = vweird.f32 %v4012_v57 }
0x1a4f   :  { %v3991_v26 = vpop.xlane.xlu0 %3990  ;;  %v4003_v46 = vpop.xlane.xlu2 %4002 }
0x1a50   :  { %v4004_v10 = vmul.f32 %v3991_v26, %v7904_v3  ;;  %v4008_v61 = vmul.f32 %v4003_v46, %v7904_v3  ;;  %v4071_v46 = vmul.f32 %v7588_v19, %v4066_v36 }
0x1a52   :  { %v7429_v63 = vpop.eup %7428  ;;  %v4009_v2 = vadd.f32 1e-05, %v4004_v10  ;;  %v4013_v11 = vadd.f32 1e-05, %v4008_v61  ;;  %v9253_v61 = vadd.f32 %v7589_v39, %v4071_v46 }
0x1a53   :  { %v4045_v51 = vmul.f32 %v7429_v63, %v4012_v57  ;;  %vm4051_vm5 = vweird.f32 %v7429_v63 }
0x1a54   :  { %7430 = vrsqrt.f32 %v4009_v2  ;;  %vm4052_vm14 = vmor %vm4050_vm11, %vm4051_vm5  ;;  %vm4060_vm2 = vweird.f32 %v4013_v11  ;;  %vm4020_vm6 = vweird.f32 %v4009_v2 }
0x1a55   :  { %v4046_v23 = vmul.f32 %v7429_v63, %v4045_v51  ;;  %7432 = vrsqrt.f32 %v4013_v11  ;;  %v7591_v51 = vld [vmem:[%s7704_s6 + $0x8] sm:$0xff]  ;;  %s10249_s6 = sld [smem:[#allocation5_spill]] }
0x1a57   :  { %v4047_v17 = vmul.f32 0.5, %v4046_v23  ;;  %v3994_v13 = vpop.xlane.xlu2 %3993  ;;  %v7593_v23 = vld [vmem:[%s8495_s16 + $0x8] sm:$0xff] }
0x1a58   :  { %v4005_v45 = vmul.f32 %v3994_v13, %v7904_v3  ;;  %v7595_v13 = vld [vmem:[%s8495_s16 + $0x18] sm:$0xff] }
0x1a59   :  { %v4048_v7 = vsub.f32 1.5, %v4047_v17  ;;  %v7594_v17 = vld [vmem:[%s8495_s16 + $0x10] sm:$0xff] }
0x1a5a   :  { %v7431_v42 = vpop.eup %7430  ;;  %v4010_v43 = vadd.f32 1e-05, %v4005_v45 }
0x1a5b   :  { %v7433_v33 = vpop.eup %7432  ;;  %v4015_v20 = vmul.f32 %v7431_v42, %v4009_v2  ;;  %v4049_v35 = vmul.f32 %v7429_v63, %v4048_v7  ;;  %vm4021_vm7 = vweird.f32 %v7431_v42  ;;  %v7597_v7 = vld [vmem:[%s10247_s8 + $0x8] sm:$0xff] }
0x1a5c   :  { %v4055_v50 = vmul.f32 %v7433_v33, %v4013_v11  ;;  %7434 = vrsqrt.f32 %v4010_v43  ;;  %vm4061_vm10 = vweird.f32 %v7433_v33  ;;  %vm4022_vm5 = vmor %vm4020_vm6, %vm4021_vm7  ;;  %vm4030_vm13 = vweird.f32 %v4010_v43 }
0x1a5d   :  { %v4016_v56 = vmul.f32 %v7431_v42, %v4015_v20  ;;  %v4053_v37 = vsel %vm4052_vm14, %v7429_v63, %v4049_v35  ;;  %vm4062_vm4 = vmor %vm4060_vm2, %vm4061_vm10 }
0x1a5e   :  { %v4056_v28 = vmul.f32 %v7433_v33, %v4055_v50  ;;  %v4067_v25 = vmul.f32 %v4053_v37, %v9211_v34  ;;  %vm10251_vm10 = vmmov %vm10248_vm15 }
0x1a5f   :  { %v4017_v30 = vmul.f32 0.5, %v4016_v56  ;;  %vm10253_vm2 = vmmov %vm10252_vm3 }
0x1a60   :  { %v4057_v40 = vmul.f32 0.5, %v4056_v28  ;;  %v4072_v38 = vmul.f32 %v7588_v19, %v4067_v25  ;;  %v7598_v28 = vld [vmem:[%s10249_s6] ss:$0 sm:$0xff]  ;;  %vm10254_vm7 = vmmov %vm10253_vm2 }
0x1a61   :  { %v4018_v18 = vsub.f32 1.5, %v4017_v30  ;;  %v7599_v25 = vld [vmem:[%s10247_s8] sm:$0xff]  ;;  %vm10256_vm6 = vmmov %vm10253_vm2 }
0x1a62   :  { %v7435_v41 = vpop.eup %7434  ;;  %v4058_v16 = vsub.f32 1.5, %v4057_v40  ;;  %v9249_v48 = vadd.f32 %v7589_v39, %v4072_v38  ;;  %v7602_v38 = vld [vmem:[%s8550_s30] ss:$0 sm:$0xff] }
0x1a63   :  { %v4025_v21 = vmul.f32 %v7435_v41, %v4010_v43  ;;  %v4019_v6 = vmul.f32 %v7431_v42, %v4018_v18  ;;  %vm4031_vm11 = vweird.f32 %v7435_v41 }
0x1a64   :  { %v4059_v8 = vmul.f32 %v7433_v33, %v4058_v16  ;;  %vm4032_vm14 = vmor %vm4030_vm13, %vm4031_vm11 }
0x1a65   :  { %v4026_v29 = vmul.f32 %v7435_v41, %v4025_v21  ;;  %v4023_v59 = vsel %vm4022_vm5, %v7431_v42, %v4019_v6  ;;  %vm10257_vm5 = vmmov %vm10253_vm2 }
0x1a66   :  { %v4063_v60 = vsel %vm4062_vm4, %v7433_v33, %v4059_v8  ;;  %vm10255_vm4 = vmmov %vm10253_vm2 }
0x1a67   :  { %v4068_v54 = vmul.f32 %v4063_v60, %v9218_v1  ;;  %v4027_v5 = vmul.f32 0.5, %v4026_v29  ;;  %v4064_v1 = vmul.f32 %v4023_v59, %v9220_v52  ;;  %v7600_v29 = vld [vmem:[%s10250_s20 + $0x8] sm:$0xff]  ;;  %v7601_v60 = vld [vmem:[%s10250_s20] sm:$0xff]  ;;  %vm10258_vm11 = vmmov %vm10253_vm2 }
0x1a68   :  { %vm10259_vm13 = vmmov %vm10253_vm2 }
0x1a69   :  { %v4073_v47 = vmul.f32 %v7588_v19, %v4068_v54  ;;  %v4028_v57 = vsub.f32 1.5, %v4027_v5  ;;  %v4069_v2 = vmul.f32 %v7588_v19, %v4064_v1 }
0x1a6b   :  { %v4029_v34 = vmul.f32 %v7435_v41, %v4028_v57  ;;  %v9244_v26 = vadd.f32 %v7589_v39, %v4073_v47  ;;  %v9259_v11 = vadd.f32 %v7589_v39, %v4069_v2  ;;  %v7603_v57 = vld [vmem:[%s8562_s24] sm:$0xff] }
0x1a6d   :  { %v4033_v49 = vsel %vm4032_vm14, %v7435_v41, %v4029_v34  ;;  %6898 = vmatpush.msk.msrb.mxu2 %vm1333_vm8, %v9244_v26  ;;  %vm10260_vm14 = vcmask 25600  }
0x1a6e   :  { %v4065_v10 = vmul.f32 %v4033_v49, %v9229_v58  ;;  %v7590_v58 = vld [vmem:[%s8495_s16] sm:$0xff] }
0x1a6f   :  { %4094 = vmatpush.msrb.mxu2 %v9249_v48 }
0x1a70   :  { %v4070_v63 = vmul.f32 %v7588_v19, %v4065_v10 }
0x1a71   :  { %4095 = vmatpush.msrb.mxu2 %v9253_v61 }
0x1a72   :  { %v9256_v52 = vadd.f32 %v7589_v39, %v4070_v63  ;;  %v7604_v39 = vld [vmem:[%s8567_s28] sm:$0xff]  ;;  %v7605_v63 = vld [vmem:[%s8562_s24 + $0x8] sm:$0xff] }
0x1a74   :  { %4096 = vmatpush.msrb.mxu2 %v9256_v52 }
0x1a76   :  { %4097 = vmatpush.msrb.mxu2 %v9259_v11 }
0x1a77   :  { %6899 = vmatmul.msk.f32.vlgmr.msrb.gmra.mxu2 %vm1182_vm9, %v7590_v58 }
0x1a78   :  { %4292 = vmatpush.msra.mxu2 %v7591_v51 }
0x1a7a   :  { %4293 = vmatpush.msra.mxu2 %v7592_v4 }
0x1a7c   :  { %6943 = vmatpush.msk.msrb.mxu2 %vm10248_vm15, %v7857_v53  ;;  %vm10261_vm15 = vmmov %vm10253_vm2 }
0x1a7f   :  { %6900 = vmatmul.msk.f32.gmra.mxu2 %vm1182_vm9, %v7593_v23 }
0x1a87   :  { %6901 = vmatmul.msk.f32.gmra.mxu2 %vm1182_vm9, %v7594_v17 }
0x1a8f   :  { %6902 = vmatmul.msk.f32.gmra.mxu2 %vm1182_vm9, %v7595_v13 }
0x1a97   :  { %6903 = vmatmul.msk.f32.gmra.mxu2 %vm1182_vm9, %v7596_v32 }
0x1afa   :  { %v4099_v45 = vpop.f32.mrf.mxu2 }
0x1afb   :  { %6904 = vmatmul.msk.f32.vlgmr.msrb.gmra.mxu1 %vm222_vm0, %v4099_v45 }
0x1afc   :  { %4793 = vmatpush.msrb.mxu1 %v7597_v7  ;;  %v7609_v7 = vld [vmem:[%s8562_s24 + $0x18] sm:$0xff] }
0x1b02   :  { %v4102_v42 = vpop.f32.mrf.mxu2 }
0x1b03   :  { %6905 = vmatmul.msk.f32.gmra.mxu1 %vm222_vm0, %v4102_v42  ;;  %v7610_v42 = vld [vmem:[%s8567_s28 + $0x18] sm:$0xff] }
0x1b0a   :  { %v4105_v53 = vpop.f32.mrf.mxu2 }
0x1b0b   :  { %6906 = vmatmul.msk.f32.gmra.mxu1 %vm222_vm0, %v4105_v53 }
0x1b12   :  { %v4108_v43 = vpop.f32.mrf.mxu2 }
0x1b13   :  { %6907 = vmatmul.msk.f32.gmra.mxu1 %vm222_vm0, %v4108_v43 }
0x1b1a   :  { %v4111_v33 = vpop.f32.mrf.mxu2 }
0x1b1b   :  { %6908 = vmatmul.msk.f32.gmra.mxu1 %vm222_vm0, %v4111_v33 }
0x1b78   :  { %v4146_v20 = vpop.f32.mrf.mxu1 }
0x1b79   :  { %v4147_v16 = vadd.f32 %v7598_v28, %v4146_v20 }
0x1b7b   :  { %v4161_v8 = vmax.f32 %v4147_v16, 0.0 }
0x1b80   :  { %v4149_v15 = vpop.f32.mrf.mxu1 }
0x1b81   :  { %v4150_v18 = vadd.f32 %v7598_v28, %v4149_v15  ;;  %v7611_v15 = vld [vmem:[%s8562_s24 + $0x20] sm:$0x3] }
0x1b83   :  { %v4162_v12 = vmax.f32 %v4150_v18, 0.0 }
0x1b88   :  { %v4152_v50 = vpop.f32.mrf.mxu1 }
0x1b89   :  { %v4153_v40 = vadd.f32 %v7598_v28, %v4152_v50 }
0x1b8b   :  { %v4163_v21 = vmax.f32 %v4153_v40, 0.0 }
0x1b90   :  { %v4155_v35 = vpop.f32.mrf.mxu1 }
0x1b91   :  { %v4156_v30 = vadd.f32 %v7598_v28, %v4155_v35  ;;  %v7612_v35 = vld [vmem:[%s8567_s28 + $0x20] sm:$0x3] }
0x1b93   :  { %v4164_v41 = vmax.f32 %v4156_v30, 0.0 }
0x1b98   :  { %v4158_v56 = vpop.f32.mrf.mxu1 }
0x1b99   :  { %v4159_v55 = vadd.f32 %v7598_v28, %v4158_v56  ;;  %v7613_v28 = vld [vmem:[%s7712_s13] ss:$0 sm:$0xff]  ;;  %s7690_s13 = smov 29  }
0x1b9b   :  { %v4165_v37 = vmax.f32 %v4159_v55, 0.0 }
0x1b9d   :  { %6909 = vmatpush.msk.msra.mxu3 %vm1333_vm8, %v4165_v37 }
0x1b9f   :  { %4181 = vmatpush.msra.mxu3 %v4164_v41 }
0x1ba1   :  { %4182 = vmatpush.msra.mxu3 %v4163_v21 }
0x1ba3   :  { %4183 = vmatpush.msra.mxu3 %v4162_v12 }
0x1ba5   :  { %4184 = vmatpush.msra.mxu3 %v4161_v8 }
0x1ba6   :  { %6910 = vmatmul.msk.f32.vlgmr.msra.gmra.mxu3 %vm1182_vm9, %v7590_v58 }
0x1ba7   :  { %6931 = vmatpush.msk.msrb.mxu3 %vm10251_vm10, %v7830_v14  ;;  %vm10262_vm10 = vmmov %vm10260_vm14 }
0x1ba9   :  { %4840 = vmatpush.msra.mxu3 %v7599_v25 }
0x1bae   :  { %6911 = vmatmul.msk.f32.gmra.mxu3 %vm1182_vm9, %v7593_v23  ;;  %v7608_v23 = vld [vmem:[%s8567_s28 + $0x10] sm:$0xff] }
0x1bb6   :  { %6912 = vmatmul.msk.f32.gmra.mxu3 %vm1182_vm9, %v7594_v17 }
0x1bbe   :  { %6913 = vmatmul.msk.f32.gmra.mxu3 %vm1182_vm9, %v7595_v13 }
0x1bc6   :  { %6914 = vmatmul.msk.f32.gmra.mxu3 %vm1182_vm9, %v7596_v32 }
0x1c29   :  { %v4186_v6 = vpop.f32.mrf.mxu3 }
0x1c2a   :  { %6915 = vmatmul.msk.f32.vlgmr.msrb.gmra.mxu0 %vm222_vm0, %v4186_v6 }
0x1c2b   :  { %5016 = vmatpush.msrb.mxu0 %v7600_v29  ;;  %v7614_v29 = vld [vmem:[%s7769_s23] sm:$0xff] }
0x1c2d   :  { %5017 = vmatpush.msrb.mxu0 %v7601_v60 }
0x1c31   :  { %v4189_v14 = vpop.f32.mrf.mxu3 }
0x1c32   :  { %6916 = vmatmul.msk.f32.gmra.mxu0 %vm222_vm0, %v4189_v14 }
0x1c39   :  { %v4192_v54 = vpop.f32.mrf.mxu3 }
0x1c3a   :  { %6917 = vmatmul.msk.f32.gmra.mxu0 %vm222_vm0, %v4192_v54 }
0x1c41   :  { %v4195_v5 = vpop.f32.mrf.mxu3 }
0x1c42   :  { %6918 = vmatmul.msk.f32.gmra.mxu0 %vm222_vm0, %v4195_v5 }
0x1c49   :  { %v4198_v36 = vpop.f32.mrf.mxu3 }
0x1c4a   :  { %6919 = vmatmul.msk.f32.gmra.mxu0 %vm222_vm0, %v4198_v36 }
0x1ca7   :  { %v4233_v19 = vpop.f32.mrf.mxu0 }
0x1ca8   :  { %v4234_v59 = vadd.f32 %v7602_v38, %v4233_v19  ;;  %v7615_v19 = vld [vmem:[%s7769_s23 + $0x8] sm:$0xff] }
0x1caa   :  { %v9301_v47 = vadd.f32 %v4234_v59, %v9259_v11  ;;  %v7606_v11 = vld [vmem:[%s8567_s28 + $0x8] sm:$0xff]  ;;  %s7691_s28 = smov 31  }
0x1cac   :  { %v4253_v34 = vmul.f32 %v7603_v57, %v9301_v47 }
0x1cae   :  { %v9306_v46 = vadd.f32 %v7604_v39, %v4253_v34 }
0x1caf   :  { %v4236_v1 = vpop.f32.mrf.mxu0 }
0x1cb0   :  { %v4237_v49 = vadd.f32 %v7602_v38, %v4236_v1  ;;  %6920 = vmatmul.msk.f32.vlgmr.msra.gmra.mxu2 %vm222_vm0, %v9306_v46 }
0x1cb1   :  { %5048 = vmatpush.msra.mxu2 %v7982_v31 }
0x1cb2   :  { %v9312_v10 = vadd.f32 %v4237_v49, %v9256_v52  ;;  %v7607_v52 = vld [vmem:[%s8562_s24 + $0x10] sm:$0xff]  ;;  %s10015_s24 = sld [smem:[%s10179_s0 + %s7690_s13]]  }
0x1cb3   :  { %5049 = vmatpush.msra.mxu2 %v7986_v44 }
0x1cb4   :  { %v4254_v2 = vmul.f32 %v7605_v63, %v9312_v10 }
0x1cb6   :  { %v9318_v58 = vadd.f32 %v7606_v11, %v4254_v2 }
0x1cb7   :  { %v4239_v51 = vpop.f32.mrf.mxu0 }
0x1cb8   :  { %v4240_v4 = vadd.f32 %v7602_v38, %v4239_v51  ;;  %6921 = vmatmul.msk.f32.gmra.mxu2 %vm222_vm0, %v9318_v58 }
0x1cba   :  { %v9323_v31 = vadd.f32 %v4240_v4, %v9253_v61 }
0x1cbc   :  { %v4255_v44 = vmul.f32 %v7607_v52, %v9323_v31 }
0x1cbe   :  { %v9328_v17 = vadd.f32 %v7608_v23, %v4255_v44  ;;  %v7616_v44 = vld [vmem:[%s7769_s23 + $0x10] sm:$0xff] }
0x1cbf   :  { %v4242_v13 = vpop.f32.mrf.mxu0 }
0x1cc0   :  { %v4243_v32 = vadd.f32 %v7602_v38, %v4242_v13  ;;  %6922 = vmatmul.msk.f32.gmra.mxu2 %vm222_vm0, %v9328_v17 }
0x1cc2   :  { %v9333_v45 = vadd.f32 %v4243_v32, %v9249_v48 }
0x1cc4   :  { %v4256_v61 = vmul.f32 %v7609_v7, %v9333_v45 }
0x1cc6   :  { %v9338_v53 = vadd.f32 %v7610_v42, %v4256_v61 }
0x1cc7   :  { %v4245_v43 = vpop.f32.mrf.mxu0 }
0x1cc8   :  { %v4246_v33 = vadd.f32 %v7602_v38, %v4245_v43  ;;  %6923 = vmatmul.msk.f32.gmra.mxu2 %vm222_vm0, %v9338_v53 }
0x1cca   :  { %v9343_v20 = vadd.f32 %v4246_v33, %v9244_v26 }
0x1ccc   :  { %v4257_v50 = vmul.f32 %v7611_v15, %v9343_v20  ;;  %v7617_v15 = vld [vmem:[%s7769_s23 + $0x18] sm:$0xff] }
0x1cce   :  { %v9348_v48 = vadd.f32 %v7612_v35, %v4257_v50 }
0x1cd0   :  { %6924 = vmatmul.msk.f32.gmra.mxu2 %vm222_vm0, %v9348_v48 }
0x1d33   :  { %v4295_v56 = vpop.f32.mrf.mxu2 }
0x1d34   :  { %v4296_v30 = vadd.f32 %v7613_v28, %v4295_v56 }
0x1d36   :  { %4534 = vrot.lane.b32.xlu1 %v4296_v30, %s10202_s19  ;;  %6926 = vmatmul.msk.f32.vlgmr.msra.gmra.mxu1 %vm304_vm1, %v4296_v30 }
0x1d3b   :  { %v4298_v55 = vpop.f32.mrf.mxu2 }
0x1d3c   :  { %v4299_v40 = vadd.f32 %v7613_v28, %v4298_v55 }
0x1d3e   :  { %4536 = vrot.lane.b32.xlu2 %v4299_v40, %s10202_s19  ;;  %6927 = vmatmul.msk.f32.gmra.mxu1 %vm304_vm1, %v4299_v40 }
0x1d43   :  { %v4301_v26 = vpop.f32.mrf.mxu2 }
0x1d44   :  { %v4302_v37 = vadd.f32 %v7613_v28, %v4301_v26 }
0x1d46   :  { %4538 = vrot.lane.b32.xlu0 %v4302_v37, %s10202_s19  ;;  %6928 = vmatmul.msk.f32.gmra.mxu1 %vm304_vm1, %v4302_v37 }
0x1d4b   :  { %v4304_v18 = vpop.f32.mrf.mxu2 }
0x1d4c   :  { %v4305_v41 = vadd.f32 %v7613_v28, %v4304_v18 }
0x1d4e   :  { %4540 = vrot.lane.b32.xlu0 %v4305_v41, %s10202_s19  ;;  %6929 = vmatmul.msk.f32.gmra.mxu1 %vm304_vm1, %v4305_v41 }
0x1d53   :  { %v4307_v16 = vpop.f32.mrf.mxu2 }
0x1d54   :  { %v4308_v21 = vadd.f32 %v7613_v28, %v4307_v16  ;;  %v7618_v16 = vld [vmem:[%s7769_s23 + $0x20] sm:$0x3] }
0x1d56   :  { %4542 = vrot.lane.b32.xlu1 %v4308_v21, %s10202_s19  ;;  %6930 = vmatmul.msk.f32.gmra.mxu1 %vm304_vm1, %v4308_v21 }
0x1d98   :  { %v4537_v8 = vpop.permute.xlu2 %4536 }
0x1da8   :  { %v4535_v12 = vpop.permute.xlu1 %4534 }
0x1da9   :  { %6938 = vmatmul.msk.f32.vlgmr.msra.gmra.mxu0 %vm304_vm1, %v4535_v12 }
0x1db1   :  { %6939 = vmatmul.msk.f32.gmra.mxu0 %vm304_vm1, %v4537_v8 }
0x1db3   :  { %v4342_v25 = vpop.f32.mrf.mxu1 }
0x1db4   :  { %v4357_v6 = vmul.f32 0.35355338, %v4342_v25 }
0x1db6   :  { %v4362_v60 = vadd.f32 %v7614_v29, %v4357_v6 }
0x1db8   :  { %v4539_v14 = vpop.permute.xlu0 %4538  ;;  %v4367_v54 = vsel %vm10252_vm3, %v4362_v60, -inf  ;;  %vm10263_vm3 = vmmov %vm10253_vm2 }
0x1db9   :  { %4368 = vmax.xlane.f32.xlu2 %v4367_v54  ;;  %6940 = vmatmul.msk.f32.gmra.mxu0 %vm304_vm1, %v4539_v14 }
0x1dbb   :  { %v4345_v5 = vpop.f32.mrf.mxu1 }
0x1dbc   :  { %v4358_v36 = vmul.f32 0.35355338, %v4345_v5 }
0x1dbe   :  { %v4363_v38 = vadd.f32 %v7615_v19, %v4358_v36 }
0x1dc0   :  { %v4541_v59 = vpop.permute.xlu0 %4540  ;;  %v4370_v57 = vsel %vm10253_vm2, %v4363_v38, -inf }
0x1dc1   :  { %6941 = vmatmul.msk.f32.gmra.mxu0 %vm304_vm1, %v4541_v59  ;;  %4371 = vmax.xlane.f32.xlu1 %v4370_v57 }
0x1dc3   :  { %v4348_v39 = vpop.f32.mrf.mxu1 }
0x1dc4   :  { %v4359_v2 = vmul.f32 0.35355338, %v4348_v39 }
0x1dc6   :  { %v4364_v23 = vadd.f32 %v7616_v44, %v4359_v2 }
0x1dc8   :  { %v4543_v34 = vpop.permute.xlu1 %4542  ;;  %v4373_v7 = vsel %vm10255_vm4, %v4364_v23, -inf  ;;  %vm10265_vm4 = vmmov %vm10253_vm2 }
0x1dc9   :  { %6942 = vmatmul.msk.f32.gmra.mxu0 %vm304_vm1, %v4543_v34 }
0x1dcb   :  { %v4351_v51 = vpop.f32.mrf.mxu1 }
0x1dcc   :  { %v4360_v32 = vmul.f32 0.35355338, %v4351_v51 }
0x1dce   :  { %v4365_v50 = vadd.f32 %v7617_v15, %v4360_v32 }
0x1dd0   :  { %v4376_v55 = vsel %vm10257_vm5, %v4365_v50, -inf  ;;  %vm10267_vm5 = vmmov %vm10253_vm2 }
0x1dd3   :  { %v4354_v35 = vpop.f32.mrf.mxu1 }
0x1dd4   :  { %v4361_v30 = vmul.f32 0.35355338, %v4354_v35 }
0x1dd6   :  { %v4366_v21 = vadd.f32 %v7618_v16, %v4361_v30 }
0x1dd8   :  { %v4379_v6 = vsel %vm10260_vm14, %v4366_v21, -inf }
0x1e26   :  { %v4571_v1 = vpop.f32.mrf.mxu0 }
0x1e27   :  { %v4586_v49 = vmul.f32 0.35355338, %v4571_v1 }
0x1e29   :  { %v4591_v63 = vadd.f32 %v7614_v29, %v4586_v49 }
0x1e2b   :  { %v4596_v11 = vsel %vm10254_vm7, %v4591_v63, -inf  ;;  %vm10264_vm7 = vmmov %vm10253_vm2 }
0x1e2c   :  { %4597 = vmax.xlane.f32.xlu0 %v4596_v11  ;;  %v4369_v43 = vpop.xlane.xlu2 %4368 }
0x1e2d   :  { %v4382_v28 = vsub.f32 %v4362_v60, %v4369_v43 }
0x1e2e   :  { %v4574_v4 = vpop.f32.mrf.mxu0 }
0x1e2f   :  { %v4587_v52 = vmul.f32 0.35355338, %v4574_v4  ;;  %v4387_v26 = vmul.f32 1.442695, %v4382_v28 }
0x1e31   :  { %v4592_v13 = vadd.f32 %v7615_v19, %v4587_v52  ;;  %7436 = vpow2.f32 %v4387_v26 }
0x1e33   :  { %v4599_v61 = vsel %vm10256_vm6, %v4592_v13, -inf  ;;  %vm10266_vm6 = vmmov %vm10253_vm2 }
0x1e34   :  { %4374 = vmax.xlane.f32.xlu0 %v4373_v7  ;;  %4600 = vmax.xlane.f32.xlu2 %v4599_v61  ;;  %v4372_v18 = vpop.xlane.xlu1 %4371 }
0x1e35   :  { %v4383_v8 = vsub.f32 %v4363_v38, %v4372_v18 }
0x1e36   :  { %v4577_v42 = vpop.f32.mrf.mxu0 }
0x1e37   :  { %v4588_v33 = vmul.f32 0.35355338, %v4577_v42  ;;  %v4389_v29 = vmul.f32 1.442695, %v4383_v8  ;;  %v9382_v54 = vpop.eup %7436 }
0x1e38   :  { %v4397_v36 = vsel %vm10261_vm15, %v9382_v54, 0.0  ;;  %vm10270_vm15 = vmmov %vm10262_vm10 }
0x1e39   :  { %v4593_v56 = vadd.f32 %v7616_v44, %v4588_v33  ;;  %7438 = vpow2.f32 %v4389_v29 }
0x1e3b   :  { %v4602_v40 = vsel %vm10258_vm11, %v4593_v56, -inf  ;;  %vm10268_vm11 = vmmov %vm10253_vm2 }
0x1e3c   :  { %4377 = vmax.xlane.f32.xlu2 %v4376_v55  ;;  %4603 = vmax.xlane.f32.xlu1 %v4602_v40 }
0x1e3e   :  { %v4580_v37 = vpop.f32.mrf.mxu0 }
0x1e3f   :  { %v4589_v41 = vmul.f32 0.35355338, %v4580_v37  ;;  %v9387_v38 = vpop.eup %7438 }
0x1e40   :  { %v4400_v59 = vsel %vm10263_vm3, %v9387_v38, 0.0 }
0x1e41   :  { %v4594_v12 = vadd.f32 %v7617_v15, %v4589_v41 }
0x1e43   :  { %v4605_v25 = vsel %vm10259_vm13, %v4594_v12, -inf  ;;  %vm10269_vm13 = vmmov %vm10262_vm10 }
0x1e44   :  { %4606 = vmax.xlane.f32.xlu0 %v4605_v25  ;;  %4380 = vmax.xlane.f32.xlu1 %v4379_v6 }
0x1e46   :  { %v4583_v60 = vpop.f32.mrf.mxu0 }
0x1e47   :  { %v4590_v14 = vmul.f32 0.35355338, %v4583_v60 }
0x1e49   :  { %v4595_v5 = vadd.f32 %v7618_v16, %v4590_v14 }
0x1e4b   :  { %v4608_v19 = vsel %vm10262_vm10, %v4595_v5, -inf }
0x1e4c   :  { %4398 = vadd.xlane.f32.xlu0 %v4397_v36  ;;  %4609 = vmax.xlane.f32.xlu2 %v4608_v19 }
0x1e54   :  { %4401 = vadd.xlane.f32.xlu2 %v4400_v59 }
0x1e9f   :  { %v4598_v57 = vpop.xlane.xlu0 %4597 }
0x1ea0   :  { %v4611_v34 = vsub.f32 %v4591_v63, %v4598_v57 }
0x1ea2   :  { %v4616_v39 = vmul.f32 1.442695, %v4611_v34 }
0x1ea4   :  { %7440 = vpow2.f32 %v4616_v39 }
0x1ea7   :  { %v4375_v1 = vpop.xlane.xlu0 %4374  ;;  %v4601_v49 = vpop.xlane.xlu2 %4600 }
0x1ea8   :  { %v4384_v2 = vsub.f32 %v4364_v23, %v4375_v1  ;;  %v4612_v11 = vsub.f32 %v4592_v13, %v4601_v49 }
0x1eaa   :  { %v9391_v51 = vpop.eup %7440  ;;  %v4391_v4 = vmul.f32 1.442695, %v4384_v2  ;;  %v4618_v52 = vmul.f32 1.442695, %v4612_v11 }
0x1eab   :  { %v4626_v44 = vsel %vm10253_vm2, %v9391_v51, 0.0 }
0x1eac   :  { %7442 = vpow2.f32 %v4391_v4  ;;  %4627 = vadd.xlane.f32.xlu1 %v4626_v44 }
0x1ead   :  { %7444 = vpow2.f32 %v4618_v52 }
0x1eaf   :  { %v4378_v32 = vpop.xlane.xlu2 %4377  ;;  %v4604_v7 = vpop.xlane.xlu1 %4603 }
0x1eb0   :  { %v4385_v61 = vsub.f32 %v4365_v50, %v4378_v32  ;;  %v4613_v63 = vsub.f32 %v4593_v56, %v4604_v7 }
0x1eb2   :  { %v9395_v42 = vpop.eup %7442  ;;  %v4393_v43 = vmul.f32 1.442695, %v4385_v61  ;;  %v4620_v33 = vmul.f32 1.442695, %v4613_v63 }
0x1eb3   :  { %v9397_v23 = vpop.eup %7444  ;;  %v4403_v13 = vsel %vm10264_vm7, %v9395_v42, 0.0 }
0x1eb4   :  { %7446 = vpow2.f32 %v4393_v43  ;;  %v4629_v15 = vsel %vm10265_vm4, %v9397_v23, 0.0  ;;  %4404 = vadd.xlane.f32.xlu1 %v4403_v13 }
0x1eb5   :  { %7448 = vpow2.f32 %v4620_v33  ;;  %4630 = vadd.xlane.f32.xlu0 %v4629_v15 }
0x1eb7   :  { %v4607_v35 = vpop.xlane.xlu0 %4606  ;;  %v4381_v28 = vpop.xlane.xlu1 %4380 }
0x1eb8   :  { %v4614_v50 = vsub.f32 %v4594_v12, %v4607_v35  ;;  %v4386_v56 = vsub.f32 %v4366_v21, %v4381_v28 }
0x1eba   :  { %v9403_v30 = vpop.eup %7446  ;;  %v4622_v55 = vmul.f32 1.442695, %v4614_v50  ;;  %v4395_v40 = vmul.f32 1.442695, %v4386_v56 }
0x1ebb   :  { %v9405_v26 = vpop.eup %7448  ;;  %v4406_v37 = vsel %vm10266_vm6, %v9403_v30, 0.0 }
0x1ebc   :  { %7450 = vpow2.f32 %v4622_v55  ;;  %v4632_v18 = vsel %vm10267_vm5, %v9405_v26, 0.0 }
0x1ebd   :  { %7452 = vpow2.f32 %v4395_v40  ;;  %4407 = vadd.xlane.f32.xlu0 %v4406_v37  ;;  %4633 = vadd.xlane.f32.xlu2 %v4632_v18 }
0x1ebf   :  { %v4399_v41 = vpop.xlane.xlu0 %4398  ;;  %v4610_v16 = vpop.xlane.xlu2 %4609 }
0x1ec0   :  { %7454 = vrcp.f32 %v4399_v41  ;;  %v4615_v21 = vsub.f32 %v4595_v5, %v4610_v16  ;;  %v4423_v5 = vand.u32 2147483648, %v4399_v41  ;;  %v4421_v34 = vand.u32 2147483647, %v4399_v41 }
0x1ec1   :  { %vm4417_vm10 = vweird.f32 %v4399_v41 }
0x1ec2   :  { %v9411_v12 = vpop.eup %7450  ;;  %v4624_v25 = vmul.f32 1.442695, %v4615_v21  ;;  %v4424_v2 = vor.u32 1.1754944e-38, %v4423_v5  ;;  %vm4422_vm2 = vcmp.eq.f32.partialorder %v4421_v34, 8.507059e+37 }
0x1ec3   :  { %v9413_v8 = vpop.eup %7452  ;;  %v4635_v6 = vsel %vm10268_vm11, %v9411_v12, 0.0 }
0x1ec4   :  { %4636 = vadd.xlane.f32.xlu1 %v4635_v6  ;;  %v4409_v29 = vsel %vm10269_vm13, %v9413_v8, 0.0  ;;  %7456 = vpow2.f32 %v4624_v25  ;;  %vm10271_vm13 = vmmov %vm10265_vm4 }
0x1ec5   :  { %4410 = vadd.xlane.f32.xlu2 %v4409_v29 }
0x1ec6   :  { %v7455_v60 = vpop.eup %7454 }
0x1ec7   :  { %v4413_v14 = vmul.f32 %v7455_v60, %v4399_v41  ;;  %v4402_v36 = vpop.xlane.xlu2 %4401  ;;  %vm4418_vm14 = vweird.f32 %v7455_v60 }
0x1ec8   :  { %7458 = vrcp.f32 %v4402_v36  ;;  %vm4419_vm3 = vmor %vm4417_vm10, %vm4418_vm14  ;;  %v4438_v7 = vand.u32 2147483648, %v4402_v36  ;;  %v4436_v63 = vand.u32 2147483647, %v4402_v36  ;;  %vm4432_vm6 = vweird.f32 %v4402_v36 }
0x1ec9   :  { %v4414_v19 = vsub.f32 1.0, %v4413_v14 }
0x1eca   :  { %v9419_v59 = vpop.eup %7456  ;;  %v4439_v33 = vor.u32 1.1754944e-38, %v4438_v7  ;;  %vm4437_vm11 = vcmp.eq.f32.partialorder %v4436_v63, 8.507059e+37 }
0x1ecb   :  { %v4415_v57 = vmul.f32 %v7455_v60, %v4414_v19  ;;  %v4638_v39 = vsel %vm10270_vm15, %v9419_v59, 0.0 }
0x1ecc   :  { %4639 = vadd.xlane.f32.xlu0 %v4638_v39 }
0x1ecd   :  { %v4416_v1 = vadd.f32 %v7455_v60, %v4415_v57 }
0x1ece   :  { %v7459_v49 = vpop.eup %7458 }
0x1ecf   :  { %v4420_v11 = vsel %vm4419_vm3, %v7455_v60, %v4416_v1  ;;  %v4428_v4 = vmul.f32 %v7459_v49, %v4402_v36  ;;  %vm4433_vm7 = vweird.f32 %v7459_v49 }
0x1ed0   :  { %v4425_v52 = vsel %vm4422_vm2, %v4424_v2, %v4420_v11  ;;  %vm4434_vm5 = vmor %vm4432_vm6, %vm4433_vm7 }
0x1ed1   :  { %v4426_v44 = vmul.f32 %v9382_v54, %v4425_v52  ;;  %v4429_v32 = vsub.f32 1.0, %v4428_v4  ;;  %vm10272_vm2 = vmmov %vm10265_vm4 }
0x1ed3   :  { %v4430_v61 = vmul.f32 %v7459_v49, %v4429_v32  ;;  %6932 = vmatmul.msk.f32.vlgmr.msrb.gmra.mxu3 %vm10265_vm4, %v4426_v44 }
0x1ed5   :  { %v4431_v43 = vadd.f32 %v7459_v49, %v4430_v61 }
0x1ed7   :  { %v4435_v13 = vsel %vm4434_vm5, %v7459_v49, %v4431_v43 }
0x1ed8   :  { %v4440_v15 = vsel %vm4437_vm11, %v4439_v33, %v4435_v13 }
0x1ed9   :  { %v4441_v35 = vmul.f32 %v9387_v38, %v4440_v15 }
0x1edb   :  { %6933 = vmatmul.msk.f32.gmra.mxu3 %vm10271_vm13, %v4441_v35 }
0x1f1f   :  { %v4628_v28 = vpop.xlane.xlu1 %4627 }
0x1f20   :  { %7460 = vrcp.f32 %v4628_v28  ;;  %v4652_v37 = vand.u32 2147483648, %v4628_v28  ;;  %v4650_v41 = vand.u32 2147483647, %v4628_v28  ;;  %vm4646_vm15 = vweird.f32 %v4628_v28 }
0x1f22   :  { %v4653_v38 = vor.u32 1.1754944e-38, %v4652_v37  ;;  %vm4651_vm3 = vcmp.eq.f32.partialorder %v4650_v41, 8.507059e+37 }
0x1f26   :  { %v7461_v54 = vpop.eup %7460 }
0x1f27   :  { %v4642_v50 = vmul.f32 %v7461_v54, %v4628_v28  ;;  %v4405_v56 = vpop.xlane.xlu1 %4404  ;;  %vm4647_vm14 = vweird.f32 %v7461_v54 }
0x1f28   :  { %v4631_v55 = vpop.xlane.xlu0 %4630  ;;  %7462 = vrcp.f32 %v4405_v56  ;;  %vm4648_vm10 = vmor %vm4646_vm15, %vm4647_vm14  ;;  %v4451_v2 = vand.u32 2147483647, %v4405_v56  ;;  %v4453_v11 = vand.u32 2147483648, %v4405_v56  ;;  %vm4447_vm4 = vweird.f32 %v4405_v56 }
0x1f29   :  { %v4643_v40 = vsub.f32 1.0, %v4642_v50  ;;  %7464 = vrcp.f32 %v4631_v55  ;;  %v4665_v4 = vand.u32 2147483647, %v4631_v55  ;;  %v4667_v52 = vand.u32 2147483648, %v4631_v55 }
0x1f2a   :  { %vm4661_vm11 = vweird.f32 %v4631_v55  ;;  %vm4452_vm13 = vcmp.eq.f32.partialorder %v4451_v2, 8.507059e+37  ;;  %v4454_v13 = vor.u32 1.1754944e-38, %v4453_v11 }
0x1f2b   :  { %v4644_v18 = vmul.f32 %v7461_v54, %v4643_v40  ;;  %vm4666_vm15 = vcmp.eq.f32.partialorder %v4665_v4, 8.507059e+37  ;;  %v4668_v28 = vor.u32 1.1754944e-38, %v4667_v52 }
0x1f2d   :  { %v4645_v16 = vadd.f32 %v7461_v54, %v4644_v18 }
0x1f2e   :  { %v7463_v21 = vpop.eup %7462 }
0x1f2f   :  { %v7465_v25 = vpop.eup %7464  ;;  %v4649_v6 = vsel %vm4648_vm10, %v7461_v54, %v4645_v16  ;;  %v4443_v29 = vmul.f32 %v7463_v21, %v4405_v56  ;;  %vm4448_vm7 = vweird.f32 %v7463_v21 }
0x1f30   :  { %v4654_v60 = vsel %vm4651_vm3, %v4653_v38, %v4649_v6  ;;  %v4657_v14 = vmul.f32 %v7465_v25, %v4631_v55  ;;  %v4408_v36 = vpop.xlane.xlu0 %4407  ;;  %v9427_v19 = vpop.xlane.xlu2 %4633  ;;  %vm4662_vm6 = vweird.f32 %v7465_v25  ;;  %vm9432_vm5 = vmor %vm4447_vm4, %vm4448_vm7 }
0x1f31   :  { %v4655_v5 = vmul.f32 %v9391_v51, %v4654_v60  ;;  %v4444_v57 = vsub.f32 1.0, %v4443_v29  ;;  %7466 = vrcp.f32 %v4408_v36  ;;  %vm9445_vm14 = vmor %vm4661_vm11, %vm4662_vm6  ;;  %v4466_v50 = vand.u32 2147483647, %v4408_v36 }
0x1f32   :  { %v4658_v34 = vsub.f32 1.0, %v4657_v14  ;;  %7468 = vrcp.f32 %v9427_v19  ;;  %v4468_v56 = vand.u32 2147483648, %v4408_v36  ;;  %v4680_v41 = vand.u32 2147483647, %v9427_v19 }
0x1f33   :  { %v4445_v39 = vmul.f32 %v7463_v21, %v4444_v57  ;;  %6944 = vmatmul.msk.f32.vlgmr.msrb.gmra.mxu2 %vm10272_vm2, %v4655_v5  ;;  %v4682_v16 = vand.u32 2147483648, %v9427_v19  ;;  %vm4462_vm3 = vweird.f32 %v4408_v36  ;;  %vm4676_vm2 = vweird.f32 %v9427_v19 }
0x1f34   :  { %v4659_v1 = vmul.f32 %v7465_v25, %v4658_v34  ;;  %vm9460_vm6 = vcmp.eq.f32.partialorder %v4466_v50, 8.507059e+37  ;;  %vm9466_vm11 = vcmp.eq.f32.partialorder %v4680_v41, 8.507059e+37 }
0x1f35   :  { %v4446_v49 = vadd.f32 %v7463_v21, %v4445_v39 }
0x1f36   :  { %v4660_v32 = vadd.f32 %v7465_v25, %v4659_v1 }
0x1f37   :  { %v7467_v44 = vpop.eup %7466  ;;  %v9436_v7 = vpop.xlane.xlu1 %4636  ;;  %v4450_v33 = vsel %vm9432_vm5, %v7463_v21, %v4446_v49  ;;  %vm10281_vm5 = vcmask 31744  }
0x1f38   :  { %v7469_v61 = vpop.eup %7468  ;;  %v4458_v63 = vmul.f32 %v7467_v44, %v4408_v36  ;;  %v9438_v43 = vpop.xlane.xlu2 %4410  ;;  %7470 = vrcp.f32 %v9436_v7  ;;  %v4455_v40 = vsel %vm4452_vm13, %v4454_v13, %v4450_v33  ;;  %v4664_v37 = vsel %vm9445_vm14, %v7465_v25, %v4660_v32  ;;  %vm10284_vm13 = vmmov %vm10281_vm5 }
0x1f39   :  { %v4672_v15 = vmul.f32 %v7469_v61, %v9427_v19  ;;  %7472 = vrcp.f32 %v9438_v43  ;;  %vm4463_vm10 = vweird.f32 %v7467_v44  ;;  %v4456_v38 = vmul.f32 %v9395_v42, %v4455_v40 }
0x1f3a   :  { %v4459_v54 = vsub.f32 1.0, %v4458_v63  ;;  %v4669_v6 = vsel %vm4666_vm15, %v4668_v28, %v4664_v37  ;;  %vm4677_vm7 = vweird.f32 %v7469_v61  ;;  %vm9456_vm4 = vmor %vm4462_vm3, %vm4463_vm10  ;;  %v4469_v36 = vor.u32 1.1754944e-38, %v4468_v56 }
0x1f3b   :  { %v4673_v55 = vsub.f32 1.0, %v4672_v15  ;;  %v4670_v14 = vmul.f32 %v9397_v23, %v4669_v6  ;;  %6934 = vmatmul.msk.f32.gmra.mxu3 %vm10281_vm5, %v4456_v38  ;;  %v4683_v23 = vor.u32 1.1754944e-38, %v4682_v16  ;;  %vm4678_vm14 = vmor %vm4676_vm2, %vm4677_vm7  ;;  %v4481_v11 = vand.u32 2147483647, %v9438_v43 }
0x1f3c   :  { %v4460_v18 = vmul.f32 %v7467_v44, %v4459_v54  ;;  %v4483_v4 = vand.u32 2147483648, %v9438_v43  ;;  %v4697_v51 = vand.u32 2147483648, %v9436_v7  ;;  %v4695_v35 = vand.u32 2147483647, %v9436_v7 }
0x1f3d   :  { %v4674_v21 = vmul.f32 %v7469_v61, %v4673_v55  ;;  %6945 = vmatmul.msk.f32.gmra.mxu2 %vm10284_vm13, %v4670_v14  ;;  %vm4691_vm3 = vweird.f32 %v9436_v7  ;;  %vm4477_vm2 = vweird.f32 %v9438_v43 }
0x1f3e   :  { %v7471_v29 = vpop.eup %7470  ;;  %v4461_v60 = vadd.f32 %v7467_v44, %v4460_v18  ;;  %v4484_v56 = vor.u32 1.1754944e-38, %v4483_v4  ;;  %v7619_v4 = vld [vmem:[%s7881_s2] ss:$0 sm:$0xff] }
0x1f3f   :  { %v7473_v5 = vpop.eup %7472  ;;  %v4675_v34 = vadd.f32 %v7469_v61, %v4674_v21  ;;  %v4687_v42 = vmul.f32 %v7471_v29, %v9436_v7  ;;  %v4640_v49 = vpop.xlane.xlu0 %4639  ;;  %vm4692_vm15 = vweird.f32 %v7471_v29 }
0x1f40   :  { %v4473_v1 = vmul.f32 %v7473_v5, %v9438_v43  ;;  %v4465_v2 = vsel %vm9456_vm4, %v7467_v44, %v4461_v60  ;;  %7474 = vrcp.f32 %v4640_v49  ;;  %vm4478_vm10 = vweird.f32 %v7473_v5  ;;  %vm4693_vm7 = vmor %vm4691_vm3, %vm4692_vm15 }
0x1f41   :  { %v4688_v52 = vsub.f32 1.0, %v4687_v42  ;;  %v4470_v63 = vsel %vm9460_vm6, %v4469_v36, %v4465_v2  ;;  %v4679_v33 = vsel %vm4678_vm14, %v7469_v61, %v4675_v34  ;;  %vm4479_vm4 = vmor %vm4477_vm2, %vm4478_vm10  ;;  %v4712_v41 = vand.u32 2147483648, %v4640_v49 }
0x1f42   :  { %v4474_v32 = vsub.f32 1.0, %v4473_v1  ;;  %v4471_v44 = vmul.f32 %v9403_v30, %v4470_v63  ;;  %v4684_v19 = vsel %vm9466_vm11, %v4683_v23, %v4679_v33  ;;  %v4698_v30 = vor.u32 1.1754944e-38, %v4697_v51  ;;  %vm10285_vm6 = vmmov %vm10281_vm5 }
0x1f43   :  { %v4689_v13 = vmul.f32 %v7471_v29, %v4688_v52  ;;  %v4685_v28 = vmul.f32 %v9405_v26, %v4684_v19  ;;  %vm4482_vm5 = vcmp.eq.f32.partialorder %v4481_v11, 8.507059e+37  ;;  %vm4696_vm11 = vcmp.eq.f32.partialorder %v4695_v35, 8.507059e+37  ;;  %vm10286_vm13 = vmmov %vm10285_vm6 }
0x1f44   :  { %v4475_v15 = vmul.f32 %v7473_v5, %v4474_v32  ;;  %6935 = vmatmul.msk.f32.gmra.mxu3 %vm10285_vm6, %v4471_v44  ;;  %v4710_v21 = vand.u32 2147483647, %v4640_v49  ;;  %vm4706_vm15 = vweird.f32 %v4640_v49  ;;  %vm10287_vm3 = vmmov %vm10285_vm6 }
0x1f45   :  { %v4690_v54 = vadd.f32 %v7471_v29, %v4689_v13  ;;  %6946 = vmatmul.msk.f32.gmra.mxu2 %vm10286_vm13, %v4685_v28 }
0x1f46   :  { %v4476_v50 = vadd.f32 %v7473_v5, %v4475_v15  ;;  %v7475_v61 = vpop.eup %7474  ;;  %vm4711_vm2 = vcmp.eq.f32.partialorder %v4710_v21, 8.507059e+37 }
0x1f47   :  { %v4694_v55 = vsel %vm4693_vm7, %v7471_v29, %v4690_v54  ;;  %v4702_v40 = vmul.f32 %v7475_v61, %v4640_v49  ;;  %vm4707_vm14 = vweird.f32 %v7475_v61  ;;  %v4713_v29 = vor.u32 1.1754944e-38, %v4712_v41  ;;  %vm10288_vm7 = vmmov %vm10287_vm3 }
0x1f48   :  { %v4480_v26 = vsel %vm4479_vm4, %v7473_v5, %v4476_v50  ;;  %v4699_v18 = vsel %vm4696_vm11, %v4698_v30, %v4694_v55  ;;  %vm4708_vm10 = vmor %vm4706_vm15, %vm4707_vm14 }
0x1f49   :  { %v4485_v37 = vsel %vm4482_vm5, %v4484_v56, %v4480_v26  ;;  %v4703_v7 = vsub.f32 1.0, %v4702_v40  ;;  %v4700_v38 = vmul.f32 %v9411_v12, %v4699_v18  ;;  %vm10289_vm4 = vmmov %vm10287_vm3 }
0x1f4a   :  { %v4486_v43 = vmul.f32 %v9413_v8, %v4485_v37 }
0x1f4b   :  { %v4704_v16 = vmul.f32 %v7475_v61, %v4703_v7 }
0x1f4c   :  { %6936 = vmatmul.msk.f32.gmra.mxu3 %vm10287_vm3, %v4486_v43 }
0x1f4d   :  { %v4705_v6 = vadd.f32 %v7475_v61, %v4704_v16  ;;  %6947 = vmatmul.msk.f32.gmra.mxu2 %vm10288_vm7, %v4700_v38 }
0x1f4f   :  { %v4709_v60 = vsel %vm4708_vm10, %v7475_v61, %v4705_v6 }
0x1f50   :  { %v4714_v14 = vsel %vm4711_vm2, %v4713_v29, %v4709_v60 }
0x1f51   :  { %v4715_v5 = vmul.f32 %v9419_v59, %v4714_v14 }
0x1f55   :  { %6948 = vmatmul.msk.f32.gmra.mxu2 %vm10289_vm4, %v4715_v5 }
0x1f56   :  { %v4519_v25 = vpop.f32.mrf.mxu3 }
0x1f57   :  { %6954 = vmatmul.msk.f32.vlgmr.msra.gmra.mxu3 %vm304_vm1, %v4519_v25 }
0x1f5e   :  { %v4522_v8 = vpop.f32.mrf.mxu3 }
0x1f5f   :  { %6955 = vmatmul.msk.f32.gmra.mxu3 %vm304_vm1, %v4522_v8 }
0x1fb6   :  { %v4748_v12 = vpop.f32.mrf.mxu2 }
0x1fb7   :  { %6949 = vmatmul.msk.f32.vlgmr.msrb.gmra.mxu1 %vm304_vm1, %v4748_v12 }
0x1fbe   :  { %v4525_v57 = vpop.f32.mrf.mxu3 }
0x1fbf   :  { %6956 = vmatmul.msk.f32.gmra.mxu3 %vm304_vm1, %v4525_v57 }
0x1fc0   :  { %v4751_v36 = vpop.f32.mrf.mxu2 }
0x1fc1   :  { %6950 = vmatmul.msk.f32.gmra.mxu1 %vm304_vm1, %v4751_v36 }
0x1fc7   :  { %v4528_v34 = vpop.f32.mrf.mxu3 }
0x1fc8   :  { %v4754_v59 = vpop.f32.mrf.mxu2  ;;  %6957 = vmatmul.msk.f32.gmra.mxu3 %vm304_vm1, %v4528_v34 }
0x1fc9   :  { %6951 = vmatmul.msk.f32.gmra.mxu1 %vm304_vm1, %v4754_v59 }
0x1fcf   :  { %v4531_v42 = vpop.f32.mrf.mxu3 }
0x1fd0   :  { %v4757_v39 = vpop.f32.mrf.mxu2  ;;  %6958 = vmatmul.msk.f32.gmra.mxu3 %vm304_vm1, %v4531_v42 }
0x1fd1   :  { %6952 = vmatmul.msk.f32.gmra.mxu1 %vm304_vm1, %v4757_v39 }
0x1fd8   :  { %v4760_v23 = vpop.f32.mrf.mxu2 }
0x1fd9   :  { %6953 = vmatmul.msk.f32.gmra.mxu1 %vm304_vm1, %v4760_v23 }
0x1fda   :  { %v4842_v1 = vpop.f32.mrf.mxu3 }
0x1fe2   :  { %v4845_v51 = vpop.f32.mrf.mxu3 }
0x2034   :  { %v4795_v49 = vpop.f32.mrf.mxu1 }
0x2035   :  { %v4843_v2 = vadd.f32 %v4842_v1, %v4795_v49 }
0x2037   :  { %v4857_v11 = vadd.f32 %v4843_v2, %v9306_v46 }
0x2039   :  { %v4862_v52 = vadd.f32 %v7619_v4, %v4857_v11 }
0x203b   :  { %v4867_v32 = vsel %vm222_vm0, %v4862_v52, 0.0 }
0x203c   :  { %4868 = vadd.xlane.f32.xlu1 %v4867_v32 }
0x203e   :  { %v4798_v63 = vpop.f32.mrf.mxu1 }
0x203f   :  { %v4846_v33 = vadd.f32 %v4845_v51, %v4798_v63 }
0x2041   :  { %v4858_v13 = vadd.f32 %v4846_v33, %v9318_v58 }
0x2042   :  { %v4848_v44 = vpop.f32.mrf.mxu3 }
0x2043   :  { %v4863_v19 = vadd.f32 %v7619_v4, %v4858_v13 }
0x2045   :  { %v4870_v15 = vsel %vm222_vm0, %v4863_v19, 0.0 }
0x2046   :  { %v4801_v35 = vpop.f32.mrf.mxu1  ;;  %4871 = vadd.xlane.f32.xlu2 %v4870_v15 }
0x2047   :  { %v4849_v28 = vadd.f32 %v4848_v44, %v4801_v35 }
0x2049   :  { %v4859_v54 = vadd.f32 %v4849_v28, %v9328_v17 }
0x204b   :  { %v4864_v46 = vadd.f32 %v7619_v4, %v4859_v54  ;;  %v4851_v50 = vpop.f32.mrf.mxu3 }
0x204d   :  { %v4873_v61 = vsel %vm222_vm0, %v4864_v46, 0.0 }
0x204e   :  { %4874 = vadd.xlane.f32.xlu0 %v4873_v61  ;;  %v4804_v56 = vpop.f32.mrf.mxu1 }
0x204f   :  { %v4852_v30 = vadd.f32 %v4851_v50, %v4804_v56 }
0x2051   :  { %v4860_v55 = vadd.f32 %v4852_v30, %v9338_v53 }
0x2053   :  { %v4865_v40 = vadd.f32 %v7619_v4, %v4860_v55  ;;  %v4854_v26 = vpop.f32.mrf.mxu3  ;;  %v9548_v55 = vld [vmem:[%s7902_s7] ss:$0 sm:$0xff] }
0x2055   :  { %v4876_v58 = vsel %vm222_vm0, %v4865_v40, 0.0 }
0x2056   :  { %4877 = vadd.xlane.f32.xlu1 %v4876_v58  ;;  %v4807_v37 = vpop.f32.mrf.mxu1 }
0x2057   :  { %v4855_v18 = vadd.f32 %v4854_v26, %v4807_v37  ;;  %v9552_v26 = vld [vmem:[%s7929_s17] ss:$0 sm:$0xff]  ;;  %s6670_s17 = sld [smem:[%s10179_s0 + %s7691_s28]]  }
0x2059   :  { %v4861_v7 = vadd.f32 %v4855_v18, %v9348_v48 }
0x205b   :  { %v4866_v41 = vadd.f32 %v7619_v4, %v4861_v7 }
0x205d   :  { %v4879_v17 = vsel %vm895_vm12, %v4866_v41, 0.0 }
0x205e   :  { %4880 = vadd.xlane.f32.xlu2 %v4879_v17 }
0x20af   :  { %v4869_v43 = vpop.xlane.xlu1 %4868 }
0x20b0   :  { %v4882_v16 = vmul.f32 %v4869_v43, %v7904_v3 }
0x20b2   :  { %v4887_v21 = vsub.f32 %v4862_v52, %v4882_v16 }
0x20b4   :  { %v4892_v38 = vmul.f32 %v4887_v21, %v4887_v21 }
0x20b6   :  { %v4897_v53 = vsel %vm222_vm0, %v4892_v38, 0.0 }
0x20b7   :  { %4898 = vadd.xlane.f32.xlu0 %v4897_v53 }
0x20b9   :  { %v4872_v6 = vpop.xlane.xlu2 %4871 }
0x20ba   :  { %v4883_v29 = vmul.f32 %v4872_v6, %v7904_v3 }
0x20bc   :  { %v9521_v60 = vsub.f32 %v4863_v19, %v4883_v29 }
0x20be   :  { %v4893_v48 = vmul.f32 %v9521_v60, %v9521_v60 }
0x20c0   :  { %v4900_v14 = vsel %vm222_vm0, %v4893_v48, 0.0 }
0x20c1   :  { %v4875_v5 = vpop.xlane.xlu0 %4874  ;;  %4901 = vadd.xlane.f32.xlu1 %v4900_v14 }
0x20c2   :  { %v4884_v25 = vmul.f32 %v4875_v5, %v7904_v3 }
0x20c4   :  { %v9527_v8 = vsub.f32 %v4864_v46, %v4884_v25 }
0x20c6   :  { %v4894_v12 = vmul.f32 %v9527_v8, %v9527_v8 }
0x20c8   :  { %v4903_v57 = vsel %vm222_vm0, %v4894_v12, 0.0 }
0x20c9   :  { %4904 = vadd.xlane.f32.xlu2 %v4903_v57  ;;  %v4878_v36 = vpop.xlane.xlu1 %4877 }
0x20ca   :  { %v4885_v34 = vmul.f32 %v4878_v36, %v7904_v3 }
0x20cc   :  { %v9533_v59 = vsub.f32 %v4865_v40, %v4885_v34 }
0x20ce   :  { %v4895_v42 = vmul.f32 %v9533_v59, %v9533_v59 }
0x20d0   :  { %v4906_v39 = vsel %vm222_vm0, %v4895_v42, 0.0 }
0x20d1   :  { %v4881_v23 = vpop.xlane.xlu2 %4880  ;;  %4907 = vadd.xlane.f32.xlu0 %v4906_v39 }
0x20d2   :  { %v4886_v1 = vmul.f32 %v4881_v23, %v7904_v3 }
0x20d4   :  { %v9539_v49 = vsub.f32 %v4866_v41, %v4886_v1 }
0x20d6   :  { %v4896_v2 = vmul.f32 %v9539_v49, %v9539_v49 }
0x20d8   :  { %v4909_v11 = vsel %vm895_vm12, %v4896_v2, 0.0 }
0x20d9   :  { %4910 = vadd.xlane.f32.xlu1 %v4909_v11 }
0x212a   :  { %v4899_v4 = vpop.xlane.xlu0 %4898 }
0x212b   :  { %v4912_v52 = vmul.f32 %v4899_v4, %v7904_v3 }
0x212d   :  { %v4917_v32 = vadd.f32 1e-05, %v4912_v52 }
0x212f   :  { %7476 = vrsqrt.f32 %v4917_v32  ;;  %vm4928_vm5 = vweird.f32 %v4917_v32 }
0x2134   :  { %v4902_v33 = vpop.xlane.xlu1 %4901 }
0x2135   :  { %v7477_v51 = vpop.eup %7476  ;;  %v4913_v44 = vmul.f32 %v4902_v33, %v7904_v3 }
0x2136   :  { %v4923_v63 = vmul.f32 %v7477_v51, %v4917_v32  ;;  %vm4929_vm6 = vweird.f32 %v7477_v51 }
0x2137   :  { %v4918_v15 = vadd.f32 1e-05, %v4913_v44  ;;  %vm4930_vm11 = vmor %vm4928_vm5, %vm4929_vm6 }
0x2138   :  { %v4924_v13 = vmul.f32 %v7477_v51, %v4923_v63 }
0x2139   :  { %7478 = vrsqrt.f32 %v4918_v15  ;;  %vm4938_vm14 = vweird.f32 %v4918_v15 }
0x213a   :  { %v4925_v19 = vmul.f32 0.5, %v4924_v13 }
0x213c   :  { %v4926_v35 = vsub.f32 1.5, %v4925_v19  ;;  %v4905_v54 = vpop.xlane.xlu2 %4904 }
0x213d   :  { %v4914_v50 = vmul.f32 %v4905_v54, %v7904_v3 }
0x213e   :  { %v4927_v28 = vmul.f32 %v7477_v51, %v4926_v35 }
0x213f   :  { %v7479_v56 = vpop.eup %7478  ;;  %v4919_v30 = vadd.f32 1e-05, %v4914_v50 }
0x2140   :  { %v4931_v46 = vsel %vm4930_vm11, %v7477_v51, %v4927_v28  ;;  %v4933_v58 = vmul.f32 %v7479_v56, %v4918_v15  ;;  %vm4939_vm13 = vweird.f32 %v7479_v56 }
0x2141   :  { %v4972_v61 = vmul.f32 %v4931_v46, %v4887_v21  ;;  %7480 = vrsqrt.f32 %v4919_v30  ;;  %vm4940_vm15 = vmor %vm4938_vm14, %vm4939_vm13  ;;  %vm4948_vm3 = vweird.f32 %v4919_v30  ;;  %vm10290_vm14 = vcmask 271360  }
0x2142   :  { %v4934_v18 = vmul.f32 %v7479_v56, %v4933_v58 }
0x2143   :  { %v4977_v40 = vmul.f32 %v9548_v55, %v4972_v61 }
0x2144   :  { %v4935_v7 = vmul.f32 0.5, %v4934_v18  ;;  %v4908_v41 = vpop.xlane.xlu0 %4907 }
0x2145   :  { %v9555_v37 = vadd.f32 %v9552_v26, %v4977_v40  ;;  %v4915_v17 = vmul.f32 %v4908_v41, %v7904_v3 }
0x2146   :  { %v4936_v43 = vsub.f32 1.5, %v4935_v7 }
0x2147   :  { %6959 = vmatmul.msk.f32.vlgmr.msrb.gmra.mxu0 %vm222_vm0, %v9555_v37  ;;  %6964 = vmatmul.msk.f32.vlgmr.msra.gmra.mxu2 %vm222_vm0, %v9555_v37  ;;  %v7481_v16 = vpop.eup %7480  ;;  %v4920_v21 = vadd.f32 1e-05, %v4915_v17 }
0x2148   :  { %v4937_v38 = vmul.f32 %v7479_v56, %v4936_v43  ;;  %v4943_v53 = vmul.f32 %v7481_v16, %v4919_v30  ;;  %vm4949_vm10 = vweird.f32 %v7481_v16  ;;  %v7622_v43 = vld [vmem:[%s7952_s22] ss:$0 sm:$0xff]  ;;  %s7692_s22 = smov 30  }
0x2149   :  { %7482 = vrsqrt.f32 %v4920_v21  ;;  %vm4950_vm2 = vmor %vm4948_vm3, %vm4949_vm10  ;;  %vm4958_vm4 = vweird.f32 %v4920_v21 }
0x214a   :  { %v4941_v6 = vsel %vm4940_vm15, %v7479_v56, %v4937_v38  ;;  %v4944_v29 = vmul.f32 %v7481_v16, %v4943_v53  ;;  %vm10291_vm15 = vmmov %vm10290_vm14 }
0x214b   :  { %v4973_v48 = vmul.f32 %v4941_v6, %v9521_v60  ;;  %vm10292_vm10 = vmmov %vm10290_vm14 }
0x214c   :  { %v4945_v14 = vmul.f32 0.5, %v4944_v29  ;;  %v4911_v5 = vpop.xlane.xlu1 %4910  ;;  %vm10293_vm3 = vmmov %vm10292_vm10 }
0x214d   :  { %v4916_v25 = vmul.f32 %v4911_v5, %v7904_v3  ;;  %v4978_v12 = vmul.f32 %v9548_v55, %v4973_v48  ;;  %v7623_v5 = vld [vmem:[%s8236_s4 + $0x8] sm:$0xff] }
0x214e   :  { %v4946_v57 = vsub.f32 1.5, %v4945_v14 }
0x214f   :  { %v7483_v36 = vpop.eup %7482  ;;  %v4921_v34 = vadd.f32 1e-05, %v4916_v25  ;;  %v9566_v42 = vadd.f32 %v9552_v26, %v4978_v12 }
0x2150   :  { %v4947_v39 = vmul.f32 %v7481_v16, %v4946_v57  ;;  %v4953_v23 = vmul.f32 %v7483_v36, %v4920_v21  ;;  %vm4959_vm7 = vweird.f32 %v7483_v36 }
0x2151   :  { %7484 = vrsqrt.f32 %v4921_v34  ;;  %6960 = vmatmul.msk.f32.gmra.mxu0 %vm222_vm0, %v9566_v42  ;;  %6965 = vmatmul.msk.f32.gmra.mxu2 %vm222_vm0, %v9566_v42  ;;  %vm4960_vm6 = vmor %vm4958_vm4, %vm4959_vm7  ;;  %vm4968_vm11 = vweird.f32 %v4921_v34 }
0x2152   :  { %v4951_v60 = vsel %vm4950_vm2, %v7481_v16, %v4947_v39  ;;  %v4954_v1 = vmul.f32 %v7483_v36, %v4953_v23 }
0x2153   :  { %v4974_v2 = vmul.f32 %v4951_v60, %v9527_v8 }
0x2154   :  { %v4955_v11 = vmul.f32 0.5, %v4954_v1 }
0x2155   :  { %v4979_v4 = vmul.f32 %v9548_v55, %v4974_v2 }
0x2156   :  { %v4956_v52 = vsub.f32 1.5, %v4955_v11 }
0x2157   :  { %v7485_v32 = vpop.eup %7484  ;;  %v9575_v51 = vadd.f32 %v9552_v26, %v4979_v4  ;;  %v7624_v4 = vld [vmem:[%s8353_s21 + $0x8] sm:$0xff] }
0x2158   :  { %v4957_v63 = vmul.f32 %v7483_v36, %v4956_v52  ;;  %v4963_v33 = vmul.f32 %v7485_v32, %v4921_v34  ;;  %vm4969_vm5 = vweird.f32 %v7485_v32 }
0x2159   :  { %6961 = vmatmul.msk.f32.gmra.mxu0 %vm222_vm0, %v9575_v51  ;;  %6966 = vmatmul.msk.f32.gmra.mxu2 %vm222_vm0, %v9575_v51  ;;  %vm4970_vm13 = vmor %vm4968_vm11, %vm4969_vm5 }
0x215a   :  { %v4961_v8 = vsel %vm4960_vm6, %v7483_v36, %v4957_v63  ;;  %v4964_v13 = vmul.f32 %v7485_v32, %v4963_v33  ;;  %v7625_v33 = vld [vmem:[%s8353_s21] sm:$0xff]  ;;  %s7695_s21 = smov 33  }
0x215b   :  { %v4975_v44 = vmul.f32 %v4961_v8, %v9533_v59 }
0x215c   :  { %v4965_v19 = vmul.f32 0.5, %v4964_v13 }
0x215d   :  { %v4980_v15 = vmul.f32 %v9548_v55, %v4975_v44 }
0x215e   :  { %v4966_v35 = vsub.f32 1.5, %v4965_v19 }
0x215f   :  { %v9584_v28 = vadd.f32 %v9552_v26, %v4980_v15  ;;  %v7626_v15 = vld [vmem:[%s8075_s29] sm:$0xff] }
0x2160   :  { %v4967_v54 = vmul.f32 %v7485_v32, %v4966_v35 }
0x2161   :  { %6962 = vmatmul.msk.f32.gmra.mxu0 %vm222_vm0, %v9584_v28  ;;  %6967 = vmatmul.msk.f32.gmra.mxu2 %vm222_vm0, %v9584_v28 }
0x2162   :  { %v4971_v46 = vsel %vm4970_vm13, %v7485_v32, %v4967_v54 }
0x2163   :  { %v4976_v59 = vmul.f32 %v4971_v46, %v9539_v49 }
0x2165   :  { %v4981_v50 = vmul.f32 %v9548_v55, %v4976_v59 }
0x2167   :  { %v9593_v61 = vadd.f32 %v9552_v26, %v4981_v50  ;;  %v7627_v50 = vld [vmem:[%s8075_s29 + $0x8] sm:$0xff] }
0x2169   :  { %6963 = vmatmul.msk.f32.gmra.mxu0 %vm222_vm0, %v9593_v61  ;;  %6968 = vmatmul.msk.f32.gmra.mxu2 %vm222_vm0, %v9593_v61 }
0x21c4   :  { %v5019_v30 = vpop.f32.mrf.mxu0 }
0x21c5   :  { %v5020_v16 = vadd.f32 %v7622_v43, %v5019_v30 }
0x21ca   :  { %v5051_v56 = vpop.f32.mrf.mxu2 }
0x21cb   :  { %v5052_v58 = vadd.f32 %v5051_v56, %v8021_v9 }
0x21ce   :  { %v5022_v49 = vpop.f32.mrf.mxu0 }
0x21d4   :  { %v5054_v40 = vpop.f32.mrf.mxu2 }
0x21d5   :  { %v5055_v18 = vadd.f32 %v5054_v40, %v8021_v9 }
0x21d6   :  { %v5025_v41 = vpop.f32.mrf.mxu0 }
0x21d7   :  { %v9601_v7 = vpack.i.bf16 %v5052_v58, %v5055_v18  ;;  %v5026_v14 = vadd.f32 %v7622_v43, %v5025_v41 }
0x21dc   :  { %v5057_v55 = vpop.f32.mrf.mxu2 }
0x21dd   :  { %v5058_v26 = vadd.f32 %v5057_v55, %v8021_v9 }
0x21de   :  { %v5028_v53 = vpop.f32.mrf.mxu0 }
0x21df   :  { %5335 = vrot.lane.b32.xlu1 %v5058_v26, %s10202_s19  ;;  %v5029_v29 = vadd.f32 %v7622_v43, %v5028_v53 }
0x21e4   :  { %v5060_v17 = vpop.f32.mrf.mxu2 }
0x21e5   :  { %v5061_v21 = vadd.f32 %v5060_v17, %v8021_v9  ;;  %v7629_v17 = vld [vmem:[%s8075_s29 + $0x18] sm:$0xff] }
0x21e6   :  { %v5031_v25 = vpop.f32.mrf.mxu0 }
0x21e7   :  { %5337 = vrot.lane.b32.xlu0 %v5061_v21, %s10202_s19  ;;  %5321 = vrot.lane.b32.xlu1 %v5020_v16, %s10202_s19  ;;  %v9609_v38 = vpack.i.bf16 %v5058_v26, %v5061_v21  ;;  %v5032_v12 = vadd.f32 %v7622_v43, %v5031_v25 }
0x21ec   :  { %v5063_v6 = vpop.f32.mrf.mxu2 }
0x21ed   :  { %v9612_v48 = vadd.f32 %v5063_v6, %v8021_v9  ;;  %v5023_v9 = vadd.f32 %v7622_v43, %v5022_v49  ;;  %v7630_v6 = vld [vmem:[%s8075_s29 + $0x20] sm:$0x3] }
0x21ef   :  { %5331 = vrot.lane.b32.xlu0 %v5052_v58, %s10202_s19  ;;  %5327 = vrot.lane.b32.xlu1 %v5029_v29, %s10202_s19 }
0x21f0   :  { %5339 = vrot.lane.b32.xlu2 %v9612_v48, %s10202_s19  ;;  %6969 = vmatpush.xpose.msk.msra.mxu1 %vm304_vm1, %v9612_v48 }
0x21f4   :  { %6970 = vmatpush.xpose.msk.msra.mxu1 %vm304_vm1, %v5061_v21 }
0x21f7   :  { %7178 = vrot.lane.b32.xlu1 %v9609_v38, %s10235_s5  ;;  %5325 = vrot.lane.b32.xlu0 %v5026_v14, %s10202_s19 }
0x21f8   :  { %5333 = vrot.lane.b32.xlu2 %v5055_v18, %s10202_s19  ;;  %6971 = vmatpush.xpose.msk.msra.mxu1 %vm304_vm1, %v5058_v26 }
0x21fc   :  { %6972 = vmatpush.xpose.msk.msra.mxu1 %vm304_vm1, %v5055_v18  ;;  %v7628_v18 = vld [vmem:[%s8075_s29 + $0x10] sm:$0xff] }
0x2200   :  { %5323 = vrot.lane.b32.xlu2 %v5023_v9, %s10202_s19  ;;  %6973 = vmatpush.xpose.msk.msra.mxu1 %vm304_vm1, %v5052_v58 }
0x2203   :  { %6974 = vmatmul.msk.f32.vlgmr.msra.gmra.mxu1 %vm304_vm1, %v5020_v16 }
0x2204   :  { %5616 = vmatpush.msrb.mxu1 %v7623_v5 }
0x2208   :  { %5329 = vrot.lane.b32.xlu2 %v5032_v12, %s10202_s19 }
0x220b   :  { %6975 = vmatmul.msk.f32.gmra.mxu1 %vm304_vm1, %v5023_v9 }
0x2210   :  { %5266 = vrot.lane.b32.xlu2 %v9612_v48, %s10235_s5 }
0x2213   :  { %6976 = vmatmul.msk.f32.gmra.mxu1 %vm304_vm1, %v5026_v14 }
0x221b   :  { %6977 = vmatmul.msk.f32.gmra.mxu1 %vm304_vm1, %v5029_v29 }
0x2223   :  { %6978 = vmatmul.msk.f32.gmra.mxu1 %vm304_vm1, %v5032_v12 }
0x224a   :  { %v5340_v57 = vpop.permute.xlu2 %5339 }
0x224b   :  { %6985 = vmatpush.xpose.msk.msra.mxu0 %vm304_vm1, %v5340_v57 }
0x2251   :  { %v5336_v36 = vpop.permute.xlu1 %5335 }
0x2252   :  { %v5334_v34 = vpop.permute.xlu2 %5333 }
0x2259   :  { %v5338_v39 = vpop.permute.xlu0 %5337  ;;  %v5322_v23 = vpop.permute.xlu1 %5321 }
0x225a   :  { %v5324_v60 = vpop.permute.xlu2 %5323  ;;  %6986 = vmatpush.xpose.msk.msra.mxu0 %vm304_vm1, %v5338_v39 }
0x225e   :  { %6987 = vmatpush.xpose.msk.msra.mxu0 %vm304_vm1, %v5336_v36 }
0x2261   :  { %v5328_v1 = vpop.permute.xlu1 %5327  ;;  %v5332_v11 = vpop.permute.xlu0 %5331 }
0x2262   :  { %v5330_v2 = vpop.permute.xlu2 %5329  ;;  %6988 = vmatpush.xpose.msk.msra.mxu0 %vm304_vm1, %v5334_v34 }
0x2266   :  { %6989 = vmatpush.xpose.msk.msra.mxu0 %vm304_vm1, %v5332_v11 }
0x2269   :  { %6990 = vmatmul.msk.f32.vlgmr.msra.gmra.mxu0 %vm304_vm1, %v5322_v23  ;;  %v7179_v52 = vpop.permute.xlu1 %7178  ;;  %v5326_v13 = vpop.permute.xlu0 %5325 }
0x226a   :  { %5839 = vmatpush.msrb.mxu0 %v7624_v4  ;;  %v5267_v32 = vpop.permute.xlu2 %5266  ;;  %v7180_v63 = vunpack.i.l.bf16 %v7179_v52  ;;  %v7181_v8 = vunpack.i.h.bf16 %v7179_v52 }
0x226b   :  { %6979 = vmatpush.msk.msrb.mxu3 %vm1333_vm8, %v5267_v32 }
0x226c   :  { %5840 = vmatpush.msrb.mxu0 %v7625_v33 }
0x226d   :  { %5301 = vmatpush.msrb.mxu3 %v7180_v63 }
0x226f   :  { %5302 = vmatpush.msrb.mxu3 %v7181_v8 }
0x2271   :  { %6991 = vmatmul.msk.f32.gmra.mxu0 %vm304_vm1, %v5324_v60 }
0x2279   :  { %6992 = vmatmul.msk.f32.gmra.mxu0 %vm304_vm1, %v5326_v13 }
0x2280   :  { %v5113_v44 = vpop.f32.mrf.mxu1 }
0x2281   :  { %v5128_v19 = vmul.f32 0.35355338, %v5113_v44  ;;  %6993 = vmatmul.msk.f32.gmra.mxu0 %vm304_vm1, %v5328_v1 }
0x2283   :  { %v5133_v35 = vadd.f32 %v7626_v15, %v5128_v19 }
0x2285   :  { %v5138_v54 = vsel %vm1182_vm9, %v5133_v35, -inf }
0x2286   :  { %5139 = vmax.xlane.f32.xlu0 %v5138_v54 }
0x2288   :  { %v5116_v46 = vpop.f32.mrf.mxu1 }
0x2289   :  { %v5129_v59 = vmul.f32 0.35355338, %v5116_v46  ;;  %6994 = vmatmul.msk.f32.gmra.mxu0 %vm304_vm1, %v5330_v2 }
0x228b   :  { %v5134_v56 = vadd.f32 %v7627_v50, %v5129_v59 }
0x228d   :  { %v5141_v30 = vsel %vm1182_vm9, %v5134_v56, -inf }
0x228e   :  { %5142 = vmax.xlane.f32.xlu2 %v5141_v30 }
0x2290   :  { %v5119_v40 = vpop.f32.mrf.mxu1 }
0x2291   :  { %v5130_v58 = vmul.f32 0.35355338, %v5119_v40 }
0x2293   :  { %v5135_v49 = vadd.f32 %v7628_v18, %v5130_v58 }
0x2295   :  { %v5144_v55 = vsel %vm1182_vm9, %v5135_v49, -inf }
0x2296   :  { %5145 = vmax.xlane.f32.xlu2 %v5144_v55 }
0x2298   :  { %v5122_v26 = vpop.f32.mrf.mxu1 }
0x2299   :  { %v5131_v41 = vmul.f32 0.35355338, %v5122_v26 }
0x229b   :  { %v9658_v43 = vadd.f32 %v7629_v17, %v5131_v41 }
0x229d   :  { %v5147_v16 = vsel %vm1182_vm9, %v9658_v43, -inf }
0x229e   :  { %5148 = vmax.xlane.f32.xlu0 %v5147_v16 }
0x22a0   :  { %v5125_v21 = vpop.f32.mrf.mxu1 }
0x22a1   :  { %v5132_v53 = vmul.f32 0.35355338, %v5125_v21 }
0x22a3   :  { %v9663_v29 = vadd.f32 %v7630_v6, %v5132_v53 }
0x22a5   :  { %v5150_v14 = vsel %vm10290_vm14, %v9663_v29, -inf }
0x22a6   :  { %5151 = vmax.xlane.f32.xlu1 %v5150_v14 }
0x22e6   :  { %v5378_v9 = vpop.f32.mrf.mxu0 }
0x22e7   :  { %v5393_v5 = vmul.f32 0.35355338, %v5378_v9 }
0x22e9   :  { %v5398_v25 = vadd.f32 %v7626_v15, %v5393_v5 }
0x22eb   :  { %v5403_v12 = vsel %vm1182_vm9, %v5398_v25, -inf }
0x22ec   :  { %5404 = vmax.xlane.f32.xlu1 %v5403_v12 }
0x22ee   :  { %v5381_v57 = vpop.f32.mrf.mxu0 }
0x22ef   :  { %v5394_v36 = vmul.f32 0.35355338, %v5381_v57 }
0x22f1   :  { %v5399_v34 = vadd.f32 %v7627_v50, %v5394_v36 }
0x22f3   :  { %v5406_v39 = vsel %vm1182_vm9, %v5399_v34, -inf }
0x22f4   :  { %5407 = vmax.xlane.f32.xlu0 %v5406_v39 }
0x22f6   :  { %v5384_v23 = vpop.f32.mrf.mxu0 }
0x22f7   :  { %v5395_v60 = vmul.f32 0.35355338, %v5384_v23 }
0x22f9   :  { %v5400_v1 = vadd.f32 %v7628_v18, %v5395_v60  ;;  %v5140_v2 = vpop.xlane.xlu0 %5139 }
0x22fa   :  { %v5153_v11 = vsub.f32 %v5133_v35, %v5140_v2 }
0x22fb   :  { %v5409_v4 = vsel %vm1182_vm9, %v5400_v1, -inf }
0x22fc   :  { %v5158_v52 = vmul.f32 1.442695, %v5153_v11  ;;  %5410 = vmax.xlane.f32.xlu1 %v5409_v4 }
0x22fe   :  { %7486 = vpow2.f32 %v5158_v52  ;;  %v5387_v63 = vpop.f32.mrf.mxu0 }
0x22ff   :  { %v5396_v44 = vmul.f32 0.35355338, %v5387_v63 }
0x2301   :  { %v5143_v32 = vpop.xlane.xlu2 %5142  ;;  %v9674_v15 = vadd.f32 %v7629_v17, %v5396_v44 }
0x2302   :  { %v5154_v33 = vsub.f32 %v5134_v56, %v5143_v32 }
0x2303   :  { %v5412_v56 = vsel %vm1182_vm9, %v9674_v15, -inf }
0x2304   :  { %v9670_v8 = vpop.eup %7486  ;;  %v5160_v13 = vmul.f32 1.442695, %v5154_v33 }
0x2305   :  { %v5168_v19 = vsel %vm1182_vm9, %v9670_v8, 0.0 }
0x2306   :  { %7488 = vpow2.f32 %v5160_v13  ;;  %5169 = vadd.xlane.f32.xlu2 %v5168_v19  ;;  %v5390_v30 = vpop.f32.mrf.mxu0 }
0x2307   :  { %v5397_v58 = vmul.f32 0.35355338, %v5390_v30 }
0x2309   :  { %v5146_v35 = vpop.xlane.xlu2 %5145 }
0x230a   :  { %v5155_v54 = vsub.f32 %v5135_v49, %v5146_v35  ;;  %v5402_v49 = vadd.f32 %v7630_v6, %v5397_v58 }
0x230c   :  { %v9676_v46 = vpop.eup %7488  ;;  %v5162_v59 = vmul.f32 1.442695, %v5155_v54  ;;  %v5415_v55 = vsel %vm10291_vm15, %v5402_v49, -inf }
0x230d   :  { %v5171_v50 = vsel %vm1182_vm9, %v9676_v46, 0.0 }
0x230e   :  { %7490 = vpow2.f32 %v5162_v59  ;;  %5172 = vadd.xlane.f32.xlu0 %v5171_v50  ;;  %5413 = vmax.xlane.f32.xlu2 %v5412_v56 }
0x2311   :  { %v5149_v41 = vpop.xlane.xlu0 %5148 }
0x2312   :  { %v5156_v63 = vsub.f32 %v9658_v43, %v5149_v41 }
0x2314   :  { %v9682_v40 = vpop.eup %7490  ;;  %v5164_v33 = vmul.f32 1.442695, %v5156_v63 }
0x2315   :  { %v5174_v18 = vsel %vm1182_vm9, %v9682_v40, 0.0 }
0x2316   :  { %5175 = vadd.xlane.f32.xlu0 %v5174_v18 }
0x2319   :  { %v5152_v26 = vpop.xlane.xlu1 %5151 }
0x231e   :  { %5416 = vmax.xlane.f32.xlu0 %v5415_v55 }
0x2326   :  { %5531 = vrot.lane.b32.xlu2 %v9612_v48, %s10232_s11  ;;  %v5157_v48 = vsub.f32 %v9663_v29, %v5152_v26 }
0x235f   :  { %v5405_v17 = vpop.xlane.xlu1 %5404 }
0x2360   :  { %v5418_v16 = vsub.f32 %v5398_v25, %v5405_v17 }
0x2362   :  { %v5423_v21 = vmul.f32 1.442695, %v5418_v16 }
0x2364   :  { %7492 = vpow2.f32 %v5423_v21 }
0x2367   :  { %v5408_v53 = vpop.xlane.xlu0 %5407 }
0x2368   :  { %v5419_v14 = vsub.f32 %v5399_v34, %v5408_v53  ;;  %v5166_v34 = vmul.f32 1.442695, %v5157_v48 }
0x236a   :  { %v9689_v9 = vpop.eup %7492  ;;  %v5425_v5 = vmul.f32 1.442695, %v5419_v14 }
0x236b   :  { %v5433_v6 = vsel %vm1182_vm9, %v9689_v9, 0.0 }
0x236c   :  { %7494 = vpow2.f32 %v5425_v5  ;;  %5434 = vadd.xlane.f32.xlu1 %v5433_v6 }
0x236f   :  { %v5411_v12 = vpop.xlane.xlu1 %5410 }
0x2370   :  { %v5420_v57 = vsub.f32 %v5400_v1, %v5411_v12 }
0x2372   :  { %v9693_v36 = vpop.eup %7494  ;;  %v5427_v39 = vmul.f32 1.442695, %v5420_v57 }
0x2373   :  { %v5436_v25 = vsel %vm1182_vm9, %v9693_v36, 0.0 }
0x2374   :  { %7496 = vpow2.f32 %v5427_v39  ;;  %5437 = vadd.xlane.f32.xlu0 %v5436_v25 }
0x2375   :  { %7498 = vpow2.f32 %v5166_v34 }
0x2376   :  { %7500 = vpow2.f32 %v5164_v33 }
0x2379   :  { %v9698_v23 = vpop.xlane.xlu2 %5169 }
0x237a   :  { %v9700_v60 = vpop.eup %7496  ;;  %v5192_v6 = vand.u32 2147483647, %v9698_v23  ;;  %v5194_v12 = vand.u32 2147483648, %v9698_v23  ;;  %vm5188_vm7 = vweird.f32 %v9698_v23 }
0x237b   :  { %v5439_v2 = vsel %vm1182_vm9, %v9700_v60, 0.0  ;;  %v9704_v1 = vpop.eup %7498 }
0x237c   :  { %5440 = vadd.xlane.f32.xlu2 %v5439_v2  ;;  %v5180_v29 = vsel %vm10292_vm10, %v9704_v1, 0.0  ;;  %v9721_v54 = vpop.eup %7500  ;;  %vm5193_vm6 = vcmp.eq.f32.partialorder %v5192_v6, 8.507059e+37 }
0x2381   :  { %v5414_v11 = vpop.xlane.xlu2 %5413  ;;  %v9715_v52 = vpop.xlane.xlu0 %5172 }
0x2382   :  { %v5421_v13 = vsub.f32 %v9674_v15, %v5414_v11  ;;  %v5195_v11 = vor.u32 1.1754944e-38, %v5194_v12  ;;  %vm5203_vm15 = vweird.f32 %v9715_v52 }
0x2384   :  { %5181 = vadd.xlane.f32.xlu2 %v5180_v29  ;;  %v5429_v19 = vmul.f32 1.442695, %v5421_v13 }
0x2385   :  { %7188 = vrot.lane.b32.xlu1 %v9609_v38, %s10232_s11 }
0x2386   :  { %7502 = vpow2.f32 %v5429_v19 }
0x2388   :  { %7183 = vrot.lane.b32.xlu0 %v9601_v7, %s10235_s5 }
0x2389   :  { %v5532_v4 = vpop.permute.xlu2 %5531  ;;  %v9717_v32 = vpop.xlane.xlu0 %5175 }
0x238a   :  { %6995 = vmatpush.msk.msrb.mxu2 %vm1333_vm8, %v5532_v4 }
0x238c   :  { %v9725_v59 = vpop.eup %7502 }
0x238d   :  { %7193 = vrot.lane.b32.xlu1 %v9601_v7, %s10232_s11  ;;  %v5177_v7 = vsel %vm1182_vm9, %v9721_v54, 0.0  ;;  %v5442_v43 = vsel %vm1182_vm9, %v9725_v59, 0.0 }
0x2391   :  { %v5417_v44 = vpop.xlane.xlu0 %5416 }
0x2392   :  { %v5422_v38 = vsub.f32 %v5402_v49, %v5417_v44 }
0x2394   :  { %v5431_v35 = vmul.f32 1.442695, %v5422_v38 }
0x2396   :  { %7504 = vpow2.f32 %v5431_v35 }
0x2397   :  { %7506 = vrcp.f32 %v9698_v23 }
0x239c   :  { %v9727_v50 = vpop.eup %7504 }
0x239d   :  { %v5445_v15 = vsel %vm10293_vm3, %v9727_v50, 0.0  ;;  %v7507_v30 = vpop.eup %7506 }
0x239e   :  { %v5184_v58 = vmul.f32 %v7507_v30, %v9698_v23  ;;  %vm5189_vm2 = vweird.f32 %v7507_v30 }
0x239f   :  { %vm5190_vm4 = vmor %vm5188_vm7, %vm5189_vm2 }
0x23a0   :  { %v5185_v55 = vsub.f32 1.0, %v5184_v58 }
0x23a2   :  { %v5186_v17 = vmul.f32 %v7507_v30, %v5185_v55  ;;  %v7635_v55 = vld [vmem:[%s8390_s1 + $0x30] sm:$0xff] }
0x23a4   :  { %v5187_v5 = vadd.f32 %v7507_v30, %v5186_v17 }
0x23a6   :  { %v5191_v34 = vsel %vm5190_vm4, %v7507_v30, %v5187_v5  ;;  %v5209_v30 = vand.u32 2147483648, %v9715_v52  ;;  %v5207_v5 = vand.u32 2147483647, %v9715_v52 }
0x23a7   :  { %v5196_v44 = vsel %vm5193_vm6, %v5195_v11, %v5191_v34  ;;  %v7631_v11 = vld [vmem:[%s8236_s4] sm:$0xff] }
0x23a8   :  { %vm5208_vm7 = vcmp.eq.f32.partialorder %v5207_v5, 8.507059e+37  ;;  %v7637_v5 = vld [vmem:[%s8390_s1 + $0x20] sm:$0xff] }
0x23b2   :  { %5178 = vadd.xlane.f32.xlu0 %v5177_v7 }
0x23b7   :  { %5443 = vadd.xlane.f32.xlu1 %v5442_v43 }
0x23ba   :  { %5446 = vadd.xlane.f32.xlu0 %v5445_v15 }
0x23df   :  { %v9734_v56 = vpop.xlane.xlu1 %5434 }
0x23e0   :  { %7508 = vrcp.f32 %v9734_v56  ;;  %v5459_v38 = vand.u32 2147483648, %v9734_v56  ;;  %vm5453_vm11 = vweird.f32 %v9734_v56  ;;  %v5457_v35 = vand.u32 2147483647, %v9734_v56 }
0x23e1   :  { %7510 = vrcp.f32 %v9715_v52 }
0x23e2   :  { %v5460_v6 = vor.u32 1.1754944e-38, %v5459_v38  ;;  %vm5458_vm3 = vcmp.eq.f32.partialorder %v5457_v35, 8.507059e+37 }
0x23e6   :  { %v9741_v49 = vpop.eup %7508 }
0x23e7   :  { %v9739_v18 = vpop.xlane.xlu0 %5437  ;;  %v9744_v26 = vpop.eup %7510  ;;  %v5449_v41 = vmul.f32 %v9741_v49, %v9734_v56  ;;  %vm5454_vm5 = vweird.f32 %v9741_v49 }
0x23e8   :  { %7512 = vrcp.f32 %v9739_v18  ;;  %v5199_v16 = vmul.f32 %v9744_v26, %v9715_v52  ;;  %vm5204_vm13 = vweird.f32 %v9744_v26  ;;  %vm9779_vm14 = vmor %vm5453_vm11, %vm5454_vm5  ;;  %v5210_v52 = vor.u32 1.1754944e-38, %v5209_v30  ;;  %v7634_v30 = vld [vmem:[%s8390_s1 + $0x38] sm:$0xff] }
0x23e9   :  { %7514 = vrcp.f32 %v9717_v32  ;;  %v5450_v21 = vsub.f32 1.0, %v5449_v41  ;;  %vm9792_vm10 = vmor %vm5203_vm15, %vm5204_vm13  ;;  %vm5468_vm4 = vweird.f32 %v9739_v18  ;;  %vm5218_vm11 = vweird.f32 %v9717_v32 }
0x23ea   :  { %v5200_v57 = vsub.f32 1.0, %v5199_v16 }
0x23eb   :  { %v5451_v39 = vmul.f32 %v9741_v49, %v5450_v21  ;;  %v5197_v21 = vmul.f32 %v9670_v8, %v5196_v44 }
0x23ec   :  { %v5201_v29 = vmul.f32 %v9744_v26, %v5200_v57 }
0x23ed   :  { %v5452_v63 = vadd.f32 %v9741_v49, %v5451_v39 }
0x23ee   :  { %v9753_v14 = vpop.eup %7512  ;;  %v5202_v15 = vadd.f32 %v9744_v26, %v5201_v29  ;;  %v5474_v29 = vand.u32 2147483648, %v9739_v18 }
0x23ef   :  { %v9751_v53 = vpop.xlane.xlu2 %5440  ;;  %v9758_v48 = vpop.eup %7514  ;;  %v5464_v25 = vmul.f32 %v9753_v14, %v9739_v18  ;;  %v5456_v56 = vsel %vm9779_vm14, %v9741_v49, %v5452_v63  ;;  %vm5469_vm2 = vweird.f32 %v9753_v14  ;;  %v7632_v63 = vld [vmem:[%s8241_s10 + $0x8] sm:$0xff] }
0x23f0   :  { %7516 = vrcp.f32 %v9751_v53  ;;  %v5214_v4 = vmul.f32 %v9758_v48, %v9717_v32  ;;  %v5461_v39 = vsel %vm5458_vm3, %v5460_v6, %v5456_v56  ;;  %v5206_v8 = vsel %vm9792_vm10, %v9744_v26, %v5202_v15  ;;  %vm9813_vm5 = vmor %vm5468_vm4, %vm5469_vm2 }
0x23f1   :  { %v5465_v23 = vsub.f32 1.0, %v5464_v25  ;;  %v5472_v26 = vand.u32 2147483647, %v9739_v18  ;;  %vm5219_vm6 = vweird.f32 %v9758_v48  ;;  %vm5483_vm3 = vweird.f32 %v9751_v53 }
0x23f2   :  { %v5215_v58 = vsub.f32 1.0, %v5214_v4  ;;  %vm9830_vm13 = vmor %vm5218_vm11, %vm5219_vm6 }
0x23f3   :  { %v5466_v41 = vmul.f32 %v9753_v14, %v5465_v23  ;;  %v5462_v23 = vmul.f32 %v9689_v9, %v5461_v39  ;;  %v5224_v9 = vand.u32 2147483648, %v9717_v32  ;;  %vm5473_vm14 = vcmp.eq.f32.partialorder %v5472_v26, 8.507059e+37  ;;  %v7640_v39 = vld [vmem:[%s8390_s1 + $0x8] sm:$0xff] }
0x23f4   :  { %v5216_v57 = vmul.f32 %v9758_v48, %v5215_v58 }
0x23f5   :  { %v5467_v34 = vadd.f32 %v9753_v14, %v5466_v41  ;;  %v5489_v41 = vand.u32 2147483648, %v9751_v53 }
0x23f6   :  { %v9769_v13 = vpop.eup %7516  ;;  %v5217_v44 = vadd.f32 %v9758_v48, %v5216_v57  ;;  %v7638_v57 = vld [vmem:[%s8390_s1 + $0x18] sm:$0xff] }
0x23f7   :  { %v7189_v2 = vpop.permute.xlu1 %7188  ;;  %v5479_v17 = vmul.f32 %v9769_v13, %v9751_v53  ;;  %v5471_v35 = vsel %vm9813_vm5, %v9753_v14, %v5467_v34  ;;  %vm5484_vm15 = vweird.f32 %v9769_v13  ;;  %v5490_v12 = vor.u32 1.1754944e-38, %v5489_v41 }
0x23f8   :  { %v7190_v33 = vunpack.i.l.bf16 %v7189_v2  ;;  %v7191_v7 = vunpack.i.h.bf16 %v7189_v2  ;;  %vm5485_vm2 = vmor %vm5483_vm3, %vm5484_vm15 }
0x23f9   :  { %v5480_v2 = vsub.f32 1.0, %v5479_v17  ;;  %v7636_v17 = vld [vmem:[%s8390_s1 + $0x28] sm:$0xff] }
0x23fa   :  { %v7184_v19 = vpop.permute.xlu0 %7183  ;;  %5566 = vmatpush.msrb.mxu2 %v7190_v33  ;;  %v5211_v33 = vsel %vm5208_vm7, %v5210_v52, %v5206_v8  ;;  %v7641_v8 = vld [vmem:[%s8390_s1] sm:$0xff]  ;;  %v5182_v52 = vpop.xlane.xlu2 %5181 }
0x23fb   :  { %v7185_v43 = vunpack.i.l.bf16 %v7184_v19  ;;  %v7186_v16 = vunpack.i.h.bf16 %v7184_v19  ;;  %v7633_v19 = vld [vmem:[%s8241_s10] sm:$0xff]  ;;  %v5481_v18 = vmul.f32 %v9769_v13, %v5480_v2  ;;  %v5212_v15 = vmul.f32 %v9676_v46, %v5211_v33  ;;  %s10086_s10 = sld [smem:[%s10179_s0 + %s7692_s22]]  }
0x23fc   :  { %5567 = vmatpush.msrb.mxu2 %v7191_v7  ;;  %v5222_v7 = vand.u32 2147483647, %v9717_v32  ;;  %v5221_v32 = vsel %vm9830_vm13, %v9758_v48, %v5217_v44  ;;  %v5225_v46 = vor.u32 1.1754944e-38, %v5224_v9  ;;  %7518 = vrcp.f32 %v5182_v52 }
0x23fd   :  { %5303 = vmatpush.msrb.mxu3 %v7185_v43  ;;  %v5475_v43 = vor.u32 1.1754944e-38, %v5474_v29  ;;  %v5482_v56 = vadd.f32 %v9769_v13, %v5481_v18  ;;  %vm5248_vm15 = vweird.f32 %v5182_v52 }
0x23fe   :  { %vm5223_vm10 = vcmp.eq.f32.partialorder %v5222_v7, 8.507059e+37 }
0x23ff   :  { %v7194_v49 = vpop.permute.xlu1 %7193  ;;  %5304 = vmatpush.msrb.mxu3 %v7186_v16  ;;  %v5476_v14 = vsel %vm5473_vm14, %v5475_v43, %v5471_v35  ;;  %v5487_v16 = vand.u32 2147483647, %v9751_v53  ;;  %v5486_v6 = vsel %vm5485_vm2, %v9769_v13, %v5482_v56  ;;  %v7639_v53 = vld [vmem:[%s8390_s1 + $0x10] sm:$0xff]  ;;  %v7642_v13 = vld [vmem:[%s8417_s27 + $0x8] sm:$0xff]  ;;  %v5254_v35 = vand.u32 2147483648, %v5182_v52 }
0x2400   :  { %v7195_v25 = vunpack.i.l.bf16 %v7194_v49  ;;  %6980 = vmatmul.msk.f32.vlgmr.msrb.gmra.mxu3 %vm1182_vm9, %v5197_v21  ;;  %v7196_v4 = vunpack.i.h.bf16 %v7194_v49  ;;  %v5477_v48 = vmul.f32 %v9693_v36, %v5476_v14  ;;  %v5226_v21 = vsel %vm5223_vm10, %v5225_v46, %v5221_v32 }
0x2401   :  { %5663 = vmatpush.msra.mxu3 %v7631_v11  ;;  %v5227_v49 = vmul.f32 %v9682_v40, %v5226_v21  ;;  %vm5488_vm7 = vcmp.eq.f32.partialorder %v5487_v16, 8.507059e+37  ;;  %v7643_v40 = vld [vmem:[%s8417_s27] sm:$0xff]  ;;  %s6672_s27 = sld [smem:[%s10179_s0 + %s7695_s21]]  }
0x2402   :  { %5568 = vmatpush.msrb.mxu2 %v7195_v25  ;;  %v5491_v36 = vsel %vm5488_vm7, %v5490_v12, %v5486_v6  ;;  %v7519_v34 = vpop.eup %7518 }
0x2403   :  { %6098 = vmatpush.msrb.mxu3 %v7632_v63  ;;  %v5492_v25 = vmul.f32 %v9700_v60, %v5491_v36  ;;  %v5244_v11 = vmul.f32 %v7519_v34, %v5182_v52  ;;  %vm5249_vm5 = vweird.f32 %v7519_v34 }
0x2404   :  { %5569 = vmatpush.msrb.mxu2 %v7196_v4  ;;  %vm9861_vm10 = vmor %vm5248_vm15, %vm5249_vm5 }
0x2405   :  { %6099 = vmatpush.msrb.mxu3 %v7633_v19  ;;  %6996 = vmatmul.msk.f32.vlgmr.msrb.gmra.mxu2 %vm1182_vm9, %v5462_v23  ;;  %v5245_v63 = vsub.f32 1.0, %v5244_v11 }
0x2406   :  { %5885 = vmatpush.msra.mxu2 %v7634_v30 }
0x2407   :  { %v5246_v33 = vmul.f32 %v7519_v34, %v5245_v63 }
0x2408   :  { %6981 = vmatmul.msk.f32.gmra.mxu3 %vm1182_vm9, %v5212_v15  ;;  %5886 = vmatpush.msra.mxu2 %v7635_v55 }
0x2409   :  { %v5247_v15 = vadd.f32 %v7519_v34, %v5246_v33 }
0x240a   :  { %5887 = vmatpush.msra.mxu2 %v7636_v17  ;;  %v5252_v17 = vand.u32 2147483647, %v5182_v52 }
0x240c   :  { %5888 = vmatpush.msra.mxu2 %v7637_v5 }
0x240d   :  { %6997 = vmatmul.msk.f32.gmra.mxu2 %vm1182_vm9, %v5477_v48 }
0x240e   :  { %5889 = vmatpush.msra.mxu2 %v7638_v57  ;;  %v5255_v57 = vor.u32 1.1754944e-38, %v5254_v35 }
0x2410   :  { %6982 = vmatmul.msk.f32.gmra.mxu3 %vm1182_vm9, %v5227_v49  ;;  %5890 = vmatpush.msra.mxu2 %v7639_v53  ;;  %v5251_v49 = vsel %vm9861_vm10, %v7519_v34, %v5247_v15 }
0x2412   :  { %5891 = vmatpush.msra.mxu2 %v7640_v39 }
0x2414   :  { %5892 = vmatpush.msra.mxu2 %v7641_v8 }
0x2415   :  { %6998 = vmatmul.msk.f32.gmra.mxu2 %vm1182_vm9, %v5492_v25 }
0x2416   :  { %6185 = vmatpush.msrb.mxu2 %v7642_v13 }
0x2418   :  { %6186 = vmatpush.msrb.mxu2 %v7643_v40 }
0x2425   :  { %v5179_v2 = vpop.xlane.xlu0 %5178 }
0x2426   :  { %7520 = vrcp.f32 %v5179_v2  ;;  %v5239_v44 = vand.u32 2147483648, %v5179_v2  ;;  %v5237_v9 = vand.u32 2147483647, %v5179_v2  ;;  %vm5233_vm6 = vweird.f32 %v5179_v2 }
0x2428   :  { %v5240_v30 = vor.u32 1.1754944e-38, %v5239_v44  ;;  %vm5238_vm13 = vcmp.eq.f32.partialorder %v5237_v9, 8.507059e+37 }
0x242a   :  { %v5444_v29 = vpop.xlane.xlu1 %5443 }
0x242b   :  { %7522 = vrcp.f32 %v5444_v29  ;;  %v5504_v14 = vand.u32 2147483648, %v5444_v29  ;;  %v5502_v56 = vand.u32 2147483647, %v5444_v29  ;;  %vm5498_vm3 = vweird.f32 %v5444_v29 }
0x242c   :  { %v7521_v4 = vpop.eup %7520 }
0x242d   :  { %v5229_v23 = vmul.f32 %v7521_v4, %v5179_v2  ;;  %v5447_v60 = vpop.xlane.xlu0 %5446  ;;  %vm5234_vm4 = vweird.f32 %v7521_v4  ;;  %v5505_v6 = vor.u32 1.1754944e-38, %v5504_v14  ;;  %vm5503_vm7 = vcmp.eq.f32.partialorder %v5502_v56, 8.507059e+37 }
0x242e   :  { %7524 = vrcp.f32 %v5447_v60  ;;  %vm5235_vm11 = vmor %vm5233_vm6, %vm5234_vm4  ;;  %vm5253_vm6 = vcmp.eq.f32.partialorder %v5252_v17, 8.507059e+37  ;;  %v5519_v53 = vand.u32 2147483648, %v5447_v60  ;;  %vm5513_vm5 = vweird.f32 %v5447_v60 }
0x242f   :  { %v5230_v26 = vsub.f32 1.0, %v5229_v23  ;;  %v5517_v25 = vand.u32 2147483647, %v5447_v60  ;;  %v5256_v13 = vsel %vm5253_vm6, %v5255_v57, %v5251_v49 }
0x2430   :  { %v5520_v52 = vor.u32 1.1754944e-38, %v5519_v53  ;;  %v5257_v34 = vmul.f32 %v9704_v1, %v5256_v13 }
0x2431   :  { %v7523_v38 = vpop.eup %7522  ;;  %v5231_v19 = vmul.f32 %v7521_v4, %v5230_v26 }
0x2432   :  { %v5494_v18 = vmul.f32 %v7523_v38, %v5444_v29  ;;  %vm5499_vm14 = vweird.f32 %v7523_v38 }
0x2433   :  { %v5232_v7 = vadd.f32 %v7521_v4, %v5231_v19  ;;  %vm5500_vm2 = vmor %vm5498_vm3, %vm5499_vm14 }
0x2434   :  { %v7525_v43 = vpop.eup %7524  ;;  %v5495_v58 = vsub.f32 1.0, %v5494_v18  ;;  %v7644_v18 = vld [vmem:[%s8284_s18] ss:$0 sm:$0xff]  ;;  %s7693_s18 = smov 32  }
0x2435   :  { %v5509_v32 = vmul.f32 %v7525_v43, %v5447_v60  ;;  %v5236_v55 = vsel %vm5235_vm11, %v7521_v4, %v5232_v7  ;;  %vm5514_vm4 = vweird.f32 %v7525_v43 }
0x2436   :  { %v5496_v46 = vmul.f32 %v7523_v38, %v5495_v58  ;;  %v5241_v41 = vsel %vm5238_vm13, %v5240_v30, %v5236_v55  ;;  %vm5515_vm11 = vmor %vm5513_vm5, %vm5514_vm4  ;;  %vm5518_vm13 = vcmp.eq.f32.partialorder %v5517_v25, 8.507059e+37 }
0x2437   :  { %v5510_v16 = vsub.f32 1.0, %v5509_v32  ;;  %v5242_v48 = vmul.f32 %v9721_v54, %v5241_v41 }
0x2438   :  { %v5497_v5 = vadd.f32 %v7523_v38, %v5496_v46 }
0x2439   :  { %v5511_v12 = vmul.f32 %v7525_v43, %v5510_v16  ;;  %6983 = vmatmul.msk.f32.gmra.mxu3 %vm1182_vm9, %v5242_v48 }
0x243a   :  { %v5501_v36 = vsel %vm5500_vm2, %v7523_v38, %v5497_v5 }
0x243b   :  { %v5512_v54 = vadd.f32 %v7525_v43, %v5511_v12  ;;  %v5506_v39 = vsel %vm5503_vm7, %v5505_v6, %v5501_v36 }
0x243c   :  { %v5507_v8 = vmul.f32 %v9725_v59, %v5506_v39 }
0x243d   :  { %v5516_v40 = vsel %vm5515_vm11, %v7525_v43, %v5512_v54 }
0x243e   :  { %6999 = vmatmul.msk.f32.gmra.mxu2 %vm1182_vm9, %v5507_v8  ;;  %v5521_v2 = vsel %vm5518_vm13, %v5520_v52, %v5516_v40 }
0x243f   :  { %v5522_v11 = vmul.f32 %v9727_v50, %v5521_v2 }
0x2441   :  { %6984 = vmatmul.msk.f32.gmra.mxu3 %vm1182_vm9, %v5257_v34 }
0x2446   :  { %7000 = vmatmul.msk.f32.gmra.mxu2 %vm1182_vm9, %v5522_v11 }
0x2483   :  { %v5306_v29 = vpop.f32.mrf.mxu3 }
0x2484   :  { %7006 = vmatmul.msk.f32.vlgmr.msra.gmra.mxu3 %vm304_vm1, %v5306_v29 }
0x2488   :  { %v5571_v59 = vpop.f32.mrf.mxu2 }
0x2489   :  { %7001 = vmatmul.msk.f32.vlgmr.msrb.gmra.mxu1 %vm304_vm1, %v5571_v59 }
0x248b   :  { %v5309_v4 = vpop.f32.mrf.mxu3 }
0x248c   :  { %7007 = vmatmul.msk.f32.gmra.mxu3 %vm304_vm1, %v5309_v4 }
0x2490   :  { %v5574_v63 = vpop.f32.mrf.mxu2 }
0x2491   :  { %7002 = vmatmul.msk.f32.gmra.mxu1 %vm304_vm1, %v5574_v63 }
0x2493   :  { %v5312_v1 = vpop.f32.mrf.mxu3 }
0x2494   :  { %7008 = vmatmul.msk.f32.gmra.mxu3 %vm304_vm1, %v5312_v1 }
0x2498   :  { %v5577_v23 = vpop.f32.mrf.mxu2 }
0x2499   :  { %7003 = vmatmul.msk.f32.gmra.mxu1 %vm304_vm1, %v5577_v23 }
0x24bc   :  { %v5315_v50 = vpop.f32.mrf.mxu3 }
0x24bd   :  { %7009 = vmatmul.msk.f32.gmra.mxu3 %vm304_vm1, %v5315_v50 }
0x24c1   :  { %v5580_v60 = vpop.f32.mrf.mxu2 }
0x24c2   :  { %7004 = vmatmul.msk.f32.gmra.mxu1 %vm304_vm1, %v5580_v60 }
0x24c4   :  { %v5318_v26 = vpop.f32.mrf.mxu3 }
0x24c5   :  { %7010 = vmatmul.msk.f32.gmra.mxu3 %vm304_vm1, %v5318_v26 }
0x24c9   :  { %v5583_v33 = vpop.f32.mrf.mxu2 }
0x24ca   :  { %7005 = vmatmul.msk.f32.gmra.mxu1 %vm304_vm1, %v5583_v33 }
0x2506   :  { %v5618_v44 = vpop.f32.mrf.mxu1 }
0x2507   :  { %v5665_v38 = vpop.f32.mrf.mxu3 }
0x2508   :  { %v5666_v19 = vadd.f32 %v5665_v38, %v5618_v44 }
0x250a   :  { %v5680_v9 = vadd.f32 %v5666_v19, %v9555_v37 }
0x250c   :  { %v5685_v35 = vadd.f32 %v7644_v18, %v5680_v9 }
0x250e   :  { %v5621_v7 = vpop.f32.mrf.mxu1  ;;  %v5690_v43 = vsel %vm222_vm0, %v5685_v35, 0.0 }
0x250f   :  { %v5668_v15 = vpop.f32.mrf.mxu3  ;;  %5691 = vadd.xlane.f32.xlu2 %v5690_v43 }
0x2510   :  { %v5669_v30 = vadd.f32 %v5668_v15, %v5621_v7 }
0x2512   :  { %v5681_v58 = vadd.f32 %v5669_v30, %v9566_v42 }
0x2514   :  { %v5686_v14 = vadd.f32 %v7644_v18, %v5681_v58 }
0x2516   :  { %v5624_v32 = vpop.f32.mrf.mxu1  ;;  %v5693_v55 = vsel %vm222_vm0, %v5686_v14, 0.0 }
0x2517   :  { %v5671_v46 = vpop.f32.mrf.mxu3  ;;  %5694 = vadd.xlane.f32.xlu1 %v5693_v55 }
0x2518   :  { %v5672_v56 = vadd.f32 %v5671_v46, %v5624_v32 }
0x251a   :  { %v5682_v41 = vadd.f32 %v5672_v56, %v9575_v51 }
0x251c   :  { %v5687_v37 = vadd.f32 %v7644_v18, %v5682_v41 }
0x251e   :  { %v5696_v17 = vsel %vm222_vm0, %v5687_v37, 0.0 }
0x251f   :  { %5697 = vadd.xlane.f32.xlu0 %v5696_v17 }
0x253f   :  { %v5627_v16 = vpop.f32.mrf.mxu1 }
0x2540   :  { %v5674_v48 = vpop.f32.mrf.mxu3 }
0x2541   :  { %v5675_v21 = vadd.f32 %v5674_v48, %v5627_v16 }
0x2543   :  { %v5683_v5 = vadd.f32 %v5675_v21, %v9584_v28 }
0x2545   :  { %v5688_v6 = vadd.f32 %v7644_v18, %v5683_v5 }
0x2547   :  { %v5630_v42 = vpop.f32.mrf.mxu1  ;;  %v5699_v12 = vsel %vm222_vm0, %v5688_v6, 0.0 }
0x2548   :  { %v5677_v49 = vpop.f32.mrf.mxu3  ;;  %5700 = vadd.xlane.f32.xlu2 %v5699_v12 }
0x2549   :  { %v5678_v57 = vadd.f32 %v5677_v49, %v5630_v42  ;;  %v7645_v42 = vld [vmem:[%s8307_s26] ss:$0 sm:$0xff] }
0x254b   :  { %v5684_v36 = vadd.f32 %v5678_v57, %v9593_v61 }
0x254d   :  { %v5689_v54 = vadd.f32 %v7644_v18, %v5684_v36  ;;  %v7646_v36 = vld [vmem:[%s8326_s3] ss:$0 sm:$0xff] }
0x254f   :  { %v5702_v51 = vsel %vm895_vm12, %v5689_v54, 0.0 }
0x2550   :  { %5703 = vadd.xlane.f32.xlu1 %v5702_v51 }
0x2582   :  { %v5692_v53 = vpop.xlane.xlu2 %5691 }
0x2583   :  { %v5705_v39 = vmul.f32 %v5692_v53, %v7904_v3 }
0x2585   :  { %v5710_v25 = vsub.f32 %v5685_v35, %v5705_v39 }
0x2587   :  { %v5715_v8 = vmul.f32 %v5710_v25, %v5710_v25 }
0x2589   :  { %v5720_v28 = vsel %vm222_vm0, %v5715_v8, 0.0 }
0x258a   :  { %v5695_v13 = vpop.xlane.xlu1 %5694  ;;  %5721 = vadd.xlane.f32.xlu0 %v5720_v28 }
0x258b   :  { %v5706_v40 = vmul.f32 %v5695_v13, %v7904_v3 }
0x258d   :  { %v9898_v52 = vsub.f32 %v5686_v14, %v5706_v40 }
0x258f   :  { %v5716_v61 = vmul.f32 %v9898_v52, %v9898_v52 }
0x2591   :  { %v5723_v34 = vsel %vm222_vm0, %v5716_v61, 0.0 }
0x2592   :  { %v5698_v2 = vpop.xlane.xlu0 %5697  ;;  %5724 = vadd.xlane.f32.xlu2 %v5723_v34 }
0x2593   :  { %v5707_v11 = vmul.f32 %v5698_v2, %v7904_v3 }
0x2595   :  { %v9904_v29 = vsub.f32 %v5687_v37, %v5707_v11 }
0x2597   :  { %v5717_v59 = vmul.f32 %v9904_v29, %v9904_v29 }
0x2599   :  { %v5726_v4 = vsel %vm222_vm0, %v5717_v59, 0.0 }
0x259a   :  { %5727 = vadd.xlane.f32.xlu1 %v5726_v4 }
0x25bb   :  { %v5701_v63 = vpop.xlane.xlu2 %5700 }
0x25bc   :  { %v5708_v1 = vmul.f32 %v5701_v63, %v7904_v3 }
0x25be   :  { %v9910_v23 = vsub.f32 %v5688_v6, %v5708_v1 }
0x25c0   :  { %v5718_v50 = vmul.f32 %v9910_v23, %v9910_v23 }
0x25c2   :  { %v5729_v60 = vsel %vm222_vm0, %v5718_v50, 0.0 }
0x25c3   :  { %v5704_v26 = vpop.xlane.xlu1 %5703  ;;  %5730 = vadd.xlane.f32.xlu0 %v5729_v60 }
0x25c4   :  { %v5709_v33 = vmul.f32 %v5704_v26, %v7904_v3 }
0x25c6   :  { %v9916_v44 = vsub.f32 %v5689_v54, %v5709_v33 }
0x25c8   :  { %v5719_v38 = vmul.f32 %v9916_v44, %v9916_v44 }
0x25ca   :  { %v5732_v19 = vsel %vm895_vm12, %v5719_v38, 0.0 }
0x25cb   :  { %5733 = vadd.xlane.f32.xlu2 %v5732_v19 }
0x25fd   :  { %v5722_v9 = vpop.xlane.xlu0 %5721 }
0x25fe   :  { %v5735_v18 = vmul.f32 %v5722_v9, %v7904_v3 }
0x2600   :  { %v5740_v35 = vadd.f32 1e-05, %v5735_v18 }
0x2602   :  { %7526 = vrsqrt.f32 %v5740_v35  ;;  %vm5751_vm14 = vweird.f32 %v5740_v35 }
0x2605   :  { %v5725_v7 = vpop.xlane.xlu2 %5724 }
0x2606   :  { %v5736_v43 = vmul.f32 %v5725_v7, %v7904_v3 }
0x2608   :  { %v7527_v15 = vpop.eup %7526  ;;  %v5741_v30 = vadd.f32 1e-05, %v5736_v43 }
0x2609   :  { %v5746_v58 = vmul.f32 %v7527_v15, %v5740_v35  ;;  %vm5752_vm1 = vweird.f32 %v7527_v15 }
0x260a   :  { %7528 = vrsqrt.f32 %v5741_v30  ;;  %vm5753_vm15 = vmor %vm5751_vm14, %vm5752_vm1  ;;  %vm5761_vm3 = vweird.f32 %v5741_v30 }
0x260b   :  { %v5747_v14 = vmul.f32 %v7527_v15, %v5746_v58 }
0x260d   :  { %v5748_v32 = vmul.f32 0.5, %v5747_v14  ;;  %v5728_v55 = vpop.xlane.xlu1 %5727 }
0x260e   :  { %v5737_v46 = vmul.f32 %v5728_v55, %v7904_v3 }
0x260f   :  { %v5749_v56 = vsub.f32 1.5, %v5748_v32 }
0x2610   :  { %v7529_v41 = vpop.eup %7528  ;;  %v5742_v37 = vadd.f32 1e-05, %v5737_v46 }
0x2611   :  { %v5750_v17 = vmul.f32 %v7527_v15, %v5749_v56  ;;  %v5756_v16 = vmul.f32 %v7529_v41, %v5741_v30  ;;  %vm5762_vm10 = vweird.f32 %v7529_v41 }
0x2612   :  { %7530 = vrsqrt.f32 %v5742_v37  ;;  %vm5763_vm2 = vmor %vm5761_vm3, %vm5762_vm10  ;;  %vm5771_vm4 = vweird.f32 %v5742_v37  ;;  %vm10304_vm10 = vcmask 523264  }
0x2613   :  { %v5754_v48 = vsel %vm5753_vm15, %v7527_v15, %v5750_v17  ;;  %v5757_v21 = vmul.f32 %v7529_v41, %v5756_v16  ;;  %vm10305_vm3 = vmmov %vm10304_vm10 }
0x2614   :  { %v5795_v5 = vmul.f32 %v5754_v48, %v5710_v25 }
0x2615   :  { %v5758_v6 = vmul.f32 0.5, %v5757_v21 }
0x2616   :  { %v5800_v12 = vmul.f32 %v7645_v42, %v5795_v5 }
0x2617   :  { %v5759_v49 = vsub.f32 1.5, %v5758_v6 }
0x2618   :  { %v7531_v57 = vpop.eup %7530  ;;  %v9926_v54 = vadd.f32 %v7646_v36, %v5800_v12 }
0x2619   :  { %v5760_v51 = vmul.f32 %v7529_v41, %v5759_v49  ;;  %v5766_v53 = vmul.f32 %v7531_v57, %v5742_v37  ;;  %vm5772_vm7 = vweird.f32 %v7531_v57 }
0x261a   :  { %7011 = vmatmul.msk.f32.vlgmr.msrb.gmra.mxu0 %vm222_vm0, %v9926_v54  ;;  %vm5773_vm6 = vmor %vm5771_vm4, %vm5772_vm7 }
0x261b   :  { %v5764_v39 = vsel %vm5763_vm2, %v7529_v41, %v5760_v51  ;;  %v5767_v8 = vmul.f32 %v7531_v57, %v5766_v53  ;;  %vm10306_vm2 = vmmov %vm10305_vm3 }
0x261c   :  { %v5796_v25 = vmul.f32 %v5764_v39, %v9898_v52  ;;  %vm10307_vm7 = vmmov %vm10306_vm2 }
0x261d   :  { %v5768_v28 = vmul.f32 0.5, %v5767_v8  ;;  %vm10308_vm4 = vmmov %vm10306_vm2 }
0x261e   :  { %v5801_v13 = vmul.f32 %v7645_v42, %v5796_v25 }
0x261f   :  { %v5769_v40 = vsub.f32 1.5, %v5768_v28 }
0x2620   :  { %v9931_v61 = vadd.f32 %v7646_v36, %v5801_v13 }
0x2621   :  { %v5770_v34 = vmul.f32 %v7531_v57, %v5769_v40  ;;  %v7648_v40 = vld [vmem:[%s8412_s15] ss:$0 sm:$0xff] }
0x2622   :  { %7012 = vmatmul.msk.f32.gmra.mxu0 %vm222_vm0, %v9931_v61 }
0x2623   :  { %v5774_v2 = vsel %vm5773_vm6, %v7531_v57, %v5770_v34 }
0x2624   :  { %v5797_v11 = vmul.f32 %v5774_v2, %v9904_v29 }
0x2626   :  { %v5802_v59 = vmul.f32 %v7645_v42, %v5797_v11 }
0x2628   :  { %v9936_v4 = vadd.f32 %v7646_v36, %v5802_v59 }
0x262a   :  { %7013 = vmatmul.msk.f32.gmra.mxu0 %vm222_vm0, %v9936_v4 }
0x2636   :  { %v5731_v52 = vpop.xlane.xlu0 %5730 }
0x2637   :  { %v5738_v63 = vmul.f32 %v5731_v52, %v7904_v3 }
0x2639   :  { %v5743_v1 = vadd.f32 1e-05, %v5738_v63 }
0x263b   :  { %7532 = vrsqrt.f32 %v5743_v1  ;;  %vm5781_vm11 = vweird.f32 %v5743_v1 }
0x263e   :  { %v5734_v50 = vpop.xlane.xlu2 %5733 }
0x263f   :  { %v5739_v60 = vmul.f32 %v5734_v50, %v7904_v3 }
0x2641   :  { %v7533_v26 = vpop.eup %7532  ;;  %v5744_v33 = vadd.f32 1e-05, %v5739_v60 }
0x2642   :  { %v5776_v38 = vmul.f32 %v7533_v26, %v5743_v1  ;;  %vm5782_vm5 = vweird.f32 %v7533_v26 }
0x2643   :  { %7534 = vrsqrt.f32 %v5744_v33  ;;  %vm5783_vm13 = vmor %vm5781_vm11, %vm5782_vm5  ;;  %vm5791_vm14 = vweird.f32 %v5744_v33 }
0x2644   :  { %v5777_v19 = vmul.f32 %v7533_v26, %v5776_v38 }
0x2646   :  { %v5778_v29 = vmul.f32 0.5, %v5777_v19 }
0x2648   :  { %v5779_v9 = vsub.f32 1.5, %v5778_v29 }
0x2649   :  { %v7535_v18 = vpop.eup %7534 }
0x264a   :  { %v5780_v35 = vmul.f32 %v7533_v26, %v5779_v9  ;;  %v5786_v7 = vmul.f32 %v7535_v18, %v5744_v33  ;;  %vm5792_vm1 = vweird.f32 %v7535_v18 }
0x264b   :  { %vm5793_vm15 = vmor %vm5791_vm14, %vm5792_vm1 }
0x264c   :  { %v5784_v43 = vsel %vm5783_vm13, %v7533_v26, %v5780_v35  ;;  %v5787_v15 = vmul.f32 %v7535_v18, %v5786_v7 }
0x264d   :  { %v5798_v30 = vmul.f32 %v5784_v43, %v9910_v23  ;;  %v7647_v23 = vld [vmem:[%s8348_s12] ss:$0 sm:$0xff]  ;;  %s6671_s12 = sld [smem:[%s10179_s0 + %s7693_s18]]  }
0x264e   :  { %v5788_v58 = vmul.f32 0.5, %v5787_v15 }
0x264f   :  { %v5803_v14 = vmul.f32 %v7645_v42, %v5798_v30 }
0x2650   :  { %v5789_v32 = vsub.f32 1.5, %v5788_v58 }
0x2651   :  { %v5808_v55 = vadd.f32 %v7646_v36, %v5803_v14 }
0x2652   :  { %v5790_v46 = vmul.f32 %v7535_v18, %v5789_v32 }
0x2653   :  { %7014 = vmatmul.msk.f32.gmra.mxu0 %vm222_vm0, %v5808_v55 }
0x2654   :  { %v5794_v56 = vsel %vm5793_vm15, %v7535_v18, %v5790_v46 }
0x2655   :  { %v5799_v41 = vmul.f32 %v5794_v56, %v9916_v44 }
0x2657   :  { %v5804_v37 = vmul.f32 %v7645_v42, %v5799_v41 }
0x2659   :  { %v5809_v17 = vadd.f32 %v7646_v36, %v5804_v37 }
0x265b   :  { %7015 = vmatmul.msk.f32.gmra.mxu0 %vm222_vm0, %v5809_v17 }
0x2697   :  { %v5842_v16 = vpop.f32.mrf.mxu0 }
0x2698   :  { %v5843_v48 = vadd.f32 %v7647_v23, %v5842_v16 }
0x269a   :  { %v5857_v21 = vmax.f32 %v5843_v48, 0.0 }
0x269c   :  { %7016 = vmatmul.msk.f32.vlgmr.msra.gmra.mxu2 %vm10304_vm10, %v5857_v21 }
0x269f   :  { %v5845_v5 = vpop.f32.mrf.mxu0 }
0x26a0   :  { %v5846_v6 = vadd.f32 %v7647_v23, %v5845_v5 }
0x26a2   :  { %v5858_v12 = vmax.f32 %v5846_v6, 0.0 }
0x26a4   :  { %7017 = vmatmul.msk.f32.gmra.mxu2 %vm10305_vm3, %v5858_v12 }
0x26a7   :  { %v5848_v49 = vpop.f32.mrf.mxu0 }
0x26a8   :  { %v5849_v57 = vadd.f32 %v7647_v23, %v5848_v49 }
0x26aa   :  { %v5859_v51 = vmax.f32 %v5849_v57, 0.0 }
0x26ac   :  { %7018 = vmatmul.msk.f32.gmra.mxu2 %vm10306_vm2, %v5859_v51 }
0x26d0   :  { %v5851_v44 = vpop.f32.mrf.mxu0 }
0x26d1   :  { %v5852_v42 = vadd.f32 %v7647_v23, %v5851_v44 }
0x26d3   :  { %v5860_v36 = vmax.f32 %v5852_v42, 0.0 }
0x26d5   :  { %7019 = vmatmul.msk.f32.gmra.mxu2 %vm10307_vm7, %v5860_v36 }
0x26d8   :  { %v5854_v53 = vpop.f32.mrf.mxu0 }
0x26d9   :  { %v5855_v39 = vadd.f32 %v7647_v23, %v5854_v53 }
0x26db   :  { %v5861_v8 = vmax.f32 %v5855_v39, 0.0 }
0x26dd   :  { %7020 = vmatmul.msk.f32.gmra.mxu2 %vm10308_vm4, %v5861_v8 }
0x271f   :  { %v5894_v25 = vpop.f32.mrf.mxu2 }
0x2720   :  { %v5895_v1 = vadd.f32 %v7648_v40, %v5894_v25 }
0x2722   :  { %v5909_v26 = vadd.f32 %v5895_v1, %v9926_v54 }
0x2724   :  { %v5914_v29 = vsel %vm222_vm0, %v5909_v26, 0.0 }
0x2727   :  { %v5897_v28 = vpop.f32.mrf.mxu2 }
0x2728   :  { %v5898_v19 = vadd.f32 %v7648_v40, %v5897_v28 }
0x272a   :  { %v5910_v9 = vadd.f32 %v5898_v19, %v9931_v61 }
0x272c   :  { %v5917_v18 = vsel %vm222_vm0, %v5910_v9, 0.0 }
0x272f   :  { %v5900_v13 = vpop.f32.mrf.mxu2 }
0x2730   :  { %v5901_v34 = vadd.f32 %v7648_v40, %v5900_v13 }
0x2732   :  { %v5911_v2 = vadd.f32 %v5901_v34, %v9936_v4 }
0x2734   :  { %v5920_v11 = vsel %vm222_vm0, %v5911_v2, 0.0 }
0x2735   :  { %5921 = vadd.xlane.f32.xlu2 %v5920_v11 }
0x2758   :  { %v5903_v59 = vpop.f32.mrf.mxu2 }
0x2759   :  { %v5904_v52 = vadd.f32 %v7648_v40, %v5903_v59 }
0x275b   :  { %v5912_v63 = vadd.f32 %v5904_v52, %v5808_v55 }
0x275d   :  { %v5923_v50 = vsel %vm222_vm0, %v5912_v63, 0.0 }
0x275e   :  { %5924 = vadd.xlane.f32.xlu0 %v5923_v50 }
0x2760   :  { %v5906_v60 = vpop.f32.mrf.mxu2 }
0x2761   :  { %v5907_v33 = vadd.f32 %v7648_v40, %v5906_v60 }
0x2763   :  { %v5913_v38 = vadd.f32 %v5907_v33, %v5809_v17 }
0x2765   :  { %v5926_v4 = vsel %vm895_vm12, %v5913_v38, 0.0 }
0x2766   :  { %5915 = vadd.xlane.f32.xlu0 %v5914_v29  ;;  %5927 = vadd.xlane.f32.xlu1 %v5926_v4 }
0x276e   :  { %5918 = vadd.xlane.f32.xlu1 %v5917_v18 }
0x27a8   :  { %v5922_v35 = vpop.xlane.xlu2 %5921 }
0x27a9   :  { %v5931_v7 = vmul.f32 %v5922_v35, %v7904_v3 }
0x27ab   :  { %v9962_v43 = vsub.f32 %v5911_v2, %v5931_v7 }
0x27ad   :  { %v5941_v54 = vmul.f32 %v9962_v43, %v9962_v43 }
0x27af   :  { %v5950_v15 = vsel %vm222_vm0, %v5941_v54, 0.0 }
0x27b0   :  { %5951 = vadd.xlane.f32.xlu0 %v5950_v15 }
0x27d1   :  { %v5925_v30 = vpop.xlane.xlu0 %5924 }
0x27d2   :  { %v5932_v58 = vmul.f32 %v5925_v30, %v7904_v3 }
0x27d4   :  { %v9968_v14 = vsub.f32 %v5912_v63, %v5932_v58 }
0x27d6   :  { %v5942_v61 = vmul.f32 %v9968_v14, %v9968_v14 }
0x27d8   :  { %v5953_v32 = vsel %vm222_vm0, %v5942_v61, 0.0 }
0x27d9   :  { %v5916_v55 = vpop.xlane.xlu0 %5915  ;;  %5954 = vadd.xlane.f32.xlu1 %v5953_v32  ;;  %v5928_v46 = vpop.xlane.xlu1 %5927 }
0x27da   :  { %v5929_v56 = vmul.f32 %v5916_v55, %v7904_v3  ;;  %v5933_v41 = vmul.f32 %v5928_v46, %v7904_v3 }
0x27dc   :  { %v9975_v37 = vsub.f32 %v5909_v26, %v5929_v56  ;;  %v9977_v17 = vsub.f32 %v5913_v38, %v5933_v41 }
0x27de   :  { %v5939_v16 = vmul.f32 %v9975_v37, %v9975_v37  ;;  %v5943_v23 = vmul.f32 %v9977_v17, %v9977_v17 }
0x27e0   :  { %v5944_v48 = vsel %vm222_vm0, %v5939_v16, 0.0  ;;  %v5956_v21 = vsel %vm895_vm12, %v5943_v23, 0.0 }
0x27e1   :  { %5945 = vadd.xlane.f32.xlu1 %v5944_v48  ;;  %5957 = vadd.xlane.f32.xlu2 %v5956_v21  ;;  %v5919_v5 = vpop.xlane.xlu1 %5918 }
0x27e2   :  { %v5930_v6 = vmul.f32 %v5919_v5, %v7904_v3 }
0x27e4   :  { %v9986_v12 = vsub.f32 %v5910_v9, %v5930_v6 }
0x27e6   :  { %v5940_v49 = vmul.f32 %v9986_v12, %v9986_v12 }
0x27e8   :  { %v5947_v57 = vsel %vm222_vm0, %v5940_v49, 0.0 }
0x27e9   :  { %5948 = vadd.xlane.f32.xlu2 %v5947_v57 }
0x2823   :  { %v5952_v51 = vpop.xlane.xlu0 %5951 }
0x2824   :  { %v5961_v44 = vmul.f32 %v5952_v51, %v7904_v3  ;;  %v7649_v51 = vld [vmem:[%s8448_s9] ss:$0 sm:$0xff] }
0x2826   :  { %v5966_v42 = vadd.f32 1e-05, %v5961_v44 }
0x2828   :  { %7536 = vrsqrt.f32 %v5966_v42  ;;  %vm5995_vm13 = vweird.f32 %v5966_v42 }
0x282e   :  { %v7537_v8 = vpop.eup %7536 }
0x282f   :  { %v5990_v13 = vmul.f32 %v7537_v8, %v5966_v42  ;;  %vm5996_vm5 = vweird.f32 %v7537_v8 }
0x2830   :  { %vm5997_vm14 = vmor %vm5995_vm13, %vm5996_vm5 }
0x2831   :  { %v5991_v63 = vmul.f32 %v7537_v8, %v5990_v13 }
0x2833   :  { %v5992_v26 = vmul.f32 0.5, %v5991_v63  ;;  %v7652_v63 = vld [vmem:[%s8495_s16 + $0x8] sm:$0xff] }
0x2835   :  { %v5993_v18 = vsub.f32 1.5, %v5992_v26 }
0x2837   :  { %v5994_v58 = vmul.f32 %v7537_v8, %v5993_v18 }
0x2839   :  { %v5998_v41 = vsel %vm5997_vm14, %v7537_v8, %v5994_v58 }
0x283a   :  { %v6021_v57 = vmul.f32 %v5998_v41, %v9962_v43 }
0x284c   :  { %v5955_v36 = vpop.xlane.xlu1 %5954 }
0x284d   :  { %v5962_v53 = vmul.f32 %v5955_v36, %v7904_v3 }
0x284f   :  { %v5967_v39 = vadd.f32 1e-05, %v5962_v53 }
0x2851   :  { %7538 = vrsqrt.f32 %v5967_v39  ;;  %vm6005_vm6 = vweird.f32 %v5967_v39 }
0x2854   :  { %v5946_v25 = vpop.xlane.xlu1 %5945  ;;  %v5958_v28 = vpop.xlane.xlu2 %5957 }
0x2855   :  { %v5959_v40 = vmul.f32 %v5946_v25, %v7904_v3  ;;  %v5963_v34 = vmul.f32 %v5958_v28, %v7904_v3  ;;  %v6026_v25 = vmul.f32 %v7649_v51, %v6021_v57  ;;  %v185_v57 = vld [vmem:[%s6670_s17 + $0x10] sm:$0xff] }
0x2857   :  { %v7539_v2 = vpop.eup %7538  ;;  %v5964_v11 = vadd.f32 1e-05, %v5959_v40  ;;  %v5968_v59 = vadd.f32 1e-05, %v5963_v34 }
0x2858   :  { %v6000_v52 = vmul.f32 %v7539_v2, %v5967_v39  ;;  %vm6006_vm12 = vweird.f32 %v7539_v2  ;;  %v7650_v39 = vld [vmem:[%s8453_s14] ss:$0 sm:$0xff] }
0x2859   :  { %7540 = vrsqrt.f32 %v5964_v11  ;;  %vm6007_vm11 = vmor %vm6005_vm6, %vm6006_vm12  ;;  %vm6015_vm15 = vweird.f32 %v5968_v59  ;;  %vm5975_vm2 = vweird.f32 %v5964_v11  ;;  %v10010_v40 = vadd.f32 %v7650_v39, %v6026_v25 }
0x285a   :  { %v6001_v1 = vmul.f32 %v7539_v2, %v6000_v52  ;;  %7542 = vrsqrt.f32 %v5968_v59  ;;  %v178_v52 = vld [vmem:[%s10015_s24 + $0x10] sm:$0xff] }
0x285c   :  { %v6002_v50 = vmul.f32 0.5, %v6001_v1  ;;  %v5949_v60 = vpop.xlane.xlu2 %5948  ;;  %v7653_v1 = vld [vmem:[%s8495_s16 + $0x10] sm:$0xff] }
0x285d   :  { %v5960_v33 = vmul.f32 %v5949_v60, %v7904_v3  ;;  %v10035_v60 = vld [vmem:[%s8495_s16 + $0x20] sm:$0x3] }
0x285e   :  { %v6003_v38 = vsub.f32 1.5, %v6002_v50  ;;  %v7654_v50 = vld [vmem:[%s8495_s16 + $0x18] sm:$0xff] }
0x285f   :  { %v7541_v19 = vpop.eup %7540  ;;  %v5965_v29 = vadd.f32 1e-05, %v5960_v33  ;;  %v10051_v33 = vld [vmem:[%s10015_s24 + $0x8] sm:$0xff] }
0x2860   :  { %v7543_v4 = vpop.eup %7542  ;;  %v5970_v9 = vmul.f32 %v7541_v19, %v5964_v11  ;;  %v6004_v7 = vmul.f32 %v7539_v2, %v6003_v38  ;;  %vm5976_vm10 = vweird.f32 %v7541_v19  ;;  %v7651_v11 = vld [vmem:[%s8495_s16] sm:$0xff]  ;;  %6284 = vmatpush.msra.mxu3 %v10051_v33 }
0x2861   :  { %v6010_v35 = vmul.f32 %v7543_v4, %v5968_v59  ;;  %7544 = vrsqrt.f32 %v5965_v29  ;;  %vm6016_vm1 = vweird.f32 %v7543_v4  ;;  %vm5977_vm7 = vmor %vm5975_vm2, %vm5976_vm10  ;;  %vm5985_vm12 = vweird.f32 %v5965_v29  ;;  %v179_v59 = vld [vmem:[%s10015_s24 + $0x18] sm:$0xff] }
0x2862   :  { %v5971_v54 = vmul.f32 %v7541_v19, %v5970_v9  ;;  %v6008_v32 = vsel %vm6007_vm11, %v7539_v2, %v6004_v7  ;;  %vm6017_vm3 = vmor %vm6015_vm15, %vm6016_vm1 }
0x2863   :  { %v6011_v15 = vmul.f32 %v7543_v4, %v6010_v35  ;;  %v6022_v23 = vmul.f32 %v6008_v32, %v9968_v14 }
0x2864   :  { %v5972_v30 = vmul.f32 0.5, %v5971_v54 }
0x2865   :  { %v6012_v61 = vmul.f32 0.5, %v6011_v15  ;;  %v6027_v44 = vmul.f32 %v7649_v51, %v6022_v23 }
0x2866   :  { %v5973_v3 = vsub.f32 1.5, %v5972_v30  ;;  %v7656_v30 = vld [vmem:[%s10249_s6] ss:$0 sm:$0xff] }
0x2867   :  { %v7545_v55 = vpop.eup %7544  ;;  %v6013_v46 = vsub.f32 1.5, %v6012_v61  ;;  %v10006_v43 = vadd.f32 %v7650_v39, %v6027_v44  ;;  %v186_v44 = vld [vmem:[%s6670_s17 + $0x18] sm:$0xff] }
0x2868   :  { %v5980_v56 = vmul.f32 %v7545_v55, %v5965_v29  ;;  %v5974_v48 = vmul.f32 %v7541_v19, %v5973_v3  ;;  %vm5986_vm4 = vweird.f32 %v7545_v55 }
0x2869   :  { %v6014_v16 = vmul.f32 %v7543_v4, %v6013_v46  ;;  %vm5987_vm6 = vmor %vm5985_vm12, %vm5986_vm4 }
0x286a   :  { %v5981_v21 = vmul.f32 %v7545_v55, %v5980_v56  ;;  %v5978_v42 = vsel %vm5977_vm7, %v7541_v19, %v5974_v48  ;;  %v10055_v19 = vld [vmem:[%s10015_s24] sm:$0xff]  ;;  %v181_v48 = vld [vmem:[%s10015_s24 + $0x28] sm:$0xff] }
0x286b   :  { %v6018_v5 = vsel %vm6017_vm3, %v7543_v4, %v6014_v16  ;;  %v6019_v28 = vmul.f32 %v5978_v42, %v9975_v37  ;;  %6285 = vmatpush.msra.mxu3 %v10055_v19  ;;  %v6304_v42 = vsub.f32 %v9323_v31, %v8594_v27 }
0x286c   :  { %v6023_v6 = vmul.f32 %v6018_v5, %v9977_v17  ;;  %v5982_v49 = vmul.f32 0.5, %v5981_v21  ;;  %v180_v21 = vld [vmem:[%s10015_s24 + $0x20] sm:$0xff] }
0x286d   :  { %v6024_v34 = vmul.f32 %v7649_v51, %v6019_v28  ;;  %v183_v5 = vld [vmem:[%s6670_s17] sm:$0xff] }
0x286e   :  { %v6028_v36 = vmul.f32 %v7649_v51, %v6023_v6  ;;  %v5983_v53 = vsub.f32 1.5, %v5982_v49  ;;  %6378 = vxpose.xlu0.b32.start [1/4] (short) (narrow) %v183_v5, 8  ;;  %v184_v6 = vld [vmem:[%s6670_s17 + $0x8] sm:$0xff]  ;;  %v6302_v49 = vsub.f32 %v9301_v47, %v8572_v62 }
0x2870   :  { %v5984_v14 = vmul.f32 %v7545_v55, %v5983_v53  ;;  %v10001_v8 = vadd.f32 %v7650_v39, %v6028_v36  ;;  %v6305_v36 = vsub.f32 %v9333_v45, %v8604_v22 }
0x2872   :  { %v5988_v17 = vsel %vm5987_vm6, %v7545_v55, %v5984_v14  ;;  %7021 = vmatpush.msk.msra.mxu1 %vm1333_vm8, %v10001_v8 }
0x2873   :  { %v6020_v13 = vmul.f32 %v5988_v17, %v9986_v12  ;;  %v10021_v12 = vadd.f32 %v7650_v39, %v6024_v34 }
0x2874   :  { %6049 = vmatpush.msra.mxu1 %v10006_v43 }
0x2875   :  { %v6025_v37 = vmul.f32 %v7649_v51, %v6020_v13  ;;  %v6303_v51 = vsub.f32 %v9312_v10, %v8583_v24 }
0x2876   :  { %6050 = vmatpush.msra.mxu1 %v10010_v40  ;;  %6379 = vxpose.xlu0.b32.cont [2/4] (short) (narrow) %v184_v6, 8 }
0x2877   :  { %v10018_v2 = vadd.f32 %v7650_v39, %v6025_v37 }
0x2879   :  { %6051 = vmatpush.msra.mxu1 %v10018_v2 }
0x287b   :  { %6052 = vmatpush.msra.mxu1 %v10021_v12 }
0x287c   :  { %7022 = vmatmul.msk.f32.vlgmr.msra.gmra.mxu1 %vm1182_vm9, %v7651_v11 }
0x287d   :  { %6237 = vmatpush.msrb.mxu1 %v179_v59 }
0x287e   :  { %6380 = vxpose.xlu0.b32.cont [3/4] (short) (narrow) %v185_v57, 8  ;;  %v7694_v57 = vmov 0  }
0x287f   :  { %6238 = vmatpush.msrb.mxu1 %v178_v52  ;;  %7197 = vset.pattern.permute.xlu2 %v7694_v57 }
0x2881   :  { %6478 = vmatpush.msra.mxu1 %v179_v59 }
0x2883   :  { %6479 = vmatpush.msra.mxu1 %v178_v52 }
0x2884   :  { %7023 = vmatmul.msk.f32.gmra.mxu1 %vm1182_vm9, %v7652_v63 }
0x2886   :  { %6381 = vxpose.xlu0.b32.end [4/4] (short) (narrow) %v186_v44, 8 }
0x288c   :  { %7024 = vmatmul.msk.f32.gmra.mxu1 %vm1182_vm9, %v7653_v1 }
0x2894   :  { %7025 = vmatmul.msk.f32.gmra.mxu1 %vm1182_vm9, %v7654_v50 }
0x289c   :  { %7026 = vmatmul.msk.f32.gmra.mxu1 %vm1182_vm9, %v10035_v60 }
0x28a4   :  { %7043 = vmatmul.msk.f32.vlgmr.msrb.gmra.mxu1 %vm222_vm0, %v9301_v47 }
0x28ac   :  { %7044 = vmatmul.msk.f32.gmra.mxu1 %vm222_vm0, %v9312_v10 }
0x28b4   :  { %7045 = vmatmul.msk.f32.gmra.mxu1 %vm222_vm0, %v9323_v31 }
0x28bc   :  { %7046 = vmatmul.msk.f32.gmra.mxu1 %vm222_vm0, %v9333_v45 }
0x28c4   :  { %7047 = vmatmul.msk.f32.gmra.mxu1 %vm222_vm0, %v9343_v20 }
0x28ed   :  { %7198 = vset.pattern.permute.xlu0 %v7694_v57 }
0x28f9   :  { %v6054_v26 = vpop.f32.mrf.mxu1 }
0x28fa   :  { %7027 = vmatmul.msk.f32.vlgmr.msrb.gmra.mxu3 %vm222_vm0, %v6054_v26 }
0x28fb   :  { %6562 = vmatpush.msrb.mxu3 %v181_v48 }
0x28fd   :  { %6563 = vmatpush.msrb.mxu3 %v180_v21 }
0x2901   :  { %v6057_v38 = vpop.f32.mrf.mxu1 }
0x2902   :  { %7028 = vmatmul.msk.f32.gmra.mxu3 %vm222_vm0, %v6057_v38 }
0x2909   :  { %v6060_v29 = vpop.f32.mrf.mxu1 }
0x290a   :  { %7029 = vmatmul.msk.f32.gmra.mxu3 %vm222_vm0, %v6060_v29  ;;  %v10111_v29 = vld [vmem:[%s10086_s10] ss:$0 sm:$0xff] }
0x2911   :  { %v6063_v4 = vpop.f32.mrf.mxu1 }
0x2912   :  { %7030 = vmatmul.msk.f32.gmra.mxu3 %vm222_vm0, %v6063_v4 }
0x2919   :  { %v6066_v9 = vpop.f32.mrf.mxu1 }
0x291a   :  { %7031 = vmatmul.msk.f32.gmra.mxu3 %vm222_vm0, %v6066_v9 }
0x2921   :  { %v6240_v39 = vpop.f32.mrf.mxu1 }
0x2922   :  { %7048 = vmatmul.msk.f32.vlgmr.msra.gmra.mxu3 %vm222_vm0, %v8572_v62  ;;  %v6306_v62 = vsub.f32 %v9343_v20, %v8614_v0 }
0x2929   :  { %v6243_v28 = vpop.f32.mrf.mxu1 }
0x292a   :  { %7049 = vmatmul.msk.f32.gmra.mxu3 %vm222_vm0, %v8583_v24 }
0x2931   :  { %v6246_v34 = vpop.f32.mrf.mxu1 }
0x2932   :  { %7050 = vmatmul.msk.f32.gmra.mxu3 %vm222_vm0, %v8594_v27 }
0x2939   :  { %v6249_v52 = vpop.f32.mrf.mxu1 }
0x293a   :  { %7051 = vmatmul.msk.f32.gmra.mxu3 %vm222_vm0, %v8604_v22 }
0x2942   :  { %7052 = vmatmul.msk.f32.gmra.mxu3 %vm222_vm0, %v8614_v0 }
0x297d   :  { %v6101_v18 = vpop.f32.mrf.mxu3 }
0x297e   :  { %v6102_v56 = vadd.f32 %v7656_v30, %v6101_v18 }
0x2980   :  { %v6116_v23 = vmax.f32 %v6102_v56, 0.0 }
0x2985   :  { %v6104_v35 = vpop.f32.mrf.mxu3 }
0x2986   :  { %v6105_v55 = vadd.f32 %v7656_v30, %v6104_v35 }
0x2988   :  { %v6117_v16 = vmax.f32 %v6105_v55, 0.0 }
0x298d   :  { %v6107_v7 = vpop.f32.mrf.mxu3 }
0x298e   :  { %v6108_v32 = vadd.f32 %v7656_v30, %v6107_v7 }
0x2990   :  { %v6118_v41 = vmax.f32 %v6108_v32, 0.0 }
0x2995   :  { %v6110_v54 = vpop.f32.mrf.mxu3 }
0x2996   :  { %v6111_v58 = vadd.f32 %v7656_v30, %v6110_v54 }
0x2998   :  { %v6119_v46 = vmax.f32 %v6111_v58, 0.0 }
0x299d   :  { %v6113_v15 = vpop.f32.mrf.mxu3 }
0x299e   :  { %v6114_v61 = vadd.f32 %v7656_v30, %v6113_v15 }
0x29a0   :  { %v6120_v3 = vmax.f32 %v6114_v61, 0.0 }
0x29a2   :  { %7032 = vmatpush.msk.msra.mxu0 %vm1333_vm8, %v6120_v3  ;;  %vm6410_vm8 = vcmask 261120  }
0x29a4   :  { %6136 = vmatpush.msra.mxu0 %v6119_v46 }
0x29a5   :  { %v6287_v22 = vpop.f32.mrf.mxu3 }
0x29a6   :  { %6137 = vmatpush.msra.mxu0 %v6118_v41  ;;  %v6288_v3 = vadd.f32 %v6287_v22, %v6240_v39 }
0x29a8   :  { %6138 = vmatpush.msra.mxu0 %v6117_v16 }
0x29aa   :  { %6139 = vmatpush.msra.mxu0 %v6116_v23 }
0x29ab   :  { %7033 = vmatmul.msk.f32.vlgmr.msra.gmra.mxu0 %vm1182_vm9, %v7651_v11 }
0x29ac   :  { %6336 = vmatpush.msrb.mxu0 %v181_v48  ;;  %v10123_v48 = vpop.trf.xlu0 }
0x29ad   :  { %v6290_v0 = vpop.f32.mrf.mxu3 }
0x29ae   :  { %6337 = vmatpush.msrb.mxu0 %v180_v21  ;;  %v6291_v30 = vadd.f32 %v6290_v0, %v6243_v28  ;;  %v7657_v21 = vld [vmem:[%s8550_s30] ss:$0 sm:$0xff] }
0x29b3   :  { %7034 = vmatmul.msk.f32.gmra.mxu0 %vm1182_vm9, %v7652_v63 }
0x29b5   :  { %v6293_v13 = vpop.f32.mrf.mxu3 }
0x29b6   :  { %v6294_v18 = vadd.f32 %v6293_v13, %v6246_v34 }
0x29bb   :  { %7035 = vmatmul.msk.f32.gmra.mxu0 %vm1182_vm9, %v7653_v1 }
0x29bd   :  { %v6296_v59 = vpop.f32.mrf.mxu3 }
0x29c3   :  { %7036 = vmatmul.msk.f32.gmra.mxu0 %vm1182_vm9, %v7654_v50  ;;  %v6252_v50 = vpop.f32.mrf.mxu1 }
0x29c5   :  { %v6299_v1 = vpop.f32.mrf.mxu3 }
0x29c6   :  { %v6300_v26 = vadd.f32 %v6299_v1, %v6252_v50 }
0x29cb   :  { %7037 = vmatmul.msk.f32.gmra.mxu0 %vm1182_vm9, %v10035_v60  ;;  %v6297_v60 = vadd.f32 %v6296_v59, %v6249_v52  ;;  %vm10309_vm9 = vcmask 271360  }
0x29d3   :  { %7053 = vmatmul.msk.f32.vlgmr.msrb.gmra.mxu0 %vm222_vm0, %v6302_v49 }
0x29db   :  { %7054 = vmatmul.msk.f32.gmra.mxu0 %vm222_vm0, %v6303_v51 }
0x29e3   :  { %7055 = vmatmul.msk.f32.gmra.mxu0 %vm222_vm0, %v6304_v42 }
0x29eb   :  { %7056 = vmatmul.msk.f32.gmra.mxu0 %vm222_vm0, %v6305_v36 }
0x29f3   :  { %7057 = vmatmul.msk.f32.gmra.mxu0 %vm222_vm0, %v6306_v62 }
0x2a28   :  { %v6141_v24 = vpop.f32.mrf.mxu0 }
0x2a29   :  { %7038 = vmatmul.msk.f32.vlgmr.msrb.gmra.mxu2 %vm222_vm0, %v6141_v24 }
0x2a30   :  { %v6144_v53 = vpop.f32.mrf.mxu0 }
0x2a31   :  { %7039 = vmatmul.msk.f32.gmra.mxu2 %vm222_vm0, %v6144_v53 }
0x2a38   :  { %v6147_v14 = vpop.f32.mrf.mxu0 }
0x2a39   :  { %7040 = vmatmul.msk.f32.gmra.mxu2 %vm222_vm0, %v6147_v14 }
0x2a40   :  { %v6150_v27 = vpop.f32.mrf.mxu0 }
0x2a41   :  { %7041 = vmatmul.msk.f32.gmra.mxu2 %vm222_vm0, %v6150_v27 }
0x2a48   :  { %v6153_v25 = vpop.f32.mrf.mxu0 }
0x2a49   :  { %7042 = vmatmul.msk.f32.gmra.mxu2 %vm222_vm0, %v6153_v25 }
0x2a50   :  { %v6339_v17 = vpop.f32.mrf.mxu0 }
0x2a51   :  { %v6354_v55 = vadd.f32 %v6339_v17, %v6288_v3 }
0x2a53   :  { %v6362_v41 = vadd.f32 %v10111_v29, %v6354_v55 }
0x2a55   :  { %v6367_v23 = vmax.f32 %v6362_v41, 0.0 }
0x2a58   :  { %v6342_v37 = vpop.f32.mrf.mxu0 }
0x2a59   :  { %v6355_v58 = vadd.f32 %v6342_v37, %v6291_v30 }
0x2a5b   :  { %v6363_v46 = vadd.f32 %v10111_v29, %v6355_v58 }
0x2a5d   :  { %v6368_v16 = vmax.f32 %v6363_v46, 0.0 }
0x2a60   :  { %v6345_v11 = vpop.f32.mrf.mxu0 }
0x2a61   :  { %v6356_v7 = vadd.f32 %v6345_v11, %v6294_v18 }
0x2a63   :  { %v6364_v61 = vadd.f32 %v10111_v29, %v6356_v7 }
0x2a65   :  { %v6369_v56 = vmax.f32 %v6364_v61, 0.0 }
0x2a68   :  { %v6348_v63 = vpop.f32.mrf.mxu0 }
0x2a69   :  { %v6357_v4 = vadd.f32 %v6348_v63, %v6297_v60 }
0x2a6b   :  { %v6365_v54 = vadd.f32 %v10111_v29, %v6357_v4 }
0x2a6d   :  { %v6370_v32 = vmax.f32 %v6365_v54, 0.0 }
0x2a70   :  { %v6351_v38 = vpop.f32.mrf.mxu0 }
0x2a71   :  { %v6358_v9 = vadd.f32 %v6351_v38, %v6300_v26 }
0x2a73   :  { %v6366_v35 = vadd.f32 %v10111_v29, %v6358_v9 }
0x2a75   :  { %v6371_v15 = vmax.f32 %v6366_v35, 0.0 }
0x2a77   :  { %7058 = vmatpush.xpose.msk.msra.mxu2 %vm6410_vm8, %v6371_v15 }
0x2a7b   :  { %7059 = vmatpush.xpose.msk.msra.mxu2 %vm6410_vm8, %v6370_v32 }
0x2a7f   :  { %7060 = vmatpush.xpose.msk.msra.mxu2 %vm6410_vm8, %v6369_v56 }
0x2a83   :  { %7061 = vmatpush.xpose.msk.msra.mxu2 %vm6410_vm8, %v6368_v16 }
0x2a87   :  { %7062 = vmatpush.xpose.msk.msra.mxu2 %vm6410_vm8, %v6367_v23 }
0x2a8a   :  { %7063 = vmatmul.msk.f32.vlgmr.msra.gmra.mxu2 %vm6410_vm8, %v10123_v48 }
0x2a8b   :  { %6510 = vmatpush.msrb.mxu2 %v10051_v33  ;;  %v72_v33 = vstv %s6671_s12 }
0x2a8c   :  { %73 = vst [vmem:[#allocation2] sm:$0x1] %v72_v33 }
0x2a8d   :  { %6511 = vmatpush.msrb.mxu2 %v10055_v19 }
0x2a92   :  { %7069 = vmatmul.msk.f32.vlgmr.msrb.gmra.mxu2 %vm222_vm0, %v9301_v47 }
0x2a93   :  { %v187_v51 = vld [vmem:[#allocation2] sm:$0x1] }
0x2a94   :  { %6374 = vperm.xlu2 %7197, %v187_v51  }
0x2a9a   :  { %7070 = vmatmul.msk.f32.gmra.mxu2 %vm222_vm0, %v9312_v10 }
0x2aa2   :  { %7071 = vmatmul.msk.f32.gmra.mxu2 %vm222_vm0, %v9323_v31 }
0x2aaa   :  { %7072 = vmatmul.msk.f32.gmra.mxu2 %vm222_vm0, %v9333_v45 }
0x2aac   :  { %v6188_v19 = vpop.f32.mrf.mxu2 }
0x2aad   :  { %v6189_v5 = vadd.f32 %v7657_v21, %v6188_v19 }
0x2aaf   :  { %v6203_v6 = vadd.f32 %v6189_v5, %v10021_v12 }
0x2ab1   :  { %v6528_v49 = vsub.f32 %v6203_v6, %v9301_v47  ;;  %7064 = vmatmul.msk.f32.vlgmr.msra.gmra.mxu1 %vm222_vm0, %v6203_v6 }
0x2ab2   :  { %7073 = vmatmul.msk.f32.gmra.mxu2 %vm222_vm0, %v9343_v20 }
0x2ab3   :  { %7074 = vmatmul.msk.f32.vlgmr.msrb.gmra.mxu3 %vm222_vm0, %v6528_v49 }
0x2ab4   :  { %v6191_v44 = vpop.f32.mrf.mxu2 }
0x2ab5   :  { %v6192_v42 = vadd.f32 %v7657_v21, %v6191_v44 }
0x2ab7   :  { %v6204_v36 = vadd.f32 %v6192_v42, %v10018_v2 }
0x2ab9   :  { %v6529_v12 = vsub.f32 %v6204_v36, %v9312_v10  ;;  %7065 = vmatmul.msk.f32.gmra.mxu1 %vm222_vm0, %v6204_v36 }
0x2abb   :  { %7075 = vmatmul.msk.f32.gmra.mxu3 %vm222_vm0, %v6529_v12 }
0x2abc   :  { %v6194_v47 = vpop.f32.mrf.mxu2 }
0x2abd   :  { %v6195_v62 = vadd.f32 %v7657_v21, %v6194_v47 }
0x2abf   :  { %v6205_v24 = vadd.f32 %v6195_v62, %v10010_v40 }
0x2ac1   :  { %v6530_v53 = vsub.f32 %v6205_v24, %v9323_v31  ;;  %7066 = vmatmul.msk.f32.gmra.mxu1 %vm222_vm0, %v6205_v24 }
0x2ac3   :  { %7076 = vmatmul.msk.f32.gmra.mxu3 %vm222_vm0, %v6530_v53 }
0x2ac4   :  { %v6197_v14 = vpop.f32.mrf.mxu2 }
0x2ac5   :  { %v6198_v27 = vadd.f32 %v7657_v21, %v6197_v14 }
0x2ac7   :  { %v6206_v2 = vadd.f32 %v6198_v27, %v10006_v43 }
0x2ac9   :  { %v6531_v10 = vsub.f32 %v6206_v2, %v9333_v45  ;;  %7067 = vmatmul.msk.f32.gmra.mxu1 %vm222_vm0, %v6206_v2 }
0x2acb   :  { %7077 = vmatmul.msk.f32.gmra.mxu3 %vm222_vm0, %v6531_v10 }
0x2acc   :  { %v6200_v22 = vpop.f32.mrf.mxu2 }
0x2acd   :  { %v6201_v39 = vadd.f32 %v7657_v21, %v6200_v22 }
0x2acf   :  { %v6207_v40 = vadd.f32 %v6201_v39, %v10001_v8 }
0x2ad1   :  { %v6532_v31 = vsub.f32 %v6207_v40, %v9343_v20  ;;  %7068 = vmatmul.msk.f32.gmra.mxu1 %vm222_vm0, %v6207_v40 }
0x2ad3   :  { %7078 = vmatmul.msk.f32.gmra.mxu3 %vm222_vm0, %v6532_v31  ;;  %vm6633_vm0 = vcmask 1040384  }
0x2aee   :  { %v6375_v16 = vpop.permute.xlu2 %6374 }
0x2aef   :  { %v6377_v23 = vperm.slane %v6375_v16, 0 }
0x2b0d   :  { %v6446_v25 = vpop.f32.mrf.mxu2 }
0x2b15   :  { %v6513_v0 = vpop.f32.mrf.mxu2 }
0x2b1d   :  { %v6516_v43 = vpop.f32.mrf.mxu2 }
0x2b25   :  { %v6519_v34 = vpop.f32.mrf.mxu2 }
0x2b2d   :  { %v6522_v52 = vpop.f32.mrf.mxu2 }
0x2b2e   :  { %v6481_v28 = vpop.f32.mrf.mxu1 }
0x2b2f   :  { %v6514_v61 = vadd.f32 %v6513_v0, %v6481_v28 }
0x2b35   :  { %v6525_v1 = vpop.f32.mrf.mxu2 }
0x2b36   :  { %v6484_v17 = vpop.f32.mrf.mxu1  ;;  %v6565_v45 = vpop.f32.mrf.mxu3 }
0x2b37   :  { %v6517_v54 = vadd.f32 %v6516_v43, %v6484_v17  ;;  %v6580_v32 = vadd.f32 %v6565_v45, %v6514_v61 }
0x2b39   :  { %v6585_v46 = vadd.f32 %v10111_v29, %v6580_v32 }
0x2b3b   :  { %v6590_v41 = vmax.f32 %v6585_v46, 0.0 }
0x2b3e   :  { %v6487_v13 = vpop.f32.mrf.mxu1  ;;  %v6568_v37 = vpop.f32.mrf.mxu3 }
0x2b3f   :  { %v6520_v4 = vadd.f32 %v6519_v34, %v6487_v13  ;;  %v6581_v15 = vadd.f32 %v6568_v37, %v6517_v54 }
0x2b41   :  { %v6586_v3 = vadd.f32 %v10111_v29, %v6581_v15 }
0x2b43   :  { %v6591_v56 = vmax.f32 %v6586_v3, 0.0 }
0x2b46   :  { %v6571_v11 = vpop.f32.mrf.mxu3  ;;  %v6490_v59 = vpop.f32.mrf.mxu1 }
0x2b47   :  { %v6523_v20 = vadd.f32 %v6522_v52, %v6490_v59  ;;  %v6582_v18 = vadd.f32 %v6571_v11, %v6520_v4 }
0x2b49   :  { %v6587_v30 = vadd.f32 %v10111_v29, %v6582_v18 }
0x2b4b   :  { %v6592_v55 = vmax.f32 %v6587_v30, 0.0 }
0x2b4e   :  { %v6574_v63 = vpop.f32.mrf.mxu3  ;;  %v6493_v8 = vpop.f32.mrf.mxu1 }
0x2b4f   :  { %v6526_v50 = vadd.f32 %v6525_v1, %v6493_v8  ;;  %v6583_v26 = vadd.f32 %v6574_v63, %v6523_v20 }
0x2b51   :  { %v6588_v35 = vadd.f32 %v10111_v29, %v6583_v26 }
0x2b53   :  { %v6593_v58 = vmax.f32 %v6588_v35, 0.0 }
0x2b56   :  { %v6577_v60 = vpop.f32.mrf.mxu3 }
0x2b57   :  { %v6584_v38 = vadd.f32 %v6577_v60, %v6526_v50 }
0x2b59   :  { %v6589_v9 = vadd.f32 %v10111_v29, %v6584_v38  ;;  %v6447_v29 = vadd.f32 %v6446_v25, %v6377_v23 }
0x2b5b   :  { %v6594_v7 = vmax.f32 %v6589_v9, 0.0 }
0x2b5d   :  { %7079 = vmatpush.xpose.msk.msra.mxu0 %vm6410_vm8, %v6594_v7 }
0x2b61   :  { %7080 = vmatpush.xpose.msk.msra.mxu0 %vm6410_vm8, %v6593_v58 }
0x2b65   :  { %7081 = vmatpush.xpose.msk.msra.mxu0 %vm6410_vm8, %v6592_v55 }
0x2b69   :  { %7082 = vmatpush.xpose.msk.msra.mxu0 %vm6410_vm8, %v6591_v56 }
0x2b6d   :  { %7083 = vmatpush.xpose.msk.msra.mxu0 %vm6410_vm8, %v6590_v41 }
0x2b70   :  { %7084 = vmatmul.msk.f32.vlgmr.msra.gmra.mxu0 %vm6410_vm8, %v10123_v48 }
0x2bed   :  { %v6627_v33 = vpop.f32.mrf.mxu0 }
0x2bee   :  { %v6628_v19 = vadd.f32 %v6627_v33, %v6377_v23 }
0x2bf0   :  { %v6631_v21 = vrot.slane %v6628_v19, 7 }
0x2bf2   :  { %v6634_v5 = vsel %vm6633_vm0, %v6447_v29, %v6631_v21 }
0x2bf3   :  { %6635 = vst.msk [vmem:[%s6672_s27] sm:$0x3] %vm10309_vm9, %v6634_v5 }

</bundles_post_ra>
